<compile_context>
chip_gen: v6e
topology: v6e:2x2x1
jax: 0.10.0
libtpu: 0.0.40
codegen_flags: <defaults>
</compile_context>

<pallas_src>
import jax
import jax.numpy as jnp
from jax.experimental import pallas as pl
from jax.experimental.pallas import tpu as pltpu


# ----------------------------- static shape helpers ------------------------- #

def _conv_out(n):          # 3x3 kernel, stride 2, padding 'valid'
    return (n - 3) // 2 + 1


# --------------------- wrapper-side constant folding (once) ----------------- #

def _sel(n_out, n_in, stride, offset):
    """(n_out, n_in) 0/1 selection matrix with S[i, stride*i + offset] = 1."""
    idx = stride * jnp.arange(n_out) + offset
    return jnp.zeros((n_out, n_in), jnp.float32).at[jnp.arange(n_out), idx].set(1.0)


def _fold_conv_w(w_hwio, w_in, wc):
    """Fold kw taps + stride-2 column selection into per-kh matmul weights.

    Returns (3, w_in*Cin, wc*Cout) with M[kh][(w,ci),(j,co)] = w[kh, w-2j, ci, co].
    """
    _, _, cin, cout = w_hwio.shape
    j = jnp.arange(wc)
    mats = []
    for kh in range(3):
        m = jnp.zeros((w_in, cin, wc, cout), jnp.float32)
        for kw in range(3):
            m = m.at[2 * j + kw, :, j, :].set(w_hwio[kh, kw].astype(jnp.float32))
        mats.append(m.reshape(w_in * cin, wc * cout))
    return jnp.stack(mats)


def _stage_constants(w_hwio, b, h_in, w_in):
    """Pre-fold one conv+ReLU+maxpool stage into matmul-only constants."""
    cout = w_hwio.shape[3]
    hc, wc = _conv_out(h_in), _conv_out(w_in)
    hp, wp = hc // 2, wc // 2                       # floor-mode 2x2 pool
    bf = jnp.bfloat16
    s = jnp.stack([_sel(hc, h_in, 2, kh) for kh in range(3)]).astype(bf)   # (3,hc,h)
    m = _fold_conv_w(w_hwio, w_in, wc).astype(bf)                          # (3,w*ci,wc*co)
    brow = jnp.tile(b.astype(jnp.float32), wc).reshape(1, wc * cout)       # (1,wc*co)
    t = jnp.stack([_sel(hp, hc, 2, o) for o in (0, 1)]).astype(bf)         # (2,hp,hc)
    eye = jnp.eye(cout, dtype=jnp.float32)
    u = jnp.stack([jnp.kron(_sel(wp, wc, 2, o).T, eye)
                   for o in (0, 1)]).astype(bf)                            # (2,wc*co,wp*co)
    return (s, m, brow, t, u), (hp, wp, cout)


def make_constants(params, h, w):
    c1, (h1, w1, _) = _stage_constants(params["w1"], params["b1"], h, w)
    c2, (h2, w2, _) = _stage_constants(params["w2"], params["b2"], h1, w1)
    c3, (h3, w3, co3) = _stage_constants(params["w3"], params["b3"], h2, w2)
    # TODO(synk): AdaptiveAvgPool2d((1,1)) is trivially the identity because the
    # final feature map is 1x1 for 96x96 input; a general H>1 map would need an
    # in-kernel spatial mean before the 1x1-conv head.
    assert (h3, w3) == (1, 1), "head assumes the final feature map is 1x1"
    # lane-dense head: pad 5 output channels -> 128 lanes (zero rows give ReLU(0)=0)
    w4 = jnp.zeros((co3, 128), jnp.float32).at[:, :5].set(params["w4"].astype(jnp.float32))
    b4 = jnp.zeros((1, 128), jnp.float32).at[0, :5].set(params["b4"].astype(jnp.float32))
    return (*c1, *c2, *c3, w4, b4)


# ------------------------------- Pallas kernel ------------------------------ #

def _mm(a, b):
    """bf16 MXU matmul with f32 accumulation."""
    return jnp.dot(a.astype(jnp.bfloat16), b.astype(jnp.bfloat16),
                   preferred_element_type=jnp.float32)


def _stage(x, s_ref, m_ref, b_ref, t_ref, u_ref):
    """Conv3x3(s2,'valid') + bias + ReLU + MaxPool2x2 on one (H, W*Cin) image."""
    acc = _mm(_mm(s_ref[0], x), m_ref[0])
    for kh in (1, 2):
        acc = acc + _mm(_mm(s_ref[kh], x), m_ref[kh])
    y = jnp.maximum(acc + b_ref[...], 0.0)                     # bias + ReLU (f32)
    yr = jnp.maximum(_mm(t_ref[0], y), _mm(t_ref[1], y))       # pool rows
    return jnp.maximum(_mm(yr, u_ref[0]), _mm(yr, u_ref[1]))   # pool cols


def _hand_forward_kernel(x_ref,
                         s1, m1, b1, t1, u1,
                         s2, m2, b2, t2, u2,
                         s3, m3, b3, t3, u3,
                         w4, b4, o_ref):
    x = x_ref[0]                                    # (H, W*3) bf16
    p = _stage(x, s1, m1, b1, t1, u1)               # (23, 23*16)
    p = _stage(p, s2, m2, b2, t2, u2)               # (5, 5*32)
    p = _stage(p, s3, m3, b3, t3, u3)               # (1, 64)  final 1x1 map
    # classifier: Dropout = identity at inference; 1x1 conv + ReLU; avg-pool over
    # the 1x1 map and flatten are no-ops.  Head weights are lane-padded to 128.
    y = jnp.maximum(jnp.dot(p, w4[...], preferred_element_type=jnp.float32)
                    + b4[...], 0.0)                 # (1, 128)
    o_ref[0] = y


def hand_detection_forward(consts, x_nchw):
    n, c, h, w = x_nchw.shape
    xb = jnp.transpose(x_nchw, (0, 2, 3, 1)).reshape(n, h, w * c).astype(jnp.bfloat16)

    const_specs = [
        pl.BlockSpec(cst.shape, lambda i, _nd=cst.ndim: (0,) * _nd) for cst in consts
    ]
    out = pl.pallas_call(
        _hand_forward_kernel,
        out_shape=jax.ShapeDtypeStruct((n, 1, 128), jnp.float32),
        grid=(n,),
        in_specs=[pl.BlockSpec((1, h, w * c), lambda i: (i, 0, 0))] + const_specs,
        out_specs=pl.BlockSpec((1, 1, 128), lambda i: (i, 0, 0)),
        compiler_params=pltpu.CompilerParams(
            dimension_semantics=("parallel",)),
    )(xb, *consts)
    return out[:, 0, :5]


forward = jax.jit(hand_detection_forward)


# ------------------------------ parameters ---------------------------------- #

def init_params(key):
    """Deterministic synthetic parameters (HWIO conv weights)."""
    ks = jax.random.split(key, 8)

    def wgt(k, shape, fan_in):
        return jax.random.normal(k, shape, jnp.float32) / jnp.sqrt(jnp.float32(fan_in))

    def bias(k, n):
        return 0.01 * jax.random.normal(k, (n,), jnp.float32)

    return {
        "w1": wgt(ks[0], (3, 3, 3, 16), 3 * 3 * 3),   "b1": bias(ks[1], 16),
        "w2": wgt(ks[2], (3, 3, 16, 32), 3 * 3 * 16), "b2": bias(ks[3], 32),
        "w3": wgt(ks[4], (3, 3, 32, 64), 3 * 3 * 32), "b3": bias(ks[5], 64),
        "w4": wgt(ks[6], (64, 5), 64),                "b4": bias(ks[7], 5),
    }


# --------------------------- pure-JAX reference ------------------------------ #

def reference_forward(params, x_nchw):
    x = jnp.transpose(x_nchw, (0, 2, 3, 1)).astype(jnp.float32)
    dn = ("NHWC", "HWIO", "NHWC")

    def block(x, w, b):
        y = jax.lax.conv_general_dilated(x, w, (2, 2), "VALID", dimension_numbers=dn,
                                         precision=jax.lax.Precision.HIGHEST)
        y = jax.nn.relu(y + b)
        return jax.lax.reduce_window(y, -jnp.inf, jax.lax.max,
                                     (1, 2, 2, 1), (1, 2, 2, 1), "VALID")

    x = block(x, params["w1"], params["b1"])
    x = block(x, params["w2"], params["b2"])
    x = block(x, params["w3"], params["b3"])
    y = jax.nn.relu(jnp.einsum("nhwc,co->nhwo", x, params["w4"],
                               precision=jax.lax.Precision.HIGHEST) + params["b4"])
    return y.mean(axis=(1, 2))


# --------------------------------- main -------------------------------------- #

if __name__ == "__main__":
    key = jax.random.PRNGKey(0)
    pkey, xkey = jax.random.split(key)
    params = init_params(pkey)

    # 96x96 is the smallest "round" spatial size that survives three
    # (conv s2 'valid' + maxpool 2) stages and yields the 1x1 map the head expects.
    x = jax.random.normal(xkey, (2, 3, 96, 96), jnp.float32)   # NCHW like PyTorch

    consts = make_constants(params, 96, 96)
    out = forward(consts, x)
    out = jax.block_until_ready(out)

    ref = reference_forward(params, x)
    assert out.shape == (2, 5), f"bad output shape {out.shape}"
    assert bool(jnp.all(jnp.isfinite(out))), "non-finite output"
    max_err = float(jnp.max(jnp.abs(out - ref)))
    # bf16 MXU operands with f32 accumulation -> a few 1e-3 of expected deviation.
    assert bool(jnp.allclose(out, ref, rtol=2e-2, atol=2e-2)), \
        f"mismatch vs JAX reference (max abs err {max_err:.4g})"

    print("KERNEL_OK")
</pallas_src>

<mosaic_0001>
module attributes {stable_mosaic.version = 11 : i64} {
  func.func @_hand_forward_kernel(%arg0: i32, %arg1: memref<1x96x288xbf16, #tpu.memory_space<vmem>>, %arg2: memref<3x47x96xbf16, #tpu.memory_space<vmem>>, %arg3: memref<3x288x752xbf16, #tpu.memory_space<vmem>>, %arg4: memref<1x752xf32, #tpu.memory_space<vmem>>, %arg5: memref<2x23x47xbf16, #tpu.memory_space<vmem>>, %arg6: memref<2x752x368xbf16, #tpu.memory_space<vmem>>, %arg7: memref<3x11x23xbf16, #tpu.memory_space<vmem>>, %arg8: memref<3x368x352xbf16, #tpu.memory_space<vmem>>, %arg9: memref<1x352xf32, #tpu.memory_space<vmem>>, %arg10: memref<2x5x11xbf16, #tpu.memory_space<vmem>>, %arg11: memref<2x352x160xbf16, #tpu.memory_space<vmem>>, %arg12: memref<3x2x5xbf16, #tpu.memory_space<vmem>>, %arg13: memref<3x160x128xbf16, #tpu.memory_space<vmem>>, %arg14: memref<1x128xf32, #tpu.memory_space<vmem>>, %arg15: memref<2x1x2xbf16, #tpu.memory_space<vmem>>, %arg16: memref<2x128x64xbf16, #tpu.memory_space<vmem>>, %arg17: memref<64x128xf32, #tpu.memory_space<vmem>>, %arg18: memref<1x128xf32, #tpu.memory_space<vmem>>, %arg19: memref<1x1x128xf32, #tpu.memory_space<vmem>>) attributes {dimension_semantics = [#tpu.dimension_semantics<parallel>], iteration_bounds = array<i64: 2>, scalar_prefetch = 0 : i64, scratch_operands = 0 : i64, tpu.core_type = #tpu.core_type<tc>, window_params = [{transform_indices = @transform_0, window_bounds = array<i64: 1, 96, 288>}, {pipeline_mode = #tpu.pipeline_mode<synchronous>, transform_indices = @transform_1, window_bounds = array<i64: 3, 47, 96>}, {pipeline_mode = #tpu.pipeline_mode<synchronous>, transform_indices = @transform_2, window_bounds = array<i64: 3, 288, 752>}, {pipeline_mode = #tpu.pipeline_mode<synchronous>, transform_indices = @transform_3, window_bounds = array<i64: 1, 752>}, {pipeline_mode = #tpu.pipeline_mode<synchronous>, transform_indices = @transform_4, window_bounds = array<i64: 2, 23, 47>}, {pipeline_mode = #tpu.pipeline_mode<synchronous>, transform_indices = @transform_5, window_bounds = array<i64: 2, 752, 368>}, {pipeline_mode = #tpu.pipeline_mode<synchronous>, transform_indices = @transform_6, window_bounds = array<i64: 3, 11, 23>}, {pipeline_mode = #tpu.pipeline_mode<synchronous>, transform_indices = @transform_7, window_bounds = array<i64: 3, 368, 352>}, {pipeline_mode = #tpu.pipeline_mode<synchronous>, transform_indices = @transform_8, window_bounds = array<i64: 1, 352>}, {pipeline_mode = #tpu.pipeline_mode<synchronous>, transform_indices = @transform_9, window_bounds = array<i64: 2, 5, 11>}, {pipeline_mode = #tpu.pipeline_mode<synchronous>, transform_indices = @transform_10, window_bounds = array<i64: 2, 352, 160>}, {pipeline_mode = #tpu.pipeline_mode<synchronous>, transform_indices = @transform_11, window_bounds = array<i64: 3, 2, 5>}, {pipeline_mode = #tpu.pipeline_mode<synchronous>, transform_indices = @transform_12, window_bounds = array<i64: 3, 160, 128>}, {pipeline_mode = #tpu.pipeline_mode<synchronous>, transform_indices = @transform_13, window_bounds = array<i64: 1, 128>}, {pipeline_mode = #tpu.pipeline_mode<synchronous>, transform_indices = @transform_14, window_bounds = array<i64: 2, 1, 2>}, {pipeline_mode = #tpu.pipeline_mode<synchronous>, transform_indices = @transform_15, window_bounds = array<i64: 2, 128, 64>}, {pipeline_mode = #tpu.pipeline_mode<synchronous>, transform_indices = @transform_16, window_bounds = array<i64: 64, 128>}, {pipeline_mode = #tpu.pipeline_mode<synchronous>, transform_indices = @transform_17, window_bounds = array<i64: 1, 128>}, {transform_indices = @transform_18, window_bounds = array<i64: 1, 1, 128>}]} {
    %c0 = arith.constant 0 : index
    %c0_0 = arith.constant 0 : index
    %c0_1 = arith.constant 0 : index
    %0 = vector.load %arg1[%c0, %c0_0, %c0_1] : memref<1x96x288xbf16, #tpu.memory_space<vmem>>, vector<1x96x288xbf16>
    %1 = vector.shape_cast %0 : vector<1x96x288xbf16> to vector<96x288xbf16>
    %c0_2 = arith.constant 0 : index
    %c0_3 = arith.constant 0 : index
    %c0_4 = arith.constant 0 : index
    %2 = vector.load %arg2[%c0_2, %c0_3, %c0_4] : memref<3x47x96xbf16, #tpu.memory_space<vmem>>, vector<1x47x96xbf16>
    %3 = vector.shape_cast %2 : vector<1x47x96xbf16> to vector<47x96xbf16>
    %cst = arith.constant dense<0.000000e+00> : vector<47x288xf32>
    %4 = tpu.matmul %3, %1, %cst {dimension_numbers = #tpu.dot_dimension_numbers<[1], [0], [0], [1], [0, 0, 1, 1], [], []>} : vector<47x96xbf16>, vector<96x288xbf16>, vector<47x288xf32> -> vector<47x288xf32>
    %c0_5 = arith.constant 0 : index
    %c0_6 = arith.constant 0 : index
    %c0_7 = arith.constant 0 : index
    %5 = vector.load %arg3[%c0_5, %c0_6, %c0_7] : memref<3x288x752xbf16, #tpu.memory_space<vmem>>, vector<1x288x752xbf16>
    %6 = vector.shape_cast %5 : vector<1x288x752xbf16> to vector<288x752xbf16>
    %7 = arith.truncf %4 : vector<47x288xf32> to vector<47x288xbf16>
    %cst_8 = arith.constant dense<0.000000e+00> : vector<47x752xf32>
    %8 = tpu.matmul %7, %6, %cst_8 {dimension_numbers = #tpu.dot_dimension_numbers<[1], [0], [0], [1], [0, 0, 1, 1], [], []>} : vector<47x288xbf16>, vector<288x752xbf16>, vector<47x752xf32> -> vector<47x752xf32>
    %c1 = arith.constant 1 : index
    %c0_9 = arith.constant 0 : index
    %c0_10 = arith.constant 0 : index
    %9 = vector.load %arg2[%c1, %c0_9, %c0_10] : memref<3x47x96xbf16, #tpu.memory_space<vmem>>, vector<1x47x96xbf16>
    %10 = vector.shape_cast %9 : vector<1x47x96xbf16> to vector<47x96xbf16>
    %cst_11 = arith.constant dense<0.000000e+00> : vector<47x288xf32>
    %11 = tpu.matmul %10, %1, %cst_11 {dimension_numbers = #tpu.dot_dimension_numbers<[1], [0], [0], [1], [0, 0, 1, 1], [], []>} : vector<47x96xbf16>, vector<96x288xbf16>, vector<47x288xf32> -> vector<47x288xf32>
    %c1_12 = arith.constant 1 : index
    %c0_13 = arith.constant 0 : index
    %c0_14 = arith.constant 0 : index
    %12 = vector.load %arg3[%c1_12, %c0_13, %c0_14] : memref<3x288x752xbf16, #tpu.memory_space<vmem>>, vector<1x288x752xbf16>
    %13 = vector.shape_cast %12 : vector<1x288x752xbf16> to vector<288x752xbf16>
    %14 = arith.truncf %11 : vector<47x288xf32> to vector<47x288xbf16>
    %cst_15 = arith.constant dense<0.000000e+00> : vector<47x752xf32>
    %15 = tpu.matmul %14, %13, %cst_15 {dimension_numbers = #tpu.dot_dimension_numbers<[1], [0], [0], [1], [0, 0, 1, 1], [], []>} : vector<47x288xbf16>, vector<288x752xbf16>, vector<47x752xf32> -> vector<47x752xf32>
    %16 = arith.addf %8, %15 : vector<47x752xf32>
    %c2 = arith.constant 2 : index
    %c0_16 = arith.constant 0 : index
    %c0_17 = arith.constant 0 : index
    %17 = vector.load %arg2[%c2, %c0_16, %c0_17] : memref<3x47x96xbf16, #tpu.memory_space<vmem>>, vector<1x47x96xbf16>
    %18 = vector.shape_cast %17 : vector<1x47x96xbf16> to vector<47x96xbf16>
    %cst_18 = arith.constant dense<0.000000e+00> : vector<47x288xf32>
    %19 = tpu.matmul %18, %1, %cst_18 {dimension_numbers = #tpu.dot_dimension_numbers<[1], [0], [0], [1], [0, 0, 1, 1], [], []>} : vector<47x96xbf16>, vector<96x288xbf16>, vector<47x288xf32> -> vector<47x288xf32>
    %c2_19 = arith.constant 2 : index
    %c0_20 = arith.constant 0 : index
    %c0_21 = arith.constant 0 : index
    %20 = vector.load %arg3[%c2_19, %c0_20, %c0_21] : memref<3x288x752xbf16, #tpu.memory_space<vmem>>, vector<1x288x752xbf16>
    %21 = vector.shape_cast %20 : vector<1x288x752xbf16> to vector<288x752xbf16>
    %22 = arith.truncf %19 : vector<47x288xf32> to vector<47x288xbf16>
    %cst_22 = arith.constant dense<0.000000e+00> : vector<47x752xf32>
    %23 = tpu.matmul %22, %21, %cst_22 {dimension_numbers = #tpu.dot_dimension_numbers<[1], [0], [0], [1], [0, 0, 1, 1], [], []>} : vector<47x288xbf16>, vector<288x752xbf16>, vector<47x752xf32> -> vector<47x752xf32>
    %24 = arith.addf %16, %23 : vector<47x752xf32>
    %c0_23 = arith.constant 0 : index
    %c0_24 = arith.constant 0 : index
    %25 = vector.load %arg4[%c0_23, %c0_24] : memref<1x752xf32, #tpu.memory_space<vmem>>, vector<1x752xf32>
    %26 = vector.broadcast %25 : vector<1x752xf32> to vector<47x752xf32>
    %27 = arith.addf %24, %26 : vector<47x752xf32>
    %cst_25 = arith.constant 0.000000e+00 : f32
    %28 = vector.broadcast %cst_25 : f32 to vector<47x752xf32>
    %29 = arith.maximumf %27, %28 : vector<47x752xf32>
    %c0_26 = arith.constant 0 : index
    %c0_27 = arith.constant 0 : index
    %c0_28 = arith.constant 0 : index
    %30 = vector.load %arg5[%c0_26, %c0_27, %c0_28] : memref<2x23x47xbf16, #tpu.memory_space<vmem>>, vector<1x23x47xbf16>
    %31 = vector.shape_cast %30 : vector<1x23x47xbf16> to vector<23x47xbf16>
    %32 = arith.truncf %29 : vector<47x752xf32> to vector<47x752xbf16>
    %cst_29 = arith.constant dense<0.000000e+00> : vector<23x752xf32>
    %33 = tpu.matmul %31, %32, %cst_29 {dimension_numbers = #tpu.dot_dimension_numbers<[1], [0], [0], [1], [0, 0, 1, 1], [], []>} : vector<23x47xbf16>, vector<47x752xbf16>, vector<23x752xf32> -> vector<23x752xf32>
    %c1_30 = arith.constant 1 : index
    %c0_31 = arith.constant 0 : index
    %c0_32 = arith.constant 0 : index
    %34 = vector.load %arg5[%c1_30, %c0_31, %c0_32] : memref<2x23x47xbf16, #tpu.memory_space<vmem>>, vector<1x23x47xbf16>
    %35 = vector.shape_cast %34 : vector<1x23x47xbf16> to vector<23x47xbf16>
    %36 = arith.truncf %29 : vector<47x752xf32> to vector<47x752xbf16>
    %cst_33 = arith.constant dense<0.000000e+00> : vector<23x752xf32>
    %37 = tpu.matmul %35, %36, %cst_33 {dimension_numbers = #tpu.dot_dimension_numbers<[1], [0], [0], [1], [0, 0, 1, 1], [], []>} : vector<23x47xbf16>, vector<47x752xbf16>, vector<23x752xf32> -> vector<23x752xf32>
    %38 = arith.maximumf %33, %37 : vector<23x752xf32>
    %c0_34 = arith.constant 0 : index
    %c0_35 = arith.constant 0 : index
    %c0_36 = arith.constant 0 : index
    %39 = vector.load %arg6[%c0_34, %c0_35, %c0_36] : memref<2x752x368xbf16, #tpu.memory_space<vmem>>, vector<1x752x368xbf16>
    %40 = vector.shape_cast %39 : vector<1x752x368xbf16> to vector<752x368xbf16>
    %41 = arith.truncf %38 : vector<23x752xf32> to vector<23x752xbf16>
    %cst_37 = arith.constant dense<0.000000e+00> : vector<23x368xf32>
    %42 = tpu.matmul %41, %40, %cst_37 {dimension_numbers = #tpu.dot_dimension_numbers<[1], [0], [0], [1], [0, 0, 1, 1], [], []>} : vector<23x752xbf16>, vector<752x368xbf16>, vector<23x368xf32> -> vector<23x368xf32>
    %c1_38 = arith.constant 1 : index
    %c0_39 = arith.constant 0 : index
    %c0_40 = arith.constant 0 : index
    %43 = vector.load %arg6[%c1_38, %c0_39, %c0_40] : memref<2x752x368xbf16, #tpu.memory_space<vmem>>, vector<1x752x368xbf16>
    %44 = vector.shape_cast %43 : vector<1x752x368xbf16> to vector<752x368xbf16>
    %45 = arith.truncf %38 : vector<23x752xf32> to vector<23x752xbf16>
    %cst_41 = arith.constant dense<0.000000e+00> : vector<23x368xf32>
    %46 = tpu.matmul %45, %44, %cst_41 {dimension_numbers = #tpu.dot_dimension_numbers<[1], [0], [0], [1], [0, 0, 1, 1], [], []>} : vector<23x752xbf16>, vector<752x368xbf16>, vector<23x368xf32> -> vector<23x368xf32>
    %47 = arith.maximumf %42, %46 : vector<23x368xf32>
    %c0_42 = arith.constant 0 : index
    %c0_43 = arith.constant 0 : index
    %c0_44 = arith.constant 0 : index
    %48 = vector.load %arg7[%c0_42, %c0_43, %c0_44] : memref<3x11x23xbf16, #tpu.memory_space<vmem>>, vector<1x11x23xbf16>
    %49 = vector.shape_cast %48 : vector<1x11x23xbf16> to vector<11x23xbf16>
    %50 = arith.truncf %47 : vector<23x368xf32> to vector<23x368xbf16>
    %cst_45 = arith.constant dense<0.000000e+00> : vector<11x368xf32>
    %51 = tpu.matmul %49, %50, %cst_45 {dimension_numbers = #tpu.dot_dimension_numbers<[1], [0], [0], [1], [0, 0, 1, 1], [], []>} : vector<11x23xbf16>, vector<23x368xbf16>, vector<11x368xf32> -> vector<11x368xf32>
    %c0_46 = arith.constant 0 : index
    %c0_47 = arith.constant 0 : index
    %c0_48 = arith.constant 0 : index
    %52 = vector.load %arg8[%c0_46, %c0_47, %c0_48] : memref<3x368x352xbf16, #tpu.memory_space<vmem>>, vector<1x368x352xbf16>
    %53 = vector.shape_cast %52 : vector<1x368x352xbf16> to vector<368x352xbf16>
    %54 = arith.truncf %51 : vector<11x368xf32> to vector<11x368xbf16>
    %cst_49 = arith.constant dense<0.000000e+00> : vector<11x352xf32>
    %55 = tpu.matmul %54, %53, %cst_49 {dimension_numbers = #tpu.dot_dimension_numbers<[1], [0], [0], [1], [0, 0, 1, 1], [], []>} : vector<11x368xbf16>, vector<368x352xbf16>, vector<11x352xf32> -> vector<11x352xf32>
    %c1_50 = arith.constant 1 : index
    %c0_51 = arith.constant 0 : index
    %c0_52 = arith.constant 0 : index
    %56 = vector.load %arg7[%c1_50, %c0_51, %c0_52] : memref<3x11x23xbf16, #tpu.memory_space<vmem>>, vector<1x11x23xbf16>
    %57 = vector.shape_cast %56 : vector<1x11x23xbf16> to vector<11x23xbf16>
    %58 = arith.truncf %47 : vector<23x368xf32> to vector<23x368xbf16>
    %cst_53 = arith.constant dense<0.000000e+00> : vector<11x368xf32>
    %59 = tpu.matmul %57, %58, %cst_53 {dimension_numbers = #tpu.dot_dimension_numbers<[1], [0], [0], [1], [0, 0, 1, 1], [], []>} : vector<11x23xbf16>, vector<23x368xbf16>, vector<11x368xf32> -> vector<11x368xf32>
    %c1_54 = arith.constant 1 : index
    %c0_55 = arith.constant 0 : index
    %c0_56 = arith.constant 0 : index
    %60 = vector.load %arg8[%c1_54, %c0_55, %c0_56] : memref<3x368x352xbf16, #tpu.memory_space<vmem>>, vector<1x368x352xbf16>
    %61 = vector.shape_cast %60 : vector<1x368x352xbf16> to vector<368x352xbf16>
    %62 = arith.truncf %59 : vector<11x368xf32> to vector<11x368xbf16>
    %cst_57 = arith.constant dense<0.000000e+00> : vector<11x352xf32>
    %63 = tpu.matmul %62, %61, %cst_57 {dimension_numbers = #tpu.dot_dimension_numbers<[1], [0], [0], [1], [0, 0, 1, 1], [], []>} : vector<11x368xbf16>, vector<368x352xbf16>, vector<11x352xf32> -> vector<11x352xf32>
    %64 = arith.addf %55, %63 : vector<11x352xf32>
    %c2_58 = arith.constant 2 : index
    %c0_59 = arith.constant 0 : index
    %c0_60 = arith.constant 0 : index
    %65 = vector.load %arg7[%c2_58, %c0_59, %c0_60] : memref<3x11x23xbf16, #tpu.memory_space<vmem>>, vector<1x11x23xbf16>
    %66 = vector.shape_cast %65 : vector<1x11x23xbf16> to vector<11x23xbf16>
    %67 = arith.truncf %47 : vector<23x368xf32> to vector<23x368xbf16>
    %cst_61 = arith.constant dense<0.000000e+00> : vector<11x368xf32>
    %68 = tpu.matmul %66, %67, %cst_61 {dimension_numbers = #tpu.dot_dimension_numbers<[1], [0], [0], [1], [0, 0, 1, 1], [], []>} : vector<11x23xbf16>, vector<23x368xbf16>, vector<11x368xf32> -> vector<11x368xf32>
    %c2_62 = arith.constant 2 : index
    %c0_63 = arith.constant 0 : index
    %c0_64 = arith.constant 0 : index
    %69 = vector.load %arg8[%c2_62, %c0_63, %c0_64] : memref<3x368x352xbf16, #tpu.memory_space<vmem>>, vector<1x368x352xbf16>
    %70 = vector.shape_cast %69 : vector<1x368x352xbf16> to vector<368x352xbf16>
    %71 = arith.truncf %68 : vector<11x368xf32> to vector<11x368xbf16>
    %cst_65 = arith.constant dense<0.000000e+00> : vector<11x352xf32>
    %72 = tpu.matmul %71, %70, %cst_65 {dimension_numbers = #tpu.dot_dimension_numbers<[1], [0], [0], [1], [0, 0, 1, 1], [], []>} : vector<11x368xbf16>, vector<368x352xbf16>, vector<11x352xf32> -> vector<11x352xf32>
    %73 = arith.addf %64, %72 : vector<11x352xf32>
    %c0_66 = arith.constant 0 : index
    %c0_67 = arith.constant 0 : index
    %74 = vector.load %arg9[%c0_66, %c0_67] : memref<1x352xf32, #tpu.memory_space<vmem>>, vector<1x352xf32>
    %75 = vector.broadcast %74 : vector<1x352xf32> to vector<11x352xf32>
    %76 = arith.addf %73, %75 : vector<11x352xf32>
    %cst_68 = arith.constant 0.000000e+00 : f32
    %77 = vector.broadcast %cst_68 : f32 to vector<11x352xf32>
    %78 = arith.maximumf %76, %77 : vector<11x352xf32>
    %c0_69 = arith.constant 0 : index
    %c0_70 = arith.constant 0 : index
    %c0_71 = arith.constant 0 : index
    %79 = vector.load %arg10[%c0_69, %c0_70, %c0_71] : memref<2x5x11xbf16, #tpu.memory_space<vmem>>, vector<1x5x11xbf16>
    %80 = vector.shape_cast %79 : vector<1x5x11xbf16> to vector<5x11xbf16>
    %81 = arith.truncf %78 : vector<11x352xf32> to vector<11x352xbf16>
    %cst_72 = arith.constant dense<0.000000e+00> : vector<5x352xf32>
    %82 = tpu.matmul %80, %81, %cst_72 {dimension_numbers = #tpu.dot_dimension_numbers<[1], [0], [0], [1], [0, 0, 1, 1], [], []>} : vector<5x11xbf16>, vector<11x352xbf16>, vector<5x352xf32> -> vector<5x352xf32>
    %c1_73 = arith.constant 1 : index
    %c0_74 = arith.constant 0 : index
    %c0_75 = arith.constant 0 : index
    %83 = vector.load %arg10[%c1_73, %c0_74, %c0_75] : memref<2x5x11xbf16, #tpu.memory_space<vmem>>, vector<1x5x11xbf16>
    %84 = vector.shape_cast %83 : vector<1x5x11xbf16> to vector<5x11xbf16>
    %85 = arith.truncf %78 : vector<11x352xf32> to vector<11x352xbf16>
    %cst_76 = arith.constant dense<0.000000e+00> : vector<5x352xf32>
    %86 = tpu.matmul %84, %85, %cst_76 {dimension_numbers = #tpu.dot_dimension_numbers<[1], [0], [0], [1], [0, 0, 1, 1], [], []>} : vector<5x11xbf16>, vector<11x352xbf16>, vector<5x352xf32> -> vector<5x352xf32>
    %87 = arith.maximumf %82, %86 : vector<5x352xf32>
    %c0_77 = arith.constant 0 : index
    %c0_78 = arith.constant 0 : index
    %c0_79 = arith.constant 0 : index
    %88 = vector.load %arg11[%c0_77, %c0_78, %c0_79] : memref<2x352x160xbf16, #tpu.memory_space<vmem>>, vector<1x352x160xbf16>
    %89 = vector.shape_cast %88 : vector<1x352x160xbf16> to vector<352x160xbf16>
    %90 = arith.truncf %87 : vector<5x352xf32> to vector<5x352xbf16>
    %cst_80 = arith.constant dense<0.000000e+00> : vector<5x160xf32>
    %91 = tpu.matmul %90, %89, %cst_80 {dimension_numbers = #tpu.dot_dimension_numbers<[1], [0], [0], [1], [0, 0, 1, 1], [], []>} : vector<5x352xbf16>, vector<352x160xbf16>, vector<5x160xf32> -> vector<5x160xf32>
    %c1_81 = arith.constant 1 : index
    %c0_82 = arith.constant 0 : index
    %c0_83 = arith.constant 0 : index
    %92 = vector.load %arg11[%c1_81, %c0_82, %c0_83] : memref<2x352x160xbf16, #tpu.memory_space<vmem>>, vector<1x352x160xbf16>
    %93 = vector.shape_cast %92 : vector<1x352x160xbf16> to vector<352x160xbf16>
    %94 = arith.truncf %87 : vector<5x352xf32> to vector<5x352xbf16>
    %cst_84 = arith.constant dense<0.000000e+00> : vector<5x160xf32>
    %95 = tpu.matmul %94, %93, %cst_84 {dimension_numbers = #tpu.dot_dimension_numbers<[1], [0], [0], [1], [0, 0, 1, 1], [], []>} : vector<5x352xbf16>, vector<352x160xbf16>, vector<5x160xf32> -> vector<5x160xf32>
    %96 = arith.maximumf %91, %95 : vector<5x160xf32>
    %c0_85 = arith.constant 0 : index
    %c0_86 = arith.constant 0 : index
    %c0_87 = arith.constant 0 : index
    %97 = vector.load %arg12[%c0_85, %c0_86, %c0_87] : memref<3x2x5xbf16, #tpu.memory_space<vmem>>, vector<1x2x5xbf16>
    %98 = vector.shape_cast %97 : vector<1x2x5xbf16> to vector<2x5xbf16>
    %99 = arith.truncf %96 : vector<5x160xf32> to vector<5x160xbf16>
    %cst_88 = arith.constant dense<0.000000e+00> : vector<2x160xf32>
    %100 = tpu.matmul %98, %99, %cst_88 {dimension_numbers = #tpu.dot_dimension_numbers<[1], [0], [0], [1], [0, 0, 1, 1], [], []>} : vector<2x5xbf16>, vector<5x160xbf16>, vector<2x160xf32> -> vector<2x160xf32>
    %c0_89 = arith.constant 0 : index
    %c0_90 = arith.constant 0 : index
    %c0_91 = arith.constant 0 : index
    %101 = vector.load %arg13[%c0_89, %c0_90, %c0_91] : memref<3x160x128xbf16, #tpu.memory_space<vmem>>, vector<1x160x128xbf16>
    %102 = vector.shape_cast %101 : vector<1x160x128xbf16> to vector<160x128xbf16>
    %103 = arith.truncf %100 : vector<2x160xf32> to vector<2x160xbf16>
    %cst_92 = arith.constant dense<0.000000e+00> : vector<2x128xf32>
    %104 = tpu.matmul %103, %102, %cst_92 {dimension_numbers = #tpu.dot_dimension_numbers<[1], [0], [0], [1], [0, 0, 1, 1], [], []>} : vector<2x160xbf16>, vector<160x128xbf16>, vector<2x128xf32> -> vector<2x128xf32>
    %c1_93 = arith.constant 1 : index
    %c0_94 = arith.constant 0 : index
    %c0_95 = arith.constant 0 : index
    %105 = vector.load %arg12[%c1_93, %c0_94, %c0_95] : memref<3x2x5xbf16, #tpu.memory_space<vmem>>, vector<1x2x5xbf16>
    %106 = vector.shape_cast %105 : vector<1x2x5xbf16> to vector<2x5xbf16>
    %107 = arith.truncf %96 : vector<5x160xf32> to vector<5x160xbf16>
    %cst_96 = arith.constant dense<0.000000e+00> : vector<2x160xf32>
    %108 = tpu.matmul %106, %107, %cst_96 {dimension_numbers = #tpu.dot_dimension_numbers<[1], [0], [0], [1], [0, 0, 1, 1], [], []>} : vector<2x5xbf16>, vector<5x160xbf16>, vector<2x160xf32> -> vector<2x160xf32>
    %c1_97 = arith.constant 1 : index
    %c0_98 = arith.constant 0 : index
    %c0_99 = arith.constant 0 : index
    %109 = vector.load %arg13[%c1_97, %c0_98, %c0_99] : memref<3x160x128xbf16, #tpu.memory_space<vmem>>, vector<1x160x128xbf16>
    %110 = vector.shape_cast %109 : vector<1x160x128xbf16> to vector<160x128xbf16>
    %111 = arith.truncf %108 : vector<2x160xf32> to vector<2x160xbf16>
    %cst_100 = arith.constant dense<0.000000e+00> : vector<2x128xf32>
    %112 = tpu.matmul %111, %110, %cst_100 {dimension_numbers = #tpu.dot_dimension_numbers<[1], [0], [0], [1], [0, 0, 1, 1], [], []>} : vector<2x160xbf16>, vector<160x128xbf16>, vector<2x128xf32> -> vector<2x128xf32>
    %113 = arith.addf %104, %112 : vector<2x128xf32>
    %c2_101 = arith.constant 2 : index
    %c0_102 = arith.constant 0 : index
    %c0_103 = arith.constant 0 : index
    %114 = vector.load %arg12[%c2_101, %c0_102, %c0_103] : memref<3x2x5xbf16, #tpu.memory_space<vmem>>, vector<1x2x5xbf16>
    %115 = vector.shape_cast %114 : vector<1x2x5xbf16> to vector<2x5xbf16>
    %116 = arith.truncf %96 : vector<5x160xf32> to vector<5x160xbf16>
    %cst_104 = arith.constant dense<0.000000e+00> : vector<2x160xf32>
    %117 = tpu.matmul %115, %116, %cst_104 {dimension_numbers = #tpu.dot_dimension_numbers<[1], [0], [0], [1], [0, 0, 1, 1], [], []>} : vector<2x5xbf16>, vector<5x160xbf16>, vector<2x160xf32> -> vector<2x160xf32>
    %c2_105 = arith.constant 2 : index
    %c0_106 = arith.constant 0 : index
    %c0_107 = arith.constant 0 : index
    %118 = vector.load %arg13[%c2_105, %c0_106, %c0_107] : memref<3x160x128xbf16, #tpu.memory_space<vmem>>, vector<1x160x128xbf16>
    %119 = vector.shape_cast %118 : vector<1x160x128xbf16> to vector<160x128xbf16>
    %120 = arith.truncf %117 : vector<2x160xf32> to vector<2x160xbf16>
    %cst_108 = arith.constant dense<0.000000e+00> : vector<2x128xf32>
    %121 = tpu.matmul %120, %119, %cst_108 {dimension_numbers = #tpu.dot_dimension_numbers<[1], [0], [0], [1], [0, 0, 1, 1], [], []>} : vector<2x160xbf16>, vector<160x128xbf16>, vector<2x128xf32> -> vector<2x128xf32>
    %122 = arith.addf %113, %121 : vector<2x128xf32>
    %c0_109 = arith.constant 0 : index
    %c0_110 = arith.constant 0 : index
    %123 = vector.load %arg14[%c0_109, %c0_110] : memref<1x128xf32, #tpu.memory_space<vmem>>, vector<1x128xf32>
    %124 = vector.broadcast %123 : vector<1x128xf32> to vector<2x128xf32>
    %125 = arith.addf %122, %124 : vector<2x128xf32>
    %cst_111 = arith.constant 0.000000e+00 : f32
    %126 = vector.broadcast %cst_111 : f32 to vector<2x128xf32>
    %127 = arith.maximumf %125, %126 : vector<2x128xf32>
    %c0_112 = arith.constant 0 : index
    %c0_113 = arith.constant 0 : index
    %c0_114 = arith.constant 0 : index
    %128 = vector.load %arg15[%c0_112, %c0_113, %c0_114] : memref<2x1x2xbf16, #tpu.memory_space<vmem>>, vector<1x1x2xbf16>
    %129 = vector.shape_cast %128 : vector<1x1x2xbf16> to vector<1x2xbf16>
    %130 = arith.truncf %127 : vector<2x128xf32> to vector<2x128xbf16>
    %cst_115 = arith.constant dense<0.000000e+00> : vector<1x128xf32>
    %131 = tpu.matmul %129, %130, %cst_115 {dimension_numbers = #tpu.dot_dimension_numbers<[1], [0], [0], [1], [0, 0, 1, 1], [], []>} : vector<1x2xbf16>, vector<2x128xbf16>, vector<1x128xf32> -> vector<1x128xf32>
    %c1_116 = arith.constant 1 : index
    %c0_117 = arith.constant 0 : index
    %c0_118 = arith.constant 0 : index
    %132 = vector.load %arg15[%c1_116, %c0_117, %c0_118] : memref<2x1x2xbf16, #tpu.memory_space<vmem>>, vector<1x1x2xbf16>
    %133 = vector.shape_cast %132 : vector<1x1x2xbf16> to vector<1x2xbf16>
    %134 = arith.truncf %127 : vector<2x128xf32> to vector<2x128xbf16>
    %cst_119 = arith.constant dense<0.000000e+00> : vector<1x128xf32>
    %135 = tpu.matmul %133, %134, %cst_119 {dimension_numbers = #tpu.dot_dimension_numbers<[1], [0], [0], [1], [0, 0, 1, 1], [], []>} : vector<1x2xbf16>, vector<2x128xbf16>, vector<1x128xf32> -> vector<1x128xf32>
    %136 = arith.maximumf %131, %135 : vector<1x128xf32>
    %c0_120 = arith.constant 0 : index
    %c0_121 = arith.constant 0 : index
    %c0_122 = arith.constant 0 : index
    %137 = vector.load %arg16[%c0_120, %c0_121, %c0_122] : memref<2x128x64xbf16, #tpu.memory_space<vmem>>, vector<1x128x64xbf16>
    %138 = vector.shape_cast %137 : vector<1x128x64xbf16> to vector<128x64xbf16>
    %139 = arith.truncf %136 : vector<1x128xf32> to vector<1x128xbf16>
    %cst_123 = arith.constant dense<0.000000e+00> : vector<1x64xf32>
    %140 = tpu.matmul %139, %138, %cst_123 {dimension_numbers = #tpu.dot_dimension_numbers<[1], [0], [0], [1], [0, 0, 1, 1], [], []>} : vector<1x128xbf16>, vector<128x64xbf16>, vector<1x64xf32> -> vector<1x64xf32>
    %c1_124 = arith.constant 1 : index
    %c0_125 = arith.constant 0 : index
    %c0_126 = arith.constant 0 : index
    %141 = vector.load %arg16[%c1_124, %c0_125, %c0_126] : memref<2x128x64xbf16, #tpu.memory_space<vmem>>, vector<1x128x64xbf16>
    %142 = vector.shape_cast %141 : vector<1x128x64xbf16> to vector<128x64xbf16>
    %143 = arith.truncf %136 : vector<1x128xf32> to vector<1x128xbf16>
    %cst_127 = arith.constant dense<0.000000e+00> : vector<1x64xf32>
    %144 = tpu.matmul %143, %142, %cst_127 {dimension_numbers = #tpu.dot_dimension_numbers<[1], [0], [0], [1], [0, 0, 1, 1], [], []>} : vector<1x128xbf16>, vector<128x64xbf16>, vector<1x64xf32> -> vector<1x64xf32>
    %145 = arith.maximumf %140, %144 : vector<1x64xf32>
    %c0_128 = arith.constant 0 : index
    %c0_129 = arith.constant 0 : index
    %146 = vector.load %arg17[%c0_128, %c0_129] : memref<64x128xf32, #tpu.memory_space<vmem>>, vector<64x128xf32>
    %cst_130 = arith.constant dense<0.000000e+00> : vector<1x128xf32>
    %147 = tpu.matmul %145, %146, %cst_130 {dimension_numbers = #tpu.dot_dimension_numbers<[1], [0], [0], [1], [0, 0, 1, 1], [], []>} : vector<1x64xf32>, vector<64x128xf32>, vector<1x128xf32> -> vector<1x128xf32>
    %c0_131 = arith.constant 0 : index
    %c0_132 = arith.constant 0 : index
    %148 = vector.load %arg18[%c0_131, %c0_132] : memref<1x128xf32, #tpu.memory_space<vmem>>, vector<1x128xf32>
    %149 = arith.addf %147, %148 : vector<1x128xf32>
    %cst_133 = arith.constant 0.000000e+00 : f32
    %150 = vector.broadcast %cst_133 : f32 to vector<1x128xf32>
    %151 = arith.maximumf %149, %150 : vector<1x128xf32>
    %c0_134 = arith.constant 0 : index
    %c0_135 = arith.constant 0 : index
    %c0_136 = arith.constant 0 : index
    %152 = vector.load %arg19[%c0_134, %c0_135, %c0_136] : memref<1x1x128xf32, #tpu.memory_space<vmem>>, vector<1x1x128xf32>
    %153 = vector.shape_cast %152 : vector<1x1x128xf32> to vector<1x128xf32>
    %154 = vector.shape_cast %151 : vector<1x128xf32> to vector<1x1x128xf32>
    tpu.vector_store %arg19[%c0_134, %c0_135, %c0_136], %154 {strides = array<i32>} : memref<1x1x128xf32, #tpu.memory_space<vmem>>, vector<1x1x128xf32>,
    return
  }
  func.func @transform_0(%arg0: i32) -> (i32, i32, i32) {
    %c0_i32 = arith.constant 0 : i32
    %c0_i32_0 = arith.constant 0 : i32
    %c0_i32_1 = arith.constant 0 : i32
    return %arg0, %c0_i32, %c0_i32_0 : i32, i32, i32
  }
  func.func @transform_1(%arg0: i32) -> (i32, i32, i32) {
    %c0_i32 = arith.constant 0 : i32
    %c0_i32_0 = arith.constant 0 : i32
    %c0_i32_1 = arith.constant 0 : i32
    %c0_i32_2 = arith.constant 0 : i32
    return %c0_i32, %c0_i32_0, %c0_i32_1 : i32, i32, i32
  }
  func.func @transform_2(%arg0: i32) -> (i32, i32, i32) {
    %c0_i32 = arith.constant 0 : i32
    %c0_i32_0 = arith.constant 0 : i32
    %c0_i32_1 = arith.constant 0 : i32
    %c0_i32_2 = arith.constant 0 : i32
    return %c0_i32, %c0_i32_0, %c0_i32_1 : i32, i32, i32
  }
  func.func @transform_3(%arg0: i32) -> (i32, i32) {
    %c0_i32 = arith.constant 0 : i32
    %c0_i32_0 = arith.constant 0 : i32
    %c0_i32_1 = arith.constant 0 : i32
    return %c0_i32, %c0_i32_0 : i32, i32
  }
  func.func @transform_4(%arg0: i32) -> (i32, i32, i32) {
    %c0_i32 = arith.constant 0 : i32
    %c0_i32_0 = arith.constant 0 : i32
    %c0_i32_1 = arith.constant 0 : i32
    %c0_i32_2 = arith.constant 0 : i32
    return %c0_i32, %c0_i32_0, %c0_i32_1 : i32, i32, i32
  }
  func.func @transform_5(%arg0: i32) -> (i32, i32, i32) {
    %c0_i32 = arith.constant 0 : i32
    %c0_i32_0 = arith.constant 0 : i32
    %c0_i32_1 = arith.constant 0 : i32
    %c0_i32_2 = arith.constant 0 : i32
    return %c0_i32, %c0_i32_0, %c0_i32_1 : i32, i32, i32
  }
  func.func @transform_6(%arg0: i32) -> (i32, i32, i32) {
    %c0_i32 = arith.constant 0 : i32
    %c0_i32_0 = arith.constant 0 : i32
    %c0_i32_1 = arith.constant 0 : i32
    %c0_i32_2 = arith.constant 0 : i32
    return %c0_i32, %c0_i32_0, %c0_i32_1 : i32, i32, i32
  }
  func.func @transform_7(%arg0: i32) -> (i32, i32, i32) {
    %c0_i32 = arith.constant 0 : i32
    %c0_i32_0 = arith.constant 0 : i32
    %c0_i32_1 = arith.constant 0 : i32
    %c0_i32_2 = arith.constant 0 : i32
    return %c0_i32, %c0_i32_0, %c0_i32_1 : i32, i32, i32
  }
  func.func @transform_8(%arg0: i32) -> (i32, i32) {
    %c0_i32 = arith.constant 0 : i32
    %c0_i32_0 = arith.constant 0 : i32
    %c0_i32_1 = arith.constant 0 : i32
    return %c0_i32, %c0_i32_0 : i32, i32
  }
  func.func @transform_9(%arg0: i32) -> (i32, i32, i32) {
    %c0_i32 = arith.constant 0 : i32
    %c0_i32_0 = arith.constant 0 : i32
    %c0_i32_1 = arith.constant 0 : i32
    %c0_i32_2 = arith.constant 0 : i32
    return %c0_i32, %c0_i32_0, %c0_i32_1 : i32, i32, i32
  }
  func.func @transform_10(%arg0: i32) -> (i32, i32, i32) {
    %c0_i32 = arith.constant 0 : i32
    %c0_i32_0 = arith.constant 0 : i32
    %c0_i32_1 = arith.constant 0 : i32
    %c0_i32_2 = arith.constant 0 : i32
    return %c0_i32, %c0_i32_0, %c0_i32_1 : i32, i32, i32
  }
  func.func @transform_11(%arg0: i32) -> (i32, i32, i32) {
    %c0_i32 = arith.constant 0 : i32
    %c0_i32_0 = arith.constant 0 : i32
    %c0_i32_1 = arith.constant 0 : i32
    %c0_i32_2 = arith.constant 0 : i32
    return %c0_i32, %c0_i32_0, %c0_i32_1 : i32, i32, i32
  }
  func.func @transform_12(%arg0: i32) -> (i32, i32, i32) {
    %c0_i32 = arith.constant 0 : i32
    %c0_i32_0 = arith.constant 0 : i32
    %c0_i32_1 = arith.constant 0 : i32
    %c0_i32_2 = arith.constant 0 : i32
    return %c0_i32, %c0_i32_0, %c0_i32_1 : i32, i32, i32
  }
  func.func @transform_13(%arg0: i32) -> (i32, i32) {
    %c0_i32 = arith.constant 0 : i32
    %c0_i32_0 = arith.constant 0 : i32
    %c0_i32_1 = arith.constant 0 : i32
    return %c0_i32, %c0_i32_0 : i32, i32
  }
  func.func @transform_14(%arg0: i32) -> (i32, i32, i32) {
    %c0_i32 = arith.constant 0 : i32
    %c0_i32_0 = arith.constant 0 : i32
    %c0_i32_1 = arith.constant 0 : i32
    %c0_i32_2 = arith.constant 0 : i32
    return %c0_i32, %c0_i32_0, %c0_i32_1 : i32, i32, i32
  }
  func.func @transform_15(%arg0: i32) -> (i32, i32, i32) {
    %c0_i32 = arith.constant 0 : i32
    %c0_i32_0 = arith.constant 0 : i32
    %c0_i32_1 = arith.constant 0 : i32
    %c0_i32_2 = arith.constant 0 : i32
    return %c0_i32, %c0_i32_0, %c0_i32_1 : i32, i32, i32
  }
  func.func @transform_16(%arg0: i32) -> (i32, i32) {
    %c0_i32 = arith.constant 0 : i32
    %c0_i32_0 = arith.constant 0 : i32
    %c0_i32_1 = arith.constant 0 : i32
    return %c0_i32, %c0_i32_0 : i32, i32
  }
  func.func @transform_17(%arg0: i32) -> (i32, i32) {
    %c0_i32 = arith.constant 0 : i32
    %c0_i32_0 = arith.constant 0 : i32
    %c0_i32_1 = arith.constant 0 : i32
    return %c0_i32, %c0_i32_0 : i32, i32
  }
  func.func @transform_18(%arg0: i32) -> (i32, i32, i32) {
    %c0_i32 = arith.constant 0 : i32
    %c0_i32_0 = arith.constant 0 : i32
    %c0_i32_1 = arith.constant 0 : i32
    return %arg0, %c0_i32, %c0_i32_0 : i32, i32, i32
  }
}

</mosaic_0001>

<bundles_post_ra>
// kernel: hand_detection_forward.1
= control target key start
LH: loop header
LB: loop body
LE: loop exit
PB: predicated region body
PF: predicated region fallthrough
CT: control target
= control target key end

     0   :  { %s19531_s0 = inlined_call_operand.vmem [shape: bf16[2,96,288], index: 0, kind: input, shape index: {}]   ;;  %s19532_s1 = inlined_call_operand.vmem [shape: bf16[3,47,96], index: 1, kind: input, shape index: {}]   ;;  %s19533_s2 = inlined_call_operand.vmem [shape: bf16[3,288,752], index: 2, kind: input, shape index: {}]   ;;  %s19534_s3 = inlined_call_operand.vmem [shape: f32[1,752], index: 3, kind: input, shape index: {}]   ;;  %s19535_s4 = inlined_call_operand.vmem [shape: bf16[2,23,47], index: 4, kind: input, shape index: {}]   ;;  %s19536_s5 = inlined_call_operand.vmem [shape: bf16[2,752,368], index: 5, kind: input, shape index: {}]   ;;  %s19537_s6 = inlined_call_operand.vmem [shape: bf16[3,11,23], index: 6, kind: input, shape index: {}]   ;;  %s19538_s7 = inlined_call_operand.vmem [shape: bf16[3,368,352], index: 7, kind: input, shape index: {}]   ;;  %s19539_s8 = inlined_call_operand.vmem [shape: f32[1,352], index: 8, kind: input, shape index: {}]   ;;  %s19540_s9 = inlined_call_operand.vmem [shape: bf16[2,5,11], index: 9, kind: input, shape index: {}]   ;;  %s19541_s10 = inlined_call_operand.vmem [shape: bf16[2,352,160], index: 10, kind: input, shape index: {}]   ;;  %s19542_s11 = inlined_call_operand.vmem [shape: bf16[3,2,5], index: 11, kind: input, shape index: {}]   ;;  %s19543_s12 = inlined_call_operand.vmem [shape: bf16[3,160,128], index: 12, kind: input, shape index: {}]   ;;  %s19544_s13 = inlined_call_operand.vmem [shape: f32[1,128], index: 13, kind: input, shape index: {}]   ;;  %s19545_s14 = inlined_call_operand.vmem [shape: bf16[2,1,2], index: 14, kind: input, shape index: {}]   ;;  %s19546_s15 = inlined_call_operand.vmem [shape: bf16[2,128,64], index: 15, kind: input, shape index: {}]   ;;  %s19547_s16 = inlined_call_operand.vmem [shape: f32[64,128], index: 16, kind: input, shape index: {}]   ;;  %s19548_s17 = inlined_call_operand.vmem [shape: f32[1,128], index: 17, kind: input, shape index: {}]   ;;  %s19549_s18 = inlined_call_operand.hbm [shape: f32[2,1,128], index: 18, kind: output, shape index: {}]  }
   0x1   :  { %19564 = sst [smem:[#allocation40_spill]] %s19531_s0 }
   0x2   :  { %19565 = sst [smem:[#allocation41_spill]] %s19532_s1 }
   0x3   :  { %19566 = sst [smem:[#allocation42_spill]] %s19533_s2 }
   0x4   :  { %19567 = sst [smem:[#allocation43_spill]] %s19534_s3 }
   0x5   :  { %19568 = sst [smem:[#allocation44_spill]] %s19535_s4 }
   0x6   :  { %19569 = sst [smem:[#allocation45_spill]] %s19548_s17 }
   0x7   :  { %19570 = sst [smem:[#allocation46_spill]] %s19549_s18 }
   0x8   :  { %23 = vsyncpa [#allocation3], 0 }
   0x9   :  { %25 = vsyncpa [#allocation3 + $0x1], 0  ;;  %s15335_s27 = smov 0   ;;  %s15337_s28 = smov 0  }
   0xa   :  { %s15339_s29 = smov 0   ;;  %s15341_s30 = smov 0  }
   0xb LB: > { %19571 = sst [smem:[#allocation5_spill]] %s15221_s27  ;;  %s15356_s0 = sadd.s32 4294967295, %s15233_s30   ;;  %s15233_s30 = sphi %s15341_s30, %s19651_s30   ;;  %s15229_s29 = sphi %s15339_s29, %s19653_s29   ;;  %s15225_s28 = sphi %s15337_s28, %s19655_s28   ;;  %s15221_s27 = sphi %s15335_s27, %s19654_s27  }
   0xc   : > { %19572 = sst [smem:[#allocation6_spill]] %s15229_s29  ;;  %s11456_s19 = sadd.s32 4294967294, %s15233_s30  }
   0xd   : > { %19573 = sst [smem:[#allocation7_spill]] %s15233_s30  ;;  %s15360_s1 = sadd.s32 1, %s15233_s30  }
   0xe   : > { %19574 = sst [smem:[#allocation8_spill]] %s15360_s1  ;;  %s421_s20 = sadd.s32 1, %s15229_s29 }
   0xf   : > { %s418_s21 = ssub.s32 %s15233_s30, %s15360_s1  ;;  %p431_p0 = scmp.ne.s32.totalorder %s15229_s29, %s15225_s28 }
  0x10   : > { %p419_p1 = scmp.eq.s32.totalorder %s418_s21, 0  ;;  %p432_p2 = scmp.eq.s32.totalorder %s15356_s0, 1 }
  0x11   : > { %p437_p3 = scmp.ne.s32.totalorder %s15225_s28, %s15221_s27  ;;  %p438_p4 = scmp.eq.s32.totalorder %s11456_s19, 1 }
  0x12   : > { %s15371_s22 = scalar_select %p419_p1, %s15229_s29, %s421_s20  }
  0x13   : > { %p15373_p5 = por %p432_p2, %p431_p0  ;;  %p15377_p6 = por %p438_p4, %p437_p3 }
  0x14   : > { %19575 = sst [smem:[#allocation9_spill]] %s15371_s22  ;;  %p11459_p7 = scmp.ge.s32.totalorder %s15233_s30, 1 }
  0x15   : > { %s19577_s23 = scalar_select %p15377_p6, 1, 0 }
  0x16   : > { %p515_p8 = scmp.lt.s32.totalorder %s15233_s30, 3 }
  0x17   : > { %19578 = sst [smem:[#allocation10_spill]] %s19577_s23 }
  0x18   : > { %p516_p9 = pnand %p11459_p7, %p515_p8 }
  0x1a   : > { %519 = sbr.rel (%p516_p9) target bundleno = 4229 (0x1085), region = 92 }
  0x1f   : > { %p568_p10 = scmp.lt.s32.totalorder %s15356_s0, 1  ;;  %v19559_v0 = vmov 0.0   ;;  %vm15236_vm0 = vmmov 0   ;;  %v19561_v1 = vmov 0   ;;  %s19579_s20 = sld [smem:[#allocation40_spill]]  ;;  %vm715_vm1 = vcmask 785408  }
  0x20   : > { %13522 = vmatprep.subr.bf16.mxu1 %v19559_v0  ;;  %13534 = vmatprep.mubr.msk.bf16.mxu1 %vm15236_vm0, %v19559_v0  ;;  %s19580_s26 = sld [smem:[#allocation41_spill]]  ;;  %vm1771_vm2 = vcmask 261120   ;;  %vm4458_vm3 = vcmask 1046528   ;;  %vm4459_vm4 = vcmask 1047552   ;;  %vm4451_vm5 = vcmask 384000   ;;  %s566_s19 = sand.u32 1, %s15225_s28  }
  0x21   : > { %s569_s24 = scalar_select %p568_p10, %s15356_s0, 1  ;;  %757 = vmatprep.mubr.bf16.mxu0 %v19561_v1  ;;  %vm5774_vm6 = vcmask 916480   ;;  %vm7342_vm7 = vcmask 1042432   ;;  %vm7343_vm8 = vcmask 1043456   ;;  %vm7338_vm9 = vcmask 187392  }
  0x22   : > { %s19612_s3 = sld [smem:[#allocation43_spill]]  ;;  %vm9576_vm10 = vcmask 1044480   ;;  %vm9577_vm11 = vcmask 1045504   ;;  %vm9572_vm12 = vcmask 89088   ;;  %vm10467_vm13 = vcmask 1041408   ;;  %s567_s30 = scalar_lea.vmem [#allocation2], %s566_s19 }
  0x23   : > { %s13755_s25 = smul.u32 144, %s569_s24  ;;  %s19581_s24 = sld [smem:[#allocation42_spill]]  ;;  %vm10463_vm14 = vcmask 39936   ;;  %vm11002_vm15 = vcmask 1040384  }
  0x24   : > { %s19613_s4 = sld [smem:[#allocation44_spill]]  ;;  %s11401_s22 = sshll.u32 %s567_s30, 4  ;;  %s11402_s22 = int_to_ptr.vmem [resolvable:$true] %s11401_s22 }
  0x25   : > { %s15392_s21 = scalar_lea.vmem %s19579_s20, %s13755_s25  ;;  %s19645_s27 = sld [smem:[#allocation45_spill]] }
  0x26   : > { %v13799_v2 = vld [vmem:[%s15392_s21 + $0x7c] ss:$12 sps:$4 sm:$0xff]   ;;  %v13801_v3 = vld [vmem:[%s15392_s21 + $0x80] ss:$12 sps:$4 sm:$0xff]   ;;  %v13802_v4 = vld [vmem:[%s15392_s21 + $0x78] ss:$12 sps:$4 sm:$0xff]  }
  0x27   : > { %729 = vmatprep.subr.bf16.mxu0 %v13799_v2  ;;  %13523 = vmatpush3.bf16.msra.mxu1 %v13801_v3  ;;  %v13803_v5 = vld [vmem:[%s15392_s21 + $0x64] ss:$12 sps:$4 sm:$0xff]   ;;  %v13805_v6 = vld [vmem:[%s15392_s21 + $0x68] ss:$12 sps:$4 sm:$0xff]   ;;  %v13806_v7 = vld [vmem:[%s15392_s21 + $0x60] ss:$12 sps:$4 sm:$0xff]  }
  0x28   : > { %730 = vmatpush1.bf16.msra.mxu0 %v13802_v4  ;;  %13524 = vmatprep.subr.bf16.mxu1 %v19559_v0  ;;  %v13807_v8 = vld [vmem:[%s15392_s21 + $0x4c] ss:$12 sps:$4 sm:$0xff]   ;;  %v13809_v9 = vld [vmem:[%s15392_s21 + $0x50] ss:$12 sps:$4 sm:$0xff]   ;;  %v13810_v10 = vld [vmem:[%s15392_s21 + $0x48] ss:$12 sps:$4 sm:$0xff]  }
  0x29   : > { %731 = vmatprep.subr.bf16.mxu0 %v13803_v5  ;;  %v13811_v11 = vld [vmem:[%s15392_s21 + $0x34] ss:$12 sps:$4 sm:$0xff]   ;;  %v13813_v12 = vld [vmem:[%s15392_s21 + $0x38] ss:$12 sps:$4 sm:$0xff]   ;;  %v13814_v13 = vld [vmem:[%s15392_s21 + $0x30] ss:$12 sps:$4 sm:$0xff]  }
  0x2a   : > { %v13815_v14 = vld [vmem:[%s15392_s21 + $0x1c] ss:$12 sps:$4 sm:$0xff]   ;;  %v13817_v15 = vld [vmem:[%s15392_s21 + $0x20] ss:$12 sps:$4 sm:$0xff]   ;;  %v13818_v16 = vld [vmem:[%s15392_s21 + $0x18] ss:$12 sps:$4 sm:$0xff]  }
  0x2b   : > { %13525 = vmatpush3.bf16.msra.mxu1 %v13805_v6  ;;  %v13819_v17 = vld [vmem:[%s15392_s21 + $0x4] ss:$12 sps:$4 sm:$0xff]   ;;  %v13821_v18 = vld [vmem:[%s15392_s21 + $0x8] ss:$12 sps:$4 sm:$0xff]   ;;  %v13822_v19 = vld [vmem:[%s15392_s21] ss:$12 sps:$4 sm:$0xff]  }
  0x2c   : > { %732 = vmatpush1.bf16.msra.mxu0 %v13806_v7  ;;  %13526 = vmatprep.subr.bf16.mxu1 %v19559_v0  ;;  %v13823_v20 = vld [vmem:[%s19580_s26] sm:$0xff]   ;;  %v13824_v21 = vld [vmem:[%s19580_s26 + $0x8] sm:$0xff]   ;;  %v13825_v22 = vld [vmem:[%s19580_s26 + $0x10] sm:$0xff]   ;;  %s13246_s20 = sshll.u32 %s15356_s0, 4  ;;  %s19646_s29 = sld [smem:[#allocation46_spill]] }
  0x2d   : > { %733 = vmatprep.subr.bf16.mxu0 %v13807_v8  ;;  %v13831_v23 = vld [vmem:[%s19581_s24 + $0x4b4] ss:$24 sps:$4 sm:$0xff]   ;;  %v13826_v24 = vld [vmem:[%s19580_s26 + $0x18] sm:$0xff]   ;;  %v13829_v25 = vld [vmem:[%s19581_s24 + $0x4b0] ss:$24 sps:$4 sm:$0xff]   ;;  %s15239_s18 = smov [#allocation2]  }
  0x2e   : > { %v13834_v26 = vld [vmem:[%s19581_s24 + $0x484] ss:$24 sps:$4 sm:$0xff]   ;;  %v13832_v27 = vld [vmem:[%s19581_s24 + $0x480] ss:$24 sps:$4 sm:$0xff]   ;;  %v13837_v28 = vld [vmem:[%s19581_s24 + $0x454] ss:$24 sps:$4 sm:$0xff]  }
  0x2f   : > { %13527 = vmatpush3.bf16.msra.mxu1 %v13809_v9  ;;  %v13827_v29 = vld [vmem:[%s19580_s26 + $0x20] sm:$0xff]   ;;  %v13835_v30 = vld [vmem:[%s19581_s24 + $0x450] ss:$24 sps:$4 sm:$0xff]   ;;  %v13843_v33 = vld [vmem:[%s19581_s24 + $0x3f4] ss:$24 sps:$4 sm:$0xff]   ;;  %s15177_s23 = sshll.u32 %s15239_s18, 4  ;;  %s15178_s23 = int_to_ptr.vmem [resolvable:$false] %s15177_s23 }
  0x30   : > { %734 = vmatpush1.bf16.msra.mxu0 %v13810_v10  ;;  %13528 = vmatprep.subr.bf16.mxu1 %v19559_v0  ;;  %v13840_v31 = vld [vmem:[%s19581_s24 + $0x424] ss:$24 sps:$4 sm:$0xff]   ;;  %v13838_v32 = vld [vmem:[%s19581_s24 + $0x420] ss:$24 sps:$4 sm:$0xff]   ;;  %v13828_v34 = vld [vmem:[%s19580_s26 + $0x28] sm:$0xff]   ;;  %s15179_s0 = scalar_lea.vmem %s15178_s23, 32  ;;  %p15180_p0 = scmp.lt.s32.totalorder %s11402_s22, %s15178_s23 }
  0x31   : > { %735 = vmatprep.subr.bf16.mxu0 %v13811_v11  ;;  %v13841_v35 = vld [vmem:[%s19581_s24 + $0x3f0] ss:$24 sps:$4 sm:$0xff]   ;;  %v13846_v36 = vld [vmem:[%s19581_s24 + $0x3c4] ss:$24 sps:$4 sm:$0xff]   ;;  %v13844_v37 = vld [vmem:[%s19581_s24 + $0x3c0] ss:$24 sps:$4 sm:$0xff]  }
  0x32   : > { %v13849_v38 = vld [vmem:[%s19581_s24 + $0x394] ss:$24 sps:$4 sm:$0xff]   ;;  %v13847_v39 = vld [vmem:[%s19581_s24 + $0x390] ss:$24 sps:$4 sm:$0xff]   ;;  %v13852_v40 = vld [vmem:[%s19581_s24 + $0x364] ss:$24 sps:$4 sm:$0xff]   ;;  %s19647_s1 = smov %s19646_s29  ;;  %s11399_s17 = scalar_lea.hbm %s19646_s29, %s13246_s20 }
  0x33   : > { %13529 = vmatpush3.bf16.msra.mxu1 %v13813_v12  ;;  %v13850_v41 = vld [vmem:[%s19581_s24 + $0x360] ss:$24 sps:$4 sm:$0xff]   ;;  %v13855_v42 = vld [vmem:[%s19581_s24 + $0x634] ss:$24 sps:$4 sm:$0xff]   ;;  %v13853_v43 = vld [vmem:[%s19581_s24 + $0x630] ss:$24 sps:$4 sm:$0xff]  }
  0x34   : > { %736 = vmatpush1.bf16.msra.mxu0 %v13814_v13  ;;  %13530 = vmatprep.subr.bf16.mxu1 %v19559_v0  ;;  %v13858_v44 = vld [vmem:[%s19581_s24 + $0x604] ss:$24 sps:$4 sm:$0xff]   ;;  %v13856_v45 = vld [vmem:[%s19581_s24 + $0x600] ss:$24 sps:$4 sm:$0xff]   ;;  %v13861_v46 = vld [vmem:[%s19581_s24 + $0x5d4] ss:$24 sps:$4 sm:$0xff]  }
  0x35   : > { %737 = vmatprep.subr.bf16.mxu0 %v13815_v14  ;;  %v13859_v47 = vld [vmem:[%s19581_s24 + $0x5d0] ss:$24 sps:$4 sm:$0xff]   ;;  %v13864_v49 = vld [vmem:[%s19581_s24 + $0x694] ss:$24 sps:$4 sm:$0xff]   ;;  %v13867_v50 = vld [vmem:[%s19581_s24 + $0x5a4] ss:$24 sps:$4 sm:$0xff]  }
  0x36   : > { %v13862_v48 = vld [vmem:[%s19581_s24 + $0x690] ss:$24 sps:$4 sm:$0xff]   ;;  %v13865_v51 = vld [vmem:[%s19581_s24 + $0x5a0] ss:$24 sps:$4 sm:$0xff]   ;;  %v13870_v52 = vld [vmem:[%s19581_s24 + $0x574] ss:$24 sps:$4 sm:$0xff]  }
  0x37   : > { %13531 = vmatpush3.bf16.msra.mxu1 %v13817_v15  ;;  %v13868_v53 = vld [vmem:[%s19581_s24 + $0x570] ss:$24 sps:$4 sm:$0xff]   ;;  %v13873_v54 = vld [vmem:[%s19581_s24 + $0x544] ss:$24 sps:$4 sm:$0xff]   ;;  %v13871_v55 = vld [vmem:[%s19581_s24 + $0x540] ss:$24 sps:$4 sm:$0xff]  }
  0x38   : > { %738 = vmatpush1.bf16.msra.mxu0 %v13818_v16  ;;  %13532 = vmatprep.subr.bf16.mxu1 %v19559_v0  ;;  %v13874_v56 = vld [vmem:[%s19581_s24 + $0x660] ss:$24 sps:$4 sm:$0xff]   ;;  %v13876_v57 = vld [vmem:[%s19581_s24 + $0x664] ss:$24 sps:$4 sm:$0xff]   ;;  %v13879_v58 = vld [vmem:[%s19581_s24 + $0x514] ss:$24 sps:$4 sm:$0xff]  }
  0x39   : > { %739 = vmatprep.subr.bf16.mxu0 %v13819_v17  ;;  %v13877_v59 = vld [vmem:[%s19581_s24 + $0x510] ss:$24 sps:$4 sm:$0xff]   ;;  %v13882_v60 = vld [vmem:[%s19581_s24 + $0x4bc] ss:$24 sps:$4 sm:$0xff]   ;;  %v13883_v62 = vld [vmem:[%s19581_s24 + $0x4e0] ss:$24 sps:$4 sm:$0xff]  }
  0x3a   : > { %v13885_v61 = vld [vmem:[%s19581_s24 + $0x4e4] ss:$24 sps:$4 sm:$0xff]  }
  0x3b   : > { %13533 = vmatpush3.bf16.msra.mxu1 %v13821_v18  ;;  %v13903_v63 = vld [vmem:[%s19581_s24 + $0x69c] ss:$24 sps:$4 sm:$0xff]  }
  0x3c   : > { %740 = vmatpush1.bf16.msra.mxu0 %v13822_v19  ;;  %13546 = vmatprep.subr.bf16.mxu1 %v19559_v0 }
  0x3d   : > { %997 = vmatprep.subr.bf16.mxu0 %v13799_v2 }
  0x3e   : > { %13535 = vmatmul.mubr.msk.bf16.vlgmr.msra.gmra.mxu1 %vm715_vm1, %v13823_v20 }
  0x3f   : > { %11482 = vmatmul.mubr.msk.bf16.vlgmr.msra.gmra.mxu0 %vm715_vm1, %v13823_v20  ;;  %13547 = vmatpush3.bf16.msra.mxu1 %v13801_v3 }
  0x40   : > { %998 = vmatpush1.bf16.msra.mxu0 %v13802_v4  ;;  %13548 = vmatprep.subr.bf16.mxu1 %v19559_v0 }
  0x41   : > { %999 = vmatprep.subr.bf16.mxu0 %v13803_v5  ;;  %13538 = vmatprep.mubr.msk.bf16.mxu1 %vm15236_vm0, %v19559_v0 }
  0x42   : > { %767 = vmatprep.mubr.bf16.mxu0 %v19561_v1 }
  0x43   : > { %13549 = vmatpush3.bf16.msra.mxu1 %v13805_v6 }
  0x44   : > { %1000 = vmatpush1.bf16.msra.mxu0 %v13806_v7  ;;  %13550 = vmatprep.subr.bf16.mxu1 %v19559_v0 }
  0x45   : > { %1001 = vmatprep.subr.bf16.mxu0 %v13807_v8 }
  0x46   : > { %13539 = vmatmul.mubr.msk.bf16.gmra.mxu1 %vm715_vm1, %v13824_v21 }
  0x47   : > { %11483 = vmatmul.mubr.msk.bf16.gmra.mxu0 %vm715_vm1, %v13824_v21  ;;  %13551 = vmatpush3.bf16.msra.mxu1 %v13809_v9 }
  0x48   : > { %1002 = vmatpush1.bf16.msra.mxu0 %v13810_v10  ;;  %13552 = vmatprep.subr.bf16.mxu1 %v19559_v0 }
  0x49   : > { %1003 = vmatprep.subr.bf16.mxu0 %v13811_v11  ;;  %13542 = vmatprep.mubr.msk.bf16.mxu1 %vm15236_vm0, %v19559_v0 }
  0x4a   : > { %777 = vmatprep.mubr.bf16.mxu0 %v19561_v1 }
  0x4b   : > { %13553 = vmatpush3.bf16.msra.mxu1 %v13813_v12 }
  0x4c   : > { %1004 = vmatpush1.bf16.msra.mxu0 %v13814_v13  ;;  %13554 = vmatprep.subr.bf16.mxu1 %v19559_v0 }
  0x4d   : > { %1005 = vmatprep.subr.bf16.mxu0 %v13815_v14 }
  0x4e   : > { %13543 = vmatmul.mubr.msk.bf16.gmra.mxu1 %vm715_vm1, %v13825_v22 }
  0x4f   : > { %11484 = vmatmul.mubr.msk.bf16.gmra.mxu0 %vm715_vm1, %v13825_v22  ;;  %13555 = vmatpush3.bf16.msra.mxu1 %v13817_v15 }
  0x50   : > { %1006 = vmatpush1.bf16.msra.mxu0 %v13818_v16  ;;  %13556 = vmatprep.subr.bf16.mxu1 %v19559_v0 }
  0x51   : > { %1007 = vmatprep.subr.bf16.mxu0 %v13819_v17  ;;  %13558 = vmatprep.mubr.msk.bf16.mxu1 %vm15236_vm0, %v19559_v0 }
  0x52   : > { %1025 = vmatprep.mubr.bf16.mxu0 %v19561_v1 }
  0x53   : > { %13557 = vmatpush3.bf16.msra.mxu1 %v13821_v18 }
  0x54   : > { %1008 = vmatpush1.bf16.msra.mxu0 %v13822_v19  ;;  %1856 = vmatprep.subr.bf16.mxu1 %v13864_v49  ;;  %v13891_v49 = vld [vmem:[%s19581_s24 + $0x45c] ss:$24 sps:$4 sm:$0xff]  }
  0x55   : > { %1781 = vmatprep.subr.bf16.mxu0 %v13831_v23 }
  0x56   : > { %13559 = vmatmul.mubr.msk.bf16.vlgmr.msra.gmra.mxu1 %vm715_vm1, %v13826_v24 }
  0x57   : > { %11497 = vmatmul.mubr.msk.bf16.vlgmr.msra.gmra.mxu0 %vm715_vm1, %v13826_v24  ;;  %13562 = vmatprep.mubr.msk.bf16.mxu1 %vm15236_vm0, %v19559_v0 }
  0x58   : > { %1035 = vmatprep.mubr.bf16.mxu0 %v19561_v1  ;;  %1782 = vmatpush1.bf16.msra.mxu0 %v13829_v25 }
  0x59   : > { %1783 = vmatprep.subr.bf16.mxu0 %v13834_v26  ;;  %1857 = vmatpush1.bf16.msra.mxu1 %v13862_v48 }
  0x5a   : > { %1858 = vmatprep.subr.bf16.mxu1 %v13876_v57  ;;  %v13894_v57 = vld [vmem:[%s19581_s24 + $0x42c] ss:$24 sps:$4 sm:$0xff]  }
  0x5c   : > { %1784 = vmatpush1.bf16.msra.mxu0 %v13832_v27 }
  0x5d   : > { %1785 = vmatprep.subr.bf16.mxu0 %v13837_v28  ;;  %1859 = vmatpush1.bf16.msra.mxu1 %v13874_v56 }
  0x5e   : > { %13563 = vmatmul.mubr.msk.bf16.gmra.mxu1 %vm715_vm1, %v13827_v29  ;;  %1907 = vmatprep.subr.bf16.mxu1 %v13882_v60  ;;  %v13915_v60 = vld [vmem:[%s19581_s24 + $0x4c4] ss:$24 sps:$4 sm:$0xff]  }
  0x5f   : > { %11498 = vmatmul.mubr.msk.bf16.gmra.mxu0 %vm715_vm1, %v13827_v29  ;;  %13566 = vmatprep.mubr.msk.bf16.mxu1 %vm15236_vm0, %v19559_v0 }
  0x60   : > { %1045 = vmatprep.mubr.bf16.mxu0 %v19561_v1  ;;  %1786 = vmatpush1.bf16.msra.mxu0 %v13835_v30 }
  0x61   : > { %1787 = vmatprep.subr.bf16.mxu0 %v13840_v31 }
  0x64   : > { %1788 = vmatpush1.bf16.msra.mxu0 %v13838_v32 }
  0x65   : > { %1789 = vmatprep.subr.bf16.mxu0 %v13843_v33 }
  0x66   : > { %13567 = vmatmul.mubr.msk.bf16.gmra.mxu1 %vm715_vm1, %v13828_v34 }
  0x67   : > { %11499 = vmatmul.mubr.msk.bf16.gmra.mxu0 %vm715_vm1, %v13828_v34  ;;  %1876 = vmatprep.mubr.bf16.mxu1 %v19561_v1 }
  0x68   : > { %1790 = vmatpush1.bf16.msra.mxu0 %v13841_v35 }
  0x69   : > { %1791 = vmatprep.subr.bf16.mxu0 %v13846_v36 }
  0x6c   : > { %1792 = vmatpush1.bf16.msra.mxu0 %v13844_v37  ;;  %v13880_v37 = vld [vmem:[%s19581_s24 + $0x4b8] ss:$24 sps:$4 sm:$0xff]  }
  0x6d   : > { %1793 = vmatprep.subr.bf16.mxu0 %v13849_v38 }
  0x70   : > { %1794 = vmatpush1.bf16.msra.mxu0 %v13847_v39 }
  0x71   : > { %1795 = vmatprep.subr.bf16.mxu0 %v13852_v40  ;;  %v13888_v40 = vld [vmem:[%s19581_s24 + $0x48c] ss:$24 sps:$4 sm:$0xff]  }
  0x74   : > { %1796 = vmatpush1.bf16.msra.mxu0 %v13850_v41 }
  0x75   : > { %1797 = vmatprep.subr.bf16.mxu0 %v13855_v42 }
  0x78   : > { %1798 = vmatpush2.bf16.msra.mxu0 %v13853_v43 }
  0x79   : > { %1799 = vmatprep.subr.bf16.mxu0 %v13858_v44 }
  0x7c   : > { %1800 = vmatpush2.bf16.msra.mxu0 %v13856_v45  ;;  %v13886_v45 = vld [vmem:[%s19581_s24 + $0x488] ss:$24 sps:$4 sm:$0xff]  }
  0x7d   : > { %1801 = vmatprep.subr.bf16.mxu0 %v13861_v46 }
  0x80   : > { %1802 = vmatpush2.bf16.msra.mxu0 %v13859_v47  ;;  %v13901_v47 = vld [vmem:[%s19581_s24 + $0x698] ss:$24 sps:$4 sm:$0xff]  }
  0x81   : > { %1803 = vmatprep.subr.bf16.mxu0 %v13867_v50  ;;  %v13909_v50 = vld [vmem:[%s19581_s24 + $0x66c] ss:$24 sps:$4 sm:$0xff]  }
  0x84   : > { %1804 = vmatpush2.bf16.msra.mxu0 %v13865_v51  ;;  %v13889_v51 = vld [vmem:[%s19581_s24 + $0x458] ss:$24 sps:$4 sm:$0xff]  }
  0x85   : > { %1805 = vmatprep.subr.bf16.mxu0 %v13870_v52 }
  0x88   : > { %1806 = vmatpush2.bf16.msra.mxu0 %v13868_v53  ;;  %v13907_v53 = vld [vmem:[%s19581_s24 + $0x668] ss:$24 sps:$4 sm:$0xff]  }
  0x89   : > { %1807 = vmatprep.subr.bf16.mxu0 %v13873_v54 }
  0x8c   : > { %1808 = vmatpush2.bf16.msra.mxu0 %v13871_v55 }
  0x8d   : > { %1809 = vmatprep.subr.bf16.mxu0 %v13879_v58 }
  0x90   : > { %1810 = vmatpush2.bf16.msra.mxu0 %v13877_v59 }
  0x91   : > { %1811 = vmatprep.subr.bf16.mxu0 %v13885_v61 }
  0x94   : > { %1812 = vmatpush2.bf16.msra.mxu0 %v13883_v62 }
  0x95   : > { %1982 = vmatprep.subr.bf16.mxu0 %v13903_v63 }
  0xfe   : > { %v822_v2 = vpop.f32.mrf.mxu1 }
  0xff   : > { %v759_v3 = vpop.f32.mrf.mxu0 }
 0x100   : > { %v13536_v4 = vpop.f32.mrf.mxu1 }
 0x101   : > { %v15583_v5 = vpop.f32.mrf.mxu0 }
 0x102   : > { %v825_v6 = vpop.f32.mrf.mxu1 }
 0x103   : > { %v15585_v7 = vpack.c.bf16 %v825_v6, %v822_v2  ;;  %v763_v8 = vpop.f32.mrf.mxu0  ;;  %v13892_v2 = vld [vmem:[%s19581_s24 + $0x428] ss:$24 sps:$4 sm:$0xff]   ;;  %v13897_v6 = vld [vmem:[%s19581_s24 + $0x3fc] ss:$24 sps:$4 sm:$0xff]  }
 0x104   : > { %v15587_v9 = vpack.c.bf16 %v763_v8, %v759_v3  ;;  %v13537_v10 = vpop.f32.mrf.mxu1 }
 0x105   : > { %v15589_v11 = vpop.f32.mrf.mxu0 }
 0x106   : > { %v830_v12 = vpop.f32.mrf.mxu1 }
 0x107   : > { %v769_v13 = vpop.f32.mrf.mxu0 }
 0x108   : > { %v13540_v14 = vpop.f32.mrf.mxu1 }
 0x109   : > { %v15591_v15 = vpop.f32.mrf.mxu0 }
 0x10a   : > { %v833_v16 = vpop.f32.mrf.mxu1 }
 0x10b   : > { %v15593_v17 = vpack.c.bf16 %v833_v16, %v830_v12  ;;  %v773_v18 = vpop.f32.mrf.mxu0  ;;  %v13895_v12 = vld [vmem:[%s19581_s24 + $0x3f8] ss:$24 sps:$4 sm:$0xff]   ;;  %v13900_v16 = vld [vmem:[%s19581_s24 + $0x3cc] ss:$24 sps:$4 sm:$0xff]  }
 0x10c   : > { %v15595_v19 = vpack.c.bf16 %v773_v18, %v769_v13  ;;  %v13541_v20 = vpop.f32.mrf.mxu1 }
 0x10d   : > { %v15597_v21 = vpop.f32.mrf.mxu0 }
 0x10e   : > { %v838_v22 = vpop.f32.mrf.mxu1 }
 0x10f   : > { %v779_v23 = vpop.f32.mrf.mxu0 }
 0x110   : > { %v13544_v24 = vpop.f32.mrf.mxu1 }
 0x111   : > { %v15599_v25 = vpop.f32.mrf.mxu0 }
 0x112   : > { %v841_v26 = vpop.f32.mrf.mxu1 }
 0x113   : > { %v15601_v27 = vpack.c.bf16 %v841_v26, %v838_v22  ;;  %v783_v28 = vpop.f32.mrf.mxu0  ;;  %v13898_v26 = vld [vmem:[%s19581_s24 + $0x3c8] ss:$24 sps:$4 sm:$0xff]  }
 0x114   : > { %v15603_v29 = vpack.c.bf16 %v783_v28, %v779_v23  ;;  %v13545_v30 = vpop.f32.mrf.mxu1  ;;  %v13906_v28 = vld [vmem:[%s19581_s24 + $0x39c] ss:$24 sps:$4 sm:$0xff]  }
 0x115   : > { %v15605_v31 = vpop.f32.mrf.mxu0  ;;  %v13904_v30 = vld [vmem:[%s19581_s24 + $0x398] ss:$24 sps:$4 sm:$0xff]  }
 0x116   : > { %v1090_v32 = vpop.f32.mrf.mxu1 }
 0x117   : > { %v1027_v33 = vpop.f32.mrf.mxu0 }
 0x118   : > { %v13560_v34 = vpop.f32.mrf.mxu1 }
 0x119   : > { %v1029_v35 = vpop.f32.mrf.mxu0  ;;  %v13913_v34 = vld [vmem:[%s19581_s24 + $0x4c0] ss:$24 sps:$4 sm:$0xff]  }
 0x11a   : > { %v1093_v36 = vpop.f32.mrf.mxu1 }
 0x11b   : > { %v15610_v38 = vpack.c.bf16 %v1093_v36, %v1090_v32  ;;  %v1031_v39 = vpop.f32.mrf.mxu0  ;;  %v13912_v32 = vld [vmem:[%s19581_s24 + $0x36c] ss:$24 sps:$4 sm:$0xff]  }
 0x11c   : > { %v13561_v41 = vpop.f32.mrf.mxu1  ;;  %v15615_v42 = vpack.c.bf16 %v1031_v39, %v1027_v33  ;;  %v13910_v33 = vld [vmem:[%s19581_s24 + $0x368] ss:$24 sps:$4 sm:$0xff]   ;;  %v13921_v36 = vld [vmem:[%s19581_s24 + $0x494] ss:$24 sps:$4 sm:$0xff]  }
 0x11d   : > { %v1033_v43 = vpop.f32.mrf.mxu0  ;;  %11719 = vmatmul.mubr.msk.bf16.vlgmr.msra.gmra.mxu1 %vm1771_vm2, %v15610_v38  ;;  %v13919_v39 = vld [vmem:[%s19581_s24 + $0x490] ss:$24 sps:$4 sm:$0xff]   ;;  %v13927_v41 = vld [vmem:[%s19581_s24 + $0x464] ss:$24 sps:$4 sm:$0xff]  }
 0x11e   : > { %v15619_v44 = vpack.c.bf16 %v1033_v43, %v1029_v35  ;;  %1908 = vmatpush1.bf16.msra.mxu1 %v13880_v37  ;;  %v1098_v46 = vpop.f32.mrf.mxu1  ;;  %1886 = vmatprep.mubr.bf16.mxu1 %v19561_v1  ;;  %v13918_v35 = vld [vmem:[%s19581_s24 + $0x63c] ss:$24 sps:$4 sm:$0xff]   ;;  %v13916_v37 = vld [vmem:[%s19581_s24 + $0x638] ss:$24 sps:$4 sm:$0xff]   ;;  %v13922_v43 = vld [vmem:[%s19581_s24 + $0x608] ss:$24 sps:$4 sm:$0xff]  }
 0x11f   : > { %v1037_v48 = vpop.f32.mrf.mxu0  ;;  %1909 = vmatprep.subr.bf16.mxu1 %v13888_v40  ;;  %v13924_v40 = vld [vmem:[%s19581_s24 + $0x60c] ss:$24 sps:$4 sm:$0xff]  }
 0x120   : > { %1813 = vmatprep.mubr.bf16.mxu0 %v15619_v44  ;;  %v13564_v52 = vpop.f32.mrf.mxu1 }
 0x121   : > { %v1039_v54 = vpop.f32.mrf.mxu0  ;;  %1814 = vmatmul.mubr.bf16.vlgmr.msra.gmra.mxu0 %v15615_v42  ;;  %v13934_v52 = vld [vmem:[%s19581_s24 + $0x5a8] ss:$24 sps:$4 sm:$0xff]  }
 0x122   : > { %1910 = vmatpush1.bf16.msra.mxu1 %v13886_v45  ;;  %v1101_v55 = vpop.f32.mrf.mxu1  ;;  %1983 = vmatpush1.bf16.msra.mxu0 %v13901_v47  ;;  %v13925_v45 = vld [vmem:[%s19581_s24 + $0x460] ss:$24 sps:$4 sm:$0xff]   ;;  %v13933_v47 = vld [vmem:[%s19581_s24 + $0x434] ss:$24 sps:$4 sm:$0xff]  }
 0x123   : > { %v1041_v56 = vpop.f32.mrf.mxu0  ;;  %1911 = vmatprep.subr.bf16.mxu1 %v13891_v49  ;;  %v15645_v58 = vpack.c.bf16 %v1101_v55, %v1098_v46  ;;  %1984 = vmatprep.subr.bf16.mxu0 %v13909_v50  ;;  %v13930_v46 = vld [vmem:[%s19581_s24 + $0x5dc] ss:$24 sps:$4 sm:$0xff]   ;;  %v13931_v49 = vld [vmem:[%s19581_s24 + $0x430] ss:$24 sps:$4 sm:$0xff]   ;;  %v13936_v50 = vld [vmem:[%s19581_s24 + $0x5ac] ss:$24 sps:$4 sm:$0xff]  }
 0x124   : > { %v13565_v59 = vpop.f32.mrf.mxu1  ;;  %v15650_v61 = vpack.c.bf16 %v1041_v56, %v1037_v48  ;;  %v13928_v48 = vld [vmem:[%s19581_s24 + $0x5d8] ss:$24 sps:$4 sm:$0xff]   ;;  %v13945_v55 = vld [vmem:[%s19581_s24 + $0x3d4] ss:$24 sps:$4 sm:$0xff]  }
 0x125   : > { %v1043_v62 = vpop.f32.mrf.mxu0  ;;  %11720 = vmatmul.mubr.msk.bf16.gmra.mxu1 %vm1771_vm2, %v15645_v58  ;;  %v13940_v56 = vld [vmem:[%s19581_s24 + $0x578] ss:$24 sps:$4 sm:$0xff]   ;;  %v13948_v59 = vld [vmem:[%s19581_s24 + $0x54c] ss:$24 sps:$4 sm:$0xff]  }
 0x126   : > { %v15654_v63 = vpack.c.bf16 %v1043_v62, %v1039_v54  ;;  %1912 = vmatpush1.bf16.msra.mxu1 %v13889_v51  ;;  %v1106_v3 = vpop.f32.mrf.mxu1  ;;  %1985 = vmatpush1.bf16.msra.mxu0 %v13907_v53  ;;  %v13939_v51 = vld [vmem:[%s19581_s24 + $0x404] ss:$24 sps:$4 sm:$0xff]   ;;  %v13937_v53 = vld [vmem:[%s19581_s24 + $0x400] ss:$24 sps:$4 sm:$0xff]  }
 0x127   : > { %v1047_v4 = vpop.f32.mrf.mxu0  ;;  %1913 = vmatprep.subr.bf16.mxu1 %v13894_v57  ;;  %1896 = vmatprep.mubr.bf16.mxu1 %v19561_v1  ;;  %v13942_v54 = vld [vmem:[%s19581_s24 + $0x57c] ss:$24 sps:$4 sm:$0xff]   ;;  %v13943_v57 = vld [vmem:[%s19581_s24 + $0x3d0] ss:$24 sps:$4 sm:$0xff]  }
 0x128   : > { %1823 = vmatprep.mubr.bf16.mxu0 %v15654_v63  ;;  %v13568_v8 = vpop.f32.mrf.mxu1  ;;  %2033 = vmatprep.subr.bf16.mxu0 %v13915_v60  ;;  %v13951_v60 = vld [vmem:[%s19581_s24 + $0x3a4] ss:$24 sps:$4 sm:$0xff]   ;;  %v13946_v62 = vld [vmem:[%s19581_s24 + $0x548] ss:$24 sps:$4 sm:$0xff]  }
 0x129   : > { %v1049_v10 = vpop.f32.mrf.mxu0  ;;  %1824 = vmatmul.mubr.bf16.gmra.mxu0 %v15650_v61  ;;  %v13960_v8 = vld [vmem:[%s19581_s24 + $0x4ec] ss:$24 sps:$4 sm:$0xff]  }
 0x12a   : > { %1914 = vmatpush1.bf16.msra.mxu1 %v13892_v2  ;;  %v1109_v13 = vpop.f32.mrf.mxu1  ;;  %v13949_v2 = vld [vmem:[%s19581_s24 + $0x3a0] ss:$24 sps:$4 sm:$0xff]  }
 0x12b   : > { %v1051_v14 = vpop.f32.mrf.mxu0  ;;  %1915 = vmatprep.subr.bf16.mxu1 %v13897_v6  ;;  %v15671_v18 = vpack.c.bf16 %v1109_v13, %v1106_v3  ;;  %v13957_v3 = vld [vmem:[%s19581_s24 + $0x374] ss:$24 sps:$4 sm:$0xff]   ;;  %v13955_v6 = vld [vmem:[%s19581_s24 + $0x370] ss:$24 sps:$4 sm:$0xff]   ;;  %v13961_v13 = vld [vmem:[%s19581_s24 + $0x640] ss:$24 sps:$4 sm:$0xff]  }
 0x12c   : > { %v13569_v20 = vpop.f32.mrf.mxu1  ;;  %v15673_v22 = vpack.c.bf16 %v1051_v14, %v1047_v4  ;;  %v13952_v4 = vld [vmem:[%s19581_s24 + $0x518] ss:$24 sps:$4 sm:$0xff]   ;;  %v13966_v14 = vld [vmem:[%s19581_s24 + $0x614] ss:$24 sps:$4 sm:$0xff]  }
 0x12d   : > { %v1053_v23 = vpop.f32.mrf.mxu0  ;;  %11721 = vmatmul.mubr.msk.bf16.gmra.mxu1 %vm1771_vm2, %v15671_v18  ;;  %v13964_v20 = vld [vmem:[%s19581_s24 + $0x610] ss:$24 sps:$4 sm:$0xff]  }
 0x12e   : > { %v15677_v24 = vpack.c.bf16 %v1053_v23, %v1049_v10  ;;  %1916 = vmatpush1.bf16.msra.mxu1 %v13895_v12  ;;  %1939 = vmatprep.mubr.bf16.mxu1 %v15619_v44  ;;  %v13963_v10 = vld [vmem:[%s19581_s24 + $0x644] ss:$24 sps:$4 sm:$0xff]   ;;  %v13958_v12 = vld [vmem:[%s19581_s24 + $0x4e8] ss:$24 sps:$4 sm:$0xff]  }
 0x12f   : > { %1917 = vmatprep.subr.bf16.mxu1 %v13900_v16  ;;  %v13972_v16 = vld [vmem:[%s19581_s24 + $0x6a4] ss:$24 sps:$4 sm:$0xff]  }
 0x130   : > { %1833 = vmatprep.mubr.bf16.mxu0 %v15677_v24  ;;  %v13969_v23 = vld [vmem:[%s19581_s24 + $0x5e4] ss:$24 sps:$4 sm:$0xff]  }
 0x131   : > { %1834 = vmatmul.mubr.bf16.gmra.mxu0 %v15673_v22 }
 0x132   : > { %1918 = vmatpush1.bf16.msra.mxu1 %v13898_v26  ;;  %2002 = vmatprep.mubr.bf16.mxu0 %v19561_v1  ;;  %v13970_v26 = vld [vmem:[%s19581_s24 + $0x6a0] ss:$24 sps:$4 sm:$0xff]  }
 0x133   : > { %1919 = vmatprep.subr.bf16.mxu1 %v13906_v28  ;;  %v13984_v28 = vld [vmem:[%s19581_s24 + $0x674] ss:$24 sps:$4 sm:$0xff]  }
 0x136   : > { %1920 = vmatpush1.bf16.msra.mxu1 %v13904_v30  ;;  %v13967_v30 = vld [vmem:[%s19581_s24 + $0x5e0] ss:$24 sps:$4 sm:$0xff]  }
 0x137   : > { %1921 = vmatprep.subr.bf16.mxu1 %v13912_v32  ;;  %v13975_v32 = vld [vmem:[%s19581_s24 + $0x5b4] ss:$24 sps:$4 sm:$0xff]  }
 0x139   : > { %11722 = vmatmul.mubr.msk.bf16.vlgmr.msra.gmra.mxu0 %vm1771_vm2, %v15610_v38 }
 0x13a   : > { %1922 = vmatpush1.bf16.msra.mxu1 %v13910_v33  ;;  %2034 = vmatpush1.bf16.msra.mxu0 %v13913_v34  ;;  %v13982_v33 = vld [vmem:[%s19581_s24 + $0x670] ss:$24 sps:$4 sm:$0xff]   ;;  %v13990_v34 = vld [vmem:[%s19581_s24 + $0x154] ss:$24 sps:$4 sm:$0xff]  }
 0x13b   : > { %1923 = vmatprep.subr.bf16.mxu1 %v13918_v35  ;;  %2035 = vmatprep.subr.bf16.mxu0 %v13921_v36  ;;  %v13973_v35 = vld [vmem:[%s19581_s24 + $0x5b0] ss:$24 sps:$4 sm:$0xff]   ;;  %v13978_v36 = vld [vmem:[%s19581_s24 + $0x584] ss:$24 sps:$4 sm:$0xff]  }
 0x13c   : > { %2012 = vmatprep.mubr.bf16.mxu0 %v19561_v1 }
 0x13e   : > { %1924 = vmatpush2.bf16.msra.mxu1 %v13916_v37  ;;  %2036 = vmatpush1.bf16.msra.mxu0 %v13919_v39  ;;  %v13976_v37 = vld [vmem:[%s19581_s24 + $0x580] ss:$24 sps:$4 sm:$0xff]   ;;  %v13981_v39 = vld [vmem:[%s19581_s24 + $0x554] ss:$24 sps:$4 sm:$0xff]  }
 0x13f   : > { %1925 = vmatprep.subr.bf16.mxu1 %v13924_v40  ;;  %2037 = vmatprep.subr.bf16.mxu0 %v13927_v41  ;;  %v13979_v40 = vld [vmem:[%s19581_s24 + $0x550] ss:$24 sps:$4 sm:$0xff]   ;;  %v13987_v41 = vld [vmem:[%s19581_s24 + $0x524] ss:$24 sps:$4 sm:$0xff]  }
 0x141   : > { %11723 = vmatmul.mubr.msk.bf16.gmra.mxu0 %vm1771_vm2, %v15645_v58 }
 0x142   : > { %1926 = vmatpush2.bf16.msra.mxu1 %v13922_v43  ;;  %2038 = vmatpush1.bf16.msra.mxu0 %v13925_v45  ;;  %v13985_v43 = vld [vmem:[%s19581_s24 + $0x520] ss:$24 sps:$4 sm:$0xff]   ;;  %v13993_v45 = vld [vmem:[%s19581_s24 + $0x4f4] ss:$24 sps:$4 sm:$0xff]  }
 0x143   : > { %1927 = vmatprep.subr.bf16.mxu1 %v13930_v46  ;;  %2039 = vmatprep.subr.bf16.mxu0 %v13933_v47  ;;  %v13988_v46 = vld [vmem:[%s19581_s24 + $0x150] ss:$24 sps:$4 sm:$0xff]  }
 0x144   : > { %2022 = vmatprep.mubr.bf16.mxu0 %v19561_v1  ;;  %v13991_v47 = vld [vmem:[%s19581_s24 + $0x4f0] ss:$24 sps:$4 sm:$0xff]  }
 0x146   : > { %1928 = vmatpush2.bf16.msra.mxu1 %v13928_v48  ;;  %2040 = vmatpush1.bf16.msra.mxu0 %v13931_v49  ;;  %v13996_v48 = vld [vmem:[%s19581_s24 + $0x124] ss:$24 sps:$4 sm:$0xff]   ;;  %v14011_v49 = vld [vmem:[%s19581_s24 + $0x334] ss:$24 sps:$4 sm:$0xff]  }
 0x147   : > { %1929 = vmatprep.subr.bf16.mxu1 %v13936_v50  ;;  %2041 = vmatprep.subr.bf16.mxu0 %v13939_v51  ;;  %v13994_v50 = vld [vmem:[%s19581_s24 + $0x120] ss:$24 sps:$4 sm:$0xff]   ;;  %v13999_v51 = vld [vmem:[%s19581_s24 + $0xf4] ss:$24 sps:$4 sm:$0xff]  }
 0x149   : > { %11724 = vmatmul.mubr.msk.bf16.gmra.mxu0 %vm1771_vm2, %v15671_v18 }
 0x14a   : > { %1930 = vmatpush2.bf16.msra.mxu1 %v13934_v52  ;;  %2042 = vmatpush1.bf16.msra.mxu0 %v13937_v53  ;;  %v14009_v52 = vld [vmem:[%s19581_s24 + $0x330] ss:$24 sps:$4 sm:$0xff]   ;;  %v14017_v53 = vld [vmem:[%s19581_s24 + $0x304] ss:$24 sps:$4 sm:$0xff]  }
 0x14b   : > { %2065 = vmatprep.mubr.bf16.mxu0 %v15619_v44  ;;  %1931 = vmatprep.subr.bf16.mxu1 %v13942_v54  ;;  %v13954_v44 = vld [vmem:[%s19581_s24 + $0x51c] ss:$24 sps:$4 sm:$0xff]  }
 0x14c   : > { %2043 = vmatprep.subr.bf16.mxu0 %v13945_v55  ;;  %v14002_v54 = vld [vmem:[%s19581_s24 + $0xc4] ss:$24 sps:$4 sm:$0xff]   ;;  %v14015_v55 = vld [vmem:[%s19581_s24 + $0x300] ss:$24 sps:$4 sm:$0xff]  }
 0x14e   : > { %1932 = vmatpush2.bf16.msra.mxu1 %v13940_v56  ;;  %2044 = vmatpush1.bf16.msra.mxu0 %v13943_v57  ;;  %v14023_v56 = vld [vmem:[%s19581_s24 + $0x15c] ss:$24 sps:$4 sm:$0xff]  }
 0x14f   : > { %1933 = vmatprep.subr.bf16.mxu1 %v13948_v59  ;;  %2045 = vmatprep.subr.bf16.mxu0 %v13951_v60  ;;  %v14008_v57 = vld [vmem:[%s19581_s24 + $0x64] ss:$24 sps:$4 sm:$0xff]   ;;  %v15926_v59 = vpack.c.bf16 %v15589_v11, %v15583_v5  ;;  %v14012_v5 = vld [vmem:[%s19581_s24 + $0x30] ss:$24 sps:$4 sm:$0xff]  }
 0x150   : > { %v14020_v11 = vld [vmem:[%s19581_s24 + $0x4] ss:$24 sps:$4 sm:$0xff]   ;;  %v14021_v60 = vld [vmem:[%s19581_s24 + $0x158] ss:$24 sps:$4 sm:$0xff]  }
 0x152   : > { %1934 = vmatpush2.bf16.msra.mxu1 %v13946_v62  ;;  %2046 = vmatpush1.bf16.msra.mxu0 %v13949_v2  ;;  %v14029_v62 = vld [vmem:[%s19581_s24 + $0x12c] ss:$24 sps:$4 sm:$0xff]   ;;  %v14024_v2 = vld [vmem:[%s19581_s24 + $0x2d0] ss:$24 sps:$4 sm:$0xff]  }
 0x153   : > { %1935 = vmatprep.subr.bf16.mxu1 %v13954_v44  ;;  %2047 = vmatprep.subr.bf16.mxu0 %v13957_v3  ;;  %v14027_v44 = vld [vmem:[%s19581_s24 + $0x128] ss:$24 sps:$4 sm:$0xff]   ;;  %v14032_v3 = vld [vmem:[%s19581_s24 + $0x2a4] ss:$24 sps:$4 sm:$0xff]  }
 0x156   : > { %1936 = vmatpush2.bf16.msra.mxu1 %v13952_v4  ;;  %2048 = vmatpush1.bf16.msra.mxu0 %v13955_v6  ;;  %v14035_v4 = vld [vmem:[%s19581_s24 + $0xfc] ss:$24 sps:$4 sm:$0xff]   ;;  %v14030_v6 = vld [vmem:[%s19581_s24 + $0x2a0] ss:$24 sps:$4 sm:$0xff]  }
 0x157   : > { %1937 = vmatprep.subr.bf16.mxu1 %v13960_v8  ;;  %2049 = vmatprep.subr.bf16.mxu0 %v13963_v10  ;;  %v14033_v8 = vld [vmem:[%s19581_s24 + $0xf8] ss:$24 sps:$4 sm:$0xff]   ;;  %v14038_v10 = vld [vmem:[%s19581_s24 + $0x274] ss:$24 sps:$4 sm:$0xff]  }
 0x15a   : > { %1938 = vmatpush2.bf16.msra.mxu1 %v13958_v12  ;;  %2050 = vmatpush2.bf16.msra.mxu0 %v13961_v13  ;;  %v14041_v12 = vld [vmem:[%s19581_s24 + $0xcc] ss:$24 sps:$4 sm:$0xff]   ;;  %v14036_v13 = vld [vmem:[%s19581_s24 + $0x270] ss:$24 sps:$4 sm:$0xff]  }
 0x15b   : > { %2051 = vmatprep.subr.bf16.mxu0 %v13966_v14  ;;  %2108 = vmatprep.subr.bf16.mxu1 %v13972_v16  ;;  %v14039_v14 = vld [vmem:[%s19581_s24 + $0xc8] ss:$24 sps:$4 sm:$0xff]   ;;  %v14044_v16 = vld [vmem:[%s19581_s24 + $0x244] ss:$24 sps:$4 sm:$0xff]  }
 0x15d   : > { %1940 = vmatmul.mubr.bf16.vlgmr.msra.gmra.mxu1 %v15615_v42 }
 0x15e   : > { %1949 = vmatprep.mubr.bf16.mxu1 %v15654_v63  ;;  %2052 = vmatpush2.bf16.msra.mxu0 %v13964_v20  ;;  %v14047_v20 = vld [vmem:[%s19581_s24 + $0x9c] ss:$24 sps:$4 sm:$0xff]  }
 0x15f   : > { %2053 = vmatprep.subr.bf16.mxu0 %v13969_v23  ;;  %2109 = vmatpush1.bf16.msra.mxu1 %v13970_v26  ;;  %v14042_v23 = vld [vmem:[%s19581_s24 + $0x240] ss:$24 sps:$4 sm:$0xff]  }
 0x160   : > { %2110 = vmatprep.subr.bf16.mxu1 %v13984_v28  ;;  %v14045_v26 = vld [vmem:[%s19581_s24 + $0x98] ss:$24 sps:$4 sm:$0xff]   ;;  %v14050_v28 = vld [vmem:[%s19581_s24 + $0x214] ss:$24 sps:$4 sm:$0xff]  }
 0x162   : > { %2054 = vmatpush2.bf16.msra.mxu0 %v13967_v30  ;;  %v14053_v30 = vld [vmem:[%s19581_s24 + $0x6c] ss:$24 sps:$4 sm:$0xff]  }
 0x163   : > { %2055 = vmatprep.subr.bf16.mxu0 %v13975_v32  ;;  %2111 = vmatpush1.bf16.msra.mxu1 %v13982_v33  ;;  %v14048_v32 = vld [vmem:[%s19581_s24 + $0x210] ss:$24 sps:$4 sm:$0xff]  }
 0x164   : > { %2708 = vmatprep.subr.bf16.mxu1 %v13990_v34  ;;  %v14051_v33 = vld [vmem:[%s19581_s24 + $0x68] ss:$24 sps:$4 sm:$0xff]   ;;  %v14056_v34 = vld [vmem:[%s19581_s24 + $0x1e4] ss:$24 sps:$4 sm:$0xff]  }
 0x165   : > { %1950 = vmatmul.mubr.bf16.gmra.mxu1 %v15650_v61 }
 0x166   : > { %1959 = vmatprep.mubr.bf16.mxu1 %v15677_v24  ;;  %2056 = vmatpush2.bf16.msra.mxu0 %v13973_v35  ;;  %v14059_v35 = vld [vmem:[%s19581_s24 + $0x3c] ss:$24 sps:$4 sm:$0xff]  }
 0x167   : > { %2057 = vmatprep.subr.bf16.mxu0 %v13978_v36  ;;  %v14054_v36 = vld [vmem:[%s19581_s24 + $0x1e0] ss:$24 sps:$4 sm:$0xff]  }
 0x16a   : > { %2058 = vmatpush2.bf16.msra.mxu0 %v13976_v37  ;;  %v14057_v37 = vld [vmem:[%s19581_s24 + $0x38] ss:$24 sps:$4 sm:$0xff]  }
 0x16b   : > { %2059 = vmatprep.subr.bf16.mxu0 %v13981_v39  ;;  %v14062_v39 = vld [vmem:[%s19581_s24 + $0x1b4] ss:$24 sps:$4 sm:$0xff]  }
 0x16d   : > { %1960 = vmatmul.mubr.bf16.gmra.mxu1 %v15673_v22 }
 0x16e   : > { %2060 = vmatpush2.bf16.msra.mxu0 %v13979_v40  ;;  %2128 = vmatprep.mubr.bf16.mxu1 %v19561_v1  ;;  %v14065_v40 = vld [vmem:[%s19581_s24 + $0xc] ss:$24 sps:$4 sm:$0xff]  }
 0x16f   : > { %2061 = vmatprep.subr.bf16.mxu0 %v13987_v41  ;;  %v14060_v41 = vld [vmem:[%s19581_s24 + $0x1b0] ss:$24 sps:$4 sm:$0xff]  }
 0x172   : > { %2062 = vmatpush2.bf16.msra.mxu0 %v13985_v43  ;;  %v14063_v43 = vld [vmem:[%s19581_s24 + $0x8] ss:$24 sps:$4 sm:$0xff]  }
 0x173   : > { %2063 = vmatprep.subr.bf16.mxu0 %v13993_v45  ;;  %v14068_v45 = vld [vmem:[%s19581_s24 + $0x184] ss:$24 sps:$4 sm:$0xff]  }
 0x175   : > { %11725 = vmatmul.mubr.msk.bf16.vlgmr.msra.gmra.mxu1 %vm1771_vm2, %v15610_v38  ;;  %v13997_v38 = vld [vmem:[%s19581_s24 + $0xf0] ss:$24 sps:$4 sm:$0xff]  }
 0x176   : > { %2709 = vmatpush1.bf16.msra.mxu1 %v13988_v46  ;;  %2064 = vmatpush2.bf16.msra.mxu0 %v13991_v47  ;;  %v14071_v46 = vld [vmem:[%s19581_s24 + $0x2dc] ss:$24 sps:$4 sm:$0xff]   ;;  %v14066_v47 = vld [vmem:[%s19581_s24 + $0x180] ss:$24 sps:$4 sm:$0xff]  }
 0x177   : > { %2710 = vmatprep.subr.bf16.mxu1 %v13996_v48  ;;  %2138 = vmatprep.mubr.bf16.mxu1 %v19561_v1  ;;  %v14069_v48 = vld [vmem:[%s19581_s24 + $0x2d8] ss:$24 sps:$4 sm:$0xff]  }
 0x178   : > { %2783 = vmatprep.subr.bf16.mxu0 %v14011_v49  ;;  %v14074_v49 = vld [vmem:[%s19581_s24 + $0x2ac] ss:$24 sps:$4 sm:$0xff]  }
 0x179   : > { %2066 = vmatmul.mubr.bf16.vlgmr.msra.gmra.mxu0 %v15615_v42  ;;  %v14000_v42 = vld [vmem:[%s19581_s24 + $0xc0] ss:$24 sps:$4 sm:$0xff]  }
 0x17a   : > { %2711 = vmatpush1.bf16.msra.mxu1 %v13994_v50  ;;  %2075 = vmatprep.mubr.bf16.mxu0 %v15654_v63  ;;  %v14005_v63 = vld [vmem:[%s19581_s24 + $0x94] ss:$24 sps:$4 sm:$0xff]  }
 0x17b   : > { %2712 = vmatprep.subr.bf16.mxu1 %v13999_v51  ;;  %2784 = vmatpush1.bf16.msra.mxu0 %v14009_v52  ;;  %v14080_v50 = vld [vmem:[%s19581_s24 + $0x33c] ss:$24 sps:$4 sm:$0xff]   ;;  %v14072_v51 = vld [vmem:[%s19581_s24 + $0x2a8] ss:$24 sps:$4 sm:$0xff]  }
 0x17c   : > { %2785 = vmatprep.subr.bf16.mxu0 %v14017_v53  ;;  %v14077_v52 = vld [vmem:[%s19581_s24 + $0x27c] ss:$24 sps:$4 sm:$0xff]   ;;  %v14078_v53 = vld [vmem:[%s19581_s24 + $0x338] ss:$24 sps:$4 sm:$0xff]  }
 0x17d   : > { %11726 = vmatmul.mubr.msk.bf16.gmra.mxu1 %vm1771_vm2, %v15645_v58  ;;  %v14003_v58 = vld [vmem:[%s19581_s24 + $0x90] ss:$24 sps:$4 sm:$0xff]  }
 0x17e   : > { %2713 = vmatpush1.bf16.msra.mxu1 %v13997_v38  ;;  %2148 = vmatprep.mubr.bf16.mxu1 %v19561_v1  ;;  %v14092_v38 = vld [vmem:[%s19581_s24 + $0x30c] ss:$24 sps:$4 sm:$0xff]  }
 0x17f   : > { %2714 = vmatprep.subr.bf16.mxu1 %v14002_v54  ;;  %2786 = vmatpush1.bf16.msra.mxu0 %v14015_v55  ;;  %v16076_v54 = vpack.c.bf16 %v15597_v21, %v15591_v15  ;;  %v14075_v55 = vld [vmem:[%s19581_s24 + $0x278] ss:$24 sps:$4 sm:$0xff]   ;;  %v14098_v15 = vld [vmem:[%s19581_s24 + $0x164] ss:$24 sps:$4 sm:$0xff]   ;;  %v14081_v21 = vld [vmem:[%s19581_s24 + $0x248] ss:$24 sps:$4 sm:$0xff]  }
 0x180   : > { %2834 = vmatprep.subr.bf16.mxu0 %v14023_v56  ;;  %v14083_v56 = vld [vmem:[%s19581_s24 + $0x24c] ss:$24 sps:$4 sm:$0xff]  }
 0x181   : > { %2076 = vmatmul.mubr.bf16.gmra.mxu0 %v15650_v61  ;;  %v14006_v61 = vld [vmem:[%s19581_s24 + $0x60] ss:$24 sps:$4 sm:$0xff]  }
 0x182   : > { %2715 = vmatpush1.bf16.msra.mxu1 %v14000_v42  ;;  %2085 = vmatprep.mubr.bf16.mxu0 %v15677_v24  ;;  %v14014_v24 = vld [vmem:[%s19581_s24 + $0x34] ss:$24 sps:$4 sm:$0xff]   ;;  %v14090_v42 = vld [vmem:[%s19581_s24 + $0x308] ss:$24 sps:$4 sm:$0xff]  }
 0x183   : > { %2716 = vmatprep.subr.bf16.mxu1 %v14005_v63  ;;  %v14086_v63 = vld [vmem:[%s19581_s24 + $0x21c] ss:$24 sps:$4 sm:$0xff]  }
 0x185   : > { %11727 = vmatmul.mubr.msk.bf16.gmra.mxu1 %vm1771_vm2, %v15671_v18  ;;  %v14018_v18 = vld [vmem:[%s19581_s24] ss:$24 sps:$4 sm:$0xff]  }
 0x186   : > { %2717 = vmatpush1.bf16.msra.mxu1 %v14003_v58  ;;  %2740 = vmatprep.mubr.bf16.mxu1 %v15926_v59  ;;  %v16100_v58 = vpack.c.bf16 %v15605_v31, %v15599_v25  ;;  %v14087_v25 = vld [vmem:[%s19581_s24 + $0x1e8] ss:$24 sps:$4 sm:$0xff]   ;;  %v14095_v31 = vld [vmem:[%s19581_s24 + $0x1bc] ss:$24 sps:$4 sm:$0xff]  }
 0x187   : > { %2718 = vmatprep.subr.bf16.mxu1 %v14008_v57  ;;  %v14084_v57 = vld [vmem:[%s19581_s24 + $0x218] ss:$24 sps:$4 sm:$0xff]  }
 0x189   : > { %2086 = vmatmul.mubr.bf16.gmra.mxu0 %v15673_v22  ;;  %v14026_v22 = vld [vmem:[%s19581_s24 + $0x2d4] ss:$24 sps:$4 sm:$0xff]  }
 0x18a   : > { %2719 = vmatpush1.bf16.msra.mxu1 %v14006_v61  ;;  %2803 = vmatprep.mubr.bf16.mxu0 %v19561_v1  ;;  %v14089_v61 = vld [vmem:[%s19581_s24 + $0x1ec] ss:$24 sps:$4 sm:$0xff]  }
 0x18b   : > { %2720 = vmatprep.subr.bf16.mxu1 %v14014_v24  ;;  %v14093_v24 = vld [vmem:[%s19581_s24 + $0x1b8] ss:$24 sps:$4 sm:$0xff]  }
 0x18e   : > { %2721 = vmatpush1.bf16.msra.mxu1 %v14012_v5  ;;  %v14101_v5 = vld [vmem:[%s19581_s24 + $0x18c] ss:$24 sps:$4 sm:$0xff]  }
 0x18f   : > { %2722 = vmatprep.subr.bf16.mxu1 %v14020_v11  ;;  %v14096_v11 = vld [vmem:[%s19581_s24 + $0x160] ss:$24 sps:$4 sm:$0xff]  }
 0x191   : > { %11836 = vmatmul.mubr.msk.bf16.vlgmr.msra.gmra.mxu0 %vm1771_vm2, %v15585_v7 }
 0x192   : > { %2723 = vmatpush1.bf16.msra.mxu1 %v14018_v18  ;;  %2835 = vmatpush1.bf16.msra.mxu0 %v14021_v60  ;;  %v14099_v18 = vld [vmem:[%s19581_s24 + $0x188] ss:$24 sps:$4 sm:$0xff]   ;;  %v14104_v60 = vld [vmem:[%s19581_s24 + $0x134] ss:$24 sps:$4 sm:$0xff]  }
 0x193   : > { %2724 = vmatprep.subr.bf16.mxu1 %v14026_v22  ;;  %2836 = vmatprep.subr.bf16.mxu0 %v14029_v62  ;;  %v14119_v22 = vld [vmem:[%s19581_s24 + $0x344] ss:$24 sps:$4 sm:$0xff]   ;;  %v14102_v62 = vld [vmem:[%s19581_s24 + $0x130] ss:$24 sps:$4 sm:$0xff]  }
 0x194   : > { %2813 = vmatprep.mubr.bf16.mxu0 %v19561_v1 }
 0x196   : > { %2725 = vmatpush2.bf16.msra.mxu1 %v14024_v2  ;;  %2837 = vmatpush1.bf16.msra.mxu0 %v14027_v44  ;;  %v14107_v2 = vld [vmem:[%s19581_s24 + $0x104] ss:$24 sps:$4 sm:$0xff]   ;;  %v14117_v44 = vld [vmem:[%s19581_s24 + $0x340] ss:$24 sps:$4 sm:$0xff]  }
 0x197   : > { %2726 = vmatprep.subr.bf16.mxu1 %v14032_v3  ;;  %2838 = vmatprep.subr.bf16.mxu0 %v14035_v4  ;;  %v14125_v3 = vld [vmem:[%s19581_s24 + $0x314] ss:$24 sps:$4 sm:$0xff]   ;;  %v14105_v4 = vld [vmem:[%s19581_s24 + $0x100] ss:$24 sps:$4 sm:$0xff]  }
 0x199   : > { %11837 = vmatmul.mubr.msk.bf16.gmra.mxu0 %vm1771_vm2, %v15593_v17 }
 0x19a   : > { %2727 = vmatpush2.bf16.msra.mxu1 %v14030_v6  ;;  %2839 = vmatpush1.bf16.msra.mxu0 %v14033_v8  ;;  %v14110_v6 = vld [vmem:[%s19581_s24 + $0xd4] ss:$24 sps:$4 sm:$0xff]   ;;  %v14123_v8 = vld [vmem:[%s19581_s24 + $0x310] ss:$24 sps:$4 sm:$0xff]  }
 0x19b   : > { %2728 = vmatprep.subr.bf16.mxu1 %v14038_v10  ;;  %2840 = vmatprep.subr.bf16.mxu0 %v14041_v12  ;;  %v14108_v10 = vld [vmem:[%s19581_s24 + $0xd0] ss:$24 sps:$4 sm:$0xff]   ;;  %v14113_v12 = vld [vmem:[%s19581_s24 + $0xa4] ss:$24 sps:$4 sm:$0xff]  }
 0x19c   : > { %2823 = vmatprep.mubr.bf16.mxu0 %v19561_v1 }
 0x19e   : > { %2729 = vmatpush2.bf16.msra.mxu1 %v14036_v13  ;;  %2841 = vmatpush1.bf16.msra.mxu0 %v14039_v14  ;;  %v14111_v13 = vld [vmem:[%s19581_s24 + $0xa0] ss:$24 sps:$4 sm:$0xff]   ;;  %v15155_v14 = vld [vmem:[%s15392_s21 + $0x7c] ss:$12 sps:$4 sm:$0xff]  }
 0x19f   : > { %2730 = vmatprep.subr.bf16.mxu1 %v14044_v16  ;;  %2842 = vmatprep.subr.bf16.mxu0 %v14047_v20  ;;  %v14116_v16 = vld [vmem:[%s19581_s24 + $0x74] ss:$24 sps:$4 sm:$0xff]   ;;  %v14114_v20 = vld [vmem:[%s19581_s24 + $0x70] ss:$24 sps:$4 sm:$0xff]  }
 0x1a1   : > { %11838 = vmatmul.mubr.msk.bf16.gmra.mxu0 %vm1771_vm2, %v15601_v27 }
 0x1a2   : > { %2731 = vmatpush2.bf16.msra.mxu1 %v14042_v23  ;;  %2843 = vmatpush1.bf16.msra.mxu0 %v14045_v26  ;;  %v14122_v26 = vld [vmem:[%s19581_s24 + $0x44] ss:$24 sps:$4 sm:$0xff]  }
 0x1a3   : > { %2866 = vmatprep.mubr.bf16.mxu0 %v15926_v59  ;;  %2732 = vmatprep.subr.bf16.mxu1 %v14050_v28 }
 0x1a4   : > { %2844 = vmatprep.subr.bf16.mxu0 %v14053_v30  ;;  %v14120_v30 = vld [vmem:[%s19581_s24 + $0x40] ss:$24 sps:$4 sm:$0xff]  }
 0x1a6   : > { %2733 = vmatpush2.bf16.msra.mxu1 %v14048_v32  ;;  %2845 = vmatpush1.bf16.msra.mxu0 %v14051_v33 }
 0x1a7   : > { %2734 = vmatprep.subr.bf16.mxu1 %v14056_v34  ;;  %2846 = vmatprep.subr.bf16.mxu0 %v14059_v35  ;;  %v14128_v34 = vld [vmem:[%s19581_s24 + $0x14] ss:$24 sps:$4 sm:$0xff]  }
 0x1aa   : > { %2735 = vmatpush2.bf16.msra.mxu1 %v14054_v36  ;;  %2847 = vmatpush1.bf16.msra.mxu0 %v14057_v37 }
 0x1ab   : > { %2736 = vmatprep.subr.bf16.mxu1 %v14062_v39  ;;  %2848 = vmatprep.subr.bf16.mxu0 %v14065_v40  ;;  %v14126_v39 = vld [vmem:[%s19581_s24 + $0x10] ss:$24 sps:$4 sm:$0xff]  }
 0x1ae   : > { %2737 = vmatpush2.bf16.msra.mxu1 %v14060_v41  ;;  %2849 = vmatpush1.bf16.msra.mxu0 %v14063_v43  ;;  %v14131_v41 = vld [vmem:[%s19581_s24 + $0x2e4] ss:$24 sps:$4 sm:$0xff]  }
 0x1af   : > { %2738 = vmatprep.subr.bf16.mxu1 %v14068_v45  ;;  %2850 = vmatprep.subr.bf16.mxu0 %v14071_v46 }
 0x1b2   : > { %2739 = vmatpush2.bf16.msra.mxu1 %v14066_v47  ;;  %2851 = vmatpush2.bf16.msra.mxu0 %v14069_v48  ;;  %v14129_v48 = vld [vmem:[%s19581_s24 + $0x2e0] ss:$24 sps:$4 sm:$0xff]  }
 0x1b3   : > { %2852 = vmatprep.subr.bf16.mxu0 %v14074_v49  ;;  %2909 = vmatprep.subr.bf16.mxu1 %v14080_v50  ;;  %v14134_v50 = vld [vmem:[%s19581_s24 + $0x2b4] ss:$24 sps:$4 sm:$0xff]  }
 0x1b5   : > { %2741 = vmatmul.mubr.bf16.vlgmr.msra.gmra.mxu1 %v15587_v9 }
 0x1b6   : > { %2750 = vmatprep.mubr.bf16.mxu1 %v16076_v54  ;;  %2853 = vmatpush2.bf16.msra.mxu0 %v14072_v51 }
 0x1b7   : > { %2854 = vmatprep.subr.bf16.mxu0 %v14077_v52  ;;  %2910 = vmatpush1.bf16.msra.mxu1 %v14078_v53 }
 0x1b8   : > { %2911 = vmatprep.subr.bf16.mxu1 %v14092_v38  ;;  %v15156_v38 = vld [vmem:[%s15392_s21 + $0x78] ss:$12 sps:$4 sm:$0xff]  }
 0x1ba   : > { %2855 = vmatpush2.bf16.msra.mxu0 %v14075_v55 }
 0x1bb   : > { %2856 = vmatprep.subr.bf16.mxu0 %v14083_v56  ;;  %2912 = vmatpush1.bf16.msra.mxu1 %v14090_v42  ;;  %v15157_v56 = vld [vmem:[%s15392_s21 + $0x64] ss:$12 sps:$4 sm:$0xff]  }
 0x1bc   : > { %2960 = vmatprep.subr.bf16.mxu1 %v14098_v15 }
 0x1bd   : > { %2751 = vmatmul.mubr.bf16.gmra.mxu1 %v15595_v19 }
 0x1be   : > { %2760 = vmatprep.mubr.bf16.mxu1 %v16100_v58  ;;  %2857 = vmatpush2.bf16.msra.mxu0 %v14081_v21  ;;  %v14137_v21 = vld [vmem:[%s19581_s24 + $0x284] ss:$24 sps:$4 sm:$0xff]  }
 0x1bf   : > { %2858 = vmatprep.subr.bf16.mxu0 %v14086_v63 }
 0x1c2   : > { %2859 = vmatpush2.bf16.msra.mxu0 %v14084_v57 }
 0x1c3   : > { %2860 = vmatprep.subr.bf16.mxu0 %v14089_v61 }
 0x1c5   : > { %2761 = vmatmul.mubr.bf16.gmra.mxu1 %v15603_v29 }
 0x1c6   : > { %2861 = vmatpush2.bf16.msra.mxu0 %v14087_v25  ;;  %2929 = vmatprep.mubr.bf16.mxu1 %v19561_v1  ;;  %v15158_v25 = vld [vmem:[%s15392_s21 + $0x60] ss:$12 sps:$4 sm:$0xff]  }
 0x1c7   : > { %2862 = vmatprep.subr.bf16.mxu0 %v14095_v31  ;;  %v14135_v31 = vld [vmem:[%s19581_s24 + $0x280] ss:$24 sps:$4 sm:$0xff]  }
 0x1ca   : > { %2863 = vmatpush2.bf16.msra.mxu0 %v14093_v24  ;;  %v15159_v24 = vld [vmem:[%s15392_s21 + $0x4c] ss:$12 sps:$4 sm:$0xff]  }
 0x1cb   : > { %2864 = vmatprep.subr.bf16.mxu0 %v14101_v5 }
 0x1cd   : > { %11839 = vmatmul.mubr.msk.bf16.vlgmr.msra.gmra.mxu1 %vm1771_vm2, %v15585_v7 }
 0x1ce   : > { %2961 = vmatpush1.bf16.msra.mxu1 %v14096_v11  ;;  %2865 = vmatpush2.bf16.msra.mxu0 %v14099_v18  ;;  %v14140_v11 = vld [vmem:[%s19581_s24 + $0x254] ss:$24 sps:$4 sm:$0xff]  }
 0x1cf   : > { %2962 = vmatprep.subr.bf16.mxu1 %v14104_v60  ;;  %2939 = vmatprep.mubr.bf16.mxu1 %v19561_v1 }
 0x1d0   : > { %3035 = vmatprep.subr.bf16.mxu0 %v14119_v22 }
 0x1d1   : > { %2867 = vmatmul.mubr.bf16.vlgmr.msra.gmra.mxu0 %v15587_v9 }
 0x1d2   : > { %2963 = vmatpush1.bf16.msra.mxu1 %v14102_v62  ;;  %2876 = vmatprep.mubr.bf16.mxu0 %v16076_v54  ;;  %v15160_v62 = vld [vmem:[%s15392_s21 + $0x48] ss:$12 sps:$4 sm:$0xff]  }
 0x1d3   : > { %2964 = vmatprep.subr.bf16.mxu1 %v14107_v2  ;;  %3036 = vmatpush1.bf16.msra.mxu0 %v14117_v44  ;;  %v15161_v2 = vld [vmem:[%s15392_s21 + $0x34] ss:$12 sps:$4 sm:$0xff]  }
 0x1d4   : > { %3037 = vmatprep.subr.bf16.mxu0 %v14125_v3 }
 0x1d5   : > { %11840 = vmatmul.mubr.msk.bf16.gmra.mxu1 %vm1771_vm2, %v15593_v17 }
 0x1d6   : > { %2965 = vmatpush1.bf16.msra.mxu1 %v14105_v4  ;;  %2949 = vmatprep.mubr.bf16.mxu1 %v19561_v1  ;;  %v14143_v4 = vld [vmem:[%s19581_s24 + $0x224] ss:$24 sps:$4 sm:$0xff]  }
 0x1d7   : > { %2966 = vmatprep.subr.bf16.mxu1 %v14110_v6  ;;  %3038 = vmatpush1.bf16.msra.mxu0 %v14123_v8 }
 0x1d8   : > { %3121 = vmatprep.subr.bf16.mxu0 %v15155_v14  ;;  %v14146_v14 = vld [vmem:[%s19581_s24 + $0x1f4] ss:$24 sps:$4 sm:$0xff]  }
 0x1d9   : > { %2877 = vmatmul.mubr.bf16.gmra.mxu0 %v15595_v19 }
 0x1da   : > { %2967 = vmatpush1.bf16.msra.mxu1 %v14108_v10  ;;  %2886 = vmatprep.mubr.bf16.mxu0 %v16100_v58  ;;  %v15162_v10 = vld [vmem:[%s15392_s21 + $0x30] ss:$12 sps:$4 sm:$0xff]  }
 0x1db   : > { %2968 = vmatprep.subr.bf16.mxu1 %v14113_v12  ;;  %v14141_v12 = vld [vmem:[%s19581_s24 + $0x220] ss:$24 sps:$4 sm:$0xff]  }
 0x1dd   : > { %11841 = vmatmul.mubr.msk.bf16.gmra.mxu1 %vm1771_vm2, %v15601_v27  ;;  %v1878_v23 = vpop.f32.mrf.mxu1 }
 0x1de   : > { %2969 = vmatpush1.bf16.msra.mxu1 %v14111_v13  ;;  %2992 = vmatprep.mubr.bf16.mxu1 %v15926_v59  ;;  %v15163_v13 = vld [vmem:[%s15392_s21 + $0x1c] ss:$12 sps:$4 sm:$0xff]  }
 0x1df   : > { %2970 = vmatprep.subr.bf16.mxu1 %v14116_v16  ;;  %v1880_v28 = vpop.f32.mrf.mxu1  ;;  %v15164_v16 = vld [vmem:[%s15392_s21 + $0x18] ss:$12 sps:$4 sm:$0xff]  }
 0x1e1   : > { %2887 = vmatmul.mubr.bf16.gmra.mxu0 %v15603_v29  ;;  %v1815_v32 = vpop.f32.mrf.mxu0  ;;  %v1882_v33 = vpop.f32.mrf.mxu1 }
 0x1e2   : > { %2971 = vmatpush1.bf16.msra.mxu1 %v14114_v20  ;;  %v16196_v35 = vadd.f32 %v1878_v23, %v1815_v32  ;;  %3055 = vmatprep.mubr.bf16.mxu0 %v19561_v1  ;;  %v14144_v20 = vld [vmem:[%s19581_s24 + $0x1f0] ss:$24 sps:$4 sm:$0xff]   ;;  %v14152_v32 = vld [vmem:[%s19581_s24 + $0x194] ss:$24 sps:$4 sm:$0xff]  }
 0x1e3   : > { %2972 = vmatprep.subr.bf16.mxu1 %v14122_v26  ;;  %v1817_v59 = vpop.f32.mrf.mxu0  ;;  %v16199_v36 = vpop.f32.mrf.mxu1  ;;  %v15165_v23 = vld [vmem:[%s15392_s21 + $0x4] ss:$12 sps:$4 sm:$0xff]  }
 0x1e4   : > { %v16201_v37 = vadd.f32 %v1880_v28, %v1817_v59  ;;  %v14149_v26 = vld [vmem:[%s19581_s24 + $0x1c4] ss:$24 sps:$4 sm:$0xff]   ;;  %v15166_v28 = vld [vmem:[%s15392_s21] ss:$12 sps:$4 sm:$0xff]  }
 0x1e5   : > { %v1819_v40 = vpop.f32.mrf.mxu0  ;;  %v1888_v43 = vpop.f32.mrf.mxu1  ;;  %v16307_v59 = vld [vmem:[%s19580_s26 + $0x38] sm:$0xff]  }
 0x1e6   : > { %2973 = vmatpush1.bf16.msra.mxu1 %v14120_v30  ;;  %v16209_v45 = vadd.f32 %v1882_v33, %v1819_v40  ;;  %v14147_v30 = vld [vmem:[%s19581_s24 + $0x1c0] ss:$24 sps:$4 sm:$0xff]  }
 0x1e7   : > { %2974 = vmatprep.subr.bf16.mxu1 %v14128_v34  ;;  %v16211_v46 = vpop.f32.mrf.mxu0  ;;  %v1890_v47 = vpop.f32.mrf.mxu1  ;;  %v14150_v34 = vld [vmem:[%s19581_s24 + $0x190] ss:$24 sps:$4 sm:$0xff]  }
 0x1e9   : > { %11842 = vmatmul.mubr.msk.bf16.vlgmr.msra.gmra.mxu0 %vm1771_vm2, %v15585_v7  ;;  %v1825_v49 = vpop.f32.mrf.mxu0  ;;  %v1892_v51 = vpop.f32.mrf.mxu1  ;;  %v14132_v7 = vld [vmem:[%s19581_s24 + $0x2b0] ss:$24 sps:$4 sm:$0xff]  }
 0x1ea   : > { %2975 = vmatpush1.bf16.msra.mxu1 %v14126_v39  ;;  %3065 = vmatprep.mubr.bf16.mxu0 %v19561_v1  ;;  %v16222_v52 = vadd.f32 %v1888_v43, %v1825_v49  ;;  %v16319_v43 = vld [vmem:[%s19580_s26 + $0x40] sm:$0xff]  }
 0x1eb   : > { %2976 = vmatprep.subr.bf16.mxu1 %v14131_v41  ;;  %v1827_v53 = vpop.f32.mrf.mxu0  ;;  %3122 = vmatpush1.bf16.msra.mxu0 %v15156_v38  ;;  %v16225_v55 = vpop.f32.mrf.mxu1  ;;  %v15167_v41 = vld [vmem:[%s15392_s21 + $0x80] ss:$12 sps:$4 sm:$0xff]  }
 0x1ec   : > { %3123 = vmatprep.subr.bf16.mxu0 %v15157_v56  ;;  %v16231_v42 = vadd.f32 %v1890_v47, %v1827_v53  ;;  %v14159_v53 = vld [vmem:[%s19581_s24 + $0x7e0] ss:$24 sps:$4 sm:$0xff]   ;;  %v14162_v56 = vld [vmem:[%s19581_s24 + $0x7b0] ss:$24 sps:$4 sm:$0xff]  }
 0x1ed   : > { %v1829_v15 = vpop.f32.mrf.mxu0  ;;  %v1898_v63 = vpop.f32.mrf.mxu1 }
 0x1ee   : > { %2977 = vmatpush2.bf16.msra.mxu1 %v14129_v48  ;;  %v16236_v57 = vadd.f32 %v1892_v51, %v1829_v15  ;;  %v15168_v48 = vld [vmem:[%s15392_s21 + $0x68] ss:$12 sps:$4 sm:$0xff]   ;;  %v14161_v51 = vld [vmem:[%s19581_s24 + $0x7e4] ss:$24 sps:$4 sm:$0xff]  }
 0x1ef   : > { %2978 = vmatprep.subr.bf16.mxu1 %v14134_v50  ;;  %v16238_v61 = vpop.f32.mrf.mxu0  ;;  %3124 = vmatpush1.bf16.msra.mxu0 %v15158_v25  ;;  %v1900_v18 = vpop.f32.mrf.mxu1  ;;  %v15169_v50 = vld [vmem:[%s15392_s21 + $0x50] ss:$12 sps:$4 sm:$0xff]  }
 0x1f0   : > { %3125 = vmatprep.subr.bf16.mxu0 %v15159_v24 }
 0x1f1   : > { %11843 = vmatmul.mubr.msk.bf16.gmra.mxu0 %vm1771_vm2, %v15593_v17  ;;  %v1835_v5 = vpop.f32.mrf.mxu0  ;;  %v14138_v17 = vld [vmem:[%s19581_s24 + $0x250] ss:$24 sps:$4 sm:$0xff]   ;;  %v1902_v6 = vpop.f32.mrf.mxu1 }
 0x1f2   : > { %2979 = vmatpush2.bf16.msra.mxu1 %v14132_v7  ;;  %3075 = vmatprep.mubr.bf16.mxu0 %v19561_v1  ;;  %v16251_v60 = vadd.f32 %v1898_v63, %v1835_v5  ;;  %v15171_v63 = vld [vmem:[%s15392_s21 + $0x20] ss:$12 sps:$4 sm:$0xff]  }
 0x1f3   : > { %2980 = vmatprep.subr.bf16.mxu1 %v14137_v21  ;;  %v1837_v22 = vpop.f32.mrf.mxu0  ;;  %3126 = vmatpush1.bf16.msra.mxu0 %v15160_v62  ;;  %v16348_v7 = vpop.f32.mrf.mxu1 }
 0x1f4   : > { %3127 = vmatprep.subr.bf16.mxu0 %v15161_v2  ;;  %v16258_v44 = vadd.f32 %v1900_v18, %v1837_v22  ;;  %v15172_v22 = vld [vmem:[%s15392_s21 + $0x8] ss:$12 sps:$4 sm:$0xff]  }
 0x1f5   : > { %v1839_v3 = vpop.f32.mrf.mxu0 }
 0x1f6   : > { %2981 = vmatpush2.bf16.msra.mxu1 %v14135_v31  ;;  %v16263_v8 = vadd.f32 %v1902_v6, %v1839_v3  ;;  %v14167_v31 = vld [vmem:[%s19581_s24 + $0x784] ss:$24 sps:$4 sm:$0xff]   ;;  %v14168_v3 = vld [vmem:[%s19581_s24 + $0x750] ss:$24 sps:$4 sm:$0xff]  }
 0x1f7   : > { %2982 = vmatprep.subr.bf16.mxu1 %v14140_v11  ;;  %3128 = vmatpush1.bf16.msra.mxu0 %v15162_v10  ;;  %v16299_v33 = vpop.f32.mrf.mxu0 }
 0x1f8   : > { %3129 = vmatprep.subr.bf16.mxu0 %v15163_v13 }
 0x1f9   : > { %11844 = vmatmul.mubr.msk.bf16.gmra.mxu0 %vm1771_vm2, %v15601_v27  ;;  %v16284_v27 = vld [vmem:[%s19580_s26 + $0x30] sm:$0xff]   ;;  %v2004_v39 = vpop.f32.mrf.mxu0 }
 0x1fa   : > { %2983 = vmatpush2.bf16.msra.mxu1 %v14138_v17  ;;  %3149 = vmatprep.mubr.bf16.mxu0 %v19561_v1  ;;  %v14170_v17 = vld [vmem:[%s19581_s24 + $0x754] ss:$24 sps:$4 sm:$0xff]  }
 0x1fb   : > { %2984 = vmatprep.subr.bf16.mxu1 %v14143_v4  ;;  %3130 = vmatpush1.bf16.msra.mxu0 %v15164_v16  ;;  %v2006_v40 = vpop.f32.mrf.mxu0 }
 0x1fc   : > { %3131 = vmatprep.subr.bf16.mxu0 %v15165_v23 }
 0x1fd   : > { %v2008_v47 = vpop.f32.mrf.mxu0 }
 0x1fe   : > { %2985 = vmatpush2.bf16.msra.mxu1 %v14141_v12  ;;  %v14173_v12 = vld [vmem:[%s19581_s24 + $0x724] ss:$24 sps:$4 sm:$0xff]  }
 0x1ff   : > { %2986 = vmatprep.subr.bf16.mxu1 %v14146_v14  ;;  %3132 = vmatpush1.bf16.msra.mxu0 %v15166_v28  ;;  %v16332_v49 = vpop.f32.mrf.mxu0  ;;  %v14171_v14 = vld [vmem:[%s19581_s24 + $0x720] ss:$24 sps:$4 sm:$0xff]  }
 0x200   : > { %19582 = vst [vmem:[#allocation11_spill] sm:$0xff] %v16332_v49 }
 0x201   : > { %v2014_v38 = vpop.f32.mrf.mxu0 }
 0x202   : > { %2987 = vmatpush2.bf16.msra.mxu1 %v14144_v20  ;;  %11854 = vmatmul.mubr.msk.bf16.vlgmr.msra.gmra.mxu0 %vm715_vm1, %v16284_v27 }
 0x203   : > { %2988 = vmatprep.subr.bf16.mxu1 %v14149_v26  ;;  %3159 = vmatprep.mubr.bf16.mxu0 %v19561_v1  ;;  %v2016_v15 = vpop.f32.mrf.mxu0  ;;  %v14176_v26 = vld [vmem:[%s19581_s24 + $0x6f4] ss:$24 sps:$4 sm:$0xff]  }
 0x205   : > { %v2018_v11 = vpop.f32.mrf.mxu0 }
 0x206   : > { %2989 = vmatpush2.bf16.msra.mxu1 %v14147_v30  ;;  %v14174_v30 = vld [vmem:[%s19581_s24 + $0x6f0] ss:$24 sps:$4 sm:$0xff]  }
 0x207   : > { %2990 = vmatprep.subr.bf16.mxu1 %v14152_v32  ;;  %v16380_v4 = vpop.f32.mrf.mxu0 }
 0x209   : > { %v2024_v20 = vpop.f32.mrf.mxu0 }
 0x20a   : > { %2991 = vmatpush2.bf16.msra.mxu1 %v14150_v34  ;;  %11855 = vmatmul.mubr.msk.bf16.gmra.mxu0 %vm715_vm1, %v16307_v59 }
 0x20b   : > { %13570 = vmatprep.subr.bf16.mxu1 %v19559_v0  ;;  %3169 = vmatprep.mubr.bf16.mxu0 %v19561_v1  ;;  %v2026_v32 = vpop.f32.mrf.mxu0 }
 0x20d   : > { %2993 = vmatmul.mubr.bf16.vlgmr.msra.gmra.mxu1 %v15587_v9  ;;  %v14158_v9 = vld [vmem:[%s19581_s24 + $0x814] ss:$24 sps:$4 sm:$0xff]  }
 0x20e   : > { %3002 = vmatprep.mubr.bf16.mxu1 %v16076_v54  ;;  %13571 = vmatpush3.bf16.msra.mxu1 %v15167_v41  ;;  %v14156_v54 = vld [vmem:[%s19581_s24 + $0x810] ss:$24 sps:$4 sm:$0xff]  }
 0x20f   : > { %13572 = vmatprep.subr.bf16.mxu1 %v19559_v0  ;;  %3904 = vmatprep.subr.bf16.mxu0 %v14158_v9 }
 0x210   : > { %3905 = vmatpush1.bf16.msra.mxu0 %v14156_v54 }
 0x211   : > { %3906 = vmatprep.subr.bf16.mxu0 %v14161_v51 }
 0x212   : > { %13573 = vmatpush3.bf16.msra.mxu1 %v15168_v48  ;;  %11856 = vmatmul.mubr.msk.bf16.gmra.mxu0 %vm715_vm1, %v16319_v43 }
 0x213   : > { %13574 = vmatprep.subr.bf16.mxu1 %v19559_v0 }
 0x214   : > { %3907 = vmatpush1.bf16.msra.mxu0 %v14159_v53  ;;  %v14180_v53 = vld [vmem:[%s19581_s24 + $0x990] ss:$24 sps:$4 sm:$0xff]  }
 0x215   : > { %3003 = vmatmul.mubr.bf16.gmra.mxu1 %v15595_v19  ;;  %v15170_v19 = vld [vmem:[%s15392_s21 + $0x38] ss:$12 sps:$4 sm:$0xff]  }
 0x216   : > { %3012 = vmatprep.mubr.bf16.mxu1 %v16100_v58  ;;  %13575 = vmatpush3.bf16.msra.mxu1 %v15169_v50  ;;  %v14164_v58 = vld [vmem:[%s19581_s24 + $0x7b4] ss:$24 sps:$4 sm:$0xff]  }
 0x217   : > { %13576 = vmatprep.subr.bf16.mxu1 %v19559_v0  ;;  %3908 = vmatprep.subr.bf16.mxu0 %v14164_v58  ;;  %v14182_v50 = vld [vmem:[%s19581_s24 + $0x994] ss:$24 sps:$4 sm:$0xff]  }
 0x218   : > { %3909 = vmatpush1.bf16.msra.mxu0 %v14162_v56 }
 0x219   : > { %3910 = vmatprep.subr.bf16.mxu0 %v14167_v31  ;;  %v14188_v31 = vld [vmem:[%s19581_s24 + $0x934] ss:$24 sps:$4 sm:$0xff]  }
 0x21a   : > { %13577 = vmatpush3.bf16.msra.mxu1 %v15170_v19  ;;  %v14185_v19 = vld [vmem:[%s19581_s24 + $0x964] ss:$24 sps:$4 sm:$0xff]  }
 0x21b   : > { %13578 = vmatprep.subr.bf16.mxu1 %v19559_v0 }
 0x21d   : > { %3013 = vmatmul.mubr.bf16.gmra.mxu1 %v15603_v29  ;;  %v1941_v21 = vpop.f32.mrf.mxu1  ;;  %v14165_v29 = vld [vmem:[%s19581_s24 + $0x780] ss:$24 sps:$4 sm:$0xff]  }
 0x21e   : > { %13579 = vmatpush3.bf16.msra.mxu1 %v15171_v63  ;;  %v16356_v25 = vadd.f32 %v2004_v39, %v1941_v21  ;;  %13582 = vmatprep.mubr.msk.bf16.mxu1 %vm15236_vm0, %v19559_v0 }
 0x21f   : > { %v1943_v24 = vpop.f32.mrf.mxu1  ;;  %13580 = vmatprep.subr.bf16.mxu1 %v19559_v0  ;;  %3911 = vmatpush1.bf16.msra.mxu0 %v14165_v29 }
 0x220   : > { %v16367_v5 = vadd.f32 %v2006_v40, %v1943_v24  ;;  %3912 = vmatprep.subr.bf16.mxu0 %v14170_v17  ;;  %v14179_v40 = vld [vmem:[%s19581_s24 + $0x6c4] ss:$24 sps:$4 sm:$0xff]  }
 0x221   : > { %v1945_v18 = vpop.f32.mrf.mxu1 }
 0x222   : > { %13581 = vmatpush3.bf16.msra.mxu1 %v15172_v22  ;;  %v16370_v62 = vadd.f32 %v2008_v47, %v1945_v18  ;;  %v14177_v47 = vld [vmem:[%s19581_s24 + $0x6c0] ss:$24 sps:$4 sm:$0xff]  }
 0x223   : > { %v16375_v2 = vpop.f32.mrf.mxu1  ;;  %3913 = vmatpush1.bf16.msra.mxu0 %v14168_v3 }
 0x224   : > { %19583 = vst [vmem:[#allocation12_spill] sm:$0xff] %v16375_v2  ;;  %3914 = vmatprep.subr.bf16.mxu0 %v14173_v12 }
 0x225   : > { %13583 = vmatmul.mubr.msk.bf16.vlgmr.msra.gmra.mxu1 %vm715_vm1, %v16284_v27  ;;  %v1951_v6 = vpop.f32.mrf.mxu1 }
 0x226   : > { %v16384_v10 = vadd.f32 %v2014_v38, %v1951_v6  ;;  %13586 = vmatprep.mubr.msk.bf16.mxu1 %vm15236_vm0, %v19559_v0  ;;  %v14191_v6 = vld [vmem:[%s19581_s24 + $0x904] ss:$24 sps:$4 sm:$0xff]  }
 0x227   : > { %v1953_v13 = vpop.f32.mrf.mxu1  ;;  %3915 = vmatpush1.bf16.msra.mxu0 %v14171_v14  ;;  %v14189_v14 = vld [vmem:[%s19581_s24 + $0x900] ss:$24 sps:$4 sm:$0xff]  }
 0x228   : > { %v16394_v16 = vadd.f32 %v2016_v15, %v1953_v13  ;;  %3916 = vmatprep.subr.bf16.mxu0 %v14176_v26  ;;  %v14183_v15 = vld [vmem:[%s19581_s24 + $0x960] ss:$24 sps:$4 sm:$0xff]  }
 0x229   : > { %v1955_v23 = vpop.f32.mrf.mxu1 }
 0x22a   : > { %v16396_v27 = vadd.f32 %v2018_v11, %v1955_v23  ;;  %v14186_v11 = vld [vmem:[%s19581_s24 + $0x930] ss:$24 sps:$4 sm:$0xff]  }
 0x22b   : > { %v16401_v28 = vpop.f32.mrf.mxu1  ;;  %3917 = vmatpush1.bf16.msra.mxu0 %v14174_v30  ;;  %v14192_v30 = vld [vmem:[%s19581_s24 + $0x8d0] ss:$24 sps:$4 sm:$0xff]  }
 0x22c   : > { %3918 = vmatprep.subr.bf16.mxu0 %v14179_v40 }
 0x22d   : > { %13587 = vmatmul.mubr.msk.bf16.gmra.mxu1 %vm715_vm1, %v16307_v59  ;;  %v1961_v34 = vpop.f32.mrf.mxu1  ;;  %v2028_v59 = vpop.f32.mrf.mxu0 }
 0x22e   : > { %v16408_v39 = vadd.f32 %v2024_v20, %v1961_v34  ;;  %13590 = vmatprep.mubr.msk.bf16.mxu1 %vm15236_vm0, %v19559_v0  ;;  %v14194_v20 = vld [vmem:[%s19581_s24 + $0x8d4] ss:$24 sps:$4 sm:$0xff]   ;;  %v14197_v34 = vld [vmem:[%s19581_s24 + $0x8a4] ss:$24 sps:$4 sm:$0xff]  }
 0x22f   : > { %v1963_v41 = vpop.f32.mrf.mxu1  ;;  %3919 = vmatpush1.bf16.msra.mxu0 %v14177_v47  ;;  %v16436_v58 = vpop.f32.mrf.mxu0 }
 0x230   : > { %v16418_v48 = vadd.f32 %v2026_v32, %v1963_v41  ;;  %3920 = vmatprep.subr.bf16.mxu0 %v14182_v50  ;;  %19584 = vst [vmem:[#allocation13_spill] sm:$0xff] %v16436_v58  ;;  %v14195_v50 = vld [vmem:[%s19581_s24 + $0x8a0] ss:$24 sps:$4 sm:$0xff]  }
 0x231   : > { %v1965_v9 = vpop.f32.mrf.mxu1 }
 0x232   : > { %v16420_v54 = vadd.f32 %v2028_v59, %v1965_v9 }
 0x233   : > { %v16425_v51 = vpop.f32.mrf.mxu1  ;;  %3921 = vmatpush2.bf16.msra.mxu0 %v14180_v53 }
 0x234   : > { %3922 = vmatprep.subr.bf16.mxu0 %v14185_v19 }
 0x235   : > { %13591 = vmatmul.mubr.msk.bf16.gmra.mxu1 %vm715_vm1, %v16319_v43  ;;  %v2130_v38 = vpop.f32.mrf.mxu1 }
 0x236   : > { %3999 = vmatprep.mubr.bf16.mxu1 %v19561_v1 }
 0x237   : > { %v2132_v56 = vpop.f32.mrf.mxu1  ;;  %3923 = vmatpush2.bf16.msra.mxu0 %v14183_v15 }
 0x238   : > { %3924 = vmatprep.subr.bf16.mxu0 %v14188_v31 }
 0x239   : > { %v2067_v21 = vpop.f32.mrf.mxu0  ;;  %v2134_v63 = vpop.f32.mrf.mxu1 }
 0x23a   : > { %v16441_v43 = vadd.f32 %v2130_v38, %v2067_v21  ;;  %v14200_v38 = vld [vmem:[%s19581_s24 + $0x874] ss:$24 sps:$4 sm:$0xff]   ;;  %v14198_v21 = vld [vmem:[%s19581_s24 + $0x870] ss:$24 sps:$4 sm:$0xff]  }
 0x23b   : > { %v2069_v24 = vpop.f32.mrf.mxu0  ;;  %v16446_v29 = vpop.f32.mrf.mxu1  ;;  %3925 = vmatpush2.bf16.msra.mxu0 %v14186_v11 }
 0x23c   : > { %19585 = vst [vmem:[#allocation14_spill] sm:$0xff] %v16446_v29  ;;  %v16451_v18 = vadd.f32 %v2132_v56, %v2069_v24  ;;  %3926 = vmatprep.subr.bf16.mxu0 %v14191_v6  ;;  %v14203_v6 = vld [vmem:[%s19581_s24 + $0x844] ss:$24 sps:$4 sm:$0xff]  }
 0x23d   : > { %v2071_v22 = vpop.f32.mrf.mxu0  ;;  %v2140_v17 = vpop.f32.mrf.mxu1 }
 0x23e   : > { %v16453_v3 = vadd.f32 %v2134_v63, %v2071_v22 }
 0x23f   : > { %v16458_v12 = vpop.f32.mrf.mxu0  ;;  %v2142_v13 = vpop.f32.mrf.mxu1  ;;  %3927 = vmatpush2.bf16.msra.mxu0 %v14189_v14  ;;  %v14204_v14 = vld [vmem:[%s19581_s24 + $0x9f0] ss:$24 sps:$4 sm:$0xff]  }
 0x240   : > { %19586 = vst [vmem:[#allocation15_spill] sm:$0xff] %v16458_v12  ;;  %3928 = vmatprep.subr.bf16.mxu0 %v14194_v20  ;;  %v14206_v20 = vld [vmem:[%s19581_s24 + $0x9f4] ss:$24 sps:$4 sm:$0xff]  }
 0x241   : > { %v2077_v23 = vpop.f32.mrf.mxu0  ;;  %v2144_v26 = vpop.f32.mrf.mxu1  ;;  %3979 = vmatprep.subr.bf16.mxu1 %v14206_v20 }
 0x242   : > { %v16469_v32 = vadd.f32 %v2140_v17, %v2077_v23  ;;  %3980 = vmatpush1.bf16.msra.mxu1 %v14204_v14 }
 0x243   : > { %v2079_v40 = vpop.f32.mrf.mxu0  ;;  %v16474_v41 = vpop.f32.mrf.mxu1  ;;  %3929 = vmatpush2.bf16.msra.mxu0 %v14192_v30 }
 0x244   : > { %19587 = vst [vmem:[#allocation16_spill] sm:$0xff] %v16474_v41  ;;  %v16476_v47 = vadd.f32 %v2142_v13, %v2079_v40  ;;  %3930 = vmatprep.subr.bf16.mxu0 %v14197_v34  ;;  %v14201_v13 = vld [vmem:[%s19581_s24 + $0x840] ss:$24 sps:$4 sm:$0xff]   ;;  %v14212_v34 = vld [vmem:[%s19581_s24 + $0x9c4] ss:$24 sps:$4 sm:$0xff]  }
 0x245   : > { %v2081_v59 = vpop.f32.mrf.mxu0  ;;  %v2150_v9 = vpop.f32.mrf.mxu1  ;;  %v14210_v40 = vld [vmem:[%s19581_s24 + $0x9c0] ss:$24 sps:$4 sm:$0xff]   ;;  %3981 = vmatprep.subr.bf16.mxu1 %v14212_v34 }
 0x246   : > { %v16481_v53 = vadd.f32 %v2144_v26, %v2081_v59  ;;  %v14209_v26 = vld [vmem:[%s19581_s24 + $0x9fc] ss:$24 sps:$4 sm:$0xff]   ;;  %3982 = vmatpush1.bf16.msra.mxu1 %v14210_v40 }
 0x247   : > { %v16486_v19 = vpop.f32.mrf.mxu0  ;;  %v2152_v56 = vpop.f32.mrf.mxu1  ;;  %3931 = vmatpush2.bf16.msra.mxu0 %v14195_v50 }
 0x248   : > { %19588 = vst [vmem:[#allocation17_spill] sm:$0xff] %v16486_v19  ;;  %3932 = vmatprep.subr.bf16.mxu0 %v14200_v38 }
 0x249   : > { %v2087_v15 = vpop.f32.mrf.mxu0  ;;  %v2154_v11 = vpop.f32.mrf.mxu1 }
 0x24a   : > { %v16491_v63 = vadd.f32 %v2150_v9, %v2087_v15  ;;  %v14218_v9 = vld [vmem:[%s19581_s24 + $0x81c] ss:$24 sps:$4 sm:$0xff]  }
 0x24b   : > { %v2089_v31 = vpop.f32.mrf.mxu0  ;;  %3933 = vmatpush2.bf16.msra.mxu0 %v14198_v21  ;;  %4030 = vmatprep.subr.bf16.mxu1 %v14218_v9 }
 0x24c   : > { %v16493_v24 = vadd.f32 %v2152_v56, %v2089_v31  ;;  %3934 = vmatprep.subr.bf16.mxu0 %v14203_v6  ;;  %v16525_v56 = vpop.f32.mrf.mxu1 }
 0x24d   : > { %v2091_v22 = vpop.f32.mrf.mxu0  ;;  %19590 = vst [vmem:[#allocation19_spill] sm:$0xff] %v16525_v56 }
 0x24e   : > { %v16495_v17 = vadd.f32 %v2154_v11, %v2091_v22 }
 0x24f   : > { %3935 = vmatpush2.bf16.msra.mxu0 %v14201_v13  ;;  %v16509_v23 = vpop.f32.mrf.mxu0 }
 0x250   : > { %19589 = vst [vmem:[#allocation18_spill] sm:$0xff] %v16509_v23  ;;  %4105 = vmatprep.subr.bf16.mxu0 %v14209_v26 }
 0x251   : > { %v2805_v30 = vpop.f32.mrf.mxu0 }
 0x253   : > { %v2807_v59 = vpop.f32.mrf.mxu0 }
 0x255   : > { %v2809_v50 = vpop.f32.mrf.mxu0 }
 0x257   : > { %v16523_v38 = vpop.f32.mrf.mxu0 }
 0x259   : > { %v2815_v15 = vpop.f32.mrf.mxu0 }
 0x25b   : > { %v2817_v11 = vpop.f32.mrf.mxu0 }
 0x25d   : > { %v2819_v34 = vpop.f32.mrf.mxu0 }
 0x275   : > { %v2742_v21 = vpop.f32.mrf.mxu1 }
 0x276   : > { %v2743_v31 = vadd.f32 %v2742_v21, %v16196_v35  ;;  %v16539_v35 = vpop.f32.mrf.mxu0 }
 0x277   : > { %v2744_v22 = vpop.f32.mrf.mxu1 }
 0x278   : > { %v16528_v6 = vadd.f32 %v2805_v30, %v2743_v31  ;;  %v2745_v13 = vadd.f32 %v2744_v22, %v16201_v37  ;;  %v2825_v22 = vpop.f32.mrf.mxu0 }
 0x279   : > { %v2746_v14 = vpop.f32.mrf.mxu1 }
 0x27a   : > { %v16531_v20 = vadd.f32 %v2807_v59, %v2745_v13  ;;  %v2747_v26 = vadd.f32 %v2746_v14, %v16209_v45 }
 0x27b   : > { %v16534_v40 = vpop.f32.mrf.mxu1 }
 0x27c   : > { %v16536_v9 = vadd.f32 %v2809_v50, %v2747_v26 }
 0x27d   : > { %v2752_v0 = vpop.f32.mrf.mxu1 }
 0x27e   : > { %v2753_v1 = vadd.f32 %v2752_v0, %v16222_v52  ;;  %v2827_v52 = vpop.f32.mrf.mxu0 }
 0x27f   : > { %v2754_v21 = vpop.f32.mrf.mxu1 }
 0x280   : > { %v16541_v30 = vadd.f32 %v2815_v15, %v2753_v1  ;;  %v2755_v37 = vadd.f32 %v2754_v21, %v16231_v42 }
 0x281   : > { %v2756_v31 = vpop.f32.mrf.mxu1 }
 0x282   : > { %v16544_v59 = vadd.f32 %v2817_v11, %v2755_v37  ;;  %v2757_v45 = vadd.f32 %v2756_v31, %v16236_v57  ;;  %v2829_v57 = vpop.f32.mrf.mxu0 }
 0x283   : > { %v16547_v13 = vpop.f32.mrf.mxu1 }
 0x284   : > { %v16549_v50 = vadd.f32 %v2819_v34, %v2757_v45  ;;  %v16562_v31 = vpop.f32.mrf.mxu0 }
 0x285   : > { %v2762_v14 = vpop.f32.mrf.mxu1 }
 0x286   : > { %v2763_v0 = vadd.f32 %v2762_v14, %v16251_v60 }
 0x287   : > { %v2764_v26 = vpop.f32.mrf.mxu1 }
 0x288   : > { %v16552_v29 = vadd.f32 %v2825_v22, %v2763_v0  ;;  %v2765_v1 = vadd.f32 %v2764_v26, %v16258_v44 }
 0x289   : > { %v2766_v42 = vpop.f32.mrf.mxu1 }
 0x28a   : > { %v16555_v15 = vadd.f32 %v2827_v52, %v2765_v1  ;;  %v2767_v11 = vadd.f32 %v2766_v42, %v16263_v8 }
 0x28b   : > { %v16558_v21 = vpop.f32.mrf.mxu1 }
 0x28c   : > { %v16560_v37 = vadd.f32 %v2829_v57, %v2767_v11 }
 0x28d   : > { %v2931_v34 = vpop.f32.mrf.mxu1 }
 0x28f   : > { %v2933_v60 = vpop.f32.mrf.mxu1 }
 0x291   : > { %v2868_v45 = vpop.f32.mrf.mxu0  ;;  %v2935_v14 = vpop.f32.mrf.mxu1 }
 0x292   : > { %v2869_v22 = vadd.f32 %v2868_v45, %v16356_v25 }
 0x293   : > { %v2870_v0 = vpop.f32.mrf.mxu0  ;;  %v16565_v44 = vpop.f32.mrf.mxu1 }
 0x294   : > { %19591 = vst [vmem:[#allocation20_spill] sm:$0xff] %v16565_v44  ;;  %v16567_v52 = vadd.f32 %v2931_v34, %v2869_v22  ;;  %v2871_v8 = vadd.f32 %v2870_v0, %v16367_v5 }
 0x295   : > { %v2872_v26 = vpop.f32.mrf.mxu0  ;;  %v2941_v1 = vpop.f32.mrf.mxu1 }
 0x296   : > { %v16570_v42 = vadd.f32 %v2933_v60, %v2871_v8  ;;  %v2873_v11 = vadd.f32 %v2872_v26, %v16370_v62 }
 0x297   : > { %v16573_v57 = vpop.f32.mrf.mxu0  ;;  %v2943_v12 = vpop.f32.mrf.mxu1 }
 0x298   : > { %19592 = vst [vmem:[#allocation21_spill] sm:$0xff] %v16570_v42  ;;  %19593 = vst [vmem:[#allocation22_spill] sm:$0xff] %v16573_v57  ;;  %v16575_v56 = vadd.f32 %v2935_v14, %v2873_v11  ;;  %v14221_v57 = vld [vmem:[%s19581_s24 + $0x824] ss:$24 sps:$4 sm:$0xff]  }
 0x299   : > { %v2878_v23 = vpop.f32.mrf.mxu0  ;;  %v2945_v25 = vpop.f32.mrf.mxu1 }
 0x29a   : > { %v2879_v45 = vadd.f32 %v2878_v23, %v16384_v10 }
 0x29b   : > { %v2880_v41 = vpop.f32.mrf.mxu0  ;;  %v16578_v34 = vpop.f32.mrf.mxu1 }
 0x29c   : > { %19594 = vst [vmem:[#allocation23_spill] sm:$0xff] %v16578_v34  ;;  %v16580_v22 = vadd.f32 %v2941_v1, %v2879_v45  ;;  %v2881_v5 = vadd.f32 %v2880_v41, %v16394_v16 }
 0x29d   : > { %v2882_v60 = vpop.f32.mrf.mxu0  ;;  %v2951_v8 = vpop.f32.mrf.mxu1 }
 0x29e   : > { %v16583_v0 = vadd.f32 %v2943_v12, %v2881_v5  ;;  %v2883_v62 = vadd.f32 %v2882_v60, %v16396_v27 }
 0x29f   : > { %v16586_v26 = vpop.f32.mrf.mxu0  ;;  %v2953_v23 = vpop.f32.mrf.mxu1 }
 0x2a0   : > { %19595 = vst [vmem:[#allocation24_spill] sm:$0xff] %v16583_v0  ;;  %19596 = vst [vmem:[#allocation25_spill] sm:$0xff] %v16586_v26  ;;  %v16588_v14 = vadd.f32 %v2945_v25, %v2883_v62 }
 0x2a1   : > { %v2888_v11 = vpop.f32.mrf.mxu0  ;;  %v2955_v27 = vpop.f32.mrf.mxu1 }
 0x2a2   : > { %v2889_v10 = vadd.f32 %v2888_v11, %v16408_v39 }
 0x2a3   : > { %v2890_v19 = vpop.f32.mrf.mxu0  ;;  %v16621_v34 = vpop.f32.mrf.mxu1 }
 0x2a4   : > { %v16591_v42 = vadd.f32 %v2951_v8, %v2889_v10  ;;  %v2891_v1 = vadd.f32 %v2890_v19, %v16418_v48  ;;  %19604 = vst [vmem:[#allocation33_spill] sm:$0xff] %v16621_v34 }
 0x2a5   : > { %v2892_v16 = vpop.f32.mrf.mxu0 }
 0x2a6   : > { %19597 = vst [vmem:[#allocation26_spill] sm:$0xff] %v16591_v42  ;;  %v16594_v41 = vadd.f32 %v2953_v23, %v2891_v1  ;;  %v2893_v12 = vadd.f32 %v2892_v16, %v16420_v54 }
 0x2a7   : > { %v16597_v45 = vpop.f32.mrf.mxu0 }
 0x2a8   : > { %19598 = vst [vmem:[#allocation27_spill] sm:$0xff] %v16594_v41  ;;  %19599 = vst [vmem:[#allocation28_spill] sm:$0xff] %v16597_v45  ;;  %v16599_v5 = vadd.f32 %v2955_v27, %v2893_v12  ;;  %v14215_v41 = vld [vmem:[%s19581_s24 + $0x9cc] ss:$24 sps:$4 sm:$0xff]  }
 0x2a9   : > { %v3057_v25 = vpop.f32.mrf.mxu0 }
 0x2aa   : > { %19600 = vst [vmem:[#allocation29_spill] sm:$0xff] %v16599_v5 }
 0x2ab   : > { %v3059_v60 = vpop.f32.mrf.mxu0 }
 0x2ad   : > { %v3061_v62 = vpop.f32.mrf.mxu0 }
 0x2af   : > { %v16601_v39 = vpop.f32.mrf.mxu0 }
 0x2b0   : > { %19601 = vst [vmem:[#allocation30_spill] sm:$0xff] %v16601_v39  ;;  %v14207_v39 = vld [vmem:[%s19581_s24 + $0x9f8] ss:$24 sps:$4 sm:$0xff]  }
 0x2b1   : > { %v3067_v11 = vpop.f32.mrf.mxu0 }
 0x2b3   : > { %v3069_v8 = vpop.f32.mrf.mxu0 }
 0x2b5   : > { %v3071_v10 = vpop.f32.mrf.mxu0 }
 0x2b7   : > { %v16603_v0 = vpop.f32.mrf.mxu0 }
 0x2b8   : > { %19602 = vst [vmem:[#allocation31_spill] sm:$0xff] %v16603_v0 }
 0x2b9   : > { %v3077_v48 = vpop.f32.mrf.mxu0 }
 0x2bb   : > { %v16605_v19 = vpop.f32.mrf.mxu0 }
 0x2bd   : > { %v16607_v23 = vpop.f32.mrf.mxu0 }
 0x2bf   : > { %v16609_v54 = vpop.f32.mrf.mxu0 }
 0x2c0   : > { %19603 = vst [vmem:[#allocation32_spill] sm:$0xff] %v16609_v54 }
 0x2c2   : > { %v3151_v1 = vpop.f32.mrf.mxu0 }
 0x2c4   : > { %v3153_v16 = vpop.f32.mrf.mxu0 }
 0x2c6   : > { %v3155_v12 = vpop.f32.mrf.mxu0 }
 0x2c7   : > { %v16611_v27 = vpack.c.bf16 %v3155_v12, %v3151_v1 }
 0x2c8   : > { %v3157_v44 = vpop.f32.mrf.mxu0 }
 0x2c9   : > { %v16613_v5 = vpack.c.bf16 %v3157_v44, %v3153_v16  ;;  %v14213_v44 = vld [vmem:[%s19581_s24 + $0x9c8] ss:$24 sps:$4 sm:$0xff]  }
 0x2ca   : > { %v3161_v0 = vpop.f32.mrf.mxu0 }
 0x2cb   : > { %3936 = vmatprep.mubr.bf16.mxu0 %v16613_v5 }
 0x2cc   : > { %v3163_v54 = vpop.f32.mrf.mxu0  ;;  %3937 = vmatmul.mubr.bf16.vlgmr.msra.gmra.mxu0 %v16611_v27 }
 0x2cd   : > { %v2994_v1 = vpop.f32.mrf.mxu1  ;;  %4106 = vmatpush1.bf16.msra.mxu0 %v14207_v39 }
 0x2ce   : > { %v2995_v16 = vadd.f32 %v2994_v1, %v16441_v43  ;;  %v3165_v12 = vpop.f32.mrf.mxu0  ;;  %4107 = vmatprep.subr.bf16.mxu0 %v14215_v41 }
 0x2cf   : > { %v2996_v34 = vpop.f32.mrf.mxu1  ;;  %v16635_v49 = vpack.c.bf16 %v3165_v12, %v3161_v0 }
 0x2d0   : > { %v16632_v42 = vadd.f32 %v3057_v25, %v2995_v16  ;;  %v2997_v45 = vadd.f32 %v2996_v34, %v16451_v18  ;;  %v3167_v39 = vpop.f32.mrf.mxu0 }
 0x2d1   : > { %v2998_v2 = vpop.f32.mrf.mxu1  ;;  %v16637_v26 = vpack.c.bf16 %v3167_v39, %v3163_v54  ;;  %4108 = vmatpush1.bf16.msra.mxu0 %v14213_v44 }
 0x2d2   : > { %v16639_v58 = vadd.f32 %v3059_v60, %v2997_v45  ;;  %v2999_v43 = vadd.f32 %v2998_v2, %v16453_v3  ;;  %v3171_v41 = vpop.f32.mrf.mxu0  ;;  %4156 = vmatprep.subr.bf16.mxu0 %v14221_v57 }
 0x2d3   : > { %v16642_v1 = vpop.f32.mrf.mxu1  ;;  %3946 = vmatprep.mubr.bf16.mxu0 %v16637_v26 }
 0x2d4   : > { %19605 = vst [vmem:[#allocation34_spill] sm:$0xff] %v16639_v58  ;;  %19606 = vst [vmem:[#allocation35_spill] sm:$0xff] %v16642_v1  ;;  %v16645_v25 = vadd.f32 %v3061_v62, %v2999_v43  ;;  %v3173_v18 = vpop.f32.mrf.mxu0  ;;  %3947 = vmatmul.mubr.bf16.gmra.mxu0 %v16635_v49 }
 0x2d5   : > { %v3004_v34 = vpop.f32.mrf.mxu1 }
 0x2d6   : > { %v3005_v0 = vadd.f32 %v3004_v34, %v16469_v32  ;;  %v3175_v54 = vpop.f32.mrf.mxu0 }
 0x2d7   : > { %v3006_v44 = vpop.f32.mrf.mxu1  ;;  %v16652_v3 = vpack.c.bf16 %v3175_v54, %v3171_v41 }
 0x2d8   : > { %v16649_v45 = vadd.f32 %v3067_v11, %v3005_v0  ;;  %v3007_v2 = vadd.f32 %v3006_v44, %v16476_v47  ;;  %v3177_v57 = vpop.f32.mrf.mxu0  ;;  %v19608_v47 = vmov 0  }
 0x2d9   : > { %v3008_v60 = vpop.f32.mrf.mxu1  ;;  %v16654_v16 = vpack.c.bf16 %v3177_v57, %v3173_v18 }
 0x2da   : > { %v16656_v62 = vadd.f32 %v3069_v8, %v3007_v2  ;;  %v3009_v12 = vadd.f32 %v3008_v60, %v16481_v53 }
 0x2db   : > { %v16659_v39 = vpop.f32.mrf.mxu1  ;;  %3956 = vmatprep.mubr.bf16.mxu0 %v16654_v16 }
 0x2dc   : > { %19607 = vst [vmem:[#allocation36_spill] sm:$0xff] %v16656_v62  ;;  %v16662_v32 = vadd.f32 %v3071_v10, %v3009_v12  ;;  %3957 = vmatmul.mubr.bf16.gmra.mxu0 %v16652_v3  ;;  %v14222_v12 = vld [vmem:[%s19581_s24 + $0x7e8] ss:$24 sps:$4 sm:$0xff]  }
 0x2dd   : > { %v3014_v11 = vpop.f32.mrf.mxu1  ;;  %4125 = vmatprep.mubr.bf16.mxu0 %v19608_v47 }
 0x2de   : > { %v3015_v43 = vadd.f32 %v3014_v11, %v16491_v63  ;;  %v14216_v63 = vld [vmem:[%s19581_s24 + $0x818] ss:$24 sps:$4 sm:$0xff]  }
 0x2df   : > { %v3016_v41 = vpop.f32.mrf.mxu1  ;;  %v14225_v11 = vld [vmem:[%s19581_s24 + $0x7f0] ss:$24 sps:$4 sm:$0xff]  }
 0x2e0   : > { %v16667_v18 = vadd.f32 %v3077_v48, %v3015_v43  ;;  %v3017_v8 = vadd.f32 %v3016_v41, %v16493_v24  ;;  %v14219_v24 = vld [vmem:[%s19581_s24 + $0x820] ss:$24 sps:$4 sm:$0xff]   ;;  %v14230_v43 = vld [vmem:[%s19581_s24 + $0x7bc] ss:$24 sps:$4 sm:$0xff]  }
 0x2e1   : > { %v3018_v34 = vpop.f32.mrf.mxu1  ;;  %v14233_v41 = vld [vmem:[%s19581_s24 + $0x7c4] ss:$24 sps:$4 sm:$0xff]  }
 0x2e2   : > { %19609 = vst [vmem:[#allocation37_spill] sm:$0xff] %v16667_v18  ;;  %v16671_v53 = vadd.f32 %v16605_v19, %v3017_v8  ;;  %v3019_v0 = vadd.f32 %v3018_v34, %v16495_v17  ;;  %v14224_v17 = vld [vmem:[%s19581_s24 + $0x7ec] ss:$24 sps:$4 sm:$0xff]  }
 0x2e3   : > { %v16674_v10 = vpop.f32.mrf.mxu1  ;;  %v14227_v19 = vld [vmem:[%s19581_s24 + $0x7f4] ss:$24 sps:$4 sm:$0xff]  }
 0x2e4   : > { %19610 = vst [vmem:[#allocation38_spill] sm:$0xff] %v16671_v53  ;;  %v16677_v54 = vadd.f32 %v16607_v23, %v3019_v0  ;;  %v14228_v0 = vld [vmem:[%s19581_s24 + $0x7b8] ss:$24 sps:$4 sm:$0xff]  }
 0x2e5   : > { %v3214_v44 = vpop.f32.mrf.mxu1 }
 0x2e6   : > { %19611 = vst [vmem:[#allocation39_spill] sm:$0xff] %v16677_v54 }
 0x2e7   : > { %v13584_v2 = vpop.f32.mrf.mxu1 }
 0x2e9   : > { %v3217_v57 = vpop.f32.mrf.mxu1 }
 0x2ea   : > { %v16685_v48 = vpack.c.bf16 %v3217_v57, %v3214_v44  ;;  %v14231_v44 = vld [vmem:[%s19581_s24 + $0x7c0] ss:$24 sps:$4 sm:$0xff]   ;;  %v14236_v57 = vld [vmem:[%s19581_s24 + $0x78c] ss:$24 sps:$4 sm:$0xff]  }
 0x2eb   : > { %v13585_v23 = vpop.f32.mrf.mxu1 }
 0x2ec   : > { %12076 = vmatmul.mubr.msk.bf16.vlgmr.msra.gmra.mxu1 %vm1771_vm2, %v16685_v48  ;;  %12079 = vmatmul.mubr.msk.bf16.vlgmr.msra.gmra.mxu0 %vm1771_vm2, %v16685_v48  ;;  %v14237_v23 = vld [vmem:[%s19581_s24 + $0x790] ss:$24 sps:$4 sm:$0xff]  }
 0x2ed   : > { %4031 = vmatpush1.bf16.msra.mxu1 %v14216_v63  ;;  %4157 = vmatpush1.bf16.msra.mxu0 %v14219_v24  ;;  %v3222_v60 = vpop.f32.mrf.mxu1  ;;  %v14239_v63 = vld [vmem:[%s19581_s24 + $0x794] ss:$24 sps:$4 sm:$0xff]  }
 0x2ee   : > { %4032 = vmatprep.subr.bf16.mxu1 %v14224_v17  ;;  %4158 = vmatprep.subr.bf16.mxu0 %v14227_v19  ;;  %v14234_v19 = vld [vmem:[%s19581_s24 + $0x788] ss:$24 sps:$4 sm:$0xff]  }
 0x2ef   : > { %v13588_v8 = vpop.f32.mrf.mxu1  ;;  %4009 = vmatprep.mubr.bf16.mxu1 %v19608_v47  ;;  %4135 = vmatprep.mubr.bf16.mxu0 %v19608_v47 }
 0x2f0   : > { %v14243_v8 = vld [vmem:[%s19581_s24 + $0x760] ss:$24 sps:$4 sm:$0xff]  }
 0x2f1   : > { %4033 = vmatpush1.bf16.msra.mxu1 %v14222_v12  ;;  %4159 = vmatpush1.bf16.msra.mxu0 %v14225_v11  ;;  %v3225_v34 = vpop.f32.mrf.mxu1  ;;  %v14245_v12 = vld [vmem:[%s19581_s24 + $0x764] ss:$24 sps:$4 sm:$0xff]  }
 0x2f2   : > { %v16717_v2 = vpack.c.bf16 %v3225_v34, %v3222_v60  ;;  %4034 = vmatprep.subr.bf16.mxu1 %v14230_v43  ;;  %4160 = vmatprep.subr.bf16.mxu0 %v14233_v41  ;;  %v14242_v60 = vld [vmem:[%s19581_s24 + $0x75c] ss:$24 sps:$4 sm:$0xff]   ;;  %v14240_v41 = vld [vmem:[%s19581_s24 + $0x758] ss:$24 sps:$4 sm:$0xff]  }
 0x2f3   : > { %v13589_v24 = vpop.f32.mrf.mxu1 }
 0x2f4   : > { %12077 = vmatmul.mubr.msk.bf16.gmra.mxu1 %vm1771_vm2, %v16717_v2  ;;  %12080 = vmatmul.mubr.msk.bf16.gmra.mxu0 %vm1771_vm2, %v16717_v2  ;;  %v14249_v24 = vld [vmem:[%s19581_s24 + $0x730] ss:$24 sps:$4 sm:$0xff]  }
 0x2f5   : > { %4035 = vmatpush1.bf16.msra.mxu1 %v14228_v0  ;;  %4161 = vmatpush1.bf16.msra.mxu0 %v14231_v44  ;;  %v3230_v17 = vpop.f32.mrf.mxu1  ;;  %v14248_v0 = vld [vmem:[%s19581_s24 + $0x72c] ss:$24 sps:$4 sm:$0xff]  }
 0x2f6   : > { %4036 = vmatprep.subr.bf16.mxu1 %v14236_v57  ;;  %4162 = vmatprep.subr.bf16.mxu0 %v14239_v63  ;;  %v14251_v44 = vld [vmem:[%s19581_s24 + $0x734] ss:$24 sps:$4 sm:$0xff]   ;;  %v14246_v63 = vld [vmem:[%s19581_s24 + $0x728] ss:$24 sps:$4 sm:$0xff]  }
 0x2f7   : > { %v13592_v11 = vpop.f32.mrf.mxu1  ;;  %4019 = vmatprep.mubr.bf16.mxu1 %v19608_v47  ;;  %4145 = vmatprep.mubr.bf16.mxu0 %v19608_v47 }
 0x2f8   : > { %v14258_v11 = vld [vmem:[%s19581_s24 + $0x6c8] ss:$24 sps:$4 sm:$0xff]  }
 0x2f9   : > { %4037 = vmatpush1.bf16.msra.mxu1 %v14234_v19  ;;  %4163 = vmatpush1.bf16.msra.mxu0 %v14237_v23  ;;  %v3233_v43 = vpop.f32.mrf.mxu1  ;;  %v14257_v19 = vld [vmem:[%s19581_s24 + $0x704] ss:$24 sps:$4 sm:$0xff]   ;;  %v14252_v23 = vld [vmem:[%s19581_s24 + $0x6f8] ss:$24 sps:$4 sm:$0xff]  }
 0x2fa   : > { %v16749_v34 = vpack.c.bf16 %v3233_v43, %v3230_v17  ;;  %4038 = vmatprep.subr.bf16.mxu1 %v14242_v60  ;;  %4164 = vmatprep.subr.bf16.mxu0 %v14245_v12  ;;  %v14254_v17 = vld [vmem:[%s19581_s24 + $0x6fc] ss:$24 sps:$4 sm:$0xff]   ;;  %v14260_v60 = vld [vmem:[%s19581_s24 + $0x6cc] ss:$24 sps:$4 sm:$0xff]   ;;  %v14261_v43 = vld [vmem:[%s19581_s24 + $0x6d0] ss:$24 sps:$4 sm:$0xff]  }
 0x2fb   : > { %v13593_v57 = vpop.f32.mrf.mxu1  ;;  %v14263_v12 = vld [vmem:[%s19581_s24 + $0x6d4] ss:$24 sps:$4 sm:$0xff]  }
 0x2fc   : > { %12078 = vmatmul.mubr.msk.bf16.gmra.mxu1 %vm1771_vm2, %v16749_v34  ;;  %12081 = vmatmul.mubr.msk.bf16.gmra.mxu0 %vm1771_vm2, %v16749_v34  ;;  %v14272_v57 = vld [vmem:[%s19581_s24 + $0x96c] ss:$24 sps:$4 sm:$0xff]  }
 0x2fd   : > { %4039 = vmatpush1.bf16.msra.mxu1 %v14240_v41  ;;  %4165 = vmatpush1.bf16.msra.mxu0 %v14243_v8  ;;  %v14266_v41 = vld [vmem:[%s19581_s24 + $0x99c] ss:$24 sps:$4 sm:$0xff]  }
 0x2fe   : > { %4062 = vmatprep.mubr.bf16.mxu1 %v16613_v5  ;;  %4188 = vmatprep.mubr.bf16.mxu0 %v16613_v5  ;;  %v14255_v5 = vld [vmem:[%s19581_s24 + $0x700] ss:$24 sps:$4 sm:$0xff]   ;;  %v14269_v8 = vld [vmem:[%s19581_s24 + $0x9a4] ss:$24 sps:$4 sm:$0xff]  }
 0x2ff   : > { %4040 = vmatprep.subr.bf16.mxu1 %v14248_v0  ;;  %4166 = vmatprep.subr.bf16.mxu0 %v14251_v44  ;;  %v14264_v0 = vld [vmem:[%s19581_s24 + $0x998] ss:$24 sps:$4 sm:$0xff]  }
 0x300   : > { %v14267_v44 = vld [vmem:[%s19581_s24 + $0x9a0] ss:$24 sps:$4 sm:$0xff]  }
 0x301   : > { %4041 = vmatpush1.bf16.msra.mxu1 %v14246_v63  ;;  %4167 = vmatpush1.bf16.msra.mxu0 %v14249_v24  ;;  %v14275_v63 = vld [vmem:[%s19581_s24 + $0x974] ss:$24 sps:$4 sm:$0xff]   ;;  %v14270_v24 = vld [vmem:[%s19581_s24 + $0x968] ss:$24 sps:$4 sm:$0xff]  }
 0x302   : > { %4042 = vmatprep.subr.bf16.mxu1 %v14254_v17  ;;  %4168 = vmatprep.subr.bf16.mxu0 %v14257_v19  ;;  %v14273_v17 = vld [vmem:[%s19581_s24 + $0x970] ss:$24 sps:$4 sm:$0xff]   ;;  %v14278_v19 = vld [vmem:[%s19581_s24 + $0x93c] ss:$24 sps:$4 sm:$0xff]  }
 0x305   : > { %4043 = vmatpush1.bf16.msra.mxu1 %v14252_v23  ;;  %4169 = vmatpush1.bf16.msra.mxu0 %v14255_v5  ;;  %v14281_v23 = vld [vmem:[%s19581_s24 + $0x944] ss:$24 sps:$4 sm:$0xff]   ;;  %v14276_v5 = vld [vmem:[%s19581_s24 + $0x938] ss:$24 sps:$4 sm:$0xff]  }
 0x306   : > { %4044 = vmatprep.subr.bf16.mxu1 %v14260_v60  ;;  %4170 = vmatprep.subr.bf16.mxu0 %v14263_v12  ;;  %v14279_v60 = vld [vmem:[%s19581_s24 + $0x940] ss:$24 sps:$4 sm:$0xff]   ;;  %v14284_v12 = vld [vmem:[%s19581_s24 + $0x90c] ss:$24 sps:$4 sm:$0xff]  }
 0x309   : > { %4045 = vmatpush1.bf16.msra.mxu1 %v14258_v11  ;;  %4171 = vmatpush1.bf16.msra.mxu0 %v14261_v43  ;;  %v14287_v11 = vld [vmem:[%s19581_s24 + $0x914] ss:$24 sps:$4 sm:$0xff]   ;;  %v14282_v43 = vld [vmem:[%s19581_s24 + $0x908] ss:$24 sps:$4 sm:$0xff]  }
 0x30a   : > { %4046 = vmatprep.subr.bf16.mxu1 %v14266_v41  ;;  %4172 = vmatprep.subr.bf16.mxu0 %v14269_v8  ;;  %v14285_v41 = vld [vmem:[%s19581_s24 + $0x910] ss:$24 sps:$4 sm:$0xff]   ;;  %v14290_v8 = vld [vmem:[%s19581_s24 + $0x8dc] ss:$24 sps:$4 sm:$0xff]  }
 0x30d   : > { %4047 = vmatpush2.bf16.msra.mxu1 %v14264_v0  ;;  %4173 = vmatpush2.bf16.msra.mxu0 %v14267_v44  ;;  %v14293_v0 = vld [vmem:[%s19581_s24 + $0x8e4] ss:$24 sps:$4 sm:$0xff]   ;;  %v14288_v44 = vld [vmem:[%s19581_s24 + $0x8d8] ss:$24 sps:$4 sm:$0xff]  }
 0x30e   : > { %4048 = vmatprep.subr.bf16.mxu1 %v14272_v57  ;;  %4174 = vmatprep.subr.bf16.mxu0 %v14275_v63  ;;  %v14291_v57 = vld [vmem:[%s19581_s24 + $0x8e0] ss:$24 sps:$4 sm:$0xff]   ;;  %v14296_v63 = vld [vmem:[%s19581_s24 + $0x8ac] ss:$24 sps:$4 sm:$0xff]  }
 0x311   : > { %4049 = vmatpush2.bf16.msra.mxu1 %v14270_v24  ;;  %4175 = vmatpush2.bf16.msra.mxu0 %v14273_v17  ;;  %v14299_v24 = vld [vmem:[%s19581_s24 + $0x8b4] ss:$24 sps:$4 sm:$0xff]   ;;  %v14294_v17 = vld [vmem:[%s19581_s24 + $0x8a8] ss:$24 sps:$4 sm:$0xff]  }
 0x312   : > { %4050 = vmatprep.subr.bf16.mxu1 %v14278_v19  ;;  %4176 = vmatprep.subr.bf16.mxu0 %v14281_v23  ;;  %v14297_v19 = vld [vmem:[%s19581_s24 + $0x8b0] ss:$24 sps:$4 sm:$0xff]   ;;  %v14302_v23 = vld [vmem:[%s19581_s24 + $0x87c] ss:$24 sps:$4 sm:$0xff]  }
 0x315   : > { %4051 = vmatpush2.bf16.msra.mxu1 %v14276_v5  ;;  %4177 = vmatpush2.bf16.msra.mxu0 %v14279_v60  ;;  %v14305_v5 = vld [vmem:[%s19581_s24 + $0x884] ss:$24 sps:$4 sm:$0xff]   ;;  %v14300_v60 = vld [vmem:[%s19581_s24 + $0x878] ss:$24 sps:$4 sm:$0xff]  }
 0x316   : > { %4052 = vmatprep.subr.bf16.mxu1 %v14284_v12  ;;  %4178 = vmatprep.subr.bf16.mxu0 %v14287_v11  ;;  %v14303_v12 = vld [vmem:[%s19581_s24 + $0x880] ss:$24 sps:$4 sm:$0xff]   ;;  %v14308_v11 = vld [vmem:[%s19581_s24 + $0x84c] ss:$24 sps:$4 sm:$0xff]  }
 0x319   : > { %4053 = vmatpush2.bf16.msra.mxu1 %v14282_v43  ;;  %4179 = vmatpush2.bf16.msra.mxu0 %v14285_v41  ;;  %v14311_v43 = vld [vmem:[%s19581_s24 + $0x854] ss:$24 sps:$4 sm:$0xff]   ;;  %v14306_v41 = vld [vmem:[%s19581_s24 + $0x848] ss:$24 sps:$4 sm:$0xff]  }
 0x31a   : > { %4054 = vmatprep.subr.bf16.mxu1 %v14290_v8  ;;  %4180 = vmatprep.subr.bf16.mxu0 %v14293_v0  ;;  %v14309_v8 = vld [vmem:[%s19581_s24 + $0x850] ss:$24 sps:$4 sm:$0xff]   ;;  %v14314_v0 = vld [vmem:[%s19581_s24 + $0xa04] ss:$24 sps:$4 sm:$0xff]  }
 0x31d   : > { %4055 = vmatpush2.bf16.msra.mxu1 %v14288_v44  ;;  %4181 = vmatpush2.bf16.msra.mxu0 %v14291_v57  ;;  %v14312_v44 = vld [vmem:[%s19581_s24 + $0xa00] ss:$24 sps:$4 sm:$0xff]   ;;  %v14317_v57 = vld [vmem:[%s19581_s24 + $0x9d4] ss:$24 sps:$4 sm:$0xff]  }
 0x31e   : > { %4056 = vmatprep.subr.bf16.mxu1 %v14296_v63  ;;  %4182 = vmatprep.subr.bf16.mxu0 %v14299_v24  ;;  %v14315_v63 = vld [vmem:[%s19581_s24 + $0x9d0] ss:$24 sps:$4 sm:$0xff]   ;;  %v4320_v24 = vlaneseq }
 0x321   : > { %4057 = vmatpush2.bf16.msra.mxu1 %v14294_v17  ;;  %4183 = vmatpush2.bf16.msra.mxu0 %v14297_v19  ;;  %v16924_v17 = vshrl.u32 %v4320_v24, 7 }
 0x322   : > { %4058 = vmatprep.subr.bf16.mxu1 %v14302_v23  ;;  %4184 = vmatprep.subr.bf16.mxu0 %v14305_v5 }
 0x325   : > { %4059 = vmatpush2.bf16.msra.mxu1 %v14300_v60  ;;  %4185 = vmatpush2.bf16.msra.mxu0 %v14303_v12 }
 0x326   : > { %4060 = vmatprep.subr.bf16.mxu1 %v14308_v11  ;;  %4186 = vmatprep.subr.bf16.mxu0 %v14311_v43 }
 0x329   : > { %4061 = vmatpush2.bf16.msra.mxu1 %v14306_v41  ;;  %4187 = vmatpush2.bf16.msra.mxu0 %v14309_v8 }
 0x32a   : > { %4231 = vmatprep.subr.bf16.mxu1 %v14314_v0 }
 0x32c   : > { %4063 = vmatmul.mubr.bf16.vlgmr.msra.gmra.mxu1 %v16611_v27  ;;  %4189 = vmatmul.mubr.bf16.vlgmr.msra.gmra.mxu0 %v16611_v27 }
 0x32d   : > { %4072 = vmatprep.mubr.bf16.mxu1 %v16637_v26  ;;  %4198 = vmatprep.mubr.bf16.mxu0 %v16637_v26 }
 0x32e   : > { %4232 = vmatpush1.bf16.msra.mxu1 %v14312_v44 }
 0x32f   : > { %4233 = vmatprep.subr.bf16.mxu1 %v14317_v57 }
 0x332   : > { %4234 = vmatpush1.bf16.msra.mxu1 %v14315_v63 }
 0x334   : > { %4073 = vmatmul.mubr.bf16.gmra.mxu1 %v16635_v49  ;;  %4199 = vmatmul.mubr.bf16.gmra.mxu0 %v16635_v49 }
 0x335   : > { %4082 = vmatprep.mubr.bf16.mxu1 %v16654_v16  ;;  %4208 = vmatprep.mubr.bf16.mxu0 %v16654_v16 }
 0x33c   : > { %4083 = vmatmul.mubr.bf16.gmra.mxu1 %v16652_v3  ;;  %4209 = vmatmul.mubr.bf16.gmra.mxu0 %v16652_v3 }
 0x33d   : > { %4251 = vmatprep.mubr.bf16.mxu1 %v19608_v47  ;;  %4683 = vmatprep.mubr.bf16.mxu0 %v19608_v47 }
 0x344   : > { %12082 = vmatmul.mubr.msk.bf16.vlgmr.msra.gmra.mxu1 %vm1771_vm2, %v16685_v48 }
 0x345   : > { %4261 = vmatprep.mubr.bf16.mxu1 %v19608_v47 }
 0x34c   : > { %12083 = vmatmul.mubr.msk.bf16.gmra.mxu1 %vm1771_vm2, %v16717_v2  ;;  %v19563_v2 = vsub.s32 0, %v16924_v17 }
 0x34d   : > { %4271 = vmatprep.mubr.bf16.mxu1 %v19608_v47 }
 0x354   : > { %12084 = vmatmul.mubr.msk.bf16.gmra.mxu1 %vm1771_vm2, %v16749_v34  ;;  %v16930_v34 = vld [vmem:[%s19612_s3] sm:$0x3f]  ;;  %s11389_s3 = scalar_lea.sflag [#allocation3], %s566_s19 }
 0x355   : > { %4512 = vmatprep.mubr.bf16.mxu1 %v19608_v47  ;;  %v4323_v43 = vrot.slane %v16930_v34, %v19563_v2 }
 0x38c   : > { %v3938_v49 = vpop.f32.mrf.mxu0 }
 0x38e   : > { %v16922_v26 = vpop.f32.mrf.mxu0 }
 0x390   : > { %v3942_v27 = vpop.f32.mrf.mxu0 }
 0x392   : > { %v3944_v3 = vpop.f32.mrf.mxu0 }
 0x394   : > { %v3948_v16 = vpop.f32.mrf.mxu0 }
 0x396   : > { %v3950_v48 = vpop.f32.mrf.mxu0 }
 0x398   : > { %v3952_v19 = vpop.f32.mrf.mxu0 }
 0x39a   : > { %v3954_v60 = vpop.f32.mrf.mxu0 }
 0x39c   : > { %v3958_v0 = vpop.f32.mrf.mxu0 }
 0x39e   : > { %v3960_v54 = vpop.f32.mrf.mxu0 }
 0x3ac   : > { %v4001_v23 = vpop.f32.mrf.mxu1 }
 0x3ad   : > { %v4002_v5 = vadd.f32 %v4001_v23, %v3938_v49 }
 0x3ae   : > { %v4003_v12 = vpop.f32.mrf.mxu1 }
 0x3af   : > { %v4282_v11 = vadd.f32 %v4002_v5, %v16528_v6 }
 0x3b0   : > { %v4005_v41 = vpop.f32.mrf.mxu1 }
 0x3b1   : > { %v4006_v8 = vadd.f32 %v4005_v41, %v3942_v27  ;;  %v4350_v57 = vadd.f32 %v4323_v43, %v4282_v11  ;;  %v1895_v27 = vadd.f32 %v16225_v55, %v16238_v61  ;;  %v3962_v41 = vpop.f32.mrf.mxu0  ;;  %v4326_v55 = vsub.s32 1, %v16924_v17 }
 0x3b2   : > { %v4007_v44 = vpop.f32.mrf.mxu1 }
 0x3b3   : > { %v4288_v63 = vadd.f32 %v4006_v8, %v16536_v9  ;;  %v4386_v23 = vmax.f32 %v4350_v57, 0.0  ;;  %v2759_v8 = vadd.f32 %v16547_v13, %v1895_v27 }
 0x3b4   : > { %v4011_v24 = vpop.f32.mrf.mxu1 }
 0x3b5   : > { %v4356_v58 = vadd.f32 %v4323_v43, %v4288_v63  ;;  %v4012_v62 = vadd.f32 %v4011_v24, %v3948_v16  ;;  %v1905_v16 = vadd.f32 %v16348_v7, %v16299_v33  ;;  %v2822_v13 = vadd.f32 %v16539_v35, %v2759_v8 }
 0x3b6   : > { %v4013_v49 = vpop.f32.mrf.mxu1 }
 0x3b7   : > { %v4392_v53 = vmax.f32 %v4356_v58, 0.0  ;;  %v4294_v6 = vadd.f32 %v4012_v62, %v16541_v30  ;;  %v1885_v62 = vadd.f32 %v16199_v36, %v16211_v46 }
 0x3b8   : > { %v4015_v5 = vpop.f32.mrf.mxu1 }
 0x3b9   : > { %v16938_v1 = vpack.c.bf16 %v4392_v53, %v4386_v23  ;;  %v4016_v2 = vadd.f32 %v4015_v5, %v3952_v19  ;;  %v4362_v11 = vadd.f32 %v4323_v43, %v4294_v6  ;;  %v2769_v53 = vadd.f32 %v16558_v21, %v1905_v16  ;;  %v3964_v19 = vpop.f32.mrf.mxu0 }
 0x3ba   : > { %v4017_v18 = vpop.f32.mrf.mxu1  ;;  %v2749_v7 = vadd.f32 %v16534_v40, %v1885_v62  ;;  %v4014_v23 = vadd.f32 %v4013_v49, %v3950_v48 }
 0x3bb   : > { %v4300_v9 = vadd.f32 %v4016_v2, %v16549_v50  ;;  %v4398_v61 = vmax.f32 %v4362_v11, 0.0  ;;  %v4018_v50 = vadd.f32 %v4017_v18, %v3954_v60  ;;  %v2832_v21 = vadd.f32 %v16562_v31, %v2769_v53  ;;  %v16955_v5 = vpop.f32.mrf.mxu0 }
 0x3bc   : > { %v4021_v58 = vpop.f32.mrf.mxu1  ;;  %v4327_v18 = vrot.slane %v16930_v34, %v4326_v55  ;;  %v2812_v48 = vadd.f32 %v16523_v38, %v2749_v7  ;;  %v4295_v31 = vadd.f32 %v4014_v23, %v16544_v59 }
 0x3bd   : > { %v4368_v57 = vadd.f32 %v4323_v43, %v4300_v9  ;;  %v4022_v30 = vadd.f32 %v4021_v58, %v3958_v0  ;;  %v4301_v60 = vadd.f32 %v4018_v50, %v2822_v13  ;;  %v16964_v9 = vpop.f32.mrf.mxu0 }
 0x3be   : > { %v4023_v63 = vpop.f32.mrf.mxu1 }
 0x3bf   : > { %v4404_v24 = vmax.f32 %v4368_v57, 0.0  ;;  %v4306_v2 = vadd.f32 %v4022_v30, %v16552_v29  ;;  %v4024_v33 = vadd.f32 %v4023_v63, %v3960_v54  ;;  %v4008_v29 = vadd.f32 %v4007_v44, %v3944_v3  ;;  %v4131_v62 = vpop.f32.mrf.mxu0 }
 0x3c0   : > { %v4025_v0 = vpop.f32.mrf.mxu1  ;;  %v4369_v3 = vadd.f32 %v4327_v18, %v4301_v60  ;;  %v15238_v57 = vmov 65535  }
 0x3c1   : > { %v4431_v6 = vpack.c.bf16 %v4404_v24, %v4398_v61  ;;  %v4307_v36 = vadd.f32 %v4024_v33, %v16555_v15  ;;  %v4026_v46 = vadd.f32 %v4025_v0, %v3962_v41  ;;  %v4374_v40 = vadd.f32 %v4323_v43, %v4306_v2  ;;  %v16971_v2 = vpop.f32.mrf.mxu0 }
 0x3c2   : > { %v4027_v54 = vpop.f32.mrf.mxu1  ;;  %v4004_v15 = vadd.f32 %v4003_v12, %v16922_v26  ;;  %v4289_v16 = vadd.f32 %v4008_v29, %v2812_v48  ;;  %v4460_v38 = vsel %vm4458_vm3, 4294967295, %v15238_v57  ;;  %v4363_v26 = vadd.f32 %v4327_v18, %v4295_v31  ;;  %v16997_v29 = vld [vmem:[%s19613_s4 + $0x8] ss:$0 sps:$4 sm:$0xff]  }
 0x3c3   : > { %v4312_v35 = vadd.f32 %v4026_v46, %v16560_v37  ;;  %v4028_v27 = vadd.f32 %v4027_v54, %v3964_v19  ;;  %v4375_v49 = vadd.f32 %v4327_v18, %v4307_v36  ;;  %v4410_v44 = vmax.f32 %v4374_v40, 0.0  ;;  %v4137_v13 = vpop.f32.mrf.mxu0  ;;  %v16979_v46 = vld [vmem:[%s19613_s4] sm:$0xff]  }
 0x3c4   : > { %v4283_v37 = vadd.f32 %v4004_v15, %v16531_v20  ;;  %v16968_v19 = vsel %vm4459_vm4, %v4460_v38, 0  ;;  %v4405_v61 = vmax.f32 %v4369_v3, 0.0  ;;  %v4399_v24 = vmax.f32 %v4363_v26, 0.0 }
 0x3c5   : > { %v4380_v41 = vadd.f32 %v4323_v43, %v4312_v35  ;;  %v4313_v11 = vadd.f32 %v4028_v27, %v2832_v21  ;;  %v4411_v12 = vmax.f32 %v4375_v49, 0.0  ;;  %v4357_v43 = vadd.f32 %v4327_v18, %v4289_v16  ;;  %v16974_v36 = vpop.f32.mrf.mxu0  ;;  %v16984_v21 = vld [vmem:[%s19613_s4 + $0xc] sm:$0xff]  }
 0x3c6   : > { %v4351_v63 = vadd.f32 %v4327_v18, %v4283_v37  ;;  %v4432_v33 = vpack.c.bf16 %v4405_v61, %v4399_v24  ;;  %v4330_v35 = vsub.s32 2, %v16924_v17 }
 0x3c7   : > { %v4416_v8 = vmax.f32 %v4380_v41, 0.0  ;;  %v4381_v58 = vadd.f32 %v4327_v18, %v4313_v11  ;;  %v4393_v7 = vmax.f32 %v4357_v43, 0.0  ;;  %v4141_v18 = vpop.f32.mrf.mxu0 }
 0x3c8   : > { %v4387_v0 = vmax.f32 %v4351_v63, 0.0  ;;  %v4331_v11 = vrot.slane %v16930_v34, %v4330_v35 }
 0x3c9   : > { %v4437_v30 = vpack.c.bf16 %v4416_v8, %v4410_v44  ;;  %v4417_v59 = vmax.f32 %v4381_v58, 0.0 }
 0x3ca   : > { %v4426_v23 = vpack.c.bf16 %v4393_v7, %v4387_v0  ;;  %v19615_v0 = vld [vmem:[#allocation25_spill] sm:$0xff] }
 0x3cb   : > { %v4438_v53 = vpack.c.bf16 %v4417_v59, %v4411_v12  ;;  %v4463_v20 = vand.u32 %v16968_v19, %v4437_v30 }
 0x3cd   : > { %v4466_v50 = vand.u32 %v16968_v19, %v4438_v53 }
 0x3cf   : > { %4490 = vmatprep.subr.bf16.mxu1 %v4466_v50  ;;  %4661 = vmatprep.subr.bf16.mxu0 %v4466_v50 }
 0x3d0   : > { %4491 = vmatpush1.bf16.msra.mxu1 %v4463_v20  ;;  %4662 = vmatpush1.bf16.msra.mxu0 %v4463_v20 }
 0x3d1   : > { %4492 = vmatprep.subr.bf16.mxu1 %v4432_v33  ;;  %4663 = vmatprep.subr.bf16.mxu0 %v4432_v33  ;;  %v19614_v33 = vld [vmem:[#allocation13_spill] sm:$0xff] }
 0x3d2   : > { %v2031_v7 = vadd.f32 %v19614_v33, %v16425_v51 }
 0x3d4   : > { %4493 = vmatpush1.bf16.msra.mxu1 %v4431_v6  ;;  %4664 = vmatpush1.bf16.msra.mxu0 %v4431_v6  ;;  %v4143_v6 = vpop.f32.mrf.mxu0 }
 0x3d5   : > { %4494 = vmatprep.subr.bf16.mxu1 %v4426_v23  ;;  %4665 = vmatprep.subr.bf16.mxu0 %v4426_v23 }
 0x3d6   : > { %v4147_v54 = vpop.f32.mrf.mxu0 }
 0x3d8   : > { %4495 = vmatpush1.bf16.msra.mxu1 %v16938_v1  ;;  %4666 = vmatpush1.bf16.msra.mxu0 %v16938_v1  ;;  %v17002_v1 = vld [vmem:[%s19613_s4 + $0x14] ss:$0 sps:$4 sm:$0xff]   ;;  %v4149_v60 = vpop.f32.mrf.mxu0  ;;  %s15173_s4 = scalar_lea.vmem %s11402_s22, 16 }
 0x3d9   : > { %p15174_p11 = scmp.ne.s32.totalorder %s11402_s22, %s15173_s4  ;;  %p15181_p1 = scmp.lt.s32.totalorder %s15179_s0, %s15173_s4 }
 0x3da   : > { %v4151_v40 = vpop.f32.mrf.mxu0 }
 0x3db   : > { %12087 = vmatmul.mubr.msk.bf16.vlgmr.msra.gmra.mxu1 %vm4451_vm5, %v16979_v46  ;;  %12098 = vmatmul.mubr.msk.bf16.vlgmr.msra.gmra.mxu0 %vm4451_vm5, %v16984_v21  ;;  %p15175_p12 = pnand %p15174_p11, %p15373_p5  ;;  %p15182_p2 = por %p15181_p1, %p15180_p0 }
 0x3dc   : > { %4522 = vmatprep.mubr.bf16.mxu1 %v19608_v47  ;;  %4693 = vmatprep.mubr.bf16.mxu0 %v19608_v47  ;;  %v4153_v27 = vpop.f32.mrf.mxu0 }
 0x3dd   : > { %p15176_p13 = pneg %p15175_p12 }
 0x3df   : > { %p15183_p3 = pnand %p15182_p2, %p15176_p13 }
 0x3e3   : > { %12088 = vmatmul.mubr.msk.bf16.gmra.mxu1 %vm4451_vm5, %v16997_v29  ;;  %12099 = vmatmul.mubr.msk.bf16.gmra.mxu0 %vm4451_vm5, %v17002_v1 }
 0x3e4   : > { %4563 = vmatprep.mubr.bf16.mxu1 %v19608_v47  ;;  %4785 = vmatprep.mubr.bf16.mxu0 %v19608_v47 }
 0x3ec   : > { %v4064_v48 = vpop.f32.mrf.mxu1  ;;  %v17012_v31 = vpop.f32.mrf.mxu0 }
 0x3ed   : > { %v4128_v15 = vadd.f32 %v16955_v5, %v4064_v48 }
 0x3ee   : > { %v4066_v49 = vpop.f32.mrf.mxu1  ;;  %v17018_v44 = vpop.f32.mrf.mxu0 }
 0x3ef   : > { %v4284_v41 = vadd.f32 %v4128_v15, %v16567_v52  ;;  %v19616_v15 = vld [vmem:[#allocation12_spill] sm:$0xff] }
 0x3f0   : > { %v4068_v16 = vpop.f32.mrf.mxu1  ;;  %v17021_v12 = vpop.f32.mrf.mxu0 }
 0x3f1   : > { %v4132_v3 = vadd.f32 %v4131_v62, %v4068_v16  ;;  %v4352_v58 = vadd.f32 %v4331_v11, %v4284_v41  ;;  %v19617_v41 = vld [vmem:[#allocation11_spill] sm:$0xff]  ;;  %v19618_v16 = vld [vmem:[#allocation28_spill] sm:$0xff] }
 0x3f2   : > { %v4070_v8 = vpop.f32.mrf.mxu1  ;;  %v17026_v63 = vpop.f32.mrf.mxu0 }
 0x3f3   : > { %v4290_v37 = vadd.f32 %v4132_v3, %v16575_v56  ;;  %v4388_v59 = vmax.f32 %v4352_v58, 0.0  ;;  %v2021_v56 = vadd.f32 %v16380_v4, %v16401_v28  ;;  %v2895_v3 = vadd.f32 %v19618_v16, %v2031_v7  ;;  %v19626_v16 = vld [vmem:[#allocation24_spill] sm:$0xff] }
 0x3f4   : > { %v4074_v38 = vpop.f32.mrf.mxu1  ;;  %v4334_v58 = vsub.s32 3, %v16924_v17 }
 0x3f5   : > { %v4358_v26 = vadd.f32 %v4331_v11, %v4290_v37  ;;  %v4138_v5 = vadd.f32 %v4137_v13, %v4074_v38  ;;  %v2885_v23 = vadd.f32 %v19615_v0, %v2021_v56  ;;  %v4200_v38 = vpop.f32.mrf.mxu0 }
 0x3f6   : > { %v4076_v30 = vpop.f32.mrf.mxu1  ;;  %v4335_v0 = vrot.slane %v16930_v34, %v4334_v58 }
 0x3f7   : > { %v4394_v52 = vmax.f32 %v4358_v26, 0.0  ;;  %v4296_v43 = vadd.f32 %v4138_v5, %v16580_v22  ;;  %v19619_v26 = vld [vmem:[#allocation26_spill] sm:$0xff] }
 0x3f8   : > { %v4078_v53 = vpop.f32.mrf.mxu1 }
 0x3f9   : > { %v17024_v61 = vpack.c.bf16 %v4394_v52, %v4388_v59  ;;  %v4142_v62 = vadd.f32 %v4141_v18, %v4078_v53  ;;  %v4364_v24 = vadd.f32 %v4331_v11, %v4296_v43  ;;  %v2011_v18 = vadd.f32 %v19617_v41, %v19616_v15  ;;  %v19620_v59 = vld [vmem:[#allocation22_spill] sm:$0xff]  ;;  %v19621_v53 = vld [vmem:[#allocation23_spill] sm:$0xff] }
 0x3fa   : > { %v4080_v50 = vpop.f32.mrf.mxu1  ;;  %v4140_v43 = vadd.f32 %v16974_v36, %v4076_v30  ;;  %v19624_v36 = vld [vmem:[#allocation29_spill] sm:$0xff] }
 0x3fb   : > { %v4302_v20 = vadd.f32 %v4142_v62, %v16588_v14  ;;  %v4400_v37 = vmax.f32 %v4364_v24, 0.0  ;;  %v4144_v14 = vadd.f32 %v4143_v6, %v4080_v50  ;;  %v2875_v52 = vadd.f32 %v19620_v59, %v2011_v18  ;;  %v19623_v24 = vld [vmem:[#allocation33_spill] sm:$0xff]  ;;  %v17048_v50 = vpop.f32.mrf.mxu0 }
 0x3fc   : > { %v4084_v13 = vpop.f32.mrf.mxu1  ;;  %v2948_v62 = vadd.f32 %v19621_v53, %v2885_v23  ;;  %v4134_v6 = vadd.f32 %v16971_v2, %v4070_v8  ;;  %v19625_v23 = vld [vmem:[#allocation20_spill] sm:$0xff]  ;;  %v4130_v18 = vadd.f32 %v16964_v9, %v4066_v49 }
 0x3fd   : > { %v4370_v22 = vadd.f32 %v4331_v11, %v4302_v20  ;;  %v4148_v48 = vadd.f32 %v4147_v54, %v4084_v13  ;;  %v19622_v20 = vld [vmem:[#allocation27_spill] sm:$0xff]  ;;  %v2958_v13 = vadd.f32 %v19623_v24, %v2895_v3  ;;  %v2938_v41 = vadd.f32 %v19625_v23, %v2875_v52  ;;  %v19627_v52 = vld [vmem:[#allocation21_spill] sm:$0xff] }
 0x3fe   : > { %v4086_v4 = vpop.f32.mrf.mxu1  ;;  %v4338_v3 = vsub.s32 4, %v16924_v17  ;;  %v4285_v9 = vadd.f32 %v4130_v18, %v19627_v52  ;;  %v19630_v52 = vld [vmem:[#allocation18_spill] sm:$0xff] }
 0x3ff   : > { %v4406_v28 = vmax.f32 %v4370_v22, 0.0  ;;  %v4308_v5 = vadd.f32 %v4148_v48, %v19619_v26  ;;  %v4150_v51 = vadd.f32 %v4149_v60, %v4086_v4  ;;  %v4303_v22 = vadd.f32 %v4144_v14, %v2948_v62  ;;  %v4204_v14 = vpop.f32.mrf.mxu0 }
 0x400   : > { %v4088_v54 = vpop.f32.mrf.mxu1 }
 0x401   : > { %v17042_v56 = vpack.c.bf16 %v4406_v28, %v4400_v37  ;;  %v4309_v33 = vadd.f32 %v4150_v51, %v19622_v20  ;;  %v4152_v7 = vadd.f32 %v4151_v40, %v4088_v54  ;;  %v4376_v48 = vadd.f32 %v4331_v11, %v4308_v5  ;;  %v4206_v20 = vpop.f32.mrf.mxu0 }
 0x402   : > { %v4090_v60 = vpop.f32.mrf.mxu1  ;;  %v4297_v40 = vadd.f32 %v4140_v43, %v19626_v16  ;;  %v4291_v28 = vadd.f32 %v4134_v6, %v2938_v41  ;;  %v4371_v5 = vadd.f32 %v4335_v0, %v4303_v22  ;;  %v17061_v43 = vrot.slane %v16930_v34, %v4338_v3 }
 0x403   : > { %v4314_v30 = vadd.f32 %v4152_v7, %v19624_v36  ;;  %v4154_v15 = vadd.f32 %v4153_v27, %v4090_v60  ;;  %v4377_v58 = vadd.f32 %v4335_v0, %v4309_v33  ;;  %v4412_v27 = vmax.f32 %v4376_v48, 0.0  ;;  %v4210_v23 = vpop.f32.mrf.mxu0 }
 0x404   : > { %v4253_v37 = vpop.f32.mrf.mxu1  ;;  %v4359_v24 = vadd.f32 %v4335_v0, %v4291_v28  ;;  %v4407_v6 = vmax.f32 %v4371_v5, 0.0  ;;  %v4353_v48 = vadd.f32 %v4335_v0, %v4285_v9  ;;  %v19631_v9 = vld [vmem:[#allocation19_spill] sm:$0xff] }
 0x405   : > { %v4382_v4 = vadd.f32 %v4331_v11, %v4314_v30  ;;  %v4315_v2 = vadd.f32 %v4154_v15, %v2958_v13  ;;  %v4254_v8 = vadd.f32 %v4253_v37, %v17012_v31  ;;  %v4365_v11 = vadd.f32 %v4335_v0, %v4297_v40  ;;  %v4212_v28 = vpop.f32.mrf.mxu0 }
 0x406   : > { %v17056_v26 = vpop.f32.mrf.mxu1  ;;  %v4413_v53 = vmax.f32 %v4377_v58, 0.0  ;;  %v4389_v3 = vmax.f32 %v4353_v48, 0.0 }
 0x407   : > { %v4418_v51 = vmax.f32 %v4382_v4, 0.0  ;;  %v4383_v59 = vadd.f32 %v4335_v0, %v4315_v2  ;;  %v4286_v49 = vadd.f32 %v4254_v8, %v16632_v42  ;;  %v4401_v36 = vmax.f32 %v4365_v11, 0.0  ;;  %v19628_v4 = vld [vmem:[#allocation17_spill] sm:$0xff]  ;;  %v19629_v2 = vld [vmem:[#allocation16_spill] sm:$0xff] }
 0x408   : > { %v4257_v54 = vpop.f32.mrf.mxu1  ;;  %v2147_v8 = vadd.f32 %v19629_v2, %v19628_v4 }
 0x409   : > { %v4439_v62 = vpack.c.bf16 %v4418_v51, %v4412_v27  ;;  %v4419_v31 = vmax.f32 %v4383_v59, 0.0  ;;  %v4258_v33 = vadd.f32 %v4257_v54, %v17021_v12  ;;  %v4354_v60 = vadd.f32 %v17061_v43, %v4286_v49 }
 0x40a   : > { %v4259_v7 = vpop.f32.mrf.mxu1  ;;  %v17075_v40 = vpack.c.bf16 %v4407_v6, %v4401_v36  ;;  %v2157_v49 = vadd.f32 %v19631_v9, %v19630_v52 }
 0x40b   : > { %v4440_v13 = vpack.c.bf16 %v4419_v31, %v4413_v53  ;;  %v4292_v22 = vadd.f32 %v4258_v33, %v16645_v25  ;;  %v17071_v12 = vand.u32 %v16968_v19, %v4439_v62  ;;  %v4395_v25 = vmax.f32 %v4359_v24, 0.0  ;;  %v19632_v62 = vld [vmem:[#allocation15_spill] sm:$0xff]  ;;  %v19633_v31 = vld [vmem:[#allocation14_spill] sm:$0xff]  ;;  %v4214_v24 = vpop.f32.mrf.mxu0 }
 0x40c   : > { %v4263_v42 = vpop.f32.mrf.mxu1  ;;  %v4390_v0 = vmax.f32 %v4354_v60, 0.0  ;;  %v2137_v33 = vadd.f32 %v19633_v31, %v19632_v62 }
 0x40d   : > { %v4264_v30 = vadd.f32 %v4263_v42, %v4200_v38  ;;  %v17067_v15 = vand.u32 %v16968_v19, %v4440_v13  ;;  %v4360_v41 = vadd.f32 %v17061_v43, %v4292_v22  ;;  %v17085_v59 = vpack.c.bf16 %v4395_v25, %v4389_v3  ;;  %v19634_v42 = vld [vmem:[#allocation37_spill] sm:$0xff]  ;;  %v4216_v2 = vpop.f32.mrf.mxu0 }
 0x40e   : > { %v4265_v18 = vpop.f32.mrf.mxu1  ;;  %v4342_v13 = vsub.s32 5, %v16924_v17 }
 0x40f   : > { %v4298_v16 = vadd.f32 %v4264_v30, %v16649_v45  ;;  %4541 = vmatprep.subr.bf16.mxu1 %v17067_v15  ;;  %v4396_v37 = vmax.f32 %v4360_v41, 0.0  ;;  %v19635_v30 = vld [vmem:[#allocation35_spill] sm:$0xff] }
 0x410   : > { %v4267_v38 = vpop.f32.mrf.mxu1  ;;  %4542 = vmatpush1.bf16.msra.mxu1 %v17071_v12  ;;  %v3001_v41 = vadd.f32 %v19635_v30, %v2137_v33 }
 0x411   : > { %v4268_v58 = vadd.f32 %v4267_v38, %v4204_v14  ;;  %4543 = vmatprep.subr.bf16.mxu1 %v17075_v40  ;;  %v17081_v5 = vpack.c.bf16 %v4396_v37, %v4390_v0  ;;  %v4366_v45 = vadd.f32 %v17061_v43, %v4298_v16  ;;  %v3011_v14 = vadd.f32 %v16659_v39, %v2147_v8  ;;  %v19637_v37 = vld [vmem:[#allocation38_spill] sm:$0xff] }
 0x412   : > { %v4269_v27 = vpop.f32.mrf.mxu1  ;;  %v4266_v0 = vadd.f32 %v4265_v18, %v17048_v50  ;;  %v4260_v8 = vadd.f32 %v4259_v7, %v17026_v63  ;;  %v19640_v50 = vld [vmem:[#allocation30_spill] sm:$0xff] }
 0x413   : > { %v4304_v51 = vadd.f32 %v4268_v58, %v16662_v32  ;;  %v3021_v32 = vadd.f32 %v16674_v10, %v2157_v49  ;;  %v4402_v6 = vmax.f32 %v4366_v45, 0.0  ;;  %v4270_v39 = vadd.f32 %v4269_v27, %v4206_v20  ;;  %v19638_v58 = vld [vmem:[#allocation32_spill] sm:$0xff] }
 0x414   : > { %v4273_v54 = vpop.f32.mrf.mxu1  ;;  %4544 = vmatpush1.bf16.msra.mxu1 %v17042_v56  ;;  %v4343_v20 = vrot.slane %v16930_v34, %v4342_v13  ;;  %v3064_v18 = vadd.f32 %v19640_v50, %v3001_v41  ;;  %v4256_v49 = vadd.f32 %v17056_v26, %v17018_v44  ;;  %v19641_v34 = vld [vmem:[#allocation36_spill] sm:$0xff] }
 0x415   : > { %v4372_v11 = vadd.f32 %v17061_v43, %v4304_v51  ;;  %v4274_v53 = vadd.f32 %v4273_v54, %v4210_v23  ;;  %4545 = vmatprep.subr.bf16.mxu1 %v17085_v59  ;;  %v19636_v23 = vld [vmem:[#allocation31_spill] sm:$0xff]  ;;  %v3084_v4 = vadd.f32 %v19638_v58, %v3021_v32  ;;  %v19642_v32 = vld [vmem:[#allocation34_spill] sm:$0xff] }
 0x416   : > { %v4275_v60 = vpop.f32.mrf.mxu1  ;;  %v3074_v16 = vadd.f32 %v19636_v23, %v3011_v14  ;;  %v19639_v51 = vld [vmem:[#allocation39_spill] sm:$0xff]  ;;  %v4299_v14 = vadd.f32 %v4266_v0, %v19641_v34  ;;  %v14325_v0 = vld [vmem:[%s19536_s5 + $0x90] ss:$12 sps:$4 sm:$0xff]  }
 0x417   : > { %v4408_v22 = vmax.f32 %v4372_v11, 0.0  ;;  %v4310_v48 = vadd.f32 %v4274_v53, %v19634_v42  ;;  %v4276_v36 = vadd.f32 %v4275_v60, %v4212_v28  ;;  %v4293_v11 = vadd.f32 %v4260_v8, %v3064_v18  ;;  %v14334_v58 = vld [vmem:[%s19536_s5 + $0x48] ss:$12 sps:$4 sm:$0xff]   ;;  %v14345_v8 = vld [vmem:[%s19536_s5 + $0x4] ss:$12 sps:$4 sm:$0xff]  }
 0x418   : > { %v4277_v25 = vpop.f32.mrf.mxu1  ;;  %4546 = vmatpush1.bf16.msra.mxu1 %v17024_v61  ;;  %v4305_v45 = vadd.f32 %v4270_v39, %v3074_v16  ;;  %v4367_v13 = vadd.f32 %v4343_v20, %v4299_v14  ;;  %v14346_v50 = vld [vmem:[%s19536_s5 + $0x168] ss:$12 sps:$4 sm:$0xff]   ;;  %v14349_v14 = vld [vmem:[%s19536_s5 + $0x150] ss:$12 sps:$4 sm:$0xff]  }
 0x419   : > { %v4435_v10 = vpack.c.bf16 %v4408_v22, %v4402_v6  ;;  %v4311_v38 = vadd.f32 %v4276_v36, %v19637_v37  ;;  %v4278_v3 = vadd.f32 %v4277_v25, %v4214_v24  ;;  %v4378_v27 = vadd.f32 %v17061_v43, %v4310_v48  ;;  %v14379_v25 = vld [vmem:[%s19536_s5 + $0x228] ss:$12 sps:$4 sm:$0xff]   ;;  %v14328_v37 = vld [vmem:[%s19536_s5 + $0x78] ss:$12 sps:$4 sm:$0xff]  }
 0x41a   : > { %v4279_v28 = vpop.f32.mrf.mxu1  ;;  %v4373_v53 = vadd.f32 %v4343_v20, %v4305_v45  ;;  %v4287_v24 = vadd.f32 %v4256_v49, %v19642_v32  ;;  %v4361_v44 = vadd.f32 %v4343_v20, %v4293_v11  ;;  %v4403_v42 = vmax.f32 %v4367_v13, 0.0  ;;  %v14405_v45 = vld [vmem:[%s19536_s5 + $0x1cc] ss:$12 sps:$4 sm:$0xff]   ;;  %v14351_v18 = vld [vmem:[%s19536_s5 + $0x154] ss:$12 sps:$4 sm:$0xff]  }
 0x41b   : > { %v4316_v52 = vadd.f32 %v4278_v3, %v19639_v51  ;;  %v4280_v9 = vadd.f32 %v4279_v28, %v4216_v2  ;;  %12089 = vmatmul.mubr.msk.bf16.vlgmr.msra.gmra.mxu1 %vm4451_vm5, %v16979_v46  ;;  %v4379_v63 = vadd.f32 %v4343_v20, %v4311_v38  ;;  %v4414_v62 = vmax.f32 %v4378_v27, 0.0  ;;  %v14331_v38 = vld [vmem:[%s19536_s5 + $0x60] ss:$12 sps:$4 sm:$0xff]   ;;  %v14342_v2 = vld [vmem:[%s19536_s5 + $0x1c] ss:$12 sps:$4 sm:$0xff]  }
 0x41c   : > { %4573 = vmatprep.mubr.bf16.mxu1 %v19608_v47  ;;  %v4409_v39 = vmax.f32 %v4373_v53, 0.0  ;;  %v4397_v41 = vmax.f32 %v4361_v44, 0.0  ;;  %v14336_v3 = vld [vmem:[%s19536_s5 + $0x4c] ss:$12 sps:$4 sm:$0xff]   ;;  %v14403_v28 = vld [vmem:[%s19536_s5 + $0x1c8] ss:$12 sps:$4 sm:$0xff]  }
 0x41d   : > { %v4384_v7 = vadd.f32 %v17061_v43, %v4316_v52  ;;  %v4317_v54 = vadd.f32 %v4280_v9, %v3084_v4  ;;  %v4415_v6 = vmax.f32 %v4379_v63, 0.0  ;;  %v4355_v43 = vadd.f32 %v4343_v20, %v4287_v24  ;;  %v14337_v4 = vld [vmem:[%s19536_s5 + $0x30] ss:$12 sps:$4 sm:$0xff]   ;;  %v14343_v27 = vld [vmem:[%s19536_s5] ss:$12 sps:$4 sm:$0xff]  }
 0x41e   : > { %v4436_v30 = vpack.c.bf16 %v4409_v39, %v4403_v42  ;;  %v14348_v51 = vld [vmem:[%s19536_s5 + $0x16c] ss:$12 sps:$4 sm:$0xff]   ;;  %v14409_v52 = vld [vmem:[%s19536_s5 + $0x1b0] ss:$12 sps:$4 sm:$0xff]   ;;  %v14411_v9 = vld [vmem:[%s19536_s5 + $0x1b4] ss:$12 sps:$4 sm:$0xff]  }
 0x41f   : > { %v4420_v31 = vmax.f32 %v4384_v7, 0.0  ;;  %v4385_v33 = vadd.f32 %v4343_v20, %v4317_v54  ;;  %v4391_v23 = vmax.f32 %v4355_v43, 0.0  ;;  %v14340_v20 = vld [vmem:[%s19536_s5 + $0x18] ss:$12 sps:$4 sm:$0xff]   ;;  %v14417_v34 = vld [vmem:[%s19536_s5 + $0x19c] ss:$12 sps:$4 sm:$0xff]  }
 0x420   : > { %v14415_v49 = vld [vmem:[%s19536_s5 + $0x198] ss:$12 sps:$4 sm:$0xff]   ;;  %v14354_v63 = vld [vmem:[%s19536_s5 + $0x13c] ss:$12 sps:$4 sm:$0xff]   ;;  %v14421_v7 = vld [vmem:[%s19536_s5 + $0x180] ss:$12 sps:$4 sm:$0xff]  }
 0x421   : > { %v4441_v60 = vpack.c.bf16 %v4420_v31, %v4414_v62  ;;  %v4421_v22 = vmax.f32 %v4385_v33, 0.0  ;;  %v4430_v16 = vpack.c.bf16 %v4397_v41, %v4391_v23  ;;  %v14423_v54 = vld [vmem:[%s19536_s5 + $0x184] ss:$12 sps:$4 sm:$0xff]   ;;  %v14429_v62 = vld [vmem:[%s19536_s5 + $0x2ec] ss:$12 sps:$4 sm:$0xff]  }
 0x422   : > { %v14352_v11 = vld [vmem:[%s19536_s5 + $0x138] ss:$12 sps:$4 sm:$0xff]   ;;  %v14427_v31 = vld [vmem:[%s19536_s5 + $0x2e8] ss:$12 sps:$4 sm:$0xff]   ;;  %v14355_v32 = vld [vmem:[%s19536_s5 + $0x120] ss:$12 sps:$4 sm:$0xff]  }
 0x423   : > { %12090 = vmatmul.mubr.msk.bf16.gmra.mxu1 %vm4451_vm5, %v16997_v29  ;;  %v4442_v26 = vpack.c.bf16 %v4421_v22, %v4415_v6  ;;  %v4475_v36 = vand.u32 %v16968_v19, %v4441_v60  ;;  %v14357_v53 = vld [vmem:[%s19536_s5 + $0x124] ss:$12 sps:$4 sm:$0xff]   ;;  %v14435_v33 = vld [vmem:[%s19536_s5 + $0x2d4] ss:$12 sps:$4 sm:$0xff]   ;;  %v14360_v24 = vld [vmem:[%s19536_s5 + $0x10c] ss:$12 sps:$4 sm:$0xff]  }
 0x424   : > { %4614 = vmatprep.mubr.bf16.mxu1 %v19608_v47  ;;  %v14433_v13 = vld [vmem:[%s19536_s5 + $0x2d0] ss:$12 sps:$4 sm:$0xff]   ;;  %v14358_v6 = vld [vmem:[%s19536_s5 + $0x108] ss:$12 sps:$4 sm:$0xff]   ;;  %v14439_v39 = vld [vmem:[%s19536_s5 + $0x2b8] ss:$12 sps:$4 sm:$0xff]  }
 0x425   : > { %v4478_v48 = vand.u32 %v16968_v19, %v4442_v26  ;;  %v14381_v19 = vld [vmem:[%s19536_s5 + $0x22c] ss:$12 sps:$4 sm:$0xff]   ;;  %v14363_v60 = vld [vmem:[%s19536_s5 + $0xf4] ss:$12 sps:$4 sm:$0xff]   ;;  %v14361_v22 = vld [vmem:[%s19536_s5 + $0xf0] ss:$12 sps:$4 sm:$0xff]  }
 0x426   : > { %v14366_v44 = vld [vmem:[%s19536_s5 + $0xdc] ss:$12 sps:$4 sm:$0xff]   ;;  %v14364_v43 = vld [vmem:[%s19536_s5 + $0xd8] ss:$12 sps:$4 sm:$0xff]  }
 0x427   : > { %4592 = vmatprep.subr.bf16.mxu1 %v4478_v48  ;;  %4763 = vmatprep.subr.bf16.mxu0 %v4478_v48  ;;  %v14441_v26 = vld [vmem:[%s19536_s5 + $0x2bc] ss:$12 sps:$4 sm:$0xff]   ;;  %v14369_v42 = vld [vmem:[%s19536_s5 + $0xc4] ss:$12 sps:$4 sm:$0xff]   ;;  %v14372_v41 = vld [vmem:[%s19536_s5 + $0x3ac] ss:$12 sps:$4 sm:$0xff]  }
 0x428   : > { %4593 = vmatpush1.bf16.msra.mxu1 %v4475_v36  ;;  %4764 = vmatpush1.bf16.msra.mxu0 %v4475_v36  ;;  %v14447_v48 = vld [vmem:[%s19536_s5 + $0x2a4] ss:$12 sps:$4 sm:$0xff]   ;;  %v14445_v36 = vld [vmem:[%s19536_s5 + $0x2a0] ss:$12 sps:$4 sm:$0xff]  }
 0x429   : > { %4594 = vmatprep.subr.bf16.mxu1 %v4436_v30  ;;  %4765 = vmatprep.subr.bf16.mxu0 %v4436_v30  ;;  %v14367_v30 = vld [vmem:[%s19536_s5 + $0xc0] ss:$12 sps:$4 sm:$0xff]  }
 0x42a   : > { %v14453_v23 = vld [vmem:[%s19536_s5 + $0x28c] ss:$12 sps:$4 sm:$0xff]  }
 0x42c   : > { %4595 = vmatpush1.bf16.msra.mxu1 %v4435_v10  ;;  %4766 = vmatpush1.bf16.msra.mxu0 %v4435_v10  ;;  %v14330_v10 = vld [vmem:[%s19536_s5 + $0x7c] ss:$12 sps:$4 sm:$0xff]  }
 0x42d   : > { %4596 = vmatprep.subr.bf16.mxu1 %v4430_v16  ;;  %4767 = vmatprep.subr.bf16.mxu0 %v4430_v16  ;;  %v14451_v16 = vld [vmem:[%s19536_s5 + $0x288] ss:$12 sps:$4 sm:$0xff]  }
 0x430   : > { %4597 = vmatpush1.bf16.msra.mxu1 %v17081_v5  ;;  %4768 = vmatpush1.bf16.msra.mxu0 %v17081_v5  ;;  %v14387_v5 = vld [vmem:[%s19536_s5 + $0x214] ss:$12 sps:$4 sm:$0xff]  }
 0x431   : > { %4712 = vmatprep.subr.bf16.mxu1 %v17067_v15  ;;  %5832 = vmatprep.subr.bf16.mxu0 %v14381_v19  ;;  %v14324_v15 = vld [vmem:[%s19536_s5 + $0xac] ss:$12 sps:$4 sm:$0xff]   ;;  %v14455_v19 = vld [vmem:[%s19536_s5 + $0x270] ss:$12 sps:$4 sm:$0xff]  }
 0x433   : > { %12091 = vmatmul.mubr.msk.bf16.vlgmr.msra.gmra.mxu1 %vm4451_vm5, %v16979_v46  ;;  %12102 = vmatmul.mubr.msk.bf16.vlgmr.msra.gmra.mxu0 %vm4451_vm5, %v16984_v21  ;;  %v14385_v46 = vld [vmem:[%s19536_s5 + $0x210] ss:$12 sps:$4 sm:$0xff]  }
 0x434   : > { %4713 = vmatpush1.bf16.msra.mxu1 %v17071_v12  ;;  %4624 = vmatprep.mubr.bf16.mxu1 %v19608_v47  ;;  %v14393_v12 = vld [vmem:[%s19536_s5 + $0x1fc] ss:$12 sps:$4 sm:$0xff]  }
 0x435   : > { %4714 = vmatprep.subr.bf16.mxu1 %v17075_v40  ;;  %4795 = vmatprep.mubr.bf16.mxu0 %v19608_v47  ;;  %v14391_v40 = vld [vmem:[%s19536_s5 + $0x1f8] ss:$12 sps:$4 sm:$0xff]  }
 0x436   : > { %5833 = vmatpush1.bf16.msra.mxu0 %v14379_v25  ;;  %v14457_v25 = vld [vmem:[%s19536_s5 + $0x274] ss:$12 sps:$4 sm:$0xff]  }
 0x437   : > { %5834 = vmatprep.subr.bf16.mxu0 %v14387_v5  ;;  %v14461_v5 = vld [vmem:[%s19536_s5 + $0x25c] ss:$12 sps:$4 sm:$0xff]  }
 0x438   : > { %4715 = vmatpush1.bf16.msra.mxu1 %v17042_v56  ;;  %v14399_v56 = vld [vmem:[%s19536_s5 + $0x1e4] ss:$12 sps:$4 sm:$0xff]  }
 0x439   : > { %4716 = vmatprep.subr.bf16.mxu1 %v17085_v59  ;;  %v14397_v59 = vld [vmem:[%s19536_s5 + $0x1e0] ss:$12 sps:$4 sm:$0xff]  }
 0x43a   : > { %5835 = vmatpush1.bf16.msra.mxu0 %v14385_v46  ;;  %v14459_v46 = vld [vmem:[%s19536_s5 + $0x258] ss:$12 sps:$4 sm:$0xff]  }
 0x43b   : > { %12092 = vmatmul.mubr.msk.bf16.gmra.mxu1 %vm4451_vm5, %v16997_v29  ;;  %12103 = vmatmul.mubr.msk.bf16.gmra.mxu0 %vm4451_vm5, %v17002_v1  ;;  %v14322_v29 = vld [vmem:[%s19536_s5 + $0xa8] ss:$12 sps:$4 sm:$0xff]  }
 0x43c   : > { %4717 = vmatpush1.bf16.msra.mxu1 %v17024_v61  ;;  %4734 = vmatprep.mubr.bf16.mxu1 %v19608_v47  ;;  %v14327_v61 = vld [vmem:[%s19536_s5 + $0x94] ss:$12 sps:$4 sm:$0xff]  }
 0x43d   : > { %5781 = vmatprep.subr.bf16.mxu1 %v14324_v15  ;;  %5836 = vmatprep.subr.bf16.mxu0 %v14393_v12  ;;  %v14465_v15 = vld [vmem:[%s19536_s5 + $0x244] ss:$12 sps:$4 sm:$0xff]   ;;  %v14463_v12 = vld [vmem:[%s19536_s5 + $0x240] ss:$12 sps:$4 sm:$0xff]  }
 0x43e   : > { %5837 = vmatpush1.bf16.msra.mxu0 %v14391_v40  ;;  %v14467_v40 = vld [vmem:[%s19536_s5 + $0x170] ss:$12 sps:$4 sm:$0xff]  }
 0x43f   : > { %5838 = vmatprep.subr.bf16.mxu0 %v14399_v56 }
 0x442   : > { %5839 = vmatpush1.bf16.msra.mxu0 %v14397_v59 }
 0x443   : > { %12100 = vmatmul.mubr.msk.bf16.vlgmr.msra.gmra.mxu1 %vm4451_vm5, %v16984_v21  ;;  %v14333_v21 = vld [vmem:[%s19536_s5 + $0x64] ss:$12 sps:$4 sm:$0xff]   ;;  %5840 = vmatprep.subr.bf16.mxu0 %v14405_v45  ;;  %v14375_v45 = vld [vmem:[%s19536_s5 + $0x394] ss:$12 sps:$4 sm:$0xff]  }
 0x444   : > { %4744 = vmatprep.mubr.bf16.mxu1 %v19608_v47  ;;  %5782 = vmatpush1.bf16.msra.mxu1 %v14322_v29 }
 0x445   : > { %5783 = vmatprep.subr.bf16.mxu1 %v14327_v61 }
 0x446   : > { %5841 = vmatpush1.bf16.msra.mxu0 %v14403_v28  ;;  %v14370_v28 = vld [vmem:[%s19536_s5 + $0x3a8] ss:$12 sps:$4 sm:$0xff]  }
 0x447   : > { %5842 = vmatprep.subr.bf16.mxu0 %v14411_v9 }
 0x448   : > { %5784 = vmatpush1.bf16.msra.mxu1 %v14325_v0 }
 0x449   : > { %5785 = vmatprep.subr.bf16.mxu1 %v14330_v10 }
 0x44a   : > { %5843 = vmatpush1.bf16.msra.mxu0 %v14409_v52 }
 0x44b   : > { %12101 = vmatmul.mubr.msk.bf16.gmra.mxu1 %vm4451_vm5, %v17002_v1  ;;  %v14339_v1 = vld [vmem:[%s19536_s5 + $0x34] ss:$12 sps:$4 sm:$0xff]   ;;  %5844 = vmatprep.subr.bf16.mxu0 %v14417_v34 }
 0x44c   : > { %5786 = vmatpush1.bf16.msra.mxu1 %v14328_v37 }
 0x44d   : > { %5787 = vmatprep.subr.bf16.mxu1 %v14333_v21 }
 0x44e   : > { %5845 = vmatpush1.bf16.msra.mxu0 %v14415_v49  ;;  %v14373_v49 = vld [vmem:[%s19536_s5 + $0x390] ss:$12 sps:$4 sm:$0xff]  }
 0x44f   : > { %5846 = vmatprep.subr.bf16.mxu0 %v14423_v54 }
 0x450   : > { %5788 = vmatpush1.bf16.msra.mxu1 %v14331_v38 }
 0x451   : > { %5789 = vmatprep.subr.bf16.mxu1 %v14336_v3 }
 0x452   : > { %5847 = vmatpush1.bf16.msra.mxu0 %v14421_v7 }
 0x453   : > { %5848 = vmatprep.subr.bf16.mxu0 %v14429_v62  ;;  %v14382_v62 = vld [vmem:[%s19536_s5 + $0x360] ss:$12 sps:$4 sm:$0xff]  }
 0x454   : > { %5790 = vmatpush1.bf16.msra.mxu1 %v14334_v58 }
 0x455   : > { %5791 = vmatprep.subr.bf16.mxu1 %v14339_v1 }
 0x456   : > { %5849 = vmatpush2.bf16.msra.mxu0 %v14427_v31  ;;  %v14390_v31 = vld [vmem:[%s19536_s5 + $0x34c] ss:$12 sps:$4 sm:$0xff]  }
 0x457   : > { %5850 = vmatprep.subr.bf16.mxu0 %v14435_v33  ;;  %v14388_v33 = vld [vmem:[%s19536_s5 + $0x348] ss:$12 sps:$4 sm:$0xff]  }
 0x458   : > { %5792 = vmatpush1.bf16.msra.mxu1 %v14337_v4 }
 0x459   : > { %5793 = vmatprep.subr.bf16.mxu1 %v14342_v2 }
 0x45a   : > { %5851 = vmatpush2.bf16.msra.mxu0 %v14433_v13  ;;  %v14402_v13 = vld [vmem:[%s19536_s5 + $0x31c] ss:$12 sps:$4 sm:$0xff]  }
 0x45b   : > { %5852 = vmatprep.subr.bf16.mxu0 %v14441_v26  ;;  %v14412_v26 = vld [vmem:[%s19536_s5 + $0x450] ss:$12 sps:$4 sm:$0xff]  }
 0x45c   : > { %5794 = vmatpush1.bf16.msra.mxu1 %v14340_v20 }
 0x45d   : > { %5795 = vmatprep.subr.bf16.mxu1 %v14345_v8 }
 0x45e   : > { %5853 = vmatpush2.bf16.msra.mxu0 %v14439_v39  ;;  %v14420_v39 = vld [vmem:[%s19536_s5 + $0x43c] ss:$12 sps:$4 sm:$0xff]  }
 0x45f   : > { %5854 = vmatprep.subr.bf16.mxu0 %v14447_v48  ;;  %v14424_v48 = vld [vmem:[%s19536_s5 + $0x420] ss:$12 sps:$4 sm:$0xff]  }
 0x460   : > { %5796 = vmatpush1.bf16.msra.mxu1 %v14343_v27 }
 0x461   : > { %5797 = vmatprep.subr.bf16.mxu1 %v14348_v51 }
 0x462   : > { %5855 = vmatpush2.bf16.msra.mxu0 %v14445_v36  ;;  %v14432_v36 = vld [vmem:[%s19536_s5 + $0x40c] ss:$12 sps:$4 sm:$0xff]  }
 0x463   : > { %5856 = vmatprep.subr.bf16.mxu0 %v14453_v23  ;;  %v14436_v23 = vld [vmem:[%s19536_s5 + $0x3f0] ss:$12 sps:$4 sm:$0xff]  }
 0x464   : > { %5798 = vmatpush2.bf16.msra.mxu1 %v14346_v50 }
 0x465   : > { %5799 = vmatprep.subr.bf16.mxu1 %v14351_v18 }
 0x466   : > { %5857 = vmatpush2.bf16.msra.mxu0 %v14451_v16  ;;  %v14444_v16 = vld [vmem:[%s19536_s5 + $0x3dc] ss:$12 sps:$4 sm:$0xff]  }
 0x467   : > { %5858 = vmatprep.subr.bf16.mxu0 %v14457_v25  ;;  %v14450_v25 = vld [vmem:[%s19536_s5 + $0x3c4] ss:$12 sps:$4 sm:$0xff]  }
 0x468   : > { %5800 = vmatpush2.bf16.msra.mxu1 %v14349_v14  ;;  %v14378_v14 = vld [vmem:[%s19536_s5 + $0x37c] ss:$12 sps:$4 sm:$0xff]  }
 0x469   : > { %5801 = vmatprep.subr.bf16.mxu1 %v14354_v63 }
 0x46a   : > { %5859 = vmatpush2.bf16.msra.mxu0 %v14455_v19  ;;  %v14442_v19 = vld [vmem:[%s19536_s5 + $0x3d8] ss:$12 sps:$4 sm:$0xff]  }
 0x46b   : > { %5860 = vmatprep.subr.bf16.mxu0 %v14461_v5 }
 0x46c   : > { %5802 = vmatpush2.bf16.msra.mxu1 %v14352_v11  ;;  %v14376_v11 = vld [vmem:[%s19536_s5 + $0x378] ss:$12 sps:$4 sm:$0xff]  }
 0x46d   : > { %5803 = vmatprep.subr.bf16.mxu1 %v14357_v53  ;;  %v14384_v53 = vld [vmem:[%s19536_s5 + $0x364] ss:$12 sps:$4 sm:$0xff]  }
 0x46e   : > { %5861 = vmatpush2.bf16.msra.mxu0 %v14459_v46  ;;  %v14448_v46 = vld [vmem:[%s19536_s5 + $0x3c0] ss:$12 sps:$4 sm:$0xff]  }
 0x46f   : > { %5862 = vmatprep.subr.bf16.mxu0 %v14465_v15 }
 0x470   : > { %5804 = vmatpush2.bf16.msra.mxu1 %v14355_v32  ;;  %v14396_v32 = vld [vmem:[%s19536_s5 + $0x334] ss:$12 sps:$4 sm:$0xff]  }
 0x471   : > { %5805 = vmatprep.subr.bf16.mxu1 %v14360_v24  ;;  %v14394_v24 = vld [vmem:[%s19536_s5 + $0x330] ss:$12 sps:$4 sm:$0xff]  }
 0x472   : > { %5863 = vmatpush2.bf16.msra.mxu0 %v14463_v12 }
 0x473   : > { %13276 = vmatprep.subr.bf16.mxu0 %v14467_v40 }
 0x474   : > { %5806 = vmatpush2.bf16.msra.mxu1 %v14358_v6  ;;  %v14400_v6 = vld [vmem:[%s19536_s5 + $0x318] ss:$12 sps:$4 sm:$0xff]  }
 0x475   : > { %5807 = vmatprep.subr.bf16.mxu1 %v14363_v60  ;;  %v14408_v60 = vld [vmem:[%s19536_s5 + $0x304] ss:$12 sps:$4 sm:$0xff]  }
 0x478   : > { %5808 = vmatpush2.bf16.msra.mxu1 %v14361_v22  ;;  %v14406_v22 = vld [vmem:[%s19536_s5 + $0x300] ss:$12 sps:$4 sm:$0xff]  }
 0x479   : > { %5809 = vmatprep.subr.bf16.mxu1 %v14366_v44  ;;  %v14414_v44 = vld [vmem:[%s19536_s5 + $0x454] ss:$12 sps:$4 sm:$0xff]  }
 0x47c   : > { %5810 = vmatpush2.bf16.msra.mxu1 %v14364_v43  ;;  %v14418_v43 = vld [vmem:[%s19536_s5 + $0x438] ss:$12 sps:$4 sm:$0xff]  }
 0x47d   : > { %5811 = vmatprep.subr.bf16.mxu1 %v14369_v42  ;;  %v14426_v42 = vld [vmem:[%s19536_s5 + $0x424] ss:$12 sps:$4 sm:$0xff]  }
 0x480   : > { %5812 = vmatpush2.bf16.msra.mxu1 %v14367_v30  ;;  %v14430_v30 = vld [vmem:[%s19536_s5 + $0x408] ss:$12 sps:$4 sm:$0xff]  }
 0x481   : > { %5883 = vmatprep.subr.bf16.mxu1 %v14372_v41  ;;  %v14438_v41 = vld [vmem:[%s19536_s5 + $0x3f4] ss:$12 sps:$4 sm:$0xff]  }
 0x49b   : > { %v4514_v56 = vpop.f32.mrf.mxu1  ;;  %v4685_v59 = vpop.f32.mrf.mxu0 }
 0x49c   : > { %v4804_v0 = vmax.f32 %v4514_v56, %v4685_v59 }
 0x49d   : > { %v4516_v29 = vpop.f32.mrf.mxu1  ;;  %v4687_v61 = vpop.f32.mrf.mxu0 }
 0x49e   : > { %v4805_v21 = vmax.f32 %v4516_v29, %v4687_v61 }
 0x49f   : > { %v4518_v10 = vpop.f32.mrf.mxu1  ;;  %v4689_v37 = vpop.f32.mrf.mxu0 }
 0x4a0   : > { %v4810_v38 = vmax.f32 %v4518_v10, %v4689_v37 }
 0x4a1   : > { %v4520_v3 = vpop.f32.mrf.mxu1  ;;  %v4691_v58 = vpop.f32.mrf.mxu0 }
 0x4a2   : > { %v4811_v1 = vmax.f32 %v4520_v3, %v4691_v58  ;;  %v17344_v4 = vpack.c.bf16 %v4810_v38, %v4804_v0 }
 0x4a3   : > { %v4524_v2 = vpop.f32.mrf.mxu1  ;;  %v4695_v20 = vpop.f32.mrf.mxu0 }
 0x4a4   : > { %v17346_v8 = vpack.c.bf16 %v4811_v1, %v4805_v21  ;;  %v4816_v9 = vmax.f32 %v4524_v2, %v4695_v20 }
 0x4a5   : > { %v4526_v27 = vpop.f32.mrf.mxu1  ;;  %v4697_v51 = vpop.f32.mrf.mxu0 }
 0x4a6   : > { %5813 = vmatprep.mubr.bf16.mxu1 %v17346_v8  ;;  %v4817_v52 = vmax.f32 %v4526_v27, %v4697_v51  ;;  %v17365_v54 = vpack.c.bf16 %v4816_v9, %v4816_v9  ;;  %v14454_v9 = vld [vmem:[%s19536_s5 + $0x3b0] ss:$12 sps:$4 sm:$0xff]  }
 0x4a7   : > { %5814 = vmatmul.mubr.bf16.vlgmr.msra.gmra.mxu1 %v17344_v4  ;;  %v4528_v50 = vpop.f32.mrf.mxu1  ;;  %v4699_v18 = vpop.f32.mrf.mxu0 }
 0x4a8   : > { %5884 = vmatpush1.bf16.msra.mxu1 %v14370_v28  ;;  %v17359_v34 = vpack.c.bf16 %v4817_v52, %v4817_v52 }
 0x4a9   : > { %5885 = vmatprep.subr.bf16.mxu1 %v14375_v45  ;;  %v4529_v63 = vpop.f32.mrf.mxu1  ;;  %v4700_v7 = vpop.f32.mrf.mxu0 }
 0x4aa   : > { %5823 = vmatprep.mubr.bf16.mxu1 %v17359_v34 }
 0x4ac   : > { %5886 = vmatpush1.bf16.msra.mxu1 %v14373_v49 }
 0x4ad   : > { %5887 = vmatprep.subr.bf16.mxu1 %v14378_v14 }
 0x4af   : > { %5824 = vmatmul.mubr.bf16.gmra.mxu1 %v17365_v54 }
 0x4b0   : > { %5888 = vmatpush1.bf16.msra.mxu1 %v14376_v11 }
 0x4b1   : > { %5889 = vmatprep.subr.bf16.mxu1 %v14384_v53  ;;  %v14458_v53 = vld [vmem:[%s19536_s5 + $0x398] ss:$12 sps:$4 sm:$0xff]  }
 0x4b4   : > { %5890 = vmatpush1.bf16.msra.mxu1 %v14382_v62 }
 0x4b5   : > { %5891 = vmatprep.subr.bf16.mxu1 %v14390_v31 }
 0x4b8   : > { %5892 = vmatpush1.bf16.msra.mxu1 %v14388_v33 }
 0x4b9   : > { %5893 = vmatprep.subr.bf16.mxu1 %v14396_v32 }
 0x4bc   : > { %5894 = vmatpush1.bf16.msra.mxu1 %v14394_v24  ;;  %v14462_v24 = vld [vmem:[%s19536_s5 + $0x380] ss:$12 sps:$4 sm:$0xff]  }
 0x4bd   : > { %5895 = vmatprep.subr.bf16.mxu1 %v14402_v13 }
 0x4c0   : > { %5896 = vmatpush1.bf16.msra.mxu1 %v14400_v6 }
 0x4c1   : > { %5897 = vmatprep.subr.bf16.mxu1 %v14408_v60 }
 0x4c4   : > { %5898 = vmatpush1.bf16.msra.mxu1 %v14406_v22  ;;  %v14466_v22 = vld [vmem:[%s19536_s5 + $0x368] ss:$12 sps:$4 sm:$0xff]  }
 0x4c5   : > { %5901 = vmatprep.subr.bf16.mxu1 %v14414_v44 }
 0x4c8   : > { %5902 = vmatpush2.bf16.msra.mxu1 %v14412_v26 }
 0x4c9   : > { %5903 = vmatprep.subr.bf16.mxu1 %v14420_v39 }
 0x4cc   : > { %5904 = vmatpush2.bf16.msra.mxu1 %v14418_v43 }
 0x4cd   : > { %5905 = vmatprep.subr.bf16.mxu1 %v14426_v42 }
 0x4d0   : > { %5906 = vmatpush2.bf16.msra.mxu1 %v14424_v48 }
 0x4d1   : > { %5907 = vmatprep.subr.bf16.mxu1 %v14432_v36 }
 0x4d4   : > { %5908 = vmatpush2.bf16.msra.mxu1 %v14430_v30  ;;  %v14468_v30 = vld [vmem:[%s19536_s5 + $0xb0] ss:$12 sps:$4 sm:$0xff]  }
 0x4d5   : > { %5909 = vmatprep.subr.bf16.mxu1 %v14438_v41  ;;  %v14469_v41 = vld [vmem:[%s19536_s5 + $0x350] ss:$12 sps:$4 sm:$0xff]  }
 0x4d8   : > { %5910 = vmatpush2.bf16.msra.mxu1 %v14436_v23 }
 0x4d9   : > { %5911 = vmatprep.subr.bf16.mxu1 %v14444_v16 }
 0x4db   : > { %v17440_v5 = vpop.f32.mrf.mxu1 }
 0x4dc   : > { %5912 = vmatpush2.bf16.msra.mxu1 %v14442_v19  ;;  %v14470_v19 = vld [vmem:[%s19536_s5 + $0x158] ss:$12 sps:$4 sm:$0xff]  }
 0x4dd   : > { %v4567_v15 = vpop.f32.mrf.mxu1  ;;  %5913 = vmatprep.subr.bf16.mxu1 %v14450_v25 }
 0x4df   : > { %v17445_v12 = vpop.f32.mrf.mxu1 }
 0x4e0   : > { %5914 = vmatpush2.bf16.msra.mxu1 %v14448_v46 }
 0x4e1   : > { %v4571_v40 = vpop.f32.mrf.mxu1  ;;  %6030 = vmatprep.subr.bf16.mxu1 %v19608_v47 }
 0x4e3   : > { %v17448_v56 = vpop.f32.mrf.mxu1 }
 0x4e5   : > { %v4577_v59 = vpop.f32.mrf.mxu1 }
 0x4e7   : > { %v4579_v29 = vpop.f32.mrf.mxu1 }
 0x4e9   : > { %v4580_v61 = vpop.f32.mrf.mxu1 }
 0x4ea   : > { %v14474_v61 = vld [vmem:[%s19536_s5 + $0x80] ss:$12 sps:$4 sm:$0xff]  }
 0x4f3   : > { %v4616_v0 = vpop.f32.mrf.mxu1  ;;  %v4787_v10 = vpop.f32.mrf.mxu0 }
 0x4f4   : > { %v4808_v45 = vmax.f32 %v4616_v0, %v4787_v10  ;;  %v14476_v10 = vld [vmem:[%s19536_s5 + $0x128] ss:$12 sps:$4 sm:$0xff]  }
 0x4f5   : > { %v4618_v37 = vpop.f32.mrf.mxu1  ;;  %v4789_v21 = vpop.f32.mrf.mxu0 }
 0x4f6   : > { %v4809_v20 = vmax.f32 %v4618_v37, %v4789_v21  ;;  %v14477_v37 = vld [vmem:[%s19536_s5 + $0x68] ss:$12 sps:$4 sm:$0xff]  }
 0x4f7   : > { %v4620_v38 = vpop.f32.mrf.mxu1  ;;  %v4791_v3 = vpop.f32.mrf.mxu0  ;;  %v14478_v21 = vld [vmem:[%s19536_s5 + $0x308] ss:$12 sps:$4 sm:$0xff]  }
 0x4f8   : > { %v4814_v58 = vmax.f32 %v4620_v38, %v4791_v3  ;;  %v14479_v38 = vld [vmem:[%s19536_s5 + $0x110] ss:$12 sps:$4 sm:$0xff]  }
 0x4f9   : > { %v4622_v1 = vpop.f32.mrf.mxu1  ;;  %v4793_v2 = vpop.f32.mrf.mxu0  ;;  %v14480_v3 = vld [vmem:[%s19536_s5 + $0x50] ss:$12 sps:$4 sm:$0xff]  }
 0x4fa   : > { %v4815_v28 = vmax.f32 %v4622_v1, %v4793_v2  ;;  %v17455_v50 = vpack.c.bf16 %v4814_v58, %v4808_v45  ;;  %v14481_v58 = vld [vmem:[%s19536_s5 + $0x458] ss:$12 sps:$4 sm:$0xff]   ;;  %v14486_v45 = vld [vmem:[%s19536_s5 + $0x20] ss:$12 sps:$4 sm:$0xff]  }
 0x4fb   : > { %v4626_v27 = vpop.f32.mrf.mxu1  ;;  %v4797_v51 = vpop.f32.mrf.mxu0  ;;  %v14482_v1 = vld [vmem:[%s19536_s5 + $0xf8] ss:$12 sps:$4 sm:$0xff]  }
 0x4fc   : > { %v17450_v52 = vpack.c.bf16 %v4815_v28, %v4809_v20  ;;  %v4820_v62 = vmax.f32 %v4626_v27, %v4797_v51  ;;  %v14483_v2 = vld [vmem:[%s19536_s5 + $0x38] ss:$12 sps:$4 sm:$0xff]   ;;  %v14484_v20 = vld [vmem:[%s19536_s5 + $0x440] ss:$12 sps:$4 sm:$0xff]   ;;  %v14487_v27 = vld [vmem:[%s19536_s5 + $0x428] ss:$12 sps:$4 sm:$0xff]  }
 0x4fd   : > { %v4628_v18 = vpop.f32.mrf.mxu1  ;;  %v4799_v49 = vpop.f32.mrf.mxu0  ;;  %v14485_v28 = vld [vmem:[%s19536_s5 + $0xe0] ss:$12 sps:$4 sm:$0xff]   ;;  %v14488_v51 = vld [vmem:[%s19536_s5 + $0xc8] ss:$12 sps:$4 sm:$0xff]  }
 0x4fe   : > { %v4821_v14 = vmax.f32 %v4628_v18, %v4799_v49  ;;  %12245 = vmatprep.mubr.msk.bf16.mxu1 %vm5774_vm6, %v17450_v52  ;;  %v17471_v13 = vpack.c.bf16 %v4820_v62, %v4820_v62  ;;  %v14490_v18 = vld [vmem:[%s19536_s5 + $0x410] ss:$12 sps:$4 sm:$0xff]   ;;  %v14496_v62 = vld [vmem:[%s19536_s5 + $0x3e0] ss:$12 sps:$4 sm:$0xff]  }
 0x4ff   : > { %v4630_v63 = vpop.f32.mrf.mxu1  ;;  %5916 = vmatmul.mubr.bf16.vlgmr.msra.gmra.mxu1 %v17455_v50  ;;  %v4801_v7 = vpop.f32.mrf.mxu0  ;;  %v14491_v49 = vld [vmem:[%s19536_s5 + $0x2f0] ss:$12 sps:$4 sm:$0xff]  }
 0x500   : > { %v17460_v11 = vpack.c.bf16 %v4821_v14, %v4821_v14  ;;  %6031 = vmatpush1.bf16.msra.mxu1 %v14454_v9  ;;  %v14489_v9 = vld [vmem:[%s19536_s5 + $0x8] ss:$12 sps:$4 sm:$0xff]   ;;  %v14492_v14 = vld [vmem:[%s19536_s5 + $0x230] ss:$12 sps:$4 sm:$0xff]   ;;  %v14493_v63 = vld [vmem:[%s19536_s5 + $0x3f8] ss:$12 sps:$4 sm:$0xff]  }
 0x501   : > { %v4631_v31 = vpop.f32.mrf.mxu1  ;;  %6032 = vmatprep.subr.bf16.mxu1 %v19608_v47  ;;  %v4802_v33 = vpop.f32.mrf.mxu0  ;;  %v14494_v7 = vld [vmem:[%s19536_s5 + $0x2d8] ss:$12 sps:$4 sm:$0xff]  }
 0x502   : > { %12246 = vmatprep.mubr.msk.bf16.mxu1 %vm5774_vm6, %v17460_v11  ;;  %v14497_v31 = vld [vmem:[%s19536_s5 + $0x2c0] ss:$12 sps:$4 sm:$0xff]  }
 0x503   : > { %v4736_v32 = vpop.f32.mrf.mxu1  ;;  %v14498_v33 = vld [vmem:[%s19536_s5 + $0x200] ss:$12 sps:$4 sm:$0xff]  }
 0x504   : > { %6033 = vmatpush1.bf16.msra.mxu1 %v14458_v53  ;;  %v4806_v42 = vmax.f32 %v17440_v5, %v4736_v32  ;;  %v14495_v53 = vld [vmem:[%s19536_s5 + $0x218] ss:$12 sps:$4 sm:$0xff]   ;;  %v14499_v32 = vld [vmem:[%s19536_s5 + $0x3c8] ss:$12 sps:$4 sm:$0xff]  }
 0x505   : > { %v4738_v6 = vpop.f32.mrf.mxu1  ;;  %6034 = vmatprep.subr.bf16.mxu1 %v19608_v47 }
 0x506   : > { %v4807_v39 = vmax.f32 %v4567_v15, %v4738_v6  ;;  %v14471_v15 = vld [vmem:[%s19536_s5 + $0x98] ss:$12 sps:$4 sm:$0xff]   ;;  %v14503_v6 = vld [vmem:[%s19536_s5 + $0x694] ss:$12 sps:$4 sm:$0xff]  }
 0x507   : > { %v4740_v60 = vpop.f32.mrf.mxu1  ;;  %5926 = vmatmul.mubr.bf16.gmra.mxu1 %v17471_v13 }
 0x508   : > { %6035 = vmatpush1.bf16.msra.mxu1 %v14462_v24  ;;  %12247 = vmatprep.mubr.msk.bf16.mxu1 %vm5774_vm6, %v17450_v52  ;;  %v4812_v44 = vmax.f32 %v17445_v12, %v4740_v60  ;;  %v14472_v12 = vld [vmem:[%s19536_s5 + $0x338] ss:$12 sps:$4 sm:$0xff]   ;;  %v14500_v24 = vld [vmem:[%s19536_s5 + $0x2a8] ss:$12 sps:$4 sm:$0xff]  }
 0x509   : > { %v4742_v26 = vpop.f32.mrf.mxu1  ;;  %6036 = vmatprep.subr.bf16.mxu1 %v19608_v47  ;;  %v14504_v60 = vld [vmem:[%s19536_s5 + $0x1e8] ss:$12 sps:$4 sm:$0xff]  }
 0x50a   : > { %v4813_v43 = vmax.f32 %v4571_v40, %v4742_v26  ;;  %v17491_v23 = vpack.c.bf16 %v4812_v44, %v4806_v42  ;;  %v14505_v44 = vld [vmem:[%s19536_s5 + $0x290] ss:$12 sps:$4 sm:$0xff]   ;;  %v14510_v42 = vld [vmem:[%s19536_s5 + $0x278] ss:$12 sps:$4 sm:$0xff]  }
 0x50b   : > { %v4746_v48 = vpop.f32.mrf.mxu1  ;;  %v14508_v26 = vld [vmem:[%s19536_s5 + $0x67c] ss:$12 sps:$4 sm:$0xff]  }
 0x50c   : > { %v17483_v36 = vpack.c.bf16 %v4813_v43, %v4807_v39  ;;  %6037 = vmatpush1.bf16.msra.mxu1 %v14466_v22  ;;  %v4818_v40 = vmax.f32 %v17448_v56, %v4746_v48  ;;  %v14475_v56 = vld [vmem:[%s19536_s5 + $0x320] ss:$12 sps:$4 sm:$0xff]   ;;  %v14501_v22 = vld [vmem:[%s19536_s5 + $0x690] ss:$12 sps:$4 sm:$0xff]   ;;  %v14506_v43 = vld [vmem:[%s19536_s5 + $0x678] ss:$12 sps:$4 sm:$0xff]  }
 0x50d   : > { %v4748_v16 = vpop.f32.mrf.mxu1  ;;  %6038 = vmatprep.subr.bf16.mxu1 %v19608_v47  ;;  %v14509_v39 = vld [vmem:[%s19536_s5 + $0x1d0] ss:$12 sps:$4 sm:$0xff]  }
 0x50e   : > { %v4819_v25 = vmax.f32 %v4577_v59, %v4748_v16  ;;  %5864 = vmatprep.mubr.bf16.mxu0 %v17483_v36  ;;  %v14473_v59 = vld [vmem:[%s19536_s5 + $0x140] ss:$12 sps:$4 sm:$0xff]   ;;  %v17519_v0 = vpack.c.bf16 %v4818_v40, %v4818_v40  ;;  %v14513_v48 = vld [vmem:[%s19536_s5 + $0x664] ss:$12 sps:$4 sm:$0xff]   ;;  %v14524_v40 = vld [vmem:[%s19536_s5 + $0x188] ss:$12 sps:$4 sm:$0xff]  }
 0x50f   : > { %5865 = vmatmul.mubr.bf16.vlgmr.msra.gmra.mxu0 %v17491_v23  ;;  %v4750_v5 = vpop.f32.mrf.mxu1  ;;  %v14515_v16 = vld [vmem:[%s19536_s5 + $0x260] ss:$12 sps:$4 sm:$0xff]  }
 0x510   : > { %v17499_v46 = vpack.c.bf16 %v4819_v25, %v4819_v25  ;;  %13277 = vmatpush3.bf16.msra.mxu0 %v14468_v30  ;;  %6039 = vmatpush1.bf16.msra.mxu1 %v14469_v41  ;;  %v14514_v30 = vld [vmem:[%s19536_s5 + $0x1b8] ss:$12 sps:$4 sm:$0xff]   ;;  %v14511_v41 = vld [vmem:[%s19536_s5 + $0x660] ss:$12 sps:$4 sm:$0xff]   ;;  %v14516_v5 = vld [vmem:[%s19536_s5 + $0x648] ss:$12 sps:$4 sm:$0xff]  }
 0x511   : > { %13278 = vmatprep.subr.bf16.mxu0 %v14470_v19  ;;  %6040 = vmatprep.subr.bf16.mxu1 %v19608_v47  ;;  %v4751_v29 = vpop.f32.mrf.mxu1  ;;  %v14518_v19 = vld [vmem:[%s19536_s5 + $0x64c] ss:$12 sps:$4 sm:$0xff]  }
 0x512   : > { %5874 = vmatprep.mubr.bf16.mxu0 %v17499_v46  ;;  %v14519_v25 = vld [vmem:[%s19536_s5 + $0x1a0] ss:$12 sps:$4 sm:$0xff]  }
 0x513   : > { %v14527_v29 = vld [vmem:[%s19536_s5 + $0x514] ss:$12 sps:$4 sm:$0xff]  }
 0x514   : > { %13279 = vmatpush3.bf16.msra.mxu0 %v14471_v15  ;;  %6041 = vmatpush1.bf16.msra.mxu1 %v14472_v12  ;;  %v14520_v15 = vld [vmem:[%s19536_s5 + $0x248] ss:$12 sps:$4 sm:$0xff]  }
 0x515   : > { %13280 = vmatprep.subr.bf16.mxu0 %v14473_v59  ;;  %6042 = vmatprep.subr.bf16.mxu1 %v19608_v47  ;;  %v14523_v12 = vld [vmem:[%s19536_s5 + $0x634] ss:$12 sps:$4 sm:$0xff]   ;;  %v14521_v59 = vld [vmem:[%s19536_s5 + $0x630] ss:$12 sps:$4 sm:$0xff]  }
 0x517   : > { %5875 = vmatmul.mubr.bf16.gmra.mxu0 %v17519_v0 }
 0x518   : > { %13281 = vmatpush3.bf16.msra.mxu0 %v14474_v61  ;;  %6043 = vmatpush1.bf16.msra.mxu1 %v14475_v56  ;;  %v14530_v61 = vld [vmem:[%s19536_s5 + $0x61c] ss:$12 sps:$4 sm:$0xff]  }
 0x519   : > { %5966 = vmatprep.mubr.bf16.mxu0 %v17346_v8  ;;  %13282 = vmatprep.subr.bf16.mxu0 %v14476_v10  ;;  %v14525_v56 = vld [vmem:[%s19536_s5 + $0x510] ss:$12 sps:$4 sm:$0xff]   ;;  %v14528_v10 = vld [vmem:[%s19536_s5 + $0x618] ss:$12 sps:$4 sm:$0xff]  }
 0x51a   : > { %6044 = vmatprep.subr.bf16.mxu1 %v19608_v47 }
 0x51c   : > { %13283 = vmatpush3.bf16.msra.mxu0 %v14477_v37  ;;  %6045 = vmatpush1.bf16.msra.mxu1 %v14478_v21  ;;  %v14533_v37 = vld [vmem:[%s19536_s5 + $0x4fc] ss:$12 sps:$4 sm:$0xff]   ;;  %v14536_v21 = vld [vmem:[%s19536_s5 + $0x604] ss:$12 sps:$4 sm:$0xff]  }
 0x51d   : > { %13284 = vmatprep.subr.bf16.mxu0 %v14479_v38  ;;  %6048 = vmatprep.subr.bf16.mxu1 %v19608_v47  ;;  %v14531_v38 = vld [vmem:[%s19536_s5 + $0x4f8] ss:$12 sps:$4 sm:$0xff]  }
 0x520   : > { %13285 = vmatpush3.bf16.msra.mxu0 %v14480_v3  ;;  %6049 = vmatpush2.bf16.msra.mxu1 %v14481_v58  ;;  %v14534_v3 = vld [vmem:[%s19536_s5 + $0x600] ss:$12 sps:$4 sm:$0xff]   ;;  %v14539_v58 = vld [vmem:[%s19536_s5 + $0x4e4] ss:$12 sps:$4 sm:$0xff]  }
 0x521   : > { %13286 = vmatprep.subr.bf16.mxu0 %v14482_v1  ;;  %6050 = vmatprep.subr.bf16.mxu1 %v19608_v47  ;;  %v14542_v1 = vld [vmem:[%s19536_s5 + $0x5ec] ss:$12 sps:$4 sm:$0xff]  }
 0x524   : > { %13287 = vmatpush3.bf16.msra.mxu0 %v14483_v2  ;;  %6051 = vmatpush2.bf16.msra.mxu1 %v14484_v20  ;;  %v14537_v2 = vld [vmem:[%s19536_s5 + $0x4e0] ss:$12 sps:$4 sm:$0xff]   ;;  %v14540_v20 = vld [vmem:[%s19536_s5 + $0x5e8] ss:$12 sps:$4 sm:$0xff]  }
 0x525   : > { %13288 = vmatprep.subr.bf16.mxu0 %v14485_v28  ;;  %6052 = vmatprep.subr.bf16.mxu1 %v19608_v47  ;;  %v14545_v28 = vld [vmem:[%s19536_s5 + $0x4cc] ss:$12 sps:$4 sm:$0xff]  }
 0x528   : > { %13289 = vmatpush3.bf16.msra.mxu0 %v14486_v45  ;;  %6053 = vmatpush2.bf16.msra.mxu1 %v14487_v27  ;;  %v14548_v45 = vld [vmem:[%s19536_s5 + $0x754] ss:$12 sps:$4 sm:$0xff]  }
 0x529   : > { %13290 = vmatprep.subr.bf16.mxu0 %v14488_v51  ;;  %6054 = vmatprep.subr.bf16.mxu1 %v19608_v47  ;;  %v14543_v27 = vld [vmem:[%s19536_s5 + $0x4c8] ss:$12 sps:$4 sm:$0xff]   ;;  %v14546_v51 = vld [vmem:[%s19536_s5 + $0x750] ss:$12 sps:$4 sm:$0xff]  }
 0x52c   : > { %13291 = vmatpush3.bf16.msra.mxu0 %v14489_v9  ;;  %6055 = vmatpush2.bf16.msra.mxu1 %v14490_v18  ;;  %v14551_v9 = vld [vmem:[%s19536_s5 + $0x4b4] ss:$12 sps:$4 sm:$0xff]   ;;  %v14554_v18 = vld [vmem:[%s19536_s5 + $0x73c] ss:$12 sps:$4 sm:$0xff]  }
 0x52d   : > { %13304 = vmatprep.subr.bf16.mxu0 %v14491_v49  ;;  %6056 = vmatprep.subr.bf16.mxu1 %v19608_v47  ;;  %v14549_v49 = vld [vmem:[%s19536_s5 + $0x4b0] ss:$12 sps:$4 sm:$0xff]  }
 0x52f   : > { %5967 = vmatmul.mubr.bf16.vlgmr.msra.gmra.mxu0 %v17344_v4 }
 0x530   : > { %5974 = vmatprep.mubr.bf16.mxu0 %v17359_v34  ;;  %13305 = vmatpush3.bf16.msra.mxu0 %v14492_v14  ;;  %v14552_v14 = vld [vmem:[%s19536_s5 + $0x738] ss:$12 sps:$4 sm:$0xff]  }
 0x531   : > { %6057 = vmatpush2.bf16.msra.mxu1 %v14493_v63  ;;  %13306 = vmatprep.subr.bf16.mxu0 %v14494_v7  ;;  %v14557_v63 = vld [vmem:[%s19536_s5 + $0x49c] ss:$12 sps:$4 sm:$0xff]   ;;  %v14560_v7 = vld [vmem:[%s19536_s5 + $0x724] ss:$12 sps:$4 sm:$0xff]  }
 0x532   : > { %6058 = vmatprep.subr.bf16.mxu1 %v19608_v47 }
 0x534   : > { %13307 = vmatpush3.bf16.msra.mxu0 %v14495_v53  ;;  %v14555_v53 = vld [vmem:[%s19536_s5 + $0x498] ss:$12 sps:$4 sm:$0xff]  }
 0x535   : > { %6059 = vmatpush2.bf16.msra.mxu1 %v14496_v62  ;;  %13308 = vmatprep.subr.bf16.mxu0 %v14497_v31  ;;  %v14558_v62 = vld [vmem:[%s19536_s5 + $0x720] ss:$12 sps:$4 sm:$0xff]   ;;  %v14563_v31 = vld [vmem:[%s19536_s5 + $0x484] ss:$12 sps:$4 sm:$0xff]  }
 0x536   : > { %6060 = vmatprep.subr.bf16.mxu1 %v19608_v47 }
 0x537   : > { %5975 = vmatmul.mubr.bf16.gmra.mxu0 %v17365_v54 }
 0x538   : > { %13309 = vmatpush3.bf16.msra.mxu0 %v14498_v33  ;;  %6014 = vmatprep.mubr.bf16.mxu0 %v17483_v36  ;;  %v14566_v33 = vld [vmem:[%s19536_s5 + $0x70c] ss:$12 sps:$4 sm:$0xff]  }
 0x539   : > { %6061 = vmatpush2.bf16.msra.mxu1 %v14499_v32  ;;  %13310 = vmatprep.subr.bf16.mxu0 %v14500_v24  ;;  %v14561_v32 = vld [vmem:[%s19536_s5 + $0x480] ss:$12 sps:$4 sm:$0xff]   ;;  %v14564_v24 = vld [vmem:[%s19536_s5 + $0x708] ss:$12 sps:$4 sm:$0xff]  }
 0x53a   : > { %7070 = vmatprep.subr.bf16.mxu1 %v14503_v6  ;;  %v14569_v6 = vld [vmem:[%s19536_s5 + $0x46c] ss:$12 sps:$4 sm:$0xff]  }
 0x53c   : > { %6063 = vmatmul.mubr.bf16.vlgmr.msra.gmra.mxu1 %v17455_v50  ;;  %13311 = vmatpush3.bf16.msra.mxu0 %v14504_v60  ;;  %v14572_v60 = vld [vmem:[%s19536_s5 + $0x6f4] ss:$12 sps:$4 sm:$0xff]  }
 0x53d   : > { %12248 = vmatprep.mubr.msk.bf16.mxu1 %vm5774_vm6, %v17460_v11  ;;  %7071 = vmatpush1.bf16.msra.mxu1 %v14501_v22 }
 0x53e   : > { %13312 = vmatprep.subr.bf16.mxu0 %v14505_v44  ;;  %7072 = vmatprep.subr.bf16.mxu1 %v14508_v26  ;;  %v14567_v44 = vld [vmem:[%s19536_s5 + $0x468] ss:$12 sps:$4 sm:$0xff]   ;;  %v14570_v26 = vld [vmem:[%s19536_s5 + $0x6f0] ss:$12 sps:$4 sm:$0xff]  }
 0x540   : > { %13313 = vmatpush3.bf16.msra.mxu0 %v14509_v39  ;;  %v14575_v39 = vld [vmem:[%s19536_s5 + $0x5d4] ss:$12 sps:$4 sm:$0xff]  }
 0x541   : > { %7073 = vmatpush1.bf16.msra.mxu1 %v14506_v43  ;;  %13314 = vmatprep.subr.bf16.mxu0 %v14510_v42  ;;  %v14578_v42 = vld [vmem:[%s19536_s5 + $0x6dc] ss:$12 sps:$4 sm:$0xff]  }
 0x542   : > { %7074 = vmatprep.subr.bf16.mxu1 %v14513_v48 }
 0x544   : > { %6071 = vmatmul.mubr.bf16.gmra.mxu1 %v17471_v13  ;;  %13315 = vmatpush3.bf16.msra.mxu0 %v14514_v30  ;;  %v14573_v30 = vld [vmem:[%s19536_s5 + $0x5d0] ss:$12 sps:$4 sm:$0xff]  }
 0x545   : > { %7075 = vmatpush1.bf16.msra.mxu1 %v14511_v41  ;;  %7102 = vmatprep.mubr.bf16.mxu1 %v17483_v36  ;;  %v14576_v41 = vld [vmem:[%s19536_s5 + $0x6d8] ss:$12 sps:$4 sm:$0xff]  }
 0x546   : > { %13316 = vmatprep.subr.bf16.mxu0 %v14515_v16  ;;  %7076 = vmatprep.subr.bf16.mxu1 %v14518_v19  ;;  %v14581_v16 = vld [vmem:[%s19536_s5 + $0x5bc] ss:$12 sps:$4 sm:$0xff]  }
 0x548   : > { %13317 = vmatpush3.bf16.msra.mxu0 %v14519_v25  ;;  %v14584_v25 = vld [vmem:[%s19536_s5 + $0x6c4] ss:$12 sps:$4 sm:$0xff]  }
 0x549   : > { %7077 = vmatpush1.bf16.msra.mxu1 %v14516_v5  ;;  %13318 = vmatprep.subr.bf16.mxu0 %v14520_v15  ;;  %v14579_v15 = vld [vmem:[%s19536_s5 + $0x5b8] ss:$12 sps:$4 sm:$0xff]  }
 0x54a   : > { %7078 = vmatprep.subr.bf16.mxu1 %v14523_v12  ;;  %v14582_v12 = vld [vmem:[%s19536_s5 + $0x6c0] ss:$12 sps:$4 sm:$0xff]  }
 0x54c   : > { %13319 = vmatpush3.bf16.msra.mxu0 %v14524_v40  ;;  %v14587_v40 = vld [vmem:[%s19536_s5 + $0x5a4] ss:$12 sps:$4 sm:$0xff]  }
 0x54d   : > { %7079 = vmatpush1.bf16.msra.mxu1 %v14521_v59  ;;  %7019 = vmatprep.subr.bf16.mxu0 %v14527_v29  ;;  %v14590_v29 = vld [vmem:[%s19536_s5 + $0x6ac] ss:$12 sps:$4 sm:$0xff]  }
 0x54e   : > { %7080 = vmatprep.subr.bf16.mxu1 %v14530_v61 }
 0x54f   : > { %6015 = vmatmul.mubr.bf16.vlgmr.msra.gmra.mxu0 %v17491_v23 }
 0x550   : > { %6022 = vmatprep.mubr.bf16.mxu0 %v17499_v46  ;;  %7020 = vmatpush1.bf16.msra.mxu0 %v14525_v56  ;;  %v14585_v56 = vld [vmem:[%s19536_s5 + $0x5a0] ss:$12 sps:$4 sm:$0xff]  }
 0x551   : > { %7081 = vmatpush1.bf16.msra.mxu1 %v14528_v10  ;;  %7021 = vmatprep.subr.bf16.mxu0 %v14533_v37  ;;  %v14588_v10 = vld [vmem:[%s19536_s5 + $0x6a8] ss:$12 sps:$4 sm:$0xff]   ;;  %v14593_v37 = vld [vmem:[%s19536_s5 + $0x58c] ss:$12 sps:$4 sm:$0xff]  }
 0x552   : > { %7082 = vmatprep.subr.bf16.mxu1 %v14536_v21 }
 0x554   : > { %7022 = vmatpush1.bf16.msra.mxu0 %v14531_v38  ;;  %v14594_v38 = vld [vmem:[%s19536_s5 + $0x5d8] ss:$12 sps:$4 sm:$0xff]  }
 0x555   : > { %7083 = vmatpush1.bf16.msra.mxu1 %v14534_v3  ;;  %7023 = vmatprep.subr.bf16.mxu0 %v14539_v58  ;;  %v14591_v3 = vld [vmem:[%s19536_s5 + $0x588] ss:$12 sps:$4 sm:$0xff]   ;;  %v14595_v58 = vld [vmem:[%s19536_s5 + $0x518] ss:$12 sps:$4 sm:$0xff]  }
 0x556   : > { %7084 = vmatprep.subr.bf16.mxu1 %v14542_v1  ;;  %v14598_v1 = vld [vmem:[%s19536_s5 + $0x574] ss:$12 sps:$4 sm:$0xff]  }
 0x557   : > { %6023 = vmatmul.mubr.bf16.gmra.mxu0 %v17519_v0 }
 0x558   : > { %7024 = vmatpush1.bf16.msra.mxu0 %v14537_v2  ;;  %7051 = vmatprep.mubr.bf16.mxu0 %v17346_v8  ;;  %v14599_v2 = vld [vmem:[%s19536_s5 + $0x5c0] ss:$12 sps:$4 sm:$0xff]  }
 0x559   : > { %7085 = vmatpush1.bf16.msra.mxu1 %v14540_v20  ;;  %7025 = vmatprep.subr.bf16.mxu0 %v14545_v28  ;;  %v14596_v20 = vld [vmem:[%s19536_s5 + $0x570] ss:$12 sps:$4 sm:$0xff]   ;;  %v14600_v28 = vld [vmem:[%s19536_s5 + $0x500] ss:$12 sps:$4 sm:$0xff]  }
 0x55a   : > { %7086 = vmatprep.subr.bf16.mxu1 %v14548_v45  ;;  %v14603_v45 = vld [vmem:[%s19536_s5 + $0x55c] ss:$12 sps:$4 sm:$0xff]  }
 0x55c   : > { %7026 = vmatpush1.bf16.msra.mxu0 %v14543_v27  ;;  %v14604_v27 = vld [vmem:[%s19536_s5 + $0x5a8] ss:$12 sps:$4 sm:$0xff]  }
 0x55d   : > { %7087 = vmatpush2.bf16.msra.mxu1 %v14546_v51  ;;  %7027 = vmatprep.subr.bf16.mxu0 %v14551_v9  ;;  %v14601_v51 = vld [vmem:[%s19536_s5 + $0x558] ss:$12 sps:$4 sm:$0xff]   ;;  %v14605_v9 = vld [vmem:[%s19536_s5 + $0x4e8] ss:$12 sps:$4 sm:$0xff]  }
 0x55e   : > { %7088 = vmatprep.subr.bf16.mxu1 %v14554_v18  ;;  %v14608_v18 = vld [vmem:[%s19536_s5 + $0x544] ss:$12 sps:$4 sm:$0xff]  }
 0x560   : > { %7028 = vmatpush1.bf16.msra.mxu0 %v14549_v49  ;;  %v14609_v49 = vld [vmem:[%s19536_s5 + $0x590] ss:$12 sps:$4 sm:$0xff]  }
 0x561   : > { %7089 = vmatpush2.bf16.msra.mxu1 %v14552_v14  ;;  %7029 = vmatprep.subr.bf16.mxu0 %v14557_v63  ;;  %v14606_v14 = vld [vmem:[%s19536_s5 + $0x540] ss:$12 sps:$4 sm:$0xff]   ;;  %v14610_v63 = vld [vmem:[%s19536_s5 + $0x4d0] ss:$12 sps:$4 sm:$0xff]  }
 0x562   : > { %7090 = vmatprep.subr.bf16.mxu1 %v14560_v7  ;;  %v14613_v7 = vld [vmem:[%s19536_s5 + $0x52c] ss:$12 sps:$4 sm:$0xff]  }
 0x564   : > { %7030 = vmatpush1.bf16.msra.mxu0 %v14555_v53  ;;  %v14614_v53 = vld [vmem:[%s19536_s5 + $0x578] ss:$12 sps:$4 sm:$0xff]  }
 0x565   : > { %7091 = vmatpush2.bf16.msra.mxu1 %v14558_v62  ;;  %7031 = vmatprep.subr.bf16.mxu0 %v14563_v31  ;;  %v14611_v62 = vld [vmem:[%s19536_s5 + $0x528] ss:$12 sps:$4 sm:$0xff]  }
 0x566   : > { %7092 = vmatprep.subr.bf16.mxu1 %v14566_v33  ;;  %v14618_v31 = vld [vmem:[%s19536_s5 + $0x814] ss:$12 sps:$4 sm:$0xff]  }
 0x567   : > { %v17767_v22 = vpop.f32.mrf.mxu1  ;;  %v14619_v33 = vld [vmem:[%s19536_s5 + $0x560] ss:$12 sps:$4 sm:$0xff]  }
 0x568   : > { %7032 = vmatpush1.bf16.msra.mxu0 %v14561_v32  ;;  %v14616_v32 = vld [vmem:[%s19536_s5 + $0x810] ss:$12 sps:$4 sm:$0xff]  }
 0x569   : > { %7093 = vmatpush2.bf16.msra.mxu1 %v14564_v24  ;;  %7033 = vmatprep.subr.bf16.mxu0 %v14569_v6  ;;  %v17778_v43 = vpop.f32.mrf.mxu1  ;;  %v14620_v24 = vld [vmem:[%s19536_s5 + $0x4a0] ss:$12 sps:$4 sm:$0xff]   ;;  %v14623_v6 = vld [vmem:[%s19536_s5 + $0x7fc] ss:$12 sps:$4 sm:$0xff]  }
 0x56a   : > { %7094 = vmatprep.subr.bf16.mxu1 %v14572_v60  ;;  %v14624_v60 = vld [vmem:[%s19536_s5 + $0x548] ss:$12 sps:$4 sm:$0xff]  }
 0x56b   : > { %v17783_v48 = vpop.f32.mrf.mxu1 }
 0x56c   : > { %7034 = vmatpush1.bf16.msra.mxu0 %v14567_v44  ;;  %v14621_v44 = vld [vmem:[%s19536_s5 + $0x7f8] ss:$12 sps:$4 sm:$0xff]  }
 0x56d   : > { %7095 = vmatpush2.bf16.msra.mxu1 %v14570_v26  ;;  %7035 = vmatprep.subr.bf16.mxu0 %v14575_v39  ;;  %v17794_v19 = vpop.f32.mrf.mxu1  ;;  %v14625_v26 = vld [vmem:[%s19536_s5 + $0x488] ss:$12 sps:$4 sm:$0xff]   ;;  %v14628_v39 = vld [vmem:[%s19536_s5 + $0x7e4] ss:$12 sps:$4 sm:$0xff]  }
 0x56e   : > { %7096 = vmatprep.subr.bf16.mxu1 %v14578_v42  ;;  %v14629_v42 = vld [vmem:[%s19536_s5 + $0x530] ss:$12 sps:$4 sm:$0xff]  }
 0x56f   : > { %v17799_v5 = vpop.f32.mrf.mxu1 }
 0x570   : > { %7036 = vmatpush2.bf16.msra.mxu0 %v14573_v30  ;;  %v14626_v30 = vld [vmem:[%s19536_s5 + $0x7e0] ss:$12 sps:$4 sm:$0xff]  }
 0x571   : > { %7097 = vmatpush2.bf16.msra.mxu1 %v14576_v41  ;;  %7037 = vmatprep.subr.bf16.mxu0 %v14581_v16  ;;  %v17810_v59 = vpop.f32.mrf.mxu1  ;;  %v14630_v41 = vld [vmem:[%s19536_s5 + $0x470] ss:$12 sps:$4 sm:$0xff]   ;;  %v14633_v16 = vld [vmem:[%s19536_s5 + $0x7cc] ss:$12 sps:$4 sm:$0xff]  }
 0x572   : > { %7098 = vmatprep.subr.bf16.mxu1 %v14584_v25  ;;  %v14631_v25 = vld [vmem:[%s19536_s5 + $0x7c8] ss:$12 sps:$4 sm:$0xff]  }
 0x573   : > { %v5829_v61 = vpop.f32.mrf.mxu1 }
 0x574   : > { %7038 = vmatpush2.bf16.msra.mxu0 %v14579_v15  ;;  %v14634_v15 = vld [vmem:[%s19536_s5 + $0x818] ss:$12 sps:$4 sm:$0xff]   ;;  %v14641_v61 = vld [vmem:[%s19536_s5 + $0x79c] ss:$12 sps:$4 sm:$0xff]  }
 0x575   : > { %7099 = vmatpush2.bf16.msra.mxu1 %v14582_v12  ;;  %7039 = vmatprep.subr.bf16.mxu0 %v14587_v40  ;;  %v5830_v21 = vpop.f32.mrf.mxu1  ;;  %v14637_v12 = vld [vmem:[%s19536_s5 + $0x7b4] ss:$12 sps:$4 sm:$0xff]   ;;  %v14635_v40 = vld [vmem:[%s19536_s5 + $0x7b0] ss:$12 sps:$4 sm:$0xff]  }
 0x576   : > { %7100 = vmatprep.subr.bf16.mxu1 %v14590_v29  ;;  %v14638_v29 = vld [vmem:[%s19536_s5 + $0x800] ss:$12 sps:$4 sm:$0xff]  }
 0x577   : > { %v14649_v21 = vld [vmem:[%s19536_s5 + $0x76c] ss:$12 sps:$4 sm:$0xff]  }
 0x578   : > { %7040 = vmatpush2.bf16.msra.mxu0 %v14585_v56  ;;  %v14645_v56 = vld [vmem:[%s19536_s5 + $0x784] ss:$12 sps:$4 sm:$0xff]  }
 0x579   : > { %7101 = vmatpush2.bf16.msra.mxu1 %v14588_v10  ;;  %7041 = vmatprep.subr.bf16.mxu0 %v14593_v37  ;;  %v14643_v10 = vld [vmem:[%s19536_s5 + $0x780] ss:$12 sps:$4 sm:$0xff]   ;;  %v14646_v37 = vld [vmem:[%s19536_s5 + $0x7d0] ss:$12 sps:$4 sm:$0xff]  }
 0x57a   : > { %13332 = vmatprep.subr.bf16.mxu1 %v14594_v38  ;;  %v14653_v38 = vld [vmem:[%s19536_s5 + $0x8bc] ss:$12 sps:$4 sm:$0xff]  }
 0x57c   : > { %7103 = vmatmul.mubr.bf16.vlgmr.msra.gmra.mxu1 %v17491_v23  ;;  %7042 = vmatpush2.bf16.msra.mxu0 %v14591_v3  ;;  %v14651_v3 = vld [vmem:[%s19536_s5 + $0x8b8] ss:$12 sps:$4 sm:$0xff]  }
 0x57d   : > { %7112 = vmatprep.mubr.bf16.mxu1 %v17499_v46  ;;  %13333 = vmatpush3.bf16.msra.mxu1 %v14595_v58  ;;  %v14654_v58 = vld [vmem:[%s19536_s5 + $0x7a0] ss:$12 sps:$4 sm:$0xff]  }
 0x57e   : > { %7043 = vmatprep.subr.bf16.mxu0 %v14598_v1  ;;  %13334 = vmatprep.subr.bf16.mxu1 %v14599_v2  ;;  %v14657_v1 = vld [vmem:[%s19536_s5 + $0x8a4] ss:$12 sps:$4 sm:$0xff]   ;;  %v14655_v2 = vld [vmem:[%s19536_s5 + $0x8a0] ss:$12 sps:$4 sm:$0xff]  }
 0x580   : > { %7044 = vmatpush2.bf16.msra.mxu0 %v14596_v20  ;;  %v14658_v20 = vld [vmem:[%s19536_s5 + $0x788] ss:$12 sps:$4 sm:$0xff]  }
 0x581   : > { %13335 = vmatpush3.bf16.msra.mxu1 %v14600_v28  ;;  %7045 = vmatprep.subr.bf16.mxu0 %v14603_v45  ;;  %v14661_v28 = vld [vmem:[%s19536_s5 + $0x88c] ss:$12 sps:$4 sm:$0xff]   ;;  %v14659_v45 = vld [vmem:[%s19536_s5 + $0x888] ss:$12 sps:$4 sm:$0xff]  }
 0x582   : > { %13336 = vmatprep.subr.bf16.mxu1 %v14604_v27  ;;  %v14662_v27 = vld [vmem:[%s19536_s5 + $0x770] ss:$12 sps:$4 sm:$0xff]  }
 0x584   : > { %7113 = vmatmul.mubr.bf16.gmra.mxu1 %v17519_v0  ;;  %7046 = vmatpush2.bf16.msra.mxu0 %v14601_v51  ;;  %v14665_v51 = vld [vmem:[%s19536_s5 + $0x874] ss:$12 sps:$4 sm:$0xff]  }
 0x585   : > { %13337 = vmatpush3.bf16.msra.mxu1 %v14605_v9  ;;  %7204 = vmatprep.mubr.bf16.mxu1 %v17346_v8  ;;  %v14615_v8 = vld [vmem:[%s19536_s5 + $0x4b8] ss:$12 sps:$4 sm:$0xff]   ;;  %v14663_v9 = vld [vmem:[%s19536_s5 + $0x870] ss:$12 sps:$4 sm:$0xff]  }
 0x586   : > { %7047 = vmatprep.subr.bf16.mxu0 %v14608_v18  ;;  %13338 = vmatprep.subr.bf16.mxu1 %v14609_v49  ;;  %v14666_v18 = vld [vmem:[%s19536_s5 + $0x8c0] ss:$12 sps:$4 sm:$0xff]   ;;  %v14669_v49 = vld [vmem:[%s19536_s5 + $0x85c] ss:$12 sps:$4 sm:$0xff]  }
 0x588   : > { %7048 = vmatpush2.bf16.msra.mxu0 %v14606_v14  ;;  %v14667_v14 = vld [vmem:[%s19536_s5 + $0x858] ss:$12 sps:$4 sm:$0xff]  }
 0x589   : > { %13339 = vmatpush3.bf16.msra.mxu1 %v14610_v63  ;;  %7049 = vmatprep.subr.bf16.mxu0 %v14613_v7  ;;  %v14670_v63 = vld [vmem:[%s19536_s5 + $0x8a8] ss:$12 sps:$4 sm:$0xff]   ;;  %v14673_v7 = vld [vmem:[%s19536_s5 + $0x844] ss:$12 sps:$4 sm:$0xff]  }
 0x58a   : > { %13340 = vmatprep.subr.bf16.mxu1 %v14614_v53 }
 0x58c   : > { %7050 = vmatpush2.bf16.msra.mxu0 %v14611_v62  ;;  %v14671_v62 = vld [vmem:[%s19536_s5 + $0x840] ss:$12 sps:$4 sm:$0xff]  }
 0x58d   : > { %13341 = vmatpush3.bf16.msra.mxu1 %v14615_v8  ;;  %7121 = vmatprep.subr.bf16.mxu0 %v14618_v31  ;;  %v14674_v31 = vld [vmem:[%s19536_s5 + $0x890] ss:$12 sps:$4 sm:$0xff]  }
 0x58e   : > { %13342 = vmatprep.subr.bf16.mxu1 %v14619_v33  ;;  %v14677_v33 = vld [vmem:[%s19536_s5 + $0x82c] ss:$12 sps:$4 sm:$0xff]  }
 0x58f   : > { %7052 = vmatmul.mubr.bf16.vlgmr.msra.gmra.mxu0 %v17344_v4 }
 0x590   : > { %7061 = vmatprep.mubr.bf16.mxu0 %v17359_v34  ;;  %7122 = vmatpush1.bf16.msra.mxu0 %v14616_v32 }
 0x591   : > { %13343 = vmatpush3.bf16.msra.mxu1 %v14620_v24  ;;  %7123 = vmatprep.subr.bf16.mxu0 %v14623_v6  ;;  %v14675_v24 = vld [vmem:[%s19536_s5 + $0x828] ss:$12 sps:$4 sm:$0xff]  }
 0x592   : > { %13344 = vmatprep.subr.bf16.mxu1 %v14624_v60  ;;  %v14678_v60 = vld [vmem:[%s19536_s5 + $0x878] ss:$12 sps:$4 sm:$0xff]  }
 0x594   : > { %7124 = vmatpush1.bf16.msra.mxu0 %v14621_v44  ;;  %v14679_v44 = vld [vmem:[%s19536_s5 + $0x758] ss:$12 sps:$4 sm:$0xff]  }
 0x595   : > { %13345 = vmatpush3.bf16.msra.mxu1 %v14625_v26  ;;  %7125 = vmatprep.subr.bf16.mxu0 %v14628_v39  ;;  %v14680_v39 = vld [vmem:[%s19536_s5 + $0x698] ss:$12 sps:$4 sm:$0xff]  }
 0x596   : > { %13346 = vmatprep.subr.bf16.mxu1 %v14629_v42 }
 0x597   : > { %7062 = vmatmul.mubr.bf16.gmra.mxu0 %v17365_v54 }
 0x598   : > { %7126 = vmatpush1.bf16.msra.mxu0 %v14626_v30  ;;  %12578 = vmatprep.mubr.msk.bf16.mxu0 %vm5774_vm6, %v17450_v52  ;;  %v14681_v30 = vld [vmem:[%s19536_s5 + $0x860] ss:$12 sps:$4 sm:$0xff]  }
 0x599   : > { %13347 = vmatpush3.bf16.msra.mxu1 %v14630_v41  ;;  %7127 = vmatprep.subr.bf16.mxu0 %v14633_v16  ;;  %v14682_v41 = vld [vmem:[%s19536_s5 + $0x740] ss:$12 sps:$4 sm:$0xff]  }
 0x59a   : > { %7268 = vmatprep.subr.bf16.mxu1 %v19608_v47 }
 0x59c   : > { %7205 = vmatmul.mubr.bf16.vlgmr.msra.gmra.mxu1 %v17344_v4  ;;  %7128 = vmatpush1.bf16.msra.mxu0 %v14631_v25  ;;  %v14639_v4 = vld [vmem:[%s19536_s5 + $0x798] ss:$12 sps:$4 sm:$0xff]   ;;  %v14683_v25 = vld [vmem:[%s19536_s5 + $0x680] ss:$12 sps:$4 sm:$0xff]  }
 0x59d   : > { %7212 = vmatprep.mubr.bf16.mxu1 %v17359_v34  ;;  %7269 = vmatpush1.bf16.msra.mxu1 %v14634_v15  ;;  %v14642_v34 = vld [vmem:[%s19536_s5 + $0x7e8] ss:$12 sps:$4 sm:$0xff]  }
 0x59e   : > { %7129 = vmatprep.subr.bf16.mxu0 %v14637_v12  ;;  %7270 = vmatprep.subr.bf16.mxu1 %v19608_v47  ;;  %v14684_v12 = vld [vmem:[%s19536_s5 + $0x848] ss:$12 sps:$4 sm:$0xff]  }
 0x5a0   : > { %7130 = vmatpush1.bf16.msra.mxu0 %v14635_v40  ;;  %v14685_v40 = vld [vmem:[%s19536_s5 + $0x728] ss:$12 sps:$4 sm:$0xff]  }
 0x5a1   : > { %7271 = vmatpush1.bf16.msra.mxu1 %v14638_v29  ;;  %7131 = vmatprep.subr.bf16.mxu0 %v14641_v61 }
 0x5a2   : > { %7272 = vmatprep.subr.bf16.mxu1 %v19608_v47 }
 0x5a4   : > { %7213 = vmatmul.mubr.bf16.gmra.mxu1 %v17365_v54  ;;  %7132 = vmatpush1.bf16.msra.mxu0 %v14639_v4  ;;  %v14647_v54 = vld [vmem:[%s19536_s5 + $0x768] ss:$12 sps:$4 sm:$0xff]  }
 0x5a5   : > { %7273 = vmatpush1.bf16.msra.mxu1 %v14642_v34  ;;  %12580 = vmatprep.mubr.msk.bf16.mxu1 %vm5774_vm6, %v17450_v52  ;;  %v14650_v52 = vld [vmem:[%s19536_s5 + $0x7b8] ss:$12 sps:$4 sm:$0xff]   ;;  %v14686_v4 = vld [vmem:[%s19536_s5 + $0x668] ss:$12 sps:$4 sm:$0xff]  }
 0x5a6   : > { %7133 = vmatprep.subr.bf16.mxu0 %v14645_v56  ;;  %7274 = vmatprep.subr.bf16.mxu1 %v19608_v47  ;;  %v14687_v56 = vld [vmem:[%s19536_s5 + $0x830] ss:$12 sps:$4 sm:$0xff]  }
 0x5a8   : > { %7134 = vmatpush1.bf16.msra.mxu0 %v14643_v10  ;;  %v14688_v10 = vld [vmem:[%s19536_s5 + $0x710] ss:$12 sps:$4 sm:$0xff]  }
 0x5a9   : > { %7275 = vmatpush1.bf16.msra.mxu1 %v14646_v37  ;;  %7135 = vmatprep.subr.bf16.mxu0 %v14649_v21 }
 0x5aa   : > { %7276 = vmatprep.subr.bf16.mxu1 %v19608_v47 }
 0x5ac   : > { %7136 = vmatpush1.bf16.msra.mxu0 %v14647_v54 }
 0x5ad   : > { %7277 = vmatpush1.bf16.msra.mxu1 %v14650_v52  ;;  %7139 = vmatprep.subr.bf16.mxu0 %v14653_v38  ;;  %v14689_v38 = vld [vmem:[%s19536_s5 + $0x650] ss:$12 sps:$4 sm:$0xff]  }
 0x5ae   : > { %7278 = vmatprep.subr.bf16.mxu1 %v19608_v47 }
 0x5b0   : > { %7140 = vmatpush2.bf16.msra.mxu0 %v14651_v3 }
 0x5b1   : > { %7279 = vmatpush1.bf16.msra.mxu1 %v14654_v58  ;;  %7141 = vmatprep.subr.bf16.mxu0 %v14657_v1 }
 0x5b2   : > { %7280 = vmatprep.subr.bf16.mxu1 %v19608_v47 }
 0x5b4   : > { %7142 = vmatpush2.bf16.msra.mxu0 %v14655_v2 }
 0x5b5   : > { %7281 = vmatpush1.bf16.msra.mxu1 %v14658_v20  ;;  %7143 = vmatprep.subr.bf16.mxu0 %v14661_v28  ;;  %v14692_v20 = vld [vmem:[%s19536_s5 + $0x6e0] ss:$12 sps:$4 sm:$0xff]  }
 0x5b6   : > { %7282 = vmatprep.subr.bf16.mxu1 %v19608_v47 }
 0x5b8   : > { %7144 = vmatpush2.bf16.msra.mxu0 %v14659_v45 }
 0x5b9   : > { %7283 = vmatpush1.bf16.msra.mxu1 %v14662_v27  ;;  %7145 = vmatprep.subr.bf16.mxu0 %v14665_v51  ;;  %v14693_v27 = vld [vmem:[%s19536_s5 + $0x620] ss:$12 sps:$4 sm:$0xff]  }
 0x5ba   : > { %7286 = vmatprep.subr.bf16.mxu1 %v19608_v47 }
 0x5bc   : > { %7146 = vmatpush2.bf16.msra.mxu0 %v14663_v9  ;;  %v14696_v9 = vld [vmem:[%s19536_s5 + $0x6b0] ss:$12 sps:$4 sm:$0xff]  }
 0x5bd   : > { %7287 = vmatpush2.bf16.msra.mxu1 %v14666_v18  ;;  %7147 = vmatprep.subr.bf16.mxu0 %v14669_v49  ;;  %v14697_v18 = vld [vmem:[%s19536_s5 + $0x5f0] ss:$12 sps:$4 sm:$0xff]  }
 0x5be   : > { %7288 = vmatprep.subr.bf16.mxu1 %v19608_v47 }
 0x5bf   : > { %v5917_v53 = vpop.f32.mrf.mxu1 }
 0x5c0   : > { %7148 = vmatpush2.bf16.msra.mxu0 %v14667_v14 }
 0x5c1   : > { %7289 = vmatpush2.bf16.msra.mxu1 %v14670_v63  ;;  %v5919_v8 = vpop.f32.mrf.mxu1  ;;  %7149 = vmatprep.subr.bf16.mxu0 %v14673_v7 }
 0x5c2   : > { %7290 = vmatprep.subr.bf16.mxu1 %v19608_v47 }
 0x5c3   : > { %v5921_v32 = vpop.f32.mrf.mxu1 }
 0x5c4   : > { %7150 = vmatpush2.bf16.msra.mxu0 %v14671_v62 }
 0x5c5   : > { %7291 = vmatpush2.bf16.msra.mxu1 %v14674_v31  ;;  %v18047_v6 = vpop.f32.mrf.mxu1  ;;  %7151 = vmatprep.subr.bf16.mxu0 %v14677_v33 }
 0x5c6   : > { %7292 = vmatprep.subr.bf16.mxu1 %v19608_v47 }
 0x5c7   : > { %v5927_v26 = vpop.f32.mrf.mxu1 }
 0x5c8   : > { %7152 = vmatpush2.bf16.msra.mxu0 %v14675_v24 }
 0x5c9   : > { %7293 = vmatpush2.bf16.msra.mxu1 %v14678_v60  ;;  %v5929_v42 = vpop.f32.mrf.mxu1  ;;  %13360 = vmatprep.subr.bf16.mxu0 %v14679_v44 }
 0x5ca   : > { %7294 = vmatprep.subr.bf16.mxu1 %v19608_v47 }
 0x5cb   : > { %7154 = vmatmul.mubr.bf16.vlgmr.msra.gmra.mxu0 %v17455_v50  ;;  %v5931_v16 = vpop.f32.mrf.mxu1 }
 0x5cc   : > { %12579 = vmatprep.mubr.msk.bf16.mxu0 %vm5774_vm6, %v17460_v11  ;;  %13361 = vmatpush3.bf16.msra.mxu0 %v14680_v39 }
 0x5cd   : > { %7295 = vmatpush2.bf16.msra.mxu1 %v14681_v30  ;;  %v5932_v15 = vpop.f32.mrf.mxu1  ;;  %13362 = vmatprep.subr.bf16.mxu0 %v14682_v41 }
 0x5ce   : > { %7296 = vmatprep.subr.bf16.mxu1 %v19608_v47 }
 0x5cf   : > { %v5866_v29 = vpop.f32.mrf.mxu0 }
 0x5d0   : > { %v5867_v61 = vadd.f32 %v5866_v29, %v17767_v22  ;;  %13363 = vmatpush3.bf16.msra.mxu0 %v14683_v25 }
 0x5d1   : > { %7297 = vmatpush2.bf16.msra.mxu1 %v14684_v12  ;;  %v5868_v34 = vpop.f32.mrf.mxu0  ;;  %13364 = vmatprep.subr.bf16.mxu0 %v14685_v40 }
 0x5d2   : > { %v18089_v37 = vadd.f32 %v5917_v53, %v5867_v61  ;;  %v5869_v22 = vadd.f32 %v5868_v34, %v17778_v43  ;;  %7298 = vmatprep.subr.bf16.mxu1 %v19608_v47  ;;  %v14690_v43 = vld [vmem:[%s19536_s5 + $0x6f8] ss:$12 sps:$4 sm:$0xff]  }
 0x5d3   : > { %7164 = vmatmul.mubr.bf16.gmra.mxu0 %v17471_v13  ;;  %v5870_v21 = vpop.f32.mrf.mxu0 }
 0x5d4   : > { %v18094_v54 = vadd.f32 %v5919_v8, %v5869_v22  ;;  %v5871_v52 = vadd.f32 %v5870_v21, %v17783_v48  ;;  %13365 = vmatpush3.bf16.msra.mxu0 %v14686_v4  ;;  %7252 = vmatprep.mubr.bf16.mxu0 %v17483_v36  ;;  %v14691_v36 = vld [vmem:[%s19536_s5 + $0x638] ss:$12 sps:$4 sm:$0xff]  }
 0x5d5   : > { %7299 = vmatpush2.bf16.msra.mxu1 %v14687_v56  ;;  %v18101_v3 = vpop.f32.mrf.mxu0  ;;  %13366 = vmatprep.subr.bf16.mxu0 %v14688_v10 }
 0x5d6   : > { %v18106_v58 = vadd.f32 %v5921_v32, %v5871_v52 }
 0x5d7   : > { %v5876_v1 = vpop.f32.mrf.mxu0 }
 0x5d8   : > { %7301 = vmatmul.mubr.bf16.vlgmr.msra.gmra.mxu1 %v17455_v50  ;;  %v5877_v48 = vadd.f32 %v5876_v1, %v17799_v5  ;;  %13367 = vmatpush3.bf16.msra.mxu0 %v14689_v38 }
 0x5d9   : > { %12581 = vmatprep.mubr.msk.bf16.mxu1 %vm5774_vm6, %v17460_v11  ;;  %v5878_v2 = vpop.f32.mrf.mxu0  ;;  %13368 = vmatprep.subr.bf16.mxu0 %v14690_v43  ;;  %v14694_v11 = vld [vmem:[%s19536_s5 + $0x6c8] ss:$12 sps:$4 sm:$0xff]  }
 0x5da   : > { %v18118_v28 = vadd.f32 %v5927_v26, %v5877_v48  ;;  %v5879_v50 = vadd.f32 %v5878_v2, %v17810_v59  ;;  %v14695_v59 = vld [vmem:[%s19536_s5 + $0x608] ss:$12 sps:$4 sm:$0xff]  }
 0x5db   : > { %v5880_v45 = vpop.f32.mrf.mxu0 }
 0x5dc   : > { %v18121_v5 = vadd.f32 %v5929_v42, %v5879_v50  ;;  %13369 = vmatpush3.bf16.msra.mxu0 %v14691_v36 }
 0x5dd   : > { %v5881_v51 = vpop.f32.mrf.mxu0  ;;  %13370 = vmatprep.subr.bf16.mxu0 %v14692_v20 }
 0x5e0   : > { %7309 = vmatmul.mubr.bf16.gmra.mxu1 %v17471_v13  ;;  %13371 = vmatpush3.bf16.msra.mxu0 %v14693_v27 }
 0x5e1   : > { %13372 = vmatprep.subr.bf16.mxu0 %v14694_v11  ;;  %8171 = vmatprep.mubr.bf16.mxu1 %v19608_v47 }
 0x5e4   : > { %13373 = vmatpush3.bf16.msra.mxu0 %v14695_v59 }
 0x5e5   : > { %13374 = vmatprep.subr.bf16.mxu0 %v14696_v9 }
 0x5e8   : > { %13375 = vmatpush3.bf16.msra.mxu0 %v14697_v18 }
 0x5eb   : > { %7253 = vmatmul.mubr.bf16.vlgmr.msra.gmra.mxu0 %v17491_v23 }
 0x5ec   : > { %7260 = vmatprep.mubr.bf16.mxu0 %v17499_v46 }
 0x5ef   : > { %v13292_v13 = vpop.f32.mrf.mxu0 }
 0x5f1   : > { %v13293_v49 = vpop.f32.mrf.mxu0 }
 0x5f2   : > { %v13294_v14 = vadd.f32 %v13293_v49, %v13292_v13 }
 0x5f3   : > { %v13295_v63 = vpop.f32.mrf.mxu0  ;;  %7261 = vmatmul.mubr.bf16.gmra.mxu0 %v17519_v0 }
 0x5f4   : > { %7387 = vmatprep.mubr.bf16.mxu0 %v19608_v47 }
 0x5f5   : > { %v13296_v7 = vpop.f32.mrf.mxu0 }
 0x5f6   : > { %v13297_v15 = vadd.f32 %v13296_v7, %v13295_v63 }
 0x5f7   : > { %v13298_v53 = vpop.f32.mrf.mxu0 }
 0x5f9   : > { %v13299_v62 = vpop.f32.mrf.mxu0 }
 0x5fa   : > { %v13300_v8 = vadd.f32 %v13299_v62, %v13298_v53 }
 0x5fb   : > { %v13301_v31 = vpop.f32.mrf.mxu0 }
 0x5fc   : > { %v6064_v33 = vpop.f32.mrf.mxu1 }
 0x5fd   : > { %v13302_v32 = vpop.f32.mrf.mxu0 }
 0x5fe   : > { %v6066_v24 = vpop.f32.mrf.mxu1 }
 0x600   : > { %v6067_v60 = vpop.f32.mrf.mxu1 }
 0x602   : > { %v6069_v23 = vpop.f32.mrf.mxu1 }
 0x604   : > { %v6072_v44 = vpop.f32.mrf.mxu1 }
 0x606   : > { %v6074_v46 = vpop.f32.mrf.mxu1 }
 0x608   : > { %v6075_v26 = vpop.f32.mrf.mxu1 }
 0x60a   : > { %v6076_v39 = vpop.f32.mrf.mxu1 }
 0x60f   : > { %v13320_v42 = vpop.f32.mrf.mxu0 }
 0x611   : > { %v13321_v30 = vpop.f32.mrf.mxu0 }
 0x612   : > { %v13322_v41 = vadd.f32 %v13321_v30, %v13320_v42  ;;  %v5873_v30 = vadd.f32 %v18101_v3, %v17794_v19 }
 0x613   : > { %v13323_v0 = vpop.f32.mrf.mxu0 }
 0x614   : > { %v6017_v16 = vadd.f32 %v13322_v41, %v13294_v14 }
 0x615   : > { %v13324_v25 = vpop.f32.mrf.mxu0 }
 0x616   : > { %v18144_v12 = vadd.f32 %v6064_v33, %v6017_v16  ;;  %v13325_v40 = vadd.f32 %v13324_v25, %v13323_v0 }
 0x617   : > { %v13326_v29 = vpop.f32.mrf.mxu0 }
 0x618   : > { %v6020_v61 = vadd.f32 %v13325_v40, %v13297_v15 }
 0x619   : > { %v13327_v4 = vpop.f32.mrf.mxu0 }
 0x61a   : > { %v18146_v34 = vadd.f32 %v6067_v60, %v6020_v61  ;;  %v13328_v56 = vadd.f32 %v13327_v4, %v13326_v29  ;;  %v5924_v29 = vadd.f32 %v18047_v6, %v5873_v30  ;;  %v7344_v6 = vsel %vm7342_vm7, 4294967295, %v15238_v57 }
 0x61b   : > { %v13329_v10 = vpop.f32.mrf.mxu0 }
 0x61c   : > { %v6025_v22 = vadd.f32 %v13328_v56, %v13300_v8 }
 0x61d   : > { %v13330_v21 = vpop.f32.mrf.mxu0 }
 0x61e   : > { %v18148_v52 = vadd.f32 %v6072_v44, %v6025_v22 }
 0x63c   : > { %v7104_v38 = vpop.f32.mrf.mxu1 }
 0x63e   : > { %v7106_v43 = vpop.f32.mrf.mxu1 }
 0x640   : > { %v7108_v1 = vpop.f32.mrf.mxu1 }
 0x642   : > { %v7110_v48 = vpop.f32.mrf.mxu1 }
 0x644   : > { %v7114_v36 = vpop.f32.mrf.mxu1 }
 0x646   : > { %v7116_v2 = vpop.f32.mrf.mxu1 }
 0x648   : > { %v7118_v20 = vpop.f32.mrf.mxu1 }
 0x649   : > { %v7345_v20 = vsel %vm7343_vm8, %v7344_v6, 0  ;;  %v14718_v6 = vld [vmem:[%s19538_s7 + $0x240] ss:$12 sps:$4 sm:$0xff]  }
 0x64a   : > { %v7119_v50 = vpop.f32.mrf.mxu1 }
 0x64f   : > { %v7053_v45 = vpop.f32.mrf.mxu0 }
 0x650   : > { %v7105_v27 = vadd.f32 %v7104_v38, %v7053_v45 }
 0x651   : > { %v7055_v51 = vpop.f32.mrf.mxu0 }
 0x652   : > { %v7107_v11 = vadd.f32 %v7106_v43, %v7055_v51 }
 0x653   : > { %v7057_v59 = vpop.f32.mrf.mxu0 }
 0x654   : > { %v7109_v9 = vadd.f32 %v7108_v1, %v7057_v59 }
 0x655   : > { %v7059_v18 = vpop.f32.mrf.mxu0 }
 0x656   : > { %v7111_v13 = vadd.f32 %v7110_v48, %v7059_v18 }
 0x657   : > { %v7063_v49 = vpop.f32.mrf.mxu0 }
 0x658   : > { %v7115_v61 = vadd.f32 %v7114_v36, %v7063_v49 }
 0x659   : > { %v7065_v14 = vpop.f32.mrf.mxu0 }
 0x65a   : > { %v7117_v22 = vadd.f32 %v7116_v2, %v7065_v14 }
 0x65b   : > { %v7067_v63 = vpop.f32.mrf.mxu0 }
 0x65c   : > { %v13348_v7 = vpop.f32.mrf.mxu1 }
 0x65d   : > { %v7068_v53 = vpop.f32.mrf.mxu0 }
 0x65e   : > { %v13349_v62 = vpop.f32.mrf.mxu1 }
 0x65f   : > { %v18150_v8 = vadd.f32 %v13349_v62, %v13348_v7 }
 0x660   : > { %v13351_v31 = vpop.f32.mrf.mxu1 }
 0x662   : > { %v13352_v33 = vpop.f32.mrf.mxu1 }
 0x663   : > { %v18152_v32 = vadd.f32 %v13352_v33, %v13351_v31 }
 0x664   : > { %v13354_v24 = vpop.f32.mrf.mxu1 }
 0x666   : > { %v13355_v60 = vpop.f32.mrf.mxu1 }
 0x667   : > { %v18154_v23 = vadd.f32 %v13355_v60, %v13354_v24 }
 0x668   : > { %v13357_v44 = vpop.f32.mrf.mxu1 }
 0x66a   : > { %v13358_v46 = vpop.f32.mrf.mxu1 }
 0x68b   : > { %v7155_v26 = vpop.f32.mrf.mxu0 }
 0x68c   : > { %v7156_v39 = vadd.f32 %v7155_v26, %v7105_v27 }
 0x68d   : > { %v7157_v42 = vpop.f32.mrf.mxu0 }
 0x68e   : > { %v7316_v41 = vmax.f32 %v18089_v37, %v7156_v39  ;;  %v7158_v0 = vadd.f32 %v7157_v42, %v7107_v11 }
 0x68f   : > { %v7159_v16 = vpop.f32.mrf.mxu0 }
 0x690   : > { %v7317_v25 = vmax.f32 %v18094_v54, %v7158_v0  ;;  %v7160_v15 = vadd.f32 %v7159_v16, %v7109_v9  ;;  %v14698_v9 = vld [vmem:[%s19537_s6] sm:$0x3f]  }
 0x691   : > { %v7161_v40 = vpop.f32.mrf.mxu0 }
 0x692   : > { %v7319_v4 = vmax.f32 %v18106_v58, %v7160_v15  ;;  %v7162_v56 = vadd.f32 %v7161_v40, %v7111_v13  ;;  %v19643_v13 = vmov 0.0  }
 0x693   : > { %v7165_v10 = vpop.f32.mrf.mxu0 }
 0x694   : > { %v18162_v21 = vpack.c.bf16 %v7319_v4, %v7316_v41  ;;  %v7320_v19 = vmax.f32 %v5924_v29, %v7162_v56  ;;  %v7166_v3 = vadd.f32 %v7165_v10, %v7115_v61  ;;  %v14708_v61 = vld [vmem:[%s19538_s7 + $0x2a4] ss:$12 sps:$4 sm:$0xff]   ;;  %v14706_v4 = vld [vmem:[%s19538_s7 + $0x2a0] ss:$12 sps:$4 sm:$0xff]   ;;  %v14709_v10 = vld [vmem:[%s19538_s7 + $0x288] ss:$12 sps:$4 sm:$0xff]  }
 0x695   : > { %v7167_v37 = vpop.f32.mrf.mxu0  ;;  %v14711_v56 = vld [vmem:[%s19538_s7 + $0x28c] ss:$12 sps:$4 sm:$0xff]  }
 0x696   : > { %v7322_v38 = vmax.f32 %v18118_v28, %v7166_v3  ;;  %v7168_v43 = vadd.f32 %v7167_v37, %v7117_v22  ;;  %v18165_v54 = vpack.c.bf16 %v7320_v19, %v7317_v25  ;;  %v14714_v22 = vld [vmem:[%s19538_s7 + $0x274] ss:$12 sps:$4 sm:$0xff]   ;;  %v14712_v19 = vld [vmem:[%s19538_s7 + $0x270] ss:$12 sps:$4 sm:$0xff]   ;;  %v14715_v37 = vld [vmem:[%s19538_s7 + $0x258] ss:$12 sps:$4 sm:$0xff]  }
 0x697   : > { %v7169_v1 = vpop.f32.mrf.mxu0  ;;  %v14717_v3 = vld [vmem:[%s19538_s7 + $0x25c] ss:$12 sps:$4 sm:$0xff]  }
 0x698   : > { %v7323_v58 = vmax.f32 %v18121_v5, %v7168_v43  ;;  %v7302_v48 = vpop.f32.mrf.mxu1  ;;  %v7330_v36 = vpack.c.bf16 %v7322_v38, %v7322_v38  ;;  %v14720_v38 = vld [vmem:[%s19538_s7 + $0x244] ss:$12 sps:$4 sm:$0xff]   ;;  %v14735_v1 = vld [vmem:[%s19538_s7 + $0x43c] ss:$12 sps:$4 sm:$0xff]  }
 0x699   : > { %v7170_v2 = vpop.f32.mrf.mxu0  ;;  %v14733_v43 = vld [vmem:[%s19538_s7 + $0x438] ss:$12 sps:$4 sm:$0xff]   ;;  %8141 = vmatprep.subr.bf16.mxu1 %v14735_v1 }
 0x69a   : > { %v7331_v50 = vpack.c.bf16 %v7323_v58, %v7323_v58  ;;  %v7304_v45 = vpop.f32.mrf.mxu1  ;;  %v18172_v28 = vand.u32 %v7345_v20, %v7330_v36  ;;  %v14723_v58 = vld [vmem:[%s19538_s7 + $0x22c] ss:$12 sps:$4 sm:$0xff]   ;;  %8142 = vmatpush1.bf16.msra.mxu1 %v14733_v43  ;;  %v14721_v2 = vld [vmem:[%s19538_s7 + $0x228] ss:$12 sps:$4 sm:$0xff]  }
 0x69b   : > { %v14739_v36 = vld [vmem:[%s19538_s7 + $0x420] ss:$12 sps:$4 sm:$0xff]   ;;  %v14729_v45 = vld [vmem:[%s19538_s7 + $0x37c] ss:$12 sps:$4 sm:$0xff]  }
 0x69c   : > { %v7305_v27 = vpop.f32.mrf.mxu1  ;;  %v18170_v51 = vand.u32 %v7345_v20, %v7331_v50  ;;  %v14724_v50 = vld [vmem:[%s19538_s7 + $0x390] ss:$12 sps:$4 sm:$0xff]  }
 0x69e   : > { %v7307_v11 = vpop.f32.mrf.mxu1  ;;  %7367 = vmatprep.subr.bf16.mxu0 %v18170_v51 }
 0x69f   : > { %7368 = vmatpush1.bf16.msra.mxu0 %v18172_v28  ;;  %v14732_v11 = vld [vmem:[%s19538_s7 + $0x364] ss:$12 sps:$4 sm:$0xff]  }
 0x6a0   : > { %v7310_v59 = vpop.f32.mrf.mxu1  ;;  %7369 = vmatprep.subr.bf16.mxu0 %v18165_v54 }
 0x6a2   : > { %v7312_v5 = vpop.f32.mrf.mxu1 }
 0x6a3   : > { %7370 = vmatpush1.bf16.msra.mxu0 %v18162_v21  ;;  %v14738_v5 = vld [vmem:[%s19538_s7 + $0x34c] ss:$12 sps:$4 sm:$0xff]  }
 0x6a4   : > { %v7313_v18 = vpop.f32.mrf.mxu1  ;;  %13594 = vmatprep.subr.bf16.mxu0 %v19643_v13 }
 0x6a5   : > { %v14742_v18 = vld [vmem:[%s19538_s7 + $0x330] ss:$12 sps:$4 sm:$0xff]  }
 0x6a6   : > { %v7314_v49 = vpop.f32.mrf.mxu1  ;;  %12583 = vmatmul.mubr.msk.bf16.vlgmr.msra.gmra.mxu0 %vm7338_vm9, %v14698_v9 }
 0x6a7   : > { %13598 = vmatprep.mubr.msk.bf16.mxu0 %vm15236_vm0, %v19643_v13  ;;  %v14744_v49 = vld [vmem:[%s19538_s7 + $0x334] ss:$12 sps:$4 sm:$0xff]  }
 0x6ab   : > { %v13376_v14 = vpop.f32.mrf.mxu0 }
 0x6ad   : > { %v13377_v63 = vpop.f32.mrf.mxu0 }
 0x6ae   : > { %v13378_v7 = vadd.f32 %v13377_v63, %v13376_v14  ;;  %v14747_v14 = vld [vmem:[%s19538_s7 + $0x40c] ss:$12 sps:$4 sm:$0xff]   ;;  %v14745_v63 = vld [vmem:[%s19538_s7 + $0x408] ss:$12 sps:$4 sm:$0xff]  }
 0x6af   : > { %v13379_v53 = vpop.f32.mrf.mxu0 }
 0x6b0   : > { %v7255_v62 = vadd.f32 %v13378_v7, %v18150_v8  ;;  %v14750_v7 = vld [vmem:[%s19538_s7 + $0x31c] ss:$12 sps:$4 sm:$0xff]  }
 0x6b1   : > { %v13380_v31 = vpop.f32.mrf.mxu0 }
 0x6b2   : > { %v7303_v33 = vadd.f32 %v7302_v48, %v7255_v62  ;;  %v13381_v24 = vadd.f32 %v13380_v31, %v13379_v53  ;;  %v14741_v48 = vld [vmem:[%s19538_s7 + $0x424] ss:$12 sps:$4 sm:$0xff]   ;;  %v14753_v62 = vld [vmem:[%s19538_s7 + $0x3f4] ss:$12 sps:$4 sm:$0xff]  }
 0x6b3   : > { %v13382_v60 = vpop.f32.mrf.mxu0  ;;  %8143 = vmatprep.subr.bf16.mxu1 %v14741_v48  ;;  %v14748_v53 = vld [vmem:[%s19538_s7 + $0x318] ss:$12 sps:$4 sm:$0xff]   ;;  %v14751_v31 = vld [vmem:[%s19538_s7 + $0x3f0] ss:$12 sps:$4 sm:$0xff]  }
 0x6b4   : > { %v7318_v44 = vmax.f32 %v18144_v12, %v7303_v33  ;;  %v7258_v46 = vadd.f32 %v13381_v24, %v18152_v32  ;;  %v14699_v12 = vld [vmem:[%s19537_s6 + $0x8] sm:$0x3f]   ;;  %8144 = vmatpush1.bf16.msra.mxu1 %v14739_v36  ;;  %v14756_v24 = vld [vmem:[%s19538_s7 + $0x304] ss:$12 sps:$4 sm:$0xff]  }
 0x6b5   : > { %v13383_v26 = vpop.f32.mrf.mxu0  ;;  %v14705_v32 = vld [vmem:[%s19538_s7 + $0x2bc] ss:$12 sps:$4 sm:$0xff]   ;;  %8145 = vmatprep.subr.bf16.mxu1 %v14747_v14  ;;  %v14754_v33 = vld [vmem:[%s19538_s7 + $0x300] ss:$12 sps:$4 sm:$0xff]   ;;  %v14784_v14 = vld [vmem:[%s19538_s7 + $0x278] ss:$12 sps:$4 sm:$0xff]  }
 0x6b6   : > { %v7306_v39 = vadd.f32 %v7305_v27, %v7258_v46  ;;  %v13384_v42 = vadd.f32 %v13383_v26, %v13382_v60  ;;  %v14727_v27 = vld [vmem:[%s19538_s7 + $0x378] ss:$12 sps:$4 sm:$0xff]   ;;  %v14759_v60 = vld [vmem:[%s19538_s7 + $0x3dc] ss:$12 sps:$4 sm:$0xff]   ;;  %v14773_v36 = vld [vmem:[%s19538_s7 + $0x380] ss:$12 sps:$4 sm:$0xff]  }
 0x6b7   : > { %v13385_v30 = vpop.f32.mrf.mxu0  ;;  %v14762_v46 = vld [vmem:[%s19538_s7 + $0x2ec] ss:$12 sps:$4 sm:$0xff]   ;;  %v14760_v26 = vld [vmem:[%s19538_s7 + $0x2e8] ss:$12 sps:$4 sm:$0xff]  }
 0x6b8   : > { %v7321_v41 = vmax.f32 %v18146_v34, %v7306_v39  ;;  %v7263_v0 = vadd.f32 %v13384_v42, %v18154_v23  ;;  %v14702_v34 = vld [vmem:[%s19538_s7 + $0x2d4] ss:$12 sps:$4 sm:$0xff]   ;;  %v14703_v23 = vld [vmem:[%s19538_s7 + $0x2b8] ss:$12 sps:$4 sm:$0xff]   ;;  %8146 = vmatpush1.bf16.msra.mxu1 %v14745_v63 }
 0x6b9   : > { %v13386_v16 = vpop.f32.mrf.mxu0  ;;  %8147 = vmatprep.subr.bf16.mxu1 %v14753_v62  ;;  %v14765_v39 = vld [vmem:[%s19538_s7 + $0x3c4] ss:$12 sps:$4 sm:$0xff]   ;;  %v14763_v42 = vld [vmem:[%s19538_s7 + $0x3c0] ss:$12 sps:$4 sm:$0xff]  }
 0x6ba   : > { %v7311_v25 = vadd.f32 %v7310_v59, %v7263_v0  ;;  %v18190_v15 = vpack.c.bf16 %v7321_v41, %v7318_v44  ;;  %v14730_v59 = vld [vmem:[%s19538_s7 + $0x360] ss:$12 sps:$4 sm:$0xff]   ;;  %v14757_v44 = vld [vmem:[%s19538_s7 + $0x3d8] ss:$12 sps:$4 sm:$0xff]   ;;  %v14766_v41 = vld [vmem:[%s19538_s7 + $0x3a8] ss:$12 sps:$4 sm:$0xff]  }
 0x6bb   : > { %v14768_v30 = vld [vmem:[%s19538_s7 + $0x3ac] ss:$12 sps:$4 sm:$0xff]   ;;  %v14790_v62 = vld [vmem:[%s19538_s7 + $0x214] ss:$12 sps:$4 sm:$0xff]  }
 0x6bc   : > { %v7324_v8 = vmax.f32 %v18148_v52, %v7311_v25  ;;  %v14700_v52 = vld [vmem:[%s19538_s7 + $0x2d0] ss:$12 sps:$4 sm:$0xff]   ;;  %8148 = vmatpush1.bf16.msra.mxu1 %v14751_v31  ;;  %v14770_v0 = vld [vmem:[%s19538_s7 + $0x398] ss:$12 sps:$4 sm:$0xff]   ;;  %v14785_v63 = vld [vmem:[%s19538_s7 + $0x320] ss:$12 sps:$4 sm:$0xff]  }
 0x6bd   : > { %8149 = vmatprep.subr.bf16.mxu1 %v14759_v60  ;;  %v14791_v31 = vld [vmem:[%s19538_s7 + $0x308] ss:$12 sps:$4 sm:$0xff]  }
 0x6be   : > { %v7332_v40 = vpack.c.bf16 %v7324_v8, %v7324_v8  ;;  %v14795_v60 = vld [vmem:[%s19538_s7 + $0x1fc] ss:$12 sps:$4 sm:$0xff]  }
 0x6c0   : > { %v18193_v29 = vand.u32 %v7345_v20, %v7332_v40  ;;  %v14726_v20 = vld [vmem:[%s19538_s7 + $0x394] ss:$12 sps:$4 sm:$0xff]   ;;  %8150 = vmatpush1.bf16.msra.mxu1 %v14757_v44  ;;  %v14796_v44 = vld [vmem:[%s19538_s7 + $0x2f0] ss:$12 sps:$4 sm:$0xff]  }
 0x6c1   : > { %8151 = vmatprep.subr.bf16.mxu1 %v14765_v39  ;;  %v14800_v39 = vld [vmem:[%s19538_s7 + $0x1e4] ss:$12 sps:$4 sm:$0xff]  }
 0x6c2   : > { %13595 = vmatpush3.bf16.msra.mxu0 %v18193_v29 }
 0x6c3   : > { %13596 = vmatprep.subr.bf16.mxu0 %v19643_v13 }
 0x6c4   : > { %8152 = vmatpush1.bf16.msra.mxu1 %v14763_v42  ;;  %v14803_v42 = vld [vmem:[%s19538_s7 + $0xac] ss:$12 sps:$4 sm:$0xff]  }
 0x6c5   : > { %8153 = vmatprep.subr.bf16.mxu1 %v14768_v30  ;;  %v14798_v30 = vld [vmem:[%s19538_s7 + $0x1e0] ss:$12 sps:$4 sm:$0xff]  }
 0x6c6   : > { %13597 = vmatpush3.bf16.msra.mxu0 %v18190_v15 }
 0x6c7   : > { %7557 = vmatprep.subr.bf16.mxu0 %v18170_v51 }
 0x6c8   : > { %8154 = vmatpush1.bf16.msra.mxu1 %v14766_v41  ;;  %v14801_v41 = vld [vmem:[%s19538_s7 + $0xa8] ss:$12 sps:$4 sm:$0xff]  }
 0x6c9   : > { %13599 = vmatmul.mubr.msk.bf16.vlgmr.msra.gmra.mxu0 %vm7338_vm9, %v14698_v9  ;;  %v14736_v9 = vld [vmem:[%s19538_s7 + $0x348] ss:$12 sps:$4 sm:$0xff]   ;;  %13394 = vmatprep.subr.bf16.mxu1 %v14770_v0  ;;  %v14806_v0 = vld [vmem:[%s19538_s7 + $0x1cc] ss:$12 sps:$4 sm:$0xff]  }
 0x6ca   : > { %7558 = vmatpush1.bf16.msra.mxu0 %v18172_v28  ;;  %7577 = vmatprep.mubr.bf16.mxu0 %v19608_v47 }
 0x6cb   : > { %7559 = vmatprep.subr.bf16.mxu0 %v18165_v54 }
 0x6ce   : > { %7560 = vmatpush1.bf16.msra.mxu0 %v18162_v21 }
 0x6cf   : > { %13602 = vmatprep.subr.bf16.mxu0 %v19643_v13 }
 0x6d1   : > { %12588 = vmatmul.mubr.msk.bf16.vlgmr.msra.gmra.mxu0 %vm7338_vm9, %v14699_v12 }
 0x6d2   : > { %13603 = vmatpush3.bf16.msra.mxu0 %v18193_v29  ;;  %13606 = vmatprep.mubr.msk.bf16.mxu0 %vm15236_vm0, %v19643_v13 }
 0x6d3   : > { %13604 = vmatprep.subr.bf16.mxu0 %v19643_v13 }
 0x6d6   : > { %13605 = vmatpush3.bf16.msra.mxu0 %v18190_v15 }
 0x6d7   : > { %8096 = vmatprep.subr.bf16.mxu0 %v14702_v34 }
 0x6d9   : > { %13607 = vmatmul.mubr.msk.bf16.vlgmr.msra.gmra.mxu0 %vm7338_vm9, %v14699_v12 }
 0x6da   : > { %8097 = vmatpush1.bf16.msra.mxu0 %v14700_v52 }
 0x6db   : > { %8098 = vmatprep.subr.bf16.mxu0 %v14705_v32 }
 0x6de   : > { %8099 = vmatpush1.bf16.msra.mxu0 %v14703_v23 }
 0x6df   : > { %8100 = vmatprep.subr.bf16.mxu0 %v14708_v61 }
 0x6e2   : > { %8101 = vmatpush1.bf16.msra.mxu0 %v14706_v4 }
 0x6e3   : > { %8102 = vmatprep.subr.bf16.mxu0 %v14711_v56 }
 0x6e6   : > { %8103 = vmatpush1.bf16.msra.mxu0 %v14709_v10 }
 0x6e7   : > { %8104 = vmatprep.subr.bf16.mxu0 %v14714_v22 }
 0x6ea   : > { %8105 = vmatpush1.bf16.msra.mxu0 %v14712_v19 }
 0x6eb   : > { %8106 = vmatprep.subr.bf16.mxu0 %v14717_v3  ;;  %v14769_v3 = vld [vmem:[%s19538_s7 + $0x440] ss:$12 sps:$4 sm:$0xff]  }
 0x6ee   : > { %8107 = vmatpush1.bf16.msra.mxu0 %v14715_v37 }
 0x6ef   : > { %8108 = vmatprep.subr.bf16.mxu0 %v14720_v38 }
 0x6f2   : > { %8109 = vmatpush1.bf16.msra.mxu0 %v14718_v6  ;;  %v14771_v6 = vld [vmem:[%s19538_s7 + $0x428] ss:$12 sps:$4 sm:$0xff]  }
 0x6f3   : > { %8110 = vmatprep.subr.bf16.mxu0 %v14723_v58  ;;  %v14772_v58 = vld [vmem:[%s19538_s7 + $0x2d8] ss:$12 sps:$4 sm:$0xff]  }
 0x6f6   : > { %8111 = vmatpush1.bf16.msra.mxu0 %v14721_v2 }
 0x6f7   : > { %8112 = vmatprep.subr.bf16.mxu0 %v14726_v20  ;;  %v14774_v20 = vld [vmem:[%s19538_s7 + $0x410] ss:$12 sps:$4 sm:$0xff]  }
 0x6fa   : > { %8113 = vmatpush2.bf16.msra.mxu0 %v14724_v50  ;;  %v14775_v50 = vld [vmem:[%s19538_s7 + $0x2c0] ss:$12 sps:$4 sm:$0xff]  }
 0x6fb   : > { %8114 = vmatprep.subr.bf16.mxu0 %v14729_v45  ;;  %v14776_v45 = vld [vmem:[%s19538_s7 + $0x368] ss:$12 sps:$4 sm:$0xff]  }
 0x6fe   : > { %8115 = vmatpush2.bf16.msra.mxu0 %v14727_v27  ;;  %v14777_v27 = vld [vmem:[%s19538_s7 + $0x3f8] ss:$12 sps:$4 sm:$0xff]  }
 0x6ff   : > { %8116 = vmatprep.subr.bf16.mxu0 %v14732_v11  ;;  %v14778_v11 = vld [vmem:[%s19538_s7 + $0x2a8] ss:$12 sps:$4 sm:$0xff]  }
 0x702   : > { %8117 = vmatpush2.bf16.msra.mxu0 %v14730_v59  ;;  %v14779_v59 = vld [vmem:[%s19538_s7 + $0x350] ss:$12 sps:$4 sm:$0xff]  }
 0x703   : > { %8118 = vmatprep.subr.bf16.mxu0 %v14738_v5  ;;  %v14780_v5 = vld [vmem:[%s19538_s7 + $0x3e0] ss:$12 sps:$4 sm:$0xff]  }
 0x706   : > { %8119 = vmatpush2.bf16.msra.mxu0 %v14736_v9  ;;  %v14781_v9 = vld [vmem:[%s19538_s7 + $0x290] ss:$12 sps:$4 sm:$0xff]  }
 0x707   : > { %8120 = vmatprep.subr.bf16.mxu0 %v14744_v49  ;;  %v14783_v49 = vld [vmem:[%s19538_s7 + $0x3c8] ss:$12 sps:$4 sm:$0xff]  }
 0x70a   : > { %8121 = vmatpush2.bf16.msra.mxu0 %v14742_v18  ;;  %v14782_v18 = vld [vmem:[%s19538_s7 + $0x338] ss:$12 sps:$4 sm:$0xff]  }
 0x70b   : > { %8122 = vmatprep.subr.bf16.mxu0 %v14750_v7  ;;  %v14786_v7 = vld [vmem:[%s19538_s7 + $0x3b0] ss:$12 sps:$4 sm:$0xff]  }
 0x70e   : > { %8123 = vmatpush2.bf16.msra.mxu0 %v14748_v53  ;;  %v14787_v53 = vld [vmem:[%s19538_s7 + $0x260] ss:$12 sps:$4 sm:$0xff]  }
 0x70f   : > { %8124 = vmatprep.subr.bf16.mxu0 %v14756_v24  ;;  %v14792_v24 = vld [vmem:[%s19538_s7 + $0x248] ss:$12 sps:$4 sm:$0xff]  }
 0x712   : > { %8125 = vmatpush2.bf16.msra.mxu0 %v14754_v33  ;;  %v14788_v33 = vld [vmem:[%s19538_s7 + $0x210] ss:$12 sps:$4 sm:$0xff]  }
 0x713   : > { %8126 = vmatprep.subr.bf16.mxu0 %v14762_v46  ;;  %v14793_v46 = vld [vmem:[%s19538_s7 + $0x1f8] ss:$12 sps:$4 sm:$0xff]  }
 0x716   : > { %8127 = vmatpush2.bf16.msra.mxu0 %v14760_v26  ;;  %v14797_v26 = vld [vmem:[%s19538_s7 + $0x230] ss:$12 sps:$4 sm:$0xff]  }
 0x717   : > { %13610 = vmatprep.subr.bf16.mxu0 %v19643_v13 }
 0x766   : > { %v7389_v16 = vpop.f32.mrf.mxu0 }
 0x768   : > { %v18357_v25 = vpop.f32.mrf.mxu0 }
 0x76a   : > { %v7393_v8 = vpop.f32.mrf.mxu0 }
 0x76b   : > { %v18359_v40 = vpack.c.bf16 %v7393_v8, %v7389_v16  ;;  %v14809_v16 = vld [vmem:[%s19538_s7 + $0x94] ss:$12 sps:$4 sm:$0xff]  }
 0x76c   : > { %v18361_v12 = vpop.f32.mrf.mxu0 }
 0x76d   : > { %v7532_v8 = vpack.c.bf16 %v18361_v12, %v18357_v25  ;;  %v14815_v25 = vld [vmem:[%s19538_s7 + $0x7c] ss:$12 sps:$4 sm:$0xff]  }
 0x76e   : > { %v14810_v12 = vld [vmem:[%s19538_s7 + $0x1b0] ss:$12 sps:$4 sm:$0xff]  }
 0x789   : > { %v7432_v34 = vpop.f32.mrf.mxu0 }
 0x78b   : > { %v13600_v52 = vpop.f32.mrf.mxu0 }
 0x78c   : > { %v14807_v52 = vld [vmem:[%s19538_s7 + $0x90] ss:$12 sps:$4 sm:$0xff]  }
 0x78d   : > { %v7435_v32 = vpop.f32.mrf.mxu0 }
 0x78e   : > { %v18363_v23 = vpack.c.bf16 %v7435_v32, %v7432_v34  ;;  %v14804_v34 = vld [vmem:[%s19538_s7 + $0x1c8] ss:$12 sps:$4 sm:$0xff]  }
 0x78f   : > { %v13601_v61 = vpop.f32.mrf.mxu0  ;;  %v14812_v32 = vld [vmem:[%s19538_s7 + $0x1b4] ss:$12 sps:$4 sm:$0xff]  }
 0x790   : > { %v14813_v61 = vld [vmem:[%s19538_s7 + $0x78] ss:$12 sps:$4 sm:$0xff]  }
 0x791   : > { %v7579_v4 = vpop.f32.mrf.mxu0 }
 0x793   : > { %v7581_v56 = vpop.f32.mrf.mxu0 }
 0x795   : > { %v7583_v10 = vpop.f32.mrf.mxu0 }
 0x796   : > { %v18368_v37 = vpack.c.bf16 %v7583_v10, %v7579_v4  ;;  %v14818_v4 = vld [vmem:[%s19538_s7 + $0x19c] ss:$12 sps:$4 sm:$0xff]   ;;  %v14816_v10 = vld [vmem:[%s19538_s7 + $0x198] ss:$12 sps:$4 sm:$0xff]  }
 0x797   : > { %v7585_v22 = vpop.f32.mrf.mxu0 }
 0x798   : > { %v7723_v19 = vpack.c.bf16 %v7585_v22, %v7581_v56  ;;  %v14821_v56 = vld [vmem:[%s19538_s7 + $0x64] ss:$12 sps:$4 sm:$0xff]   ;;  %v14819_v22 = vld [vmem:[%s19538_s7 + $0x60] ss:$12 sps:$4 sm:$0xff]  }
 0x799   : > { %v7622_v38 = vpop.f32.mrf.mxu0 }
 0x79a   : > { %8128 = vmatprep.mubr.bf16.mxu0 %v7723_v19 }
 0x79b   : > { %v13608_v43 = vpop.f32.mrf.mxu0  ;;  %8129 = vmatmul.mubr.bf16.vlgmr.msra.gmra.mxu0 %v18368_v37 }
 0x79c   : > { %13611 = vmatpush3.bf16.msra.mxu0 %v14769_v3  ;;  %13624 = vmatprep.mubr.msk.bf16.mxu0 %vm15236_vm0, %v19643_v13  ;;  %v14827_v3 = vld [vmem:[%s19538_s7 + $0x4c] ss:$12 sps:$4 sm:$0xff]   ;;  %v14828_v43 = vld [vmem:[%s19538_s7 + $0x170] ss:$12 sps:$4 sm:$0xff]  }
 0x79d   : > { %v7625_v1 = vpop.f32.mrf.mxu0  ;;  %13612 = vmatprep.subr.bf16.mxu0 %v19643_v13 }
 0x79e   : > { %v7724_v48 = vpack.c.bf16 %v7625_v1, %v7622_v38  ;;  %v14825_v38 = vld [vmem:[%s19538_s7 + $0x48] ss:$12 sps:$4 sm:$0xff]   ;;  %v14832_v1 = vld [vmem:[%s19538_s7 + $0xb0] ss:$12 sps:$4 sm:$0xff]  }
 0x79f   : > { %v13609_v2 = vpop.f32.mrf.mxu0 }
 0x7a0   : > { %13613 = vmatpush3.bf16.msra.mxu0 %v14771_v6  ;;  %12751 = vmatmul.mubr.msk.bf16.vlgmr.msra.gmra.mxu1 %vm5774_vm6, %v7724_v48  ;;  %v14831_v6 = vld [vmem:[%s19538_s7 + $0x34] ss:$12 sps:$4 sm:$0xff]   ;;  %v14837_v2 = vld [vmem:[%s19538_s7 + $0x98] ss:$12 sps:$4 sm:$0xff]  }
 0x7a1   : > { %13395 = vmatpush3.bf16.msra.mxu1 %v14772_v58  ;;  %8214 = vmatprep.mubr.bf16.mxu1 %v7723_v19  ;;  %v14824_v19 = vld [vmem:[%s19538_s7 + $0x184] ss:$12 sps:$4 sm:$0xff]  }
 0x7a2   : > { %13614 = vmatprep.subr.bf16.mxu0 %v19643_v13  ;;  %13396 = vmatprep.subr.bf16.mxu1 %v14773_v36  ;;  %v14829_v58 = vld [vmem:[%s19538_s7 + $0x30] ss:$12 sps:$4 sm:$0xff]  }
 0x7a3   : > { %v14836_v36 = vld [vmem:[%s19538_s7 + $0x1c] ss:$12 sps:$4 sm:$0xff]  }
 0x7a4   : > { %13615 = vmatpush3.bf16.msra.mxu0 %v14774_v20  ;;  %v14834_v20 = vld [vmem:[%s19538_s7 + $0x18] ss:$12 sps:$4 sm:$0xff]  }
 0x7a5   : > { %13397 = vmatpush3.bf16.msra.mxu1 %v14775_v50  ;;  %13616 = vmatprep.subr.bf16.mxu0 %v19643_v13  ;;  %v14838_v50 = vld [vmem:[%s19538_s7 + $0x140] ss:$12 sps:$4 sm:$0xff]  }
 0x7a6   : > { %13398 = vmatprep.subr.bf16.mxu1 %v14776_v45  ;;  %v14841_v45 = vld [vmem:[%s19538_s7 + $0x4] ss:$12 sps:$4 sm:$0xff]  }
 0x7a8   : > { %13617 = vmatpush3.bf16.msra.mxu0 %v14777_v27  ;;  %v14842_v27 = vld [vmem:[%s19538_s7 + $0x80] ss:$12 sps:$4 sm:$0xff]  }
 0x7a9   : > { %13399 = vmatpush3.bf16.msra.mxu1 %v14778_v11  ;;  %13618 = vmatprep.subr.bf16.mxu0 %v19643_v13  ;;  %v14839_v11 = vld [vmem:[%s19538_s7] ss:$12 sps:$4 sm:$0xff]  }
 0x7aa   : > { %13400 = vmatprep.subr.bf16.mxu1 %v14779_v59  ;;  %v14843_v59 = vld [vmem:[%s19538_s7 + $0x128] ss:$12 sps:$4 sm:$0xff]  }
 0x7ac   : > { %13619 = vmatpush3.bf16.msra.mxu0 %v14780_v5  ;;  %v14846_v5 = vld [vmem:[%s19538_s7 + $0x16c] ss:$12 sps:$4 sm:$0xff]  }
 0x7ad   : > { %13401 = vmatpush3.bf16.msra.mxu1 %v14781_v9  ;;  %13620 = vmatprep.subr.bf16.mxu0 %v19643_v13  ;;  %v14847_v9 = vld [vmem:[%s19538_s7 + $0x68] ss:$12 sps:$4 sm:$0xff]  }
 0x7ae   : > { %13402 = vmatprep.subr.bf16.mxu1 %v14782_v18  ;;  %v14844_v18 = vld [vmem:[%s19538_s7 + $0x168] ss:$12 sps:$4 sm:$0xff]  }
 0x7b0   : > { %13621 = vmatpush3.bf16.msra.mxu0 %v14783_v49  ;;  %v14848_v49 = vld [vmem:[%s19538_s7 + $0x110] ss:$12 sps:$4 sm:$0xff]  }
 0x7b1   : > { %13403 = vmatpush3.bf16.msra.mxu1 %v14784_v14  ;;  %13622 = vmatprep.subr.bf16.mxu0 %v19643_v13  ;;  %v14851_v14 = vld [vmem:[%s19538_s7 + $0x154] ss:$12 sps:$4 sm:$0xff]  }
 0x7b2   : > { %13404 = vmatprep.subr.bf16.mxu1 %v14785_v63  ;;  %v14852_v63 = vld [vmem:[%s19538_s7 + $0x50] ss:$12 sps:$4 sm:$0xff]  }
 0x7b4   : > { %13623 = vmatpush3.bf16.msra.mxu0 %v14786_v7  ;;  %v14849_v7 = vld [vmem:[%s19538_s7 + $0x150] ss:$12 sps:$4 sm:$0xff]  }
 0x7b5   : > { %13405 = vmatpush3.bf16.msra.mxu1 %v14787_v53  ;;  %8680 = vmatprep.subr.bf16.mxu0 %v14790_v62  ;;  %v14853_v53 = vld [vmem:[%s19538_s7 + $0xf8] ss:$12 sps:$4 sm:$0xff]   ;;  %v14856_v62 = vld [vmem:[%s19538_s7 + $0x13c] ss:$12 sps:$4 sm:$0xff]  }
 0x7b6   : > { %13406 = vmatprep.subr.bf16.mxu1 %v14791_v31  ;;  %v14857_v31 = vld [vmem:[%s19538_s7 + $0x38] ss:$12 sps:$4 sm:$0xff]  }
 0x7b7   : > { %13625 = vmatmul.mubr.msk.bf16.vlgmr.msra.gmra.mxu0 %vm5774_vm6, %v7724_v48  ;;  %v14833_v48 = vld [vmem:[%s19538_s7 + $0x158] ss:$12 sps:$4 sm:$0xff]  }
 0x7b8   : > { %8681 = vmatpush1.bf16.msra.mxu0 %v14788_v33  ;;  %8710 = vmatprep.mubr.bf16.mxu0 %v19608_v47  ;;  %v14854_v33 = vld [vmem:[%s19538_s7 + $0x138] ss:$12 sps:$4 sm:$0xff]  }
 0x7b9   : > { %13407 = vmatpush3.bf16.msra.mxu1 %v14792_v24  ;;  %8682 = vmatprep.subr.bf16.mxu0 %v14795_v60  ;;  %v14858_v24 = vld [vmem:[%s19538_s7 + $0xe0] ss:$12 sps:$4 sm:$0xff]   ;;  %v14861_v60 = vld [vmem:[%s19538_s7 + $0x124] ss:$12 sps:$4 sm:$0xff]  }
 0x7ba   : > { %13408 = vmatprep.subr.bf16.mxu1 %v14796_v44  ;;  %v14862_v44 = vld [vmem:[%s19538_s7 + $0x20] ss:$12 sps:$4 sm:$0xff]  }
 0x7bc   : > { %8683 = vmatpush1.bf16.msra.mxu0 %v14793_v46  ;;  %v14859_v46 = vld [vmem:[%s19538_s7 + $0x120] ss:$12 sps:$4 sm:$0xff]  }
 0x7bd   : > { %13409 = vmatpush3.bf16.msra.mxu1 %v14797_v26  ;;  %8684 = vmatprep.subr.bf16.mxu0 %v14800_v39  ;;  %v14863_v26 = vld [vmem:[%s19538_s7 + $0xc8] ss:$12 sps:$4 sm:$0xff]   ;;  %v14866_v39 = vld [vmem:[%s19538_s7 + $0x10c] ss:$12 sps:$4 sm:$0xff]  }
 0x7be   : > { %8635 = vmatprep.subr.bf16.mxu1 %v14803_v42  ;;  %v14867_v42 = vld [vmem:[%s19538_s7 + $0x8] ss:$12 sps:$4 sm:$0xff]  }
 0x7c0   : > { %8215 = vmatmul.mubr.bf16.vlgmr.msra.gmra.mxu1 %v18368_v37  ;;  %8685 = vmatpush1.bf16.msra.mxu0 %v14798_v30  ;;  %v14822_v37 = vld [vmem:[%s19538_s7 + $0x180] ss:$12 sps:$4 sm:$0xff]   ;;  %v14864_v30 = vld [vmem:[%s19538_s7 + $0x108] ss:$12 sps:$4 sm:$0xff]  }
 0x7c1   : > { %8636 = vmatpush1.bf16.msra.mxu1 %v14801_v41  ;;  %8667 = vmatprep.mubr.bf16.mxu1 %v7532_v8  ;;  %v14870_v41 = vld [vmem:[%s19538_s7 + $0xf4] ss:$12 sps:$4 sm:$0xff]  }
 0x7c2   : > { %8686 = vmatprep.subr.bf16.mxu0 %v14806_v0  ;;  %8637 = vmatprep.subr.bf16.mxu1 %v14809_v16  ;;  %v14868_v0 = vld [vmem:[%s19538_s7 + $0xf0] ss:$12 sps:$4 sm:$0xff]  }
 0x7c3   : > { %v14873_v16 = vld [vmem:[%s19538_s7 + $0xdc] ss:$12 sps:$4 sm:$0xff]  }
 0x7c4   : > { %8687 = vmatpush1.bf16.msra.mxu0 %v14804_v34  ;;  %v14876_v34 = vld [vmem:[%s19538_s7 + $0xc4] ss:$12 sps:$4 sm:$0xff]  }
 0x7c5   : > { %8638 = vmatpush1.bf16.msra.mxu1 %v14807_v52  ;;  %8688 = vmatprep.subr.bf16.mxu0 %v14812_v32  ;;  %v14879_v52 = vld [vmem:[%s19537_s6 + $0x10] sm:$0x3f]   ;;  %v14877_v32 = vld [vmem:[%s19538_s7 + $0x218] ss:$12 sps:$4 sm:$0xff]  }
 0x7c6   : > { %8639 = vmatprep.subr.bf16.mxu1 %v14815_v25  ;;  %v14880_v25 = vld [vmem:[%s19538_s7 + $0x1e8] ss:$12 sps:$4 sm:$0xff]  }
 0x7c8   : > { %8689 = vmatpush1.bf16.msra.mxu0 %v14810_v12  ;;  %v14882_v12 = vld [vmem:[%s19538_s7 + $0x1b8] ss:$12 sps:$4 sm:$0xff]  }
 0x7c9   : > { %8640 = vmatpush1.bf16.msra.mxu1 %v14813_v61  ;;  %8690 = vmatprep.subr.bf16.mxu0 %v14818_v4  ;;  %v14883_v61 = vld [vmem:[%s19538_s7 + $0x1a0] ss:$12 sps:$4 sm:$0xff]   ;;  %v14884_v4 = vld [vmem:[%s19538_s7 + $0x188] ss:$12 sps:$4 sm:$0xff]  }
 0x7ca   : > { %8641 = vmatprep.subr.bf16.mxu1 %v14821_v56  ;;  %v14891_v56 = vld [vmem:[%s19538_s7 + $0x660] ss:$12 sps:$4 sm:$0xff]  }
 0x7cc   : > { %8691 = vmatpush1.bf16.msra.mxu0 %v14816_v10  ;;  %v14893_v10 = vld [vmem:[%s19538_s7 + $0x664] ss:$12 sps:$4 sm:$0xff]  }
 0x7cd   : > { %8642 = vmatpush1.bf16.msra.mxu1 %v14819_v22  ;;  %8692 = vmatprep.subr.bf16.mxu0 %v14824_v19  ;;  %v14885_v22 = vld [vmem:[%s19538_s7 + $0x4f8] ss:$12 sps:$4 sm:$0xff]  }
 0x7ce   : > { %8643 = vmatprep.subr.bf16.mxu1 %v14827_v3  ;;  %v14899_v19 = vld [vmem:[%s19538_s7 + $0x64c] ss:$12 sps:$4 sm:$0xff]   ;;  %v14897_v3 = vld [vmem:[%s19538_s7 + $0x648] ss:$12 sps:$4 sm:$0xff]  }
 0x7d0   : > { %8693 = vmatpush1.bf16.msra.mxu0 %v14822_v37  ;;  %v14902_v37 = vld [vmem:[%s19538_s7 + $0x4b4] ss:$12 sps:$4 sm:$0xff]  }
 0x7d1   : > { %8644 = vmatpush1.bf16.msra.mxu1 %v14825_v38  ;;  %13424 = vmatprep.subr.bf16.mxu0 %v14828_v43  ;;  %v14900_v38 = vld [vmem:[%s19538_s7 + $0x4b0] ss:$12 sps:$4 sm:$0xff]   ;;  %v14905_v43 = vld [vmem:[%s19538_s7 + $0x634] ss:$12 sps:$4 sm:$0xff]  }
 0x7d2   : > { %8645 = vmatprep.subr.bf16.mxu1 %v14831_v6  ;;  %v14903_v6 = vld [vmem:[%s19538_s7 + $0x630] ss:$12 sps:$4 sm:$0xff]  }
 0x7d3   : > { %12822 = vmatmul.mubr.msk.bf16.vlgmr.msra.gmra.mxu0 %vm5774_vm6, %v18363_v23 }
 0x7d4   : > { %13425 = vmatpush3.bf16.msra.mxu0 %v14832_v1  ;;  %8753 = vmatprep.mubr.bf16.mxu0 %v7532_v8  ;;  %v14871_v8 = vld [vmem:[%s19538_s7 + $0xd8] ss:$12 sps:$4 sm:$0xff]  }
 0x7d5   : > { %8646 = vmatpush1.bf16.msra.mxu1 %v14829_v58  ;;  %13426 = vmatprep.subr.bf16.mxu0 %v14833_v48  ;;  %v14906_v1 = vld [vmem:[%s19538_s7 + $0x498] ss:$12 sps:$4 sm:$0xff]   ;;  %v14908_v58 = vld [vmem:[%s19538_s7 + $0x49c] ss:$12 sps:$4 sm:$0xff]  }
 0x7d6   : > { %8647 = vmatprep.subr.bf16.mxu1 %v14836_v36  ;;  %v14909_v48 = vld [vmem:[%s19538_s7 + $0x618] ss:$12 sps:$4 sm:$0xff]   ;;  %v14911_v36 = vld [vmem:[%s19538_s7 + $0x61c] ss:$12 sps:$4 sm:$0xff]  }
 0x7d8   : > { %13427 = vmatpush3.bf16.msra.mxu0 %v14837_v2  ;;  %v14914_v2 = vld [vmem:[%s19538_s7 + $0x484] ss:$12 sps:$4 sm:$0xff]  }
 0x7d9   : > { %8648 = vmatpush1.bf16.msra.mxu1 %v14834_v20  ;;  %13428 = vmatprep.subr.bf16.mxu0 %v14838_v50  ;;  %v14912_v20 = vld [vmem:[%s19538_s7 + $0x480] ss:$12 sps:$4 sm:$0xff]   ;;  %v14917_v50 = vld [vmem:[%s19538_s7 + $0x604] ss:$12 sps:$4 sm:$0xff]  }
 0x7da   : > { %8649 = vmatprep.subr.bf16.mxu1 %v14841_v45  ;;  %v14915_v45 = vld [vmem:[%s19538_s7 + $0x600] ss:$12 sps:$4 sm:$0xff]  }
 0x7dc   : > { %13429 = vmatpush3.bf16.msra.mxu0 %v14842_v27  ;;  %v14920_v27 = vld [vmem:[%s19538_s7 + $0x46c] ss:$12 sps:$4 sm:$0xff]  }
 0x7dd   : > { %8650 = vmatpush1.bf16.msra.mxu1 %v14839_v11  ;;  %13430 = vmatprep.subr.bf16.mxu0 %v14843_v59  ;;  %v14918_v11 = vld [vmem:[%s19538_s7 + $0x468] ss:$12 sps:$4 sm:$0xff]   ;;  %v14923_v59 = vld [vmem:[%s19538_s7 + $0x5ec] ss:$12 sps:$4 sm:$0xff]  }
 0x7de   : > { %8651 = vmatprep.subr.bf16.mxu1 %v14846_v5  ;;  %v14921_v5 = vld [vmem:[%s19538_s7 + $0x5e8] ss:$12 sps:$4 sm:$0xff]  }
 0x7e0   : > { %13431 = vmatpush3.bf16.msra.mxu0 %v14847_v9  ;;  %v14926_v9 = vld [vmem:[%s19538_s7 + $0x454] ss:$12 sps:$4 sm:$0xff]  }
 0x7e1   : > { %8652 = vmatpush2.bf16.msra.mxu1 %v14844_v18  ;;  %13432 = vmatprep.subr.bf16.mxu0 %v14848_v49  ;;  %v14924_v18 = vld [vmem:[%s19538_s7 + $0x450] ss:$12 sps:$4 sm:$0xff]   ;;  %v14929_v49 = vld [vmem:[%s19538_s7 + $0x5d4] ss:$12 sps:$4 sm:$0xff]  }
 0x7e2   : > { %8653 = vmatprep.subr.bf16.mxu1 %v14851_v14  ;;  %v14927_v14 = vld [vmem:[%s19538_s7 + $0x5d0] ss:$12 sps:$4 sm:$0xff]  }
 0x7e4   : > { %13433 = vmatpush3.bf16.msra.mxu0 %v14852_v63  ;;  %v14932_v63 = vld [vmem:[%s19538_s7 + $0x5bc] ss:$12 sps:$4 sm:$0xff]  }
 0x7e5   : > { %8654 = vmatpush2.bf16.msra.mxu1 %v14849_v7  ;;  %13434 = vmatprep.subr.bf16.mxu0 %v14853_v53  ;;  %v14930_v7 = vld [vmem:[%s19538_s7 + $0x5b8] ss:$12 sps:$4 sm:$0xff]   ;;  %v14933_v53 = vld [vmem:[%s19538_s7 + $0x5c0] ss:$12 sps:$4 sm:$0xff]  }
 0x7e6   : > { %8655 = vmatprep.subr.bf16.mxu1 %v14856_v62  ;;  %v14937_v62 = vld [vmem:[%s19538_s7 + $0x5a4] ss:$12 sps:$4 sm:$0xff]  }
 0x7e8   : > { %13435 = vmatpush3.bf16.msra.mxu0 %v14857_v31  ;;  %v14935_v31 = vld [vmem:[%s19538_s7 + $0x5a0] ss:$12 sps:$4 sm:$0xff]  }
 0x7e9   : > { %8656 = vmatpush2.bf16.msra.mxu1 %v14854_v33  ;;  %13436 = vmatprep.subr.bf16.mxu0 %v14858_v24  ;;  %v14942_v33 = vld [vmem:[%s19538_s7 + $0x58c] ss:$12 sps:$4 sm:$0xff]   ;;  %v14940_v24 = vld [vmem:[%s19538_s7 + $0x588] ss:$12 sps:$4 sm:$0xff]  }
 0x7ea   : > { %8657 = vmatprep.subr.bf16.mxu1 %v14861_v60  ;;  %v14947_v60 = vld [vmem:[%s19538_s7 + $0x574] ss:$12 sps:$4 sm:$0xff]  }
 0x7ec   : > { %13437 = vmatpush3.bf16.msra.mxu0 %v14862_v44  ;;  %v14945_v44 = vld [vmem:[%s19538_s7 + $0x570] ss:$12 sps:$4 sm:$0xff]  }
 0x7ed   : > { %8658 = vmatpush2.bf16.msra.mxu1 %v14859_v46  ;;  %13438 = vmatprep.subr.bf16.mxu0 %v14863_v26  ;;  %v14952_v26 = vld [vmem:[%s19538_s7 + $0x55c] ss:$12 sps:$4 sm:$0xff]  }
 0x7ee   : > { %8659 = vmatprep.subr.bf16.mxu1 %v14866_v39  ;;  %v14950_v39 = vld [vmem:[%s19538_s7 + $0x558] ss:$12 sps:$4 sm:$0xff]  }
 0x7f0   : > { %13439 = vmatpush3.bf16.msra.mxu0 %v14867_v42 }
 0x7f1   : > { %8660 = vmatpush2.bf16.msra.mxu1 %v14864_v30  ;;  %13646 = vmatprep.subr.bf16.mxu0 %v19643_v13  ;;  %v14957_v30 = vld [vmem:[%s19538_s7 + $0x544] ss:$12 sps:$4 sm:$0xff]  }
 0x7f2   : > { %8661 = vmatprep.subr.bf16.mxu1 %v14870_v41 }
 0x7f3   : > { %8754 = vmatmul.mubr.bf16.vlgmr.msra.gmra.mxu0 %v18359_v40 }
 0x7f4   : > { %13647 = vmatpush3.bf16.msra.mxu0 %v18193_v29  ;;  %13650 = vmatprep.mubr.msk.bf16.mxu0 %vm15236_vm0, %v19643_v13  ;;  %v14874_v29 = vld [vmem:[%s19538_s7 + $0xc0] ss:$12 sps:$4 sm:$0xff]  }
 0x7f5   : > { %8662 = vmatpush2.bf16.msra.mxu1 %v14868_v0  ;;  %13648 = vmatprep.subr.bf16.mxu0 %v19643_v13  ;;  %v14955_v0 = vld [vmem:[%s19538_s7 + $0x540] ss:$12 sps:$4 sm:$0xff]  }
 0x7f6   : > { %8663 = vmatprep.subr.bf16.mxu1 %v14873_v16 }
 0x7f8   : > { %13649 = vmatpush3.bf16.msra.mxu0 %v18190_v15  ;;  %v14878_v15 = vld [vmem:[%s19538_s7 + $0x200] ss:$12 sps:$4 sm:$0xff]  }
 0x7f9   : > { %8664 = vmatpush2.bf16.msra.mxu1 %v14871_v8  ;;  %9410 = vmatprep.subr.bf16.mxu0 %v14893_v10 }
 0x7fa   : > { %8665 = vmatprep.subr.bf16.mxu1 %v14876_v34 }
 0x7fb   : > { %13651 = vmatmul.mubr.msk.bf16.vlgmr.msra.gmra.mxu0 %vm7338_vm9, %v14879_v52 }
 0x7fc   : > { %9440 = vmatprep.mubr.bf16.mxu0 %v19608_v47  ;;  %9411 = vmatpush1.bf16.msra.mxu0 %v14891_v56  ;;  %v14965_v56 = vld [vmem:[%s19538_s7 + $0x510] ss:$12 sps:$4 sm:$0xff]  }
 0x7fd   : > { %8666 = vmatpush2.bf16.msra.mxu1 %v14874_v29  ;;  %9412 = vmatprep.subr.bf16.mxu0 %v14899_v19  ;;  %v14962_v29 = vld [vmem:[%s19538_s7 + $0x52c] ss:$12 sps:$4 sm:$0xff]  }
 0x7fe   : > { %13628 = vmatprep.subr.bf16.mxu1 %v19643_v13 }
 0x800   : > { %8668 = vmatmul.mubr.bf16.vlgmr.msra.gmra.mxu1 %v18359_v40  ;;  %v14881_v40 = vld [vmem:[%s19538_s7 + $0x1d0] ss:$12 sps:$4 sm:$0xff]   ;;  %9413 = vmatpush1.bf16.msra.mxu0 %v14897_v3 }
 0x801   : > { %13629 = vmatpush3.bf16.msra.mxu1 %v14877_v32  ;;  %13642 = vmatprep.mubr.msk.bf16.mxu1 %vm15236_vm0, %v19643_v13 }
 0x802   : > { %13630 = vmatprep.subr.bf16.mxu1 %v19643_v13  ;;  %9414 = vmatprep.subr.bf16.mxu0 %v14905_v43 }
 0x804   : > { %9415 = vmatpush1.bf16.msra.mxu0 %v14903_v6 }
 0x805   : > { %13631 = vmatpush3.bf16.msra.mxu1 %v14878_v15  ;;  %9416 = vmatprep.subr.bf16.mxu0 %v14911_v36  ;;  %v14960_v15 = vld [vmem:[%s19538_s7 + $0x528] ss:$12 sps:$4 sm:$0xff]  }
 0x806   : > { %13632 = vmatprep.subr.bf16.mxu1 %v19643_v13 }
 0x808   : > { %9417 = vmatpush1.bf16.msra.mxu0 %v14909_v48 }
 0x809   : > { %13633 = vmatpush3.bf16.msra.mxu1 %v14880_v25  ;;  %9418 = vmatprep.subr.bf16.mxu0 %v14917_v50 }
 0x80a   : > { %13634 = vmatprep.subr.bf16.mxu1 %v19643_v13 }
 0x80c   : > { %9419 = vmatpush1.bf16.msra.mxu0 %v14915_v45 }
 0x80d   : > { %13635 = vmatpush3.bf16.msra.mxu1 %v14881_v40  ;;  %9420 = vmatprep.subr.bf16.mxu0 %v14923_v59 }
 0x80e   : > { %13636 = vmatprep.subr.bf16.mxu1 %v19643_v13 }
 0x810   : > { %9421 = vmatpush1.bf16.msra.mxu0 %v14921_v5 }
 0x811   : > { %13637 = vmatpush3.bf16.msra.mxu1 %v14882_v12  ;;  %9422 = vmatprep.subr.bf16.mxu0 %v14929_v49  ;;  %v14934_v49 = vld [vmem:[%s19538_s7 + $0x500] ss:$12 sps:$4 sm:$0xff]  }
 0x812   : > { %13638 = vmatprep.subr.bf16.mxu1 %v19643_v13 }
 0x814   : > { %9423 = vmatpush1.bf16.msra.mxu0 %v14927_v14 }
 0x815   : > { %13639 = vmatpush3.bf16.msra.mxu1 %v14883_v61  ;;  %13457 = vmatprep.subr.bf16.mxu0 %v14933_v53 }
 0x816   : > { %13640 = vmatprep.subr.bf16.mxu1 %v19643_v13 }
 0x819   : > { %13641 = vmatpush3.bf16.msra.mxu1 %v14884_v4  ;;  %v14967_v4 = vld [vmem:[%s19538_s7 + $0x514] ss:$12 sps:$4 sm:$0xff]  }
 0x81a   : > { %8826 = vmatprep.subr.bf16.mxu1 %v18170_v51  ;;  %v14887_v51 = vld [vmem:[%s19538_s7 + $0x4fc] ss:$12 sps:$4 sm:$0xff]  }
 0x81c   : > { %13643 = vmatmul.mubr.msk.bf16.vlgmr.msra.gmra.mxu1 %vm5774_vm6, %v18363_v23  ;;  %v14894_v23 = vld [vmem:[%s19538_s7 + $0x4c8] ss:$12 sps:$4 sm:$0xff]  }
 0x81d   : > { %8827 = vmatpush1.bf16.msra.mxu1 %v18172_v28  ;;  %8846 = vmatprep.mubr.bf16.mxu1 %v19608_v47  ;;  %v14890_v28 = vld [vmem:[%s19538_s7 + $0x4e4] ss:$12 sps:$4 sm:$0xff]  }
 0x81e   : > { %8828 = vmatprep.subr.bf16.mxu1 %v18165_v54  ;;  %v14888_v54 = vld [vmem:[%s19538_s7 + $0x4e0] ss:$12 sps:$4 sm:$0xff]  }
 0x821   : > { %8829 = vmatpush1.bf16.msra.mxu1 %v18162_v21  ;;  %v14896_v21 = vld [vmem:[%s19538_s7 + $0x4cc] ss:$12 sps:$4 sm:$0xff]  }
 0x822   : > { %9365 = vmatprep.subr.bf16.mxu1 %v14887_v51 }
 0x824   : > { %12827 = vmatmul.mubr.msk.bf16.vlgmr.msra.gmra.mxu1 %vm7338_vm9, %v14879_v52 }
 0x825   : > { %9366 = vmatpush1.bf16.msra.mxu1 %v14885_v22 }
 0x826   : > { %9367 = vmatprep.subr.bf16.mxu1 %v14890_v28 }
 0x829   : > { %9368 = vmatpush1.bf16.msra.mxu1 %v14888_v54 }
 0x82a   : > { %9369 = vmatprep.subr.bf16.mxu1 %v14896_v21 }
 0x82d   : > { %9370 = vmatpush1.bf16.msra.mxu1 %v14894_v23 }
 0x82e   : > { %9371 = vmatprep.subr.bf16.mxu1 %v14902_v37 }
 0x831   : > { %9372 = vmatpush1.bf16.msra.mxu1 %v14900_v38 }
 0x832   : > { %9373 = vmatprep.subr.bf16.mxu1 %v14908_v58 }
 0x835   : > { %9374 = vmatpush1.bf16.msra.mxu1 %v14906_v1 }
 0x836   : > { %9375 = vmatprep.subr.bf16.mxu1 %v14914_v2 }
 0x839   : > { %9376 = vmatpush1.bf16.msra.mxu1 %v14912_v20 }
 0x83a   : > { %9377 = vmatprep.subr.bf16.mxu1 %v14920_v27 }
 0x83d   : > { %9378 = vmatpush1.bf16.msra.mxu1 %v14918_v11 }
 0x83e   : > { %9379 = vmatprep.subr.bf16.mxu1 %v14926_v9 }
 0x841   : > { %9380 = vmatpush1.bf16.msra.mxu1 %v14924_v18 }
 0x842   : > { %9381 = vmatprep.subr.bf16.mxu1 %v14932_v63 }
 0x845   : > { %9382 = vmatpush2.bf16.msra.mxu1 %v14930_v7  ;;  %v14938_v7 = vld [vmem:[%s19538_s7 + $0x5a8] ss:$12 sps:$4 sm:$0xff]  }
 0x846   : > { %9383 = vmatprep.subr.bf16.mxu1 %v14937_v62 }
 0x849   : > { %9384 = vmatpush2.bf16.msra.mxu1 %v14935_v31 }
 0x84a   : > { %9385 = vmatprep.subr.bf16.mxu1 %v14942_v33 }
 0x84d   : > { %9386 = vmatpush2.bf16.msra.mxu1 %v14940_v24 }
 0x84e   : > { %9387 = vmatprep.subr.bf16.mxu1 %v14947_v60  ;;  %v14939_v60 = vld [vmem:[%s19538_s7 + $0x4e8] ss:$12 sps:$4 sm:$0xff]  }
 0x851   : > { %9388 = vmatpush2.bf16.msra.mxu1 %v14945_v44 }
 0x852   : > { %9389 = vmatprep.subr.bf16.mxu1 %v14952_v26 }
 0x855   : > { %9390 = vmatpush2.bf16.msra.mxu1 %v14950_v39 }
 0x856   : > { %9391 = vmatprep.subr.bf16.mxu1 %v14957_v30 }
 0x859   : > { %9392 = vmatpush2.bf16.msra.mxu1 %v14955_v0  ;;  %v14944_v0 = vld [vmem:[%s19538_s7 + $0x4d0] ss:$12 sps:$4 sm:$0xff]  }
 0x85a   : > { %9393 = vmatprep.subr.bf16.mxu1 %v14962_v29  ;;  %v14954_v29 = vld [vmem:[%s19538_s7 + $0x4a0] ss:$12 sps:$4 sm:$0xff]  }
 0x85b   : > { %v8130_v46 = vpop.f32.mrf.mxu0 }
 0x85d   : > { %v8132_v42 = vpop.f32.mrf.mxu0  ;;  %9394 = vmatpush2.bf16.msra.mxu1 %v14960_v15  ;;  %v14959_v15 = vld [vmem:[%s19538_s7 + $0x488] ss:$12 sps:$4 sm:$0xff]  }
 0x85e   : > { %9395 = vmatprep.subr.bf16.mxu1 %v14967_v4 }
 0x85f   : > { %v8134_v8 = vpop.f32.mrf.mxu0 }
 0x860   : > { %v8173_v41 = vpop.f32.mrf.mxu1 }
 0x861   : > { %v8174_v16 = vadd.f32 %v8173_v41, %v8130_v46  ;;  %v8136_v40 = vpop.f32.mrf.mxu0  ;;  %9396 = vmatpush2.bf16.msra.mxu1 %v14965_v56  ;;  %v14943_v46 = vld [vmem:[%s19538_s7 + $0x590] ss:$12 sps:$4 sm:$0xff]  }
 0x862   : > { %v8175_v34 = vpop.f32.mrf.mxu1  ;;  %13654 = vmatprep.subr.bf16.mxu1 %v19643_v13 }
 0x863   : > { %v8176_v52 = vadd.f32 %v8175_v34, %v8132_v42  ;;  %v14949_v34 = vld [vmem:[%s19538_s7 + $0x4b8] ss:$12 sps:$4 sm:$0xff]  }
 0x864   : > { %v8177_v32 = vpop.f32.mrf.mxu1 }
 0x865   : > { %v8178_v25 = vadd.f32 %v8177_v32, %v8134_v8  ;;  %v14958_v32 = vld [vmem:[%s19538_s7 + $0x548] ss:$12 sps:$4 sm:$0xff]  }
 0x866   : > { %v8179_v12 = vpop.f32.mrf.mxu1 }
 0x867   : > { %v8180_v61 = vadd.f32 %v8179_v12, %v8136_v40  ;;  %v14964_v40 = vld [vmem:[%s19538_s7 + $0x470] ss:$12 sps:$4 sm:$0xff]   ;;  %v14968_v12 = vld [vmem:[%s19538_s7 + $0x518] ss:$12 sps:$4 sm:$0xff]  }
 0x877   : > { %v8257_v10 = vpop.f32.mrf.mxu0 }
 0x879   : > { %v13626_v51 = vpop.f32.mrf.mxu0 }
 0x87b   : > { %v8260_v22 = vpop.f32.mrf.mxu0 }
 0x87d   : > { %v13627_v28 = vpop.f32.mrf.mxu0 }
 0x880   : > { %v13410_v54 = vpop.f32.mrf.mxu1 }
 0x882   : > { %v13411_v21 = vpop.f32.mrf.mxu1 }
 0x883   : > { %v13412_v23 = vadd.f32 %v13411_v21, %v13410_v54 }
 0x884   : > { %v13413_v19 = vpop.f32.mrf.mxu1 }
 0x885   : > { %v8258_v3 = vadd.f32 %v13412_v23, %v8257_v10 }
 0x886   : > { %v13414_v37 = vpop.f32.mrf.mxu1 }
 0x887   : > { %v13415_v38 = vadd.f32 %v13414_v37, %v13413_v19  ;;  %v14970_v37 = vld [vmem:[%s19538_s7 + $0x668] ss:$12 sps:$4 sm:$0xff]  }
 0x889   : > { %v8261_v43 = vadd.f32 %v13415_v38, %v8260_v22 }
 0x893   : > { %v8712_v6 = vpop.f32.mrf.mxu0 }
 0x895   : > { %v8714_v1 = vpop.f32.mrf.mxu0 }
 0x897   : > { %v8716_v58 = vpop.f32.mrf.mxu0 }
 0x899   : > { %v8718_v48 = vpop.f32.mrf.mxu0 }
 0x8b3   : > { %v13440_v36 = vpop.f32.mrf.mxu0 }
 0x8b5   : > { %v13441_v2 = vpop.f32.mrf.mxu0 }
 0x8b6   : > { %v13442_v20 = vadd.f32 %v13441_v2, %v13440_v36  ;;  %v14976_v36 = vld [vmem:[%s19538_s7 + $0x5d8] ss:$12 sps:$4 sm:$0xff]  }
 0x8b7   : > { %v13443_v50 = vpop.f32.mrf.mxu0  ;;  %v14977_v2 = vld [vmem:[%s19541_s10 + $0x70] ss:$8 sps:$4 sm:$0xff]  }
 0x8b8   : > { %v8756_v45 = vadd.f32 %v13442_v20, %v8258_v3  ;;  %v14979_v20 = vld [vmem:[%s19541_s10 + $0x74] ss:$8 sps:$4 sm:$0xff]  }
 0x8b9   : > { %v13444_v27 = vpop.f32.mrf.mxu0 }
 0x8ba   : > { %v13445_v11 = vadd.f32 %v13444_v27, %v13443_v50  ;;  %v14982_v50 = vld [vmem:[%s19541_s10 + $0x64] ss:$8 sps:$4 sm:$0xff]   ;;  %v14985_v27 = vld [vmem:[%s19541_s10 + $0x54] ss:$8 sps:$4 sm:$0xff]  }
 0x8bb   : > { %v8891_v59 = vpop.f32.mrf.mxu0 }
 0x8bc   : > { %v8759_v5 = vadd.f32 %v13445_v11, %v8261_v43  ;;  %v14971_v43 = vld [vmem:[%s19538_s7 + $0x650] ss:$12 sps:$4 sm:$0xff]  }
 0x8bd   : > { %v13652_v9 = vpop.f32.mrf.mxu0  ;;  %v14983_v11 = vld [vmem:[%s19541_s10 + $0x50] ss:$8 sps:$4 sm:$0xff]  }
 0x8be   : > { %v14991_v9 = vld [vmem:[%s19541_s10 + $0x34] ss:$8 sps:$4 sm:$0xff]  }
 0x8bf   : > { %v8894_v18 = vpop.f32.mrf.mxu0 }
 0x8c0   : > { %v8669_v14 = vpop.f32.mrf.mxu1  ;;  %v18832_v63 = vpack.c.bf16 %v8894_v18, %v8891_v59  ;;  %v14988_v59 = vld [vmem:[%s19541_s10 + $0x44] ss:$8 sps:$4 sm:$0xff]   ;;  %v14989_v18 = vld [vmem:[%s19541_s10 + $0x30] ss:$8 sps:$4 sm:$0xff]  }
 0x8c1   : > { %v8670_v53 = vadd.f32 %v8669_v14, %v8174_v16  ;;  %v13653_v62 = vpop.f32.mrf.mxu0  ;;  %v14948_v16 = vld [vmem:[%s19538_s7 + $0x578] ss:$12 sps:$4 sm:$0xff]   ;;  %v14992_v14 = vld [vmem:[%s19541_s10 + $0x20] ss:$8 sps:$4 sm:$0xff]  }
 0x8c2   : > { %v8671_v31 = vpop.f32.mrf.mxu1  ;;  %12990 = vmatmul.mubr.msk.bf16.vlgmr.msra.gmra.mxu0 %vm5774_vm6, %v18832_v63  ;;  %v14998_v62 = vld [vmem:[%s19541_s10] ss:$8 sps:$4 sm:$0xff]  }
 0x8c3   : > { %v18839_v33 = vadd.f32 %v8712_v6, %v8670_v53  ;;  %v8672_v24 = vadd.f32 %v8671_v31, %v8176_v52  ;;  %13458 = vmatpush3.bf16.msra.mxu0 %v14934_v49  ;;  %v14953_v52 = vld [vmem:[%s19538_s7 + $0x560] ss:$12 sps:$4 sm:$0xff]   ;;  %v14972_v6 = vld [vmem:[%s19538_s7 + $0x638] ss:$12 sps:$4 sm:$0xff]   ;;  %v15003_v31 = vld [vmem:[%s19541_s10 + $0xf4] ss:$8 sps:$4 sm:$0xff]  }
 0x8c4   : > { %v8673_v44 = vpop.f32.mrf.mxu1  ;;  %13459 = vmatprep.subr.bf16.mxu0 %v14938_v7  ;;  %v14994_v49 = vld [vmem:[%s19541_s10 + $0x24] ss:$8 sps:$4 sm:$0xff]   ;;  %v14995_v7 = vld [vmem:[%s19541_s10 + $0x10] ss:$8 sps:$4 sm:$0xff]  }
 0x8c5   : > { %v18847_v26 = vadd.f32 %v8714_v1, %v8672_v24  ;;  %v8674_v39 = vadd.f32 %v8673_v44, %v8178_v25  ;;  %v14963_v25 = vld [vmem:[%s19538_s7 + $0x530] ss:$12 sps:$4 sm:$0xff]   ;;  %v14973_v1 = vld [vmem:[%s19538_s7 + $0x620] ss:$12 sps:$4 sm:$0xff]  }
 0x8c6   : > { %v8675_v42 = vpop.f32.mrf.mxu1  ;;  %v15000_v53 = vld [vmem:[%s19541_s10 + $0x4] ss:$8 sps:$4 sm:$0xff]   ;;  %v15001_v24 = vld [vmem:[%s19541_s10 + $0xf0] ss:$8 sps:$4 sm:$0xff]  }
 0x8c7   : > { %v18849_v30 = vadd.f32 %v8716_v58, %v8674_v39  ;;  %v8676_v41 = vadd.f32 %v8675_v42, %v8180_v61  ;;  %13460 = vmatpush3.bf16.msra.mxu0 %v14939_v60  ;;  %v14969_v61 = vld [vmem:[%s19538_s7 + $0x458] ss:$12 sps:$4 sm:$0xff]   ;;  %v14974_v58 = vld [vmem:[%s19538_s7 + $0x608] ss:$12 sps:$4 sm:$0xff]   ;;  %v9539_v39 = vld [vmem:[%s19539_s8] sm:$0x7] }
 0x8c8   : > { %13461 = vmatprep.subr.bf16.mxu0 %v14943_v46 }
 0x8c9   : > { %v18857_v8 = vadd.f32 %v8718_v48, %v8676_v41  ;;  %v14975_v48 = vld [vmem:[%s19538_s7 + $0x5f0] ss:$12 sps:$4 sm:$0xff]  }
 0x8cb   : > { %13462 = vmatpush3.bf16.msra.mxu0 %v14944_v0 }
 0x8cc   : > { %13463 = vmatprep.subr.bf16.mxu0 %v14948_v16 }
 0x8cf   : > { %13464 = vmatpush3.bf16.msra.mxu0 %v14949_v34  ;;  %v19644_v34 = vsub.s32 0, %v16924_v17  ;;  %v12994_v17 = vld [vmem:[%s19540_s9 + $0x4] sm:$0x7] }
 0x8d0   : > { %13465 = vmatprep.subr.bf16.mxu0 %v14953_v52 }
 0x8d1   : > { %v9544_v52 = vrot.slane %v9539_v39, %v19644_v34  ;;  %v15022_v34 = vld [vmem:[%s19541_s10 + $0xa0] ss:$8 sps:$4 sm:$0xff]  }
 0x8d3   : > { %13466 = vmatpush3.bf16.msra.mxu0 %v14954_v29 }
 0x8d4   : > { %13467 = vmatprep.subr.bf16.mxu0 %v14958_v32 }
 0x8d7   : > { %13468 = vmatpush3.bf16.msra.mxu0 %v14959_v15 }
 0x8d8   : > { %13469 = vmatprep.subr.bf16.mxu0 %v14963_v25  ;;  %v9548_v25 = vrot.slane %v9539_v39, %v4326_v55 }
 0x8db   : > { %13470 = vmatpush3.bf16.msra.mxu0 %v14964_v40 }
 0x8dc   : > { %v8796_v4 = vpop.f32.mrf.mxu1  ;;  %13471 = vmatprep.subr.bf16.mxu0 %v14968_v12 }
 0x8dd   : > { %v18886_v56 = vadd.f32 %v8796_v4, %v8756_v45  ;;  %v14980_v45 = vld [vmem:[%s19541_s10 + $0x60] ss:$8 sps:$4 sm:$0xff]  }
 0x8de   : > { %v13644_v10 = vpop.f32.mrf.mxu1 }
 0x8df   : > { %13472 = vmatpush3.bf16.msra.mxu0 %v14969_v61 }
 0x8e0   : > { %v8799_v51 = vpop.f32.mrf.mxu1 }
 0x8e1   : > { %v18888_v22 = vadd.f32 %v8799_v51, %v8759_v5  ;;  %v14986_v5 = vld [vmem:[%s19541_s10 + $0x40] ss:$8 sps:$4 sm:$0xff]  }
 0x8e2   : > { %v13645_v28 = vpop.f32.mrf.mxu1 }
 0x8e4   : > { %v8848_v54 = vpop.f32.mrf.mxu1 }
 0x8e6   : > { %v8850_v21 = vpop.f32.mrf.mxu1 }
 0x8e8   : > { %v8852_v23 = vpop.f32.mrf.mxu1 }
 0x8e9   : > { %v8991_v38 = vpack.c.bf16 %v8852_v23, %v8848_v54 }
 0x8ea   : > { %v8854_v19 = vpop.f32.mrf.mxu1 }
 0x8eb   : > { %v8992_v3 = vpack.c.bf16 %v8854_v19, %v8850_v21 }
 0x8ed   : > { %9397 = vmatprep.mubr.bf16.mxu1 %v8992_v3  ;;  %9483 = vmatprep.mubr.bf16.mxu0 %v8992_v3 }
 0x8ee   : > { %9398 = vmatmul.mubr.bf16.vlgmr.msra.gmra.mxu1 %v8991_v38  ;;  %9484 = vmatmul.mubr.bf16.vlgmr.msra.gmra.mxu0 %v8991_v38 }
 0x8ef   : > { %13655 = vmatpush3.bf16.msra.mxu1 %v14970_v37  ;;  %13668 = vmatprep.mubr.msk.bf16.mxu1 %vm15236_vm0, %v19643_v13 }
 0x8f0   : > { %13656 = vmatprep.subr.bf16.mxu1 %v19643_v13  ;;  %9621 = vmatprep.mubr.bf16.mxu0 %v19608_v47 }
 0x8f3   : > { %13657 = vmatpush3.bf16.msra.mxu1 %v14971_v43 }
 0x8f4   : > { %13658 = vmatprep.subr.bf16.mxu1 %v19643_v13 }
 0x8f7   : > { %13659 = vmatpush3.bf16.msra.mxu1 %v14972_v6 }
 0x8f8   : > { %13660 = vmatprep.subr.bf16.mxu1 %v19643_v13 }
 0x8fb   : > { %13661 = vmatpush3.bf16.msra.mxu1 %v14973_v1 }
 0x8fc   : > { %13662 = vmatprep.subr.bf16.mxu1 %v19643_v13 }
 0x8ff   : > { %13663 = vmatpush3.bf16.msra.mxu1 %v14974_v58 }
 0x900   : > { %13664 = vmatprep.subr.bf16.mxu1 %v19643_v13 }
 0x903   : > { %13665 = vmatpush3.bf16.msra.mxu1 %v14975_v48 }
 0x904   : > { %13666 = vmatprep.subr.bf16.mxu1 %v19643_v13 }
 0x907   : > { %13667 = vmatpush3.bf16.msra.mxu1 %v14976_v36 }
 0x908   : > { %10029 = vmatprep.subr.bf16.mxu1 %v14979_v20 }
 0x90a   : > { %13669 = vmatmul.mubr.msk.bf16.vlgmr.msra.gmra.mxu1 %vm5774_vm6, %v18832_v63  ;;  %v14997_v63 = vld [vmem:[%s19541_s10 + $0x14] ss:$8 sps:$4 sm:$0xff]  }
 0x90b   : > { %10030 = vmatpush1.bf16.msra.mxu1 %v14977_v2 }
 0x90c   : > { %10031 = vmatprep.subr.bf16.mxu1 %v14982_v50 }
 0x90f   : > { %10032 = vmatpush1.bf16.msra.mxu1 %v14980_v45 }
 0x910   : > { %10033 = vmatprep.subr.bf16.mxu1 %v14985_v27 }
 0x913   : > { %10034 = vmatpush1.bf16.msra.mxu1 %v14983_v11 }
 0x914   : > { %10035 = vmatprep.subr.bf16.mxu1 %v14988_v59  ;;  %v9552_v59 = vrot.slane %v9539_v39, %v4330_v35  ;;  %v15004_v35 = vld [vmem:[%s19541_s10 + $0xe0] ss:$8 sps:$4 sm:$0xff]   ;;  %v15015_v39 = vld [vmem:[%s19541_s10 + $0x154] ss:$8 sps:$4 sm:$0xff]  }
 0x917   : > { %10036 = vmatpush1.bf16.msra.mxu1 %v14986_v5 }
 0x918   : > { %10037 = vmatprep.subr.bf16.mxu1 %v14991_v9 }
 0x91b   : > { %10038 = vmatpush1.bf16.msra.mxu1 %v14989_v18 }
 0x91c   : > { %10039 = vmatprep.subr.bf16.mxu1 %v14994_v49 }
 0x91f   : > { %10040 = vmatpush1.bf16.msra.mxu1 %v14992_v14 }
 0x920   : > { %10041 = vmatprep.subr.bf16.mxu1 %v14997_v63 }
 0x923   : > { %10042 = vmatpush1.bf16.msra.mxu1 %v14995_v7 }
 0x924   : > { %10043 = vmatprep.subr.bf16.mxu1 %v15000_v53 }
 0x927   : > { %10044 = vmatpush1.bf16.msra.mxu1 %v14998_v62 }
 0x928   : > { %10045 = vmatprep.subr.bf16.mxu1 %v15003_v31 }
 0x92b   : > { %10046 = vmatpush2.bf16.msra.mxu1 %v15001_v24  ;;  %v15009_v24 = vld [vmem:[%s19541_s10 + $0xd4] ss:$8 sps:$4 sm:$0xff]  }
 0x982   : > { %v9442_v60 = vpop.f32.mrf.mxu0 }
 0x984   : > { %v9444_v44 = vpop.f32.mrf.mxu0 }
 0x986   : > { %v9446_v41 = vpop.f32.mrf.mxu0 }
 0x988   : > { %v9448_v12 = vpop.f32.mrf.mxu0 }
 0x9ae   : > { %v9399_v46 = vpop.f32.mrf.mxu1  ;;  %v13473_v6 = vpop.f32.mrf.mxu0 }
 0x9af   : > { %v9443_v42 = vadd.f32 %v9442_v60, %v9399_v46  ;;  %v15012_v60 = vld [vmem:[%s19541_s10 + $0xc4] ss:$8 sps:$4 sm:$0xff]   ;;  %v15010_v46 = vld [vmem:[%s19541_s10 + $0xc0] ss:$8 sps:$4 sm:$0xff]  }
 0x9b0   : > { %v9401_v0 = vpop.f32.mrf.mxu1  ;;  %v13474_v58 = vpop.f32.mrf.mxu0 }
 0x9b1   : > { %v9533_v16 = vadd.f32 %v9443_v42, %v18839_v33  ;;  %v9445_v29 = vadd.f32 %v9444_v44, %v9401_v0  ;;  %v13475_v36 = vadd.f32 %v13474_v58, %v13473_v6  ;;  %v15013_v44 = vld [vmem:[%s19541_s10 + $0x150] ss:$8 sps:$4 sm:$0xff]   ;;  %v15018_v42 = vld [vmem:[%s19541_s10 + $0xb4] ss:$8 sps:$4 sm:$0xff]   ;;  %v15021_v0 = vld [vmem:[%s19541_s10 + $0x144] ss:$8 sps:$4 sm:$0xff]  }
 0x9b2   : > { %v9403_v32 = vpop.f32.mrf.mxu1  ;;  %v13476_v48 = vpop.f32.mrf.mxu0 }
 0x9b3   : > { %v9534_v15 = vadd.f32 %v9445_v29, %v18847_v26  ;;  %v9447_v40 = vadd.f32 %v9446_v41, %v9403_v32  ;;  %v9556_v4 = vadd.f32 %v9544_v52, %v9533_v16  ;;  %v9578_v26 = vsel %vm9576_vm10, 4294967295, %v15238_v57  ;;  %v15016_v41 = vld [vmem:[%s19541_s10 + $0xb0] ss:$8 sps:$4 sm:$0xff]   ;;  %v15019_v16 = vld [vmem:[%s19541_s10 + $0x140] ss:$8 sps:$4 sm:$0xff]  }
 0x9b4   : > { %v9405_v61 = vpop.f32.mrf.mxu1  ;;  %v9579_v43 = vsel %vm9577_vm11, %v9578_v26, 0  ;;  %v13477_v2 = vpop.f32.mrf.mxu0  ;;  %v15027_v29 = vld [vmem:[%s19541_s10 + $0x134] ss:$8 sps:$4 sm:$0xff]   ;;  %v15025_v32 = vld [vmem:[%s19541_s10 + $0x130] ss:$8 sps:$4 sm:$0xff]  }
 0x9b5   : > { %v9536_v10 = vadd.f32 %v9447_v40, %v18849_v30  ;;  %v9449_v51 = vadd.f32 %v9448_v12, %v9405_v61  ;;  %v9557_v28 = vadd.f32 %v9548_v25, %v9534_v15  ;;  %v9562_v21 = vmax.f32 %v9556_v4, 0.0  ;;  %v15028_v15 = vld [vmem:[%s19541_s10 + $0x90] ss:$8 sps:$4 sm:$0xff]   ;;  %v15033_v40 = vld [vmem:[%s19541_s10 + $0x124] ss:$8 sps:$4 sm:$0xff]  }
 0x9b6   : > { %v13478_v27 = vadd.f32 %v13477_v2, %v13476_v48  ;;  %v15031_v12 = vld [vmem:[%s19541_s10 + $0x120] ss:$8 sps:$4 sm:$0xff]   ;;  %v15036_v61 = vld [vmem:[%s19541_s10 + $0x84] ss:$8 sps:$4 sm:$0xff]  }
 0x9b7   : > { %v9559_v54 = vadd.f32 %v9544_v52, %v9536_v10  ;;  %v9537_v33 = vadd.f32 %v9449_v51, %v18857_v8  ;;  %v9563_v3 = vmax.f32 %v9557_v28, 0.0  ;;  %v9568_v8 = vld [vmem:[%s19540_s9] sm:$0x7]  ;;  %v15024_v52 = vld [vmem:[%s19541_s10 + $0xa4] ss:$8 sps:$4 sm:$0xff]  }
 0x9b8   : > { %v15034_v4 = vld [vmem:[%s19541_s10 + $0x80] ss:$8 sps:$4 sm:$0xff]   ;;  %v15039_v10 = vld [vmem:[%s19541_s10 + $0x114] ss:$8 sps:$4 sm:$0xff]   ;;  %v15037_v51 = vld [vmem:[%s19541_s10 + $0x110] ss:$8 sps:$4 sm:$0xff]  }
 0x9b9   : > { %v9565_v23 = vmax.f32 %v9559_v54, 0.0  ;;  %v9560_v19 = vadd.f32 %v9548_v25, %v9537_v33  ;;  %v15030_v25 = vld [vmem:[%s19541_s10 + $0x94] ss:$8 sps:$4 sm:$0xff]   ;;  %v15045_v54 = vld [vmem:[%s19541_s10 + $0x104] ss:$8 sps:$4 sm:$0xff]  }
 0x9ba   : > { %v15042_v28 = vld [vmem:[%s19541_s10 + $0x2b4] ss:$8 sps:$4 sm:$0xff]   ;;  %v15043_v33 = vld [vmem:[%s19541_s10 + $0x100] ss:$8 sps:$4 sm:$0xff]  }
 0x9bb   : > { %v9569_v55 = vpack.c.bf16 %v9565_v23, %v9562_v21  ;;  %v9566_v37 = vmax.f32 %v9560_v19, 0.0  ;;  %v15051_v21 = vld [vmem:[%s19541_s10 + $0x1d4] ss:$8 sps:$4 sm:$0xff]  }
 0x9bd   : > { %v9570_v38 = vpack.c.bf16 %v9566_v37, %v9563_v3  ;;  %v9581_v30 = vand.u32 %v9579_v43, %v9569_v55 }
 0x9bf   : > { %v9584_v1 = vand.u32 %v9579_v43, %v9570_v38 }
 0x9c1   : > { %9603 = vmatprep.subr.bf16.mxu0 %v9584_v1 }
 0x9c2   : > { %9604 = vmatpush1.bf16.msra.mxu0 %v9581_v30 }
 0x9c3   : > { %13672 = vmatprep.subr.bf16.mxu0 %v19643_v13 }
 0x9c5   : > { %12992 = vmatmul.mubr.msk.bf16.vlgmr.msra.gmra.mxu0 %vm9572_vm12, %v9568_v8 }
 0x9c6   : > { %13674 = vmatprep.mubr.msk.bf16.mxu0 %vm15236_vm0, %v19643_v13 }
 0x9ca   : > { %v9526_v20 = vpop.f32.mrf.mxu1 }
 0x9cb   : > { %v9527_v50 = vadd.f32 %v13475_v36, %v9526_v20  ;;  %v15040_v36 = vld [vmem:[%s19541_s10 + $0x2b0] ss:$8 sps:$4 sm:$0xff]  }
 0x9cc   : > { %v13670_v45 = vpop.f32.mrf.mxu1 }
 0x9cd   : > { %v9535_v11 = vadd.f32 %v9527_v50, %v18886_v56  ;;  %v15006_v56 = vld [vmem:[%s19541_s10 + $0xe4] ss:$8 sps:$4 sm:$0xff]  }
 0x9ce   : > { %v9529_v5 = vpop.f32.mrf.mxu1  ;;  %10047 = vmatprep.subr.bf16.mxu1 %v15006_v56  ;;  %v15048_v50 = vld [vmem:[%s19541_s10 + $0x2a4] ss:$8 sps:$4 sm:$0xff]   ;;  %v15066_v56 = vld [vmem:[%s19541_s10 + $0x274] ss:$8 sps:$4 sm:$0xff]  }
 0x9cf   : > { %v9530_v9 = vadd.f32 %v13478_v27, %v9529_v5  ;;  %v9558_v49 = vadd.f32 %v9552_v59, %v9535_v11  ;;  %10048 = vmatpush2.bf16.msra.mxu1 %v15004_v35  ;;  %v15046_v11 = vld [vmem:[%s19541_s10 + $0x2a0] ss:$8 sps:$4 sm:$0xff]   ;;  %v15049_v5 = vld [vmem:[%s19541_s10 + $0x1d0] ss:$8 sps:$4 sm:$0xff]  }
 0x9d0   : > { %v13671_v18 = vpop.f32.mrf.mxu1  ;;  %10049 = vmatprep.subr.bf16.mxu1 %v15009_v24  ;;  %v15061_v35 = vld [vmem:[%s19541_s10 + $0x1b0] ss:$8 sps:$4 sm:$0xff]  }
 0x9d1   : > { %v9538_v14 = vadd.f32 %v9530_v9, %v18888_v22  ;;  %v9564_v7 = vmax.f32 %v9558_v49, 0.0  ;;  %v15007_v22 = vld [vmem:[%s19541_s10 + $0xd0] ss:$8 sps:$4 sm:$0xff]   ;;  %v15054_v18 = vld [vmem:[%s19541_s10 + $0x294] ss:$8 sps:$4 sm:$0xff]  }
 0x9d2   : > { %v15057_v49 = vld [vmem:[%s19541_s10 + $0x1c4] ss:$8 sps:$4 sm:$0xff]   ;;  %v15064_v24 = vld [vmem:[%s19541_s10 + $0x270] ss:$8 sps:$4 sm:$0xff]  }
 0x9d3   : > { %v9561_v63 = vadd.f32 %v9552_v59, %v9538_v14  ;;  %10050 = vmatpush2.bf16.msra.mxu1 %v15007_v22  ;;  %v15069_v22 = vld [vmem:[%s19541_s10 + $0x1a4] ss:$8 sps:$4 sm:$0xff]  }
 0x9d4   : > { %10051 = vmatprep.subr.bf16.mxu1 %v15012_v60  ;;  %v15067_v60 = vld [vmem:[%s19541_s10 + $0x1a0] ss:$8 sps:$4 sm:$0xff]  }
 0x9d5   : > { %v9567_v53 = vmax.f32 %v9561_v63, 0.0  ;;  %v15052_v63 = vld [vmem:[%s19541_s10 + $0x290] ss:$8 sps:$4 sm:$0xff]  }
 0x9d7   : > { %v9571_v62 = vpack.c.bf16 %v9567_v53, %v9564_v7  ;;  %10052 = vmatpush2.bf16.msra.mxu1 %v15010_v46  ;;  %v15055_v53 = vld [vmem:[%s19541_s10 + $0x1c0] ss:$8 sps:$4 sm:$0xff]   ;;  %v15075_v46 = vld [vmem:[%s19541_s10 + $0x194] ss:$8 sps:$4 sm:$0xff]  }
 0x9d8   : > { %10053 = vmatprep.subr.bf16.mxu1 %v15018_v42  ;;  %v15073_v42 = vld [vmem:[%s19541_s10 + $0x190] ss:$8 sps:$4 sm:$0xff]  }
 0x9d9   : > { %v9587_v31 = vand.u32 %v9579_v43, %v9571_v62  ;;  %v15060_v62 = vld [vmem:[%s19541_s10 + $0x284] ss:$8 sps:$4 sm:$0xff]  }
 0x9db   : > { %13673 = vmatpush3.bf16.msra.mxu0 %v9587_v31  ;;  %10054 = vmatpush2.bf16.msra.mxu1 %v15016_v41  ;;  %v15078_v41 = vld [vmem:[%s19541_s10 + $0x184] ss:$8 sps:$4 sm:$0xff]  }
 0x9dc   : > { %9689 = vmatprep.subr.bf16.mxu0 %v9584_v1  ;;  %10055 = vmatprep.subr.bf16.mxu1 %v15024_v52  ;;  %v15084_v52 = vld [vmem:[%s19541_s10 + $0x164] ss:$8 sps:$4 sm:$0xff]  }
 0x9de   : > { %13675 = vmatmul.mubr.msk.bf16.vlgmr.msra.gmra.mxu0 %vm9572_vm12, %v9568_v8 }
 0x9df   : > { %9690 = vmatpush1.bf16.msra.mxu0 %v9581_v30  ;;  %9707 = vmatprep.mubr.bf16.mxu0 %v19608_v47 }
 0x9e0   : > { %13678 = vmatprep.subr.bf16.mxu0 %v19643_v13  ;;  %10056 = vmatpush2.bf16.msra.mxu1 %v15022_v34  ;;  %v15079_v34 = vld [vmem:[%s19541_s10 + $0x170] ss:$8 sps:$4 sm:$0xff]  }
 0x9e1   : > { %10057 = vmatprep.subr.bf16.mxu1 %v15030_v25  ;;  %v15090_v25 = vld [vmem:[%s19541_s10 + $0x244] ss:$8 sps:$4 sm:$0xff]  }
 0x9e4   : > { %10058 = vmatpush2.bf16.msra.mxu1 %v15028_v15  ;;  %v15085_v15 = vld [vmem:[%s19541_s10 + $0x250] ss:$8 sps:$4 sm:$0xff]  }
 0x9e5   : > { %10059 = vmatprep.subr.bf16.mxu1 %v15036_v61  ;;  %v15091_v61 = vld [vmem:[%s19541_s10 + $0x230] ss:$8 sps:$4 sm:$0xff]  }
 0x9e6   : > { %12995 = vmatmul.mubr.msk.bf16.vlgmr.msra.gmra.mxu0 %vm9572_vm12, %v12994_v17 }
 0x9e7   : > { %13679 = vmatpush3.bf16.msra.mxu0 %v9587_v31  ;;  %13680 = vmatprep.mubr.msk.bf16.mxu0 %vm15236_vm0, %v19643_v13  ;;  %v15063_v31 = vld [vmem:[%s19541_s10 + $0x1b4] ss:$8 sps:$4 sm:$0xff]  }
 0x9e8   : > { %10074 = vmatprep.subr.bf16.mxu0 %v15015_v39  ;;  %10060 = vmatpush2.bf16.msra.mxu1 %v15034_v4  ;;  %v15070_v39 = vld [vmem:[%s19541_s10 + $0x260] ss:$8 sps:$4 sm:$0xff]   ;;  %v15096_v4 = vld [vmem:[%s19541_s10 + $0x224] ss:$8 sps:$4 sm:$0xff]  }
 0x9e9   : > { %10421 = vmatprep.subr.bf16.mxu1 %v15042_v28  ;;  %v15097_v28 = vld [vmem:[%s19541_s10 + $0x210] ss:$8 sps:$4 sm:$0xff]  }
 0x9ee   : > { %13681 = vmatmul.mubr.msk.bf16.vlgmr.msra.gmra.mxu0 %vm9572_vm12, %v12994_v17  ;;  %v15058_v17 = vld [vmem:[%s19541_s10 + $0x280] ss:$8 sps:$4 sm:$0xff]  }
 0x9ef   : > { %10102 = vmatprep.mubr.bf16.mxu0 %v19608_v47  ;;  %10075 = vmatpush1.bf16.msra.mxu0 %v15013_v44  ;;  %v15072_v44 = vld [vmem:[%s19541_s10 + $0x264] ss:$8 sps:$4 sm:$0xff]  }
 0x9f0   : > { %10076 = vmatprep.subr.bf16.mxu0 %v15021_v0  ;;  %v15076_v0 = vld [vmem:[%s19541_s10 + $0x180] ss:$8 sps:$4 sm:$0xff]  }
 0x9f3   : > { %10077 = vmatpush1.bf16.msra.mxu0 %v15019_v16  ;;  %v15081_v16 = vld [vmem:[%s19541_s10 + $0x174] ss:$8 sps:$4 sm:$0xff]  }
 0x9f4   : > { %10078 = vmatprep.subr.bf16.mxu0 %v15027_v29  ;;  %v15082_v29 = vld [vmem:[%s19541_s10 + $0x160] ss:$8 sps:$4 sm:$0xff]  }
 0x9f7   : > { %10079 = vmatpush1.bf16.msra.mxu0 %v15025_v32  ;;  %v15087_v32 = vld [vmem:[%s19541_s10 + $0x254] ss:$8 sps:$4 sm:$0xff]  }
 0x9f8   : > { %10080 = vmatprep.subr.bf16.mxu0 %v15033_v40  ;;  %v15088_v40 = vld [vmem:[%s19541_s10 + $0x240] ss:$8 sps:$4 sm:$0xff]  }
 0x9fb   : > { %10081 = vmatpush1.bf16.msra.mxu0 %v15031_v12  ;;  %v15093_v12 = vld [vmem:[%s19541_s10 + $0x234] ss:$8 sps:$4 sm:$0xff]  }
 0x9fc   : > { %10082 = vmatprep.subr.bf16.mxu0 %v15039_v10  ;;  %v15094_v10 = vld [vmem:[%s19541_s10 + $0x220] ss:$8 sps:$4 sm:$0xff]  }
 0x9ff   : > { %10083 = vmatpush1.bf16.msra.mxu0 %v15037_v51  ;;  %v15099_v51 = vld [vmem:[%s19541_s10 + $0x214] ss:$8 sps:$4 sm:$0xff]  }
 0xa00   : > { %10084 = vmatprep.subr.bf16.mxu0 %v15045_v54  ;;  %v15102_v54 = vld [vmem:[%s19541_s10 + $0x204] ss:$8 sps:$4 sm:$0xff]  }
 0xa03   : > { %10085 = vmatpush1.bf16.msra.mxu0 %v15043_v33  ;;  %v15100_v33 = vld [vmem:[%s19541_s10 + $0x200] ss:$8 sps:$4 sm:$0xff]  }
 0xa04   : > { %10376 = vmatprep.subr.bf16.mxu0 %v15051_v21  ;;  %v15105_v21 = vld [vmem:[%s19541_s10 + $0x1f4] ss:$8 sps:$4 sm:$0xff]  }
 0xa85   : > { %v9623_v23 = vpop.f32.mrf.mxu0 }
 0xa87   : > { %v9625_v19 = vpop.f32.mrf.mxu0 }
 0xa89   : > { %v9627_v26 = vpop.f32.mrf.mxu0 }
 0xa8a   : > { %v15106_v26 = vld [vmem:[%s19541_s10 + $0x1e0] ss:$8 sps:$4 sm:$0xff]  }
 0xa8b   : > { %v9628_v3 = vpop.f32.mrf.mxu0 }
 0xa9e   : > { %v9664_v55 = vpop.f32.mrf.mxu0 }
 0xaa0   : > { %v13676_v37 = vpop.f32.mrf.mxu0 }
 0xaa2   : > { %v9667_v38 = vpop.f32.mrf.mxu0 }
 0xaa4   : > { %v13677_v43 = vpop.f32.mrf.mxu0 }
 0xaa6   : > { %v9709_v6 = vpop.f32.mrf.mxu0 }
 0xaa7   : > { %v9756_v1 = vmax.f32 %v9623_v23, %v9709_v6  ;;  %v15103_v23 = vld [vmem:[%s19541_s10 + $0x1f0] ss:$8 sps:$4 sm:$0xff]  }
 0xaa8   : > { %v9711_v30 = vpop.f32.mrf.mxu0 }
 0xaa9   : > { %v9757_v58 = vmax.f32 %v9625_v19, %v9711_v30  ;;  %v19097_v2 = vpack.c.bf16 %v9756_v1, %v9756_v1  ;;  %v15108_v19 = vld [vmem:[%s19541_s10 + $0x1e4] ss:$8 sps:$4 sm:$0xff]  }
 0xaaa   : > { %v9713_v8 = vpop.f32.mrf.mxu0 }
 0xaab   : > { %v9804_v48 = vpack.c.bf16 %v9757_v58, %v9757_v58 }
 0xaac   : > { %v9714_v20 = vpop.f32.mrf.mxu0 }
 0xaad   : > { %10061 = vmatprep.mubr.bf16.mxu1 %v9804_v48 }
 0xaae   : > { %v9750_v45 = vpop.f32.mrf.mxu0  ;;  %10062 = vmatmul.mubr.bf16.vlgmr.msra.gmra.mxu1 %v19097_v2 }
 0xaaf   : > { %v9758_v27 = vmax.f32 %v9664_v55, %v9750_v45  ;;  %10422 = vmatpush1.bf16.msra.mxu1 %v15040_v36  ;;  %10449 = vmatprep.mubr.bf16.mxu1 %v19608_v47 }
 0xab0   : > { %v13682_v59 = vpop.f32.mrf.mxu0  ;;  %10423 = vmatprep.subr.bf16.mxu1 %v15048_v50 }
 0xab1   : > { %v9805_v9 = vpack.c.bf16 %v9758_v27, %v9758_v27 }
 0xab2   : > { %v9753_v14 = vpop.f32.mrf.mxu0 }
 0xab3   : > { %10424 = vmatpush1.bf16.msra.mxu1 %v15046_v11  ;;  %13041 = vmatmul.mubr.msk.bf16.vlgmr.msra.gmra.mxu0 %vm715_vm1, %v9805_v9 }
 0xab4   : > { %10377 = vmatpush1.bf16.msra.mxu0 %v15049_v5  ;;  %v13683_v7 = vpop.f32.mrf.mxu0  ;;  %10408 = vmatprep.mubr.bf16.mxu0 %v9804_v48  ;;  %v10468_v5 = vsel %vm10467_vm13, 4294967295, %v15238_v57  ;;  %v13132_v57 = vld [vmem:[%s19542_s11 + $0x1] sm:$0x1] }
 0xab5   : > { %10425 = vmatprep.subr.bf16.mxu1 %v15054_v18  ;;  %10378 = vmatprep.subr.bf16.mxu0 %v15057_v49 }
 0xab7   : > { %10426 = vmatpush1.bf16.msra.mxu1 %v15052_v63  ;;  %v10469_v63 = vsel %vm7342_vm7, %v10468_v5, 0 }
 0xab8   : > { %10379 = vmatpush1.bf16.msra.mxu0 %v15055_v53  ;;  %10427 = vmatprep.subr.bf16.mxu1 %v15060_v62 }
 0xab9   : > { %10380 = vmatprep.subr.bf16.mxu0 %v15063_v31  ;;  %v10460_v31 = vld [vmem:[%s19542_s11] sm:$0x1] }
 0xabb   : > { %10428 = vmatpush1.bf16.msra.mxu1 %v15058_v17  ;;  %v15109_v17 = vld [vmem:[%s19543_s12 + $0x88] sm:$0xff]  }
 0xabc   : > { %10381 = vmatpush1.bf16.msra.mxu0 %v15061_v35  ;;  %10429 = vmatprep.subr.bf16.mxu1 %v15066_v56  ;;  %v15119_v35 = vld [vmem:[%s19543_s12 + $0x38] sm:$0xff]   ;;  %v15110_v56 = vld [vmem:[%s19543_s12 + $0x80] sm:$0xff]  }
 0xabd   : > { %10382 = vmatprep.subr.bf16.mxu0 %v15069_v22  ;;  %v15120_v22 = vld [vmem:[%s19543_s12 + $0x30] sm:$0xff]  }
 0xabf   : > { %10430 = vmatpush1.bf16.msra.mxu1 %v15064_v24  ;;  %v15111_v24 = vld [vmem:[%s19543_s12 + $0x78] sm:$0xff]  }
 0xac0   : > { %10383 = vmatpush1.bf16.msra.mxu0 %v15067_v60  ;;  %10431 = vmatprep.subr.bf16.mxu1 %v15072_v44  ;;  %v15121_v60 = vld [vmem:[%s19543_s12 + $0x28] sm:$0xff]   ;;  %v15112_v44 = vld [vmem:[%s19543_s12 + $0x70] sm:$0xff]  }
 0xac1   : > { %10384 = vmatprep.subr.bf16.mxu0 %v15075_v46  ;;  %v15122_v46 = vld [vmem:[%s19543_s12 + $0x20] sm:$0xff]  }
 0xac3   : > { %10432 = vmatpush1.bf16.msra.mxu1 %v15070_v39  ;;  %v15113_v39 = vld [vmem:[%s19543_s12 + $0x68] sm:$0xff]  }
 0xac4   : > { %10385 = vmatpush1.bf16.msra.mxu0 %v15073_v42  ;;  %v15123_v42 = vld [vmem:[%s19543_s12 + $0x18] sm:$0xff]  }
 0xac5   : > { %10386 = vmatprep.subr.bf16.mxu0 %v15078_v41  ;;  %v15114_v41 = vld [vmem:[%s19543_s12 + $0x60] sm:$0xff]  }
 0xac6   : > { %13130 = vmatmul.mubr.msk.bf16.vlgmr.msra.gmra.mxu1 %vm715_vm1, %v9805_v9  ;;  %vm10998_vm1 = vcmask 15360  }
 0xac7   : > { %10508 = vmatprep.mubr.bf16.mxu1 %v19608_v47 }
 0xac8   : > { %10387 = vmatpush1.bf16.msra.mxu0 %v15076_v0  ;;  %v15124_v0 = vld [vmem:[%s19543_s12 + $0x10] sm:$0xff]  }
 0xac9   : > { %10388 = vmatprep.subr.bf16.mxu0 %v15081_v16  ;;  %v15115_v16 = vld [vmem:[%s19543_s12 + $0x58] sm:$0xff]  }
 0xacc   : > { %10389 = vmatpush1.bf16.msra.mxu0 %v15079_v34  ;;  %v15125_v34 = vld [vmem:[%s19543_s12 + $0x8] sm:$0xff]  }
 0xacd   : > { %10390 = vmatprep.subr.bf16.mxu0 %v15084_v52  ;;  %v15116_v52 = vld [vmem:[%s19543_s12 + $0x50] sm:$0xff]  }
 0xad0   : > { %10391 = vmatpush1.bf16.msra.mxu0 %v15082_v29  ;;  %v15126_v29 = vld [vmem:[%s19543_s12] sm:$0xff]  }
 0xad1   : > { %10392 = vmatprep.subr.bf16.mxu0 %v15087_v32  ;;  %v15117_v32 = vld [vmem:[%s19543_s12 + $0x98] sm:$0xff]  }
 0xad4   : > { %10393 = vmatpush2.bf16.msra.mxu0 %v15085_v15  ;;  %v15127_v15 = vld [vmem:[%s19543_s12 + $0x48] sm:$0xff]  }
 0xad5   : > { %10394 = vmatprep.subr.bf16.mxu0 %v15090_v25  ;;  %v15118_v25 = vld [vmem:[%s19543_s12 + $0x90] sm:$0xff]  }
 0xad8   : > { %10395 = vmatpush2.bf16.msra.mxu0 %v15088_v40  ;;  %v15128_v40 = vld [vmem:[%s19543_s12 + $0x40] sm:$0xff]  }
 0xad9   : > { %10396 = vmatprep.subr.bf16.mxu0 %v15093_v12 }
 0xadc   : > { %10397 = vmatpush2.bf16.msra.mxu0 %v15091_v61 }
 0xadd   : > { %10398 = vmatprep.subr.bf16.mxu0 %v15096_v4 }
 0xae0   : > { %10399 = vmatpush2.bf16.msra.mxu0 %v15094_v10 }
 0xae1   : > { %10400 = vmatprep.subr.bf16.mxu0 %v15099_v51 }
 0xae4   : > { %10401 = vmatpush2.bf16.msra.mxu0 %v15097_v28 }
 0xae5   : > { %10402 = vmatprep.subr.bf16.mxu0 %v15102_v54 }
 0xae8   : > { %10403 = vmatpush2.bf16.msra.mxu0 %v15100_v33 }
 0xae9   : > { %10404 = vmatprep.subr.bf16.mxu0 %v15105_v21 }
 0xaec   : > { %10405 = vmatpush2.bf16.msra.mxu0 %v15103_v23 }
 0xaed   : > { %10406 = vmatprep.subr.bf16.mxu0 %v15108_v19  ;;  %v15129_v19 = vld [vmem:[%s19543_s12 + $0xd8] sm:$0xff]  }
 0xaf0   : > { %10407 = vmatpush2.bf16.msra.mxu0 %v15106_v26 }
 0xaf3   : > { %10409 = vmatmul.mubr.bf16.vlgmr.msra.gmra.mxu0 %v19097_v2 }
 0xaf4   : > { %10576 = vmatprep.mubr.bf16.mxu0 %v19608_v47 }
 0xb6e   : > { %v10063_v3 = vpop.f32.mrf.mxu1 }
 0xb70   : > { %v10065_v55 = vpop.f32.mrf.mxu1 }
 0xb72   : > { %v10067_v37 = vpop.f32.mrf.mxu1 }
 0xb73   : > { %v10104_v38 = vpop.f32.mrf.mxu0  ;;  %v13176_v37 = vld [vmem:[%s19542_s11 + $0x2] sm:$0x1] }
 0xb74   : > { %v10105_v43 = vadd.f32 %v10104_v38, %v10063_v3  ;;  %v10068_v6 = vpop.f32.mrf.mxu1  ;;  %v15131_v38 = vld [vmem:[%s19543_s12 + $0xc8] sm:$0xff]  }
 0xb75   : > { %v10106_v1 = vpop.f32.mrf.mxu0  ;;  %v15133_v6 = vld [vmem:[%s19543_s12 + $0xb8] sm:$0xff]  }
 0xb76   : > { %v10107_v30 = vadd.f32 %v10106_v1, %v10065_v55  ;;  %v15130_v55 = vld [vmem:[%s19543_s12 + $0xd0] sm:$0xff]  }
 0xb77   : > { %v10108_v58 = vpop.f32.mrf.mxu0  ;;  %v15134_v1 = vld [vmem:[%s19543_s12 + $0xb0] sm:$0xff]  }
 0xb78   : > { %v15136_v58 = vld [vmem:[%s19543_s12 + $0xa0] sm:$0xff]  }
 0xb79   : > { %v10109_v8 = vpop.f32.mrf.mxu0 }
 0xb7a   : > { %v15137_v8 = vld [vmem:[%s19543_s12 + $0xe8] sm:$0xff]  }
 0xb86   : > { %v10451_v48 = vpop.f32.mrf.mxu1 }
 0xb88   : > { %v10453_v36 = vpop.f32.mrf.mxu1 }
 0xb8a   : > { %v10455_v20 = vpop.f32.mrf.mxu1 }
 0xb8c   : > { %v10456_v50 = vpop.f32.mrf.mxu1 }
 0xbb3   : > { %v10410_v45 = vpop.f32.mrf.mxu0 }
 0xbb4   : > { %v10452_v27 = vadd.f32 %v10451_v48, %v10410_v45  ;;  %v15138_v48 = vld [vmem:[%s19543_s12 + $0xe0] sm:$0xff]  }
 0xbb5   : > { %v10412_v2 = vpop.f32.mrf.mxu0 }
 0xbb6   : > { %v10458_v11 = vmax.f32 %v10105_v43, %v10452_v27  ;;  %v10454_v59 = vadd.f32 %v10453_v36, %v10412_v2  ;;  %v15132_v43 = vld [vmem:[%s19543_s12 + $0xc0] sm:$0xff]  }
 0xbb7   : > { %v10414_v9 = vpop.f32.mrf.mxu0 }
 0xbb8   : > { %v10459_v18 = vmax.f32 %v10107_v30, %v10454_v59  ;;  %v10461_v49 = vpack.c.bf16 %v10458_v11, %v10458_v11  ;;  %v15135_v30 = vld [vmem:[%s19543_s12 + $0xa8] sm:$0xff]  }
 0xbb9   : > { %v10415_v14 = vpop.f32.mrf.mxu0 }
 0xbba   : > { %v10462_v7 = vpack.c.bf16 %v10459_v18, %v10459_v18  ;;  %v19233_v62 = vand.u32 %v10469_v63, %v10461_v49 }
 0xbbc   : > { %v19231_v53 = vand.u32 %v10469_v63, %v10462_v7  ;;  %v15140_v7 = vld [vmem:[%s19546_s15 + $0x78] sm:$0xff]  }
 0xbbe   : > { %10490 = vmatprep.subr.bf16.mxu1 %v19231_v53  ;;  %10558 = vmatprep.subr.bf16.mxu0 %v19231_v53 }
 0xbbf   : > { %10491 = vmatpush1.bf16.msra.mxu1 %v19233_v62  ;;  %10559 = vmatpush1.bf16.msra.mxu0 %v19233_v62 }
 0xbc0   : > { %10671 = vmatprep.subr.bf16.mxu1 %v19608_v47  ;;  %10774 = vmatprep.subr.bf16.mxu0 %v19608_v47 }
 0xbc2   : > { %13131 = vmatmul.mubr.msk.bf16.vlgmr.msra.gmra.mxu1 %vm10463_vm14, %v10460_v31  ;;  %13133 = vmatmul.mubr.msk.bf16.vlgmr.msra.gmra.mxu0 %vm10463_vm14, %v13132_v57  ;;  %v15146_v31 = vld [vmem:[%s19546_s15 + $0x60] sm:$0xff]   ;;  %v15148_v57 = vld [vmem:[%s19546_s15 + $0x58] sm:$0xff]  }
 0xbc3   : > { %10672 = vmatpush1.bf16.msra.mxu1 %v15109_v17  ;;  %10775 = vmatpush1.bf16.msra.mxu0 %v15119_v35  ;;  %v13209_v35 = vld [vmem:[%s19544_s13] ss:$0 sm:$0xff] }
 0xbc4   : > { %10673 = vmatprep.subr.bf16.mxu1 %v19608_v47  ;;  %10776 = vmatprep.subr.bf16.mxu0 %v19608_v47 }
 0xbc7   : > { %10674 = vmatpush1.bf16.msra.mxu1 %v15110_v56  ;;  %10777 = vmatpush1.bf16.msra.mxu0 %v15120_v22 }
 0xbc8   : > { %10675 = vmatprep.subr.bf16.mxu1 %v19608_v47  ;;  %10778 = vmatprep.subr.bf16.mxu0 %v19608_v47 }
 0xbcb   : > { %10676 = vmatpush1.bf16.msra.mxu1 %v15111_v24  ;;  %10779 = vmatpush1.bf16.msra.mxu0 %v15121_v60 }
 0xbcc   : > { %10677 = vmatprep.subr.bf16.mxu1 %v19608_v47  ;;  %10780 = vmatprep.subr.bf16.mxu0 %v19608_v47 }
 0xbcf   : > { %10678 = vmatpush1.bf16.msra.mxu1 %v15112_v44  ;;  %10781 = vmatpush1.bf16.msra.mxu0 %v15122_v46 }
 0xbd0   : > { %10679 = vmatprep.subr.bf16.mxu1 %v19608_v47  ;;  %10782 = vmatprep.subr.bf16.mxu0 %v19608_v47 }
 0xbd3   : > { %10680 = vmatpush1.bf16.msra.mxu1 %v15113_v39  ;;  %10783 = vmatpush1.bf16.msra.mxu0 %v15123_v42 }
 0xbd4   : > { %10681 = vmatprep.subr.bf16.mxu1 %v19608_v47  ;;  %10784 = vmatprep.subr.bf16.mxu0 %v19608_v47 }
 0xbd7   : > { %10682 = vmatpush1.bf16.msra.mxu1 %v15114_v41  ;;  %10785 = vmatpush1.bf16.msra.mxu0 %v15124_v0  ;;  %v10996_v41 = vld [vmem:[%s19545_s14] sm:$0x1]  ;;  %v13211_v0 = vld [vmem:[%s19545_s14 + $0x1] sm:$0x1] }
 0xbd8   : > { %10683 = vmatprep.subr.bf16.mxu1 %v19608_v47  ;;  %10786 = vmatprep.subr.bf16.mxu0 %v19608_v47 }
 0xbdb   : > { %10684 = vmatpush1.bf16.msra.mxu1 %v15115_v16  ;;  %10787 = vmatpush1.bf16.msra.mxu0 %v15125_v34  ;;  %v15139_v16 = vld [vmem:[%s19546_s15 + $0x38] sm:$0xff]   ;;  %v15141_v34 = vld [vmem:[%s19546_s15 + $0x30] sm:$0xff]  }
 0xbdc   : > { %10685 = vmatprep.subr.bf16.mxu1 %v19608_v47  ;;  %10788 = vmatprep.subr.bf16.mxu0 %v19608_v47 }
 0xbdf   : > { %10686 = vmatpush1.bf16.msra.mxu1 %v15116_v52  ;;  %10789 = vmatpush1.bf16.msra.mxu0 %v15126_v29  ;;  %v15143_v52 = vld [vmem:[%s19546_s15 + $0x28] sm:$0xff]   ;;  %v15145_v29 = vld [vmem:[%s19546_s15 + $0x20] sm:$0xff]  }
 0xbe0   : > { %10699 = vmatprep.subr.bf16.mxu1 %v19608_v47  ;;  %10802 = vmatprep.subr.bf16.mxu0 %v19608_v47 }
 0xbe3   : > { %10700 = vmatpush2.bf16.msra.mxu1 %v15117_v32  ;;  %10803 = vmatpush2.bf16.msra.mxu0 %v15127_v15  ;;  %v15147_v32 = vld [vmem:[%s19546_s15 + $0x18] sm:$0xff]   ;;  %v15149_v15 = vld [vmem:[%s19546_s15 + $0x10] sm:$0xff]  }
 0xbe4   : > { %10701 = vmatprep.subr.bf16.mxu1 %v19608_v47  ;;  %10804 = vmatprep.subr.bf16.mxu0 %v19608_v47 }
 0xbe7   : > { %10702 = vmatpush2.bf16.msra.mxu1 %v15118_v25  ;;  %10805 = vmatpush2.bf16.msra.mxu0 %v15128_v40  ;;  %v15150_v25 = vld [vmem:[%s19546_s15 + $0x50] sm:$0xff]   ;;  %v15151_v40 = vld [vmem:[%s19546_s15 + $0x8] sm:$0xff]  }
 0xbe8   : > { %10833 = vmatprep.subr.bf16.mxu1 %v19231_v53  ;;  %10946 = vmatprep.subr.bf16.mxu0 %v19608_v47  ;;  %v15142_v53 = vld [vmem:[%s19546_s15 + $0x70] sm:$0xff]  }
 0xc82   : > { %v10510_v12 = vpop.f32.mrf.mxu1  ;;  %v10578_v61 = vpop.f32.mrf.mxu0 }
 0xc83   : > { %v10537_v4 = vpack.c.bf16 %v10510_v12, %v10510_v12  ;;  %v10606_v33 = vpack.c.bf16 %v10578_v61, %v10578_v61  ;;  %v15152_v12 = vld [vmem:[%s19546_s15 + $0x48] sm:$0xff]   ;;  %v15153_v61 = vld [vmem:[%s19546_s15] sm:$0xff]  }
 0xc84   : > { %v10512_v10 = vpop.f32.mrf.mxu1  ;;  %v10580_v51 = vpop.f32.mrf.mxu0 }
 0xc85   : > { %v10538_v28 = vpack.c.bf16 %v10512_v10, %v10512_v10  ;;  %v10607_v54 = vpack.c.bf16 %v10580_v51, %v10580_v51 }
 0xc86   : > { %v10582_v21 = vpop.f32.mrf.mxu0  ;;  %v10514_v23 = vpop.f32.mrf.mxu1 }
 0xc87   : > { %13164 = vmatprep.mubr.msk.bf16.mxu1 %vm1771_vm2, %v10607_v54  ;;  %13175 = vmatprep.mubr.msk.bf16.mxu0 %vm1771_vm2, %v10538_v28 }
 0xc88   : > { %v10583_v26 = vpop.f32.mrf.mxu0  ;;  %10704 = vmatmul.mubr.bf16.vlgmr.msra.gmra.mxu1 %v10606_v33  ;;  %10807 = vmatmul.mubr.bf16.vlgmr.msra.gmra.mxu0 %v10537_v4  ;;  %v10515_v3 = vpop.f32.mrf.mxu1  ;;  %v15154_v4 = vld [vmem:[%s19546_s15 + $0x40] sm:$0xff]  }
 0xc89   : > { %10834 = vmatpush1.bf16.msra.mxu1 %v19233_v62  ;;  %10851 = vmatprep.mubr.bf16.mxu1 %v19608_v47  ;;  %v15144_v62 = vld [vmem:[%s19546_s15 + $0x68] sm:$0xff]   ;;  %v11310_v26 = vld [vmem:[%s19547_s16 + $0x38] sm:$0xff] }
 0xc8a   : > { %10947 = vmatpush1.bf16.msra.mxu0 %v15129_v19  ;;  %13684 = vmatprep.subr.bf16.mxu1 %v19643_v13 }
 0xc8b   : > { %10948 = vmatprep.subr.bf16.mxu0 %v19608_v47 }
 0xc8e   : > { %10949 = vmatpush1.bf16.msra.mxu0 %v15130_v55  ;;  %v11309_v55 = vld [vmem:[%s19547_s16 + $0x30] sm:$0xff] }
 0xc8f   : > { %10950 = vmatprep.subr.bf16.mxu0 %v19608_v47 }
 0xc90   : > { %13177 = vmatmul.mubr.msk.bf16.vlgmr.msra.gmra.mxu1 %vm10463_vm14, %v13176_v37 }
 0xc91   : > { %13686 = vmatprep.mubr.msk.bf16.mxu1 %vm15236_vm0, %v19643_v13 }
 0xc92   : > { %10951 = vmatpush1.bf16.msra.mxu0 %v15131_v38  ;;  %v11308_v38 = vld [vmem:[%s19547_s16 + $0x28] sm:$0xff] }
 0xc93   : > { %10952 = vmatprep.subr.bf16.mxu0 %v19608_v47 }
 0xc96   : > { %10953 = vmatpush1.bf16.msra.mxu0 %v15132_v43  ;;  %v11307_v43 = vld [vmem:[%s19547_s16 + $0x20] sm:$0xff] }
 0xc97   : > { %10954 = vmatprep.subr.bf16.mxu0 %v19608_v47 }
 0xc9a   : > { %10955 = vmatpush1.bf16.msra.mxu0 %v15133_v6  ;;  %v11306_v6 = vld [vmem:[%s19547_s16 + $0x18] sm:$0xff] }
 0xc9b   : > { %10956 = vmatprep.subr.bf16.mxu0 %v19608_v47 }
 0xc9e   : > { %10957 = vmatpush1.bf16.msra.mxu0 %v15134_v1  ;;  %v11305_v1 = vld [vmem:[%s19547_s16 + $0x10] sm:$0xff] }
 0xc9f   : > { %10958 = vmatprep.subr.bf16.mxu0 %v19608_v47 }
 0xca2   : > { %10959 = vmatpush1.bf16.msra.mxu0 %v15135_v30  ;;  %v11304_v30 = vld [vmem:[%s19547_s16 + $0x8] sm:$0xff] }
 0xca3   : > { %10960 = vmatprep.subr.bf16.mxu0 %v19608_v47 }
 0xca6   : > { %10961 = vmatpush1.bf16.msra.mxu0 %v15136_v58  ;;  %v11303_v58 = vld [vmem:[%s19547_s16] sm:$0xff] }
 0xca7   : > { %10974 = vmatprep.subr.bf16.mxu0 %v19608_v47 }
 0xcaa   : > { %10975 = vmatpush2.bf16.msra.mxu0 %v15137_v8 }
 0xcab   : > { %10976 = vmatprep.subr.bf16.mxu0 %v19608_v47 }
 0xcae   : > { %10977 = vmatpush2.bf16.msra.mxu0 %v15138_v48 }
 0xcaf   : > { %13716 = vmatprep.subr.bf16.mxu0 %v19643_v13 }
 0xd48   : > { %v10705_v36 = vpop.f32.mrf.mxu1  ;;  %v10808_v20 = vpop.f32.mrf.mxu0 }
 0xd49   : > { %v10809_v50 = vadd.f32 %v10808_v20, %v10705_v36 }
 0xd4a   : > { %v10707_v45 = vpop.f32.mrf.mxu1  ;;  %v10810_v27 = vpop.f32.mrf.mxu0 }
 0xd4c   : > { %v10708_v2 = vpop.f32.mrf.mxu1  ;;  %v10811_v11 = vpop.f32.mrf.mxu0 }
 0xd4e   : > { %v10709_v59 = vpop.f32.mrf.mxu1  ;;  %v10812_v5 = vpop.f32.mrf.mxu0 }
 0xd50   : > { %v10853_v9 = vpop.f32.mrf.mxu1 }
 0xd51   : > { %v10881_v47 = vpack.c.bf16 %v10853_v9, %v10853_v9 }
 0xd52   : > { %v10855_v18 = vpop.f32.mrf.mxu1 }
 0xd53   : > { %v10882_v49 = vpack.c.bf16 %v10855_v18, %v10855_v18 }
 0xd54   : > { %v10857_v14 = vpop.f32.mrf.mxu1 }
 0xd55   : > { %13208 = vmatprep.mubr.msk.bf16.mxu0 %vm1771_vm2, %v10882_v49 }
 0xd56   : > { %v10858_v63 = vpop.f32.mrf.mxu1  ;;  %10979 = vmatmul.mubr.bf16.vlgmr.msra.gmra.mxu0 %v10881_v47 }
 0xd57   : > { %13732 = vmatprep.mubr.msk.bf16.mxu0 %vm15236_vm0, %v19643_v13  ;;  %13717 = vmatpush3.bf16.msra.mxu0 %v15140_v7 }
 0xd58   : > { %13718 = vmatprep.subr.bf16.mxu0 %v19643_v13 }
 0xd5b   : > { %13719 = vmatpush3.bf16.msra.mxu0 %v15142_v53 }
 0xd5c   : > { %13720 = vmatprep.subr.bf16.mxu0 %v19643_v13 }
 0xd5f   : > { %13721 = vmatpush3.bf16.msra.mxu0 %v15144_v62 }
 0xd60   : > { %13722 = vmatprep.subr.bf16.mxu0 %v19643_v13 }
 0xd63   : > { %13723 = vmatpush3.bf16.msra.mxu0 %v15146_v31 }
 0xd64   : > { %13724 = vmatprep.subr.bf16.mxu0 %v19643_v13 }
 0xd67   : > { %13725 = vmatpush3.bf16.msra.mxu0 %v15148_v57 }
 0xd68   : > { %13726 = vmatprep.subr.bf16.mxu0 %v19643_v13 }
 0xd6b   : > { %13727 = vmatpush3.bf16.msra.mxu0 %v15150_v25 }
 0xd6c   : > { %13728 = vmatprep.subr.bf16.mxu0 %v19643_v13 }
 0xd6f   : > { %13729 = vmatpush3.bf16.msra.mxu0 %v15152_v12 }
 0xd70   : > { %13730 = vmatprep.subr.bf16.mxu0 %v19643_v13 }
 0xd73   : > { %13731 = vmatpush3.bf16.msra.mxu0 %v15154_v4 }
 0xe16   : > { %v10980_v17 = vpop.f32.mrf.mxu0 }
 0xe17   : > { %v10986_v56 = vadd.f32 %v10980_v17, %v10809_v50 }
 0xe18   : > { %v10982_v22 = vpop.f32.mrf.mxu0 }
 0xe19   : > { %v10994_v24 = vadd.f32 %v13209_v35, %v10986_v56 }
 0xe1a   : > { %v10983_v60 = vpop.f32.mrf.mxu0 }
 0xe1b   : > { %v10995_v44 = vmax.f32 %v10994_v24, 0.0 }
 0xe1c   : > { %v10984_v46 = vpop.f32.mrf.mxu0 }
 0xe1d   : > { %v10997_v39 = vpack.c.bf16 %v10995_v44, %v10995_v44 }
 0xe1f   : > { %v11004_v42 = vsel %vm11002_vm15, %v10997_v39, 0 }
 0xe20   : > { %13685 = vmatpush3.bf16.msra.mxu1 %v11004_v42 }
 0xe21   : > { %13690 = vmatprep.subr.bf16.mxu1 %v19643_v13 }
 0xe23   : > { %13687 = vmatmul.mubr.msk.bf16.vlgmr.msra.gmra.mxu1 %vm10998_vm1, %v10996_v41 }
 0xe24   : > { %13691 = vmatpush3.bf16.msra.mxu1 %v11004_v42  ;;  %13692 = vmatprep.mubr.msk.bf16.mxu1 %vm15236_vm0, %v19643_v13 }
 0xe25   : > { %13696 = vmatprep.subr.bf16.mxu1 %v19643_v13 }
 0xe2b   : > { %13693 = vmatmul.mubr.msk.bf16.vlgmr.msra.gmra.mxu1 %vm10998_vm1, %v13211_v0 }
 0xe2c   : > { %13697 = vmatpush3.bf16.msra.mxu1 %v15139_v16  ;;  %13712 = vmatprep.mubr.msk.bf16.mxu1 %vm15236_vm0, %v19643_v13 }
 0xe2d   : > { %13698 = vmatprep.subr.bf16.mxu1 %v19643_v13 }
 0xe30   : > { %13699 = vmatpush3.bf16.msra.mxu1 %v15141_v34 }
 0xe31   : > { %13700 = vmatprep.subr.bf16.mxu1 %v19643_v13 }
 0xe34   : > { %13701 = vmatpush3.bf16.msra.mxu1 %v15143_v52 }
 0xe35   : > { %13702 = vmatprep.subr.bf16.mxu1 %v19643_v13 }
 0xe38   : > { %13703 = vmatpush3.bf16.msra.mxu1 %v15145_v29 }
 0xe39   : > { %13704 = vmatprep.subr.bf16.mxu1 %v19643_v13 }
 0xe3c   : > { %13705 = vmatpush3.bf16.msra.mxu1 %v15147_v32 }
 0xe3d   : > { %13706 = vmatprep.subr.bf16.mxu1 %v19643_v13 }
 0xe40   : > { %13707 = vmatpush3.bf16.msra.mxu1 %v15149_v15 }
 0xe41   : > { %13708 = vmatprep.subr.bf16.mxu1 %v19643_v13 }
 0xe44   : > { %13709 = vmatpush3.bf16.msra.mxu1 %v15151_v40 }
 0xe45   : > { %13710 = vmatprep.subr.bf16.mxu1 %v19643_v13 }
 0xe48   : > { %13711 = vmatpush3.bf16.msra.mxu1 %v15153_v61 }
 0xe49   : > { %13736 = vmatprep.subr.mxu1 %v19643_v13 }
 0xee3   : > { %v11040_v10 = vpop.f32.mrf.mxu1 }
 0xee5   : > { %v13688_v51 = vpop.f32.mrf.mxu1 }
 0xee7   : > { %v11043_v28 = vpop.f32.mrf.mxu1 }
 0xee9   : > { %v13689_v54 = vpop.f32.mrf.mxu1 }
 0xeeb   : > { %v11085_v33 = vpop.f32.mrf.mxu1 }
 0xeec   : > { %v11091_v21 = vmax.f32 %v11040_v10, %v11085_v33 }
 0xeed   : > { %v13694_v23 = vpop.f32.mrf.mxu1 }
 0xeee   : > { %v11108_v19 = vpack.c.bf16 %v11091_v21, %v11091_v21 }
 0xeef   : > { %v11088_v3 = vpop.f32.mrf.mxu1 }
 0xef0   : > { %13713 = vmatmul.mubr.bf16.vlgmr.msra.gmra.mxu1 %v11108_v19  ;;  %13733 = vmatmul.mubr.bf16.vlgmr.msra.gmra.mxu0 %v11108_v19 }
 0xef1   : > { %v13695_v37 = vpop.f32.mrf.mxu1  ;;  %13737 = vmatpush3.msra.mxu1 %v11310_v26  ;;  %13752 = vmatprep.mubr.msk.f32.mxu1 %vm15236_vm0, %v19643_v13  ;;  %vm11312_vm0 = vcmask 523264  }
 0xef2   : > { %13738 = vmatprep.subr.mxu1 %v19643_v13 }
 0xef3   : > { %13739 = vmatpush3.msra.mxu1 %v11309_v55 }
 0xef4   : > { %13740 = vmatprep.subr.mxu1 %v19643_v13 }
 0xef5   : > { %13741 = vmatpush3.msra.mxu1 %v11308_v38 }
 0xef6   : > { %13742 = vmatprep.subr.mxu1 %v19643_v13 }
 0xef7   : > { %13743 = vmatpush3.msra.mxu1 %v11307_v43 }
 0xef8   : > { %13744 = vmatprep.subr.mxu1 %v19643_v13 }
 0xef9   : > { %13745 = vmatpush3.msra.mxu1 %v11306_v6 }
 0xefa   : > { %13746 = vmatprep.subr.mxu1 %v19643_v13 }
 0xefb   : > { %13747 = vmatpush3.msra.mxu1 %v11305_v1 }
 0xefc   : > { %13748 = vmatprep.subr.mxu1 %v19643_v13 }
 0xefd   : > { %13749 = vmatpush3.msra.mxu1 %v11304_v30 }
 0xefe   : > { %13750 = vmatprep.subr.mxu1 %v19643_v13  ;;  %v11311_v13 = vld [vmem:[%s19645_s27] sm:$0x1] }
 0xeff   : > { %13751 = vmatpush3.msra.mxu1 %v11303_v58 }
 0xfb0   : > { %v11191_v8 = vpop.f32.mrf.mxu1  ;;  %v11296_v48 = vpop.f32.mrf.mxu0 }
 0xfb1   : > { %v11302_v36 = vmax.f32 %v11191_v8, %v11296_v48 }
 0xfb2   : > { %v13714_v20 = vpop.f32.mrf.mxu1  ;;  %v13734_v50 = vpop.f32.mrf.mxu0 }
 0xfb3   : > { %13753 = vmatmul.mubr.msk.f32.vlgmr.msra.gmra.mxu1 %vm11312_vm0, %v11302_v36 }
 0xfb4   : > { %v11194_v45 = vpop.f32.mrf.mxu1  ;;  %v11299_v27 = vpop.f32.mrf.mxu0 }
 0xfb6   : > { %v13715_v2 = vpop.f32.mrf.mxu1  ;;  %v13735_v11 = vpop.f32.mrf.mxu0 }
0x1073   : > { %v11382_v59 = vpop.f32.mrf.mxu1 }
0x1074   : > { %v11383_v5 = vadd.f32 %v11382_v59, %v11311_v13 }
0x1075   : > { %v13754_v9 = vpop.f32.mrf.mxu1 }
0x1076   : > { %v11386_v18 = vmax.f32 %v11383_v5, 0.0 }
0x1078   : > { %11387 = vst [vmem:[%s567_s30] sm:$0x1] %v11386_v18 }
0x1079   : > { %15186 = shalt.err (!%p15183_p3)
}
0x107a   : > { %s15187_s27 = scalar_lea.hbm %s11399_s17, 16  ;;  %s15191_s30 = scalar_lea.hbm %s19647_s1, 32 }
0x107b   : > { %p15188_p4 = scmp.ne.s32.totalorder %s11399_s17, %s15187_s27  ;;  %p15192_p9 = scmp.lt.s32.totalorder %s11399_s17, %s19647_s1 }
0x107c   : > { %p15193_p10 = scmp.lt.s32.totalorder %s15191_s30, %s15187_s27 }
0x107d   : > { %p15189_p7 = pnand %p15188_p4, %p15373_p5 }
0x107e   : > { %p15194_p11 = por %p15193_p10, %p15192_p9 }
0x107f   : > { %p15190_p8 = pneg %p15189_p7 }
0x1081   : > { %p15195_p12 = pnand %p15194_p11, %p15190_p8 }
0x1083   : > { %15198 = shalt.err (!%p15195_p12)
}
0x1084   : > { %13756 = dma.vmem_to_hbm [thread:$0]  (%p15373_p5), %s11402_s22, 16, %s11399_s17, %s11389_s3  }
0x1085 PF: > { %s19648_s4 = sld [smem:[#allocation7_spill]] }
0x1086   : > { %s19649_s29 = sld [smem:[#allocation5_spill]] }
0x108b   : > { %p13762_p13 = scmp.ge.s32.totalorder %s19648_s4, 2 }
0x108c   : > { %s11413_s23 = sand.u32 1, %s19649_s29  }
0x108d   : > { %p13759_p0 = pnand %p13762_p13, %p15377_p6  ;;  %s11414_s0 = scalar_lea.sflag [#allocation3], %s11413_s23 }
0x108f   : > { %p13760_p1 = pneg %p13759_p0 }
0x1091   : > { %15216 = dma.done.wait (%p13760_p1), %s11414_s0, 16  }
0x1092   : > { %15218 = vsyncadd (%p13760_p1), %s11414_s0, 4294967280  ;;  %s19651_s30 = sld [smem:[#allocation8_spill]]  ;;  %s19654_s27 = smov %s15225_s28 }
0x1093   : > { %s19652_s19 = sld [smem:[#allocation6_spill]] }
0x1094   : > { %s19653_s29 = sld [smem:[#allocation9_spill]] }
0x1098   : > { %p28_p2 = scmp.ge.s32.totalorder %s19651_s30, 4  }
0x1099   : > { %s19655_s28 = smov %s19652_s19 }
0x109a   :  { %30 = sbr.rel (!%p28_p2) target bundleno = 11 (0xb), region = 145 }
0x109f   :  { %11418 = vsyncpa [#allocation3], 1 }
0x10a0   :  { %11420 = vsyncpa [#allocation3 + $0x1], 1 }

</bundles_post_ra>
